<compile_context>
chip_gen: v7x
topology: tpu7x:2x2x1
jax: 0.10.0
libtpu: 0.0.40
codegen_flags: <defaults>
</compile_context>

<pallas_src>
import math
from functools import partial

import jax
import jax.numpy as jnp
from jax import lax
from jax.experimental import pallas as pl
from jax.experimental.pallas import tpu as pltpu

PSEUDOIMAGE_CHANNELS = 64
D_IN = 64                           # offset_encoder output / ConvGRU input_dim
D_HID = 2 * PSEUDOIMAGE_CHANNELS    # 128, ConvGRU hidden_dim
NUM_ITERS = 4
PTS_LANES = 8                       # narrow lane width for offsets (3 real cols)
OUT_LANES = 8                       # narrow lane width for flow output (3 real cols)
TILE_MIN = 256                      # amortize ~0.35us per-grid-step overhead
TILE_MAX = 1024                     # keeps double-buffered footprint < 2 MiB


# ----------------------------------------------------------------------------
# Shared elementwise math (used by the kernel and the pure-JAX reference)
# ----------------------------------------------------------------------------
def _erf(x):
    # Abramowitz & Stegun 7.1.26 rational approximation, |err| <= 1.5e-7.
    a1, a2, a3, a4, a5 = 0.254829592, -0.284496736, 1.421413741, -1.453152027, 1.061405429
    p = 0.3275911
    sgn = jnp.where(x >= 0.0, 1.0, -1.0).astype(x.dtype)
    ax = jnp.abs(x)
    t = 1.0 / (1.0 + p * ax)
    poly = ((((a5 * t + a4) * t + a3) * t + a2) * t + a1) * t
    return sgn * (1.0 - poly * jnp.exp(-ax * ax))


def _gelu_exact(x):
    # TODO(synk): torch.nn.GELU uses exact erf; we substitute an erf rational
    # approximation (max abs error 1.5e-7) since erf lowering is not guaranteed
    # in Mosaic.
    return 0.5 * x * (1.0 + _erf(x * (1.0 / math.sqrt(2.0))))


def _sigmoid(x):
    # sigmoid(x) == 0.5*(tanh(x/2)+1): exact, tanh is an EUP op on TPU.
    return 0.5 * (jnp.tanh(0.5 * x) + 1.0)


# ----------------------------------------------------------------------------
# Pallas kernel: offset_encoder + 4x ConvGRU step + decoder head
# ----------------------------------------------------------------------------
def convgru_kernel(vox_ref, pts_ref,
                   w_off_ref, b_off_ref,
                   wh_zr_ref, wx_zrq_ref, b_zrq_ref,
                   wqh_ref,
                   wd1h_ref, wd1x_ref, bd1_ref,
                   wd2_ref, bd2_ref,
                   out_ref):
    f32, bf16 = jnp.float32, jnp.bfloat16
    D = D_HID

    def mm(a_bf16, w_bf16):   # bf16 operands on the MXU, f32 accumulation
        return jnp.dot(a_bf16, w_bf16, preferred_element_type=f32)

    # Resident weights (constant index_map -> DMA'd once, stay in VMEM).
    Woff = w_off_ref[...]            # (8, 64)    bf16
    Wh_zr = wh_zr_ref[...]           # (128, 256) bf16  [Wzh | Wrh]
    Wx_zrq = wx_zrq_ref[...]         # (64, 384)  bf16  [Wzx | Wrx | Wqx]
    Wqh = wqh_ref[...]               # (128, 128) bf16
    Wd1h = wd1h_ref[...]             # (128, 32)  bf16
    Wd1x = wd1x_ref[...]             # (64, 32)   bf16
    Wd2 = wd2_ref[...]               # (32, 8)    bf16

    h0 = vox_ref[...]                # (T, 128) f32 hidden init (gathered voxel vecs)
    pts = pts_ref[...]               # (T, 8)   f32, cols >= 3 are zero

    # offset_encoder: Linear(3, 64) (rows >= 3 of Woff are zero).
    x = mm(pts.astype(bf16), Woff) + b_off_ref[...]            # (T, 64) f32
    x_b = x.astype(bf16)                                       # cast once, reused

    # x never changes across GRU iterations -> hoist all three gate projections
    # as ONE fused N=384 matmul; keep the results resident in bf16.
    xp = mm(x_b, Wx_zrq) + b_zrq_ref[...]                      # (T, 384) f32
    xz = xp[:, :D].astype(bf16)
    xr = xp[:, D:2 * D].astype(bf16)
    xq = xp[:, 2 * D:].astype(bf16)

    def gru_step(_, h):
        h_b = h.astype(bf16)                                   # one cast per iter
        hp = mm(h_b, Wh_zr)                                    # fused z|r, (T, 256) f32
        z = _sigmoid(hp[:, :D] + xz)
        r = _sigmoid(hp[:, D:] + xr)
        q = jnp.tanh(mm((r * h).astype(bf16), Wqh) + xq)
        return (1.0 - z) * h + z * q

    h = lax.fori_loop(0, NUM_ITERS, gru_step, h0, unroll=True)

    # decoder: Linear(192, 32) (split h/x parts) -> GELU -> Linear(32, 3)
    # (output padded only to 8 lanes for a narrow, contiguous store).
    hid = _gelu_exact(mm(h.astype(bf16), Wd1h) + mm(x_b, Wd1x) + bd1_ref[...])  # (T, 32)
    out_ref[...] = mm(hid.astype(bf16), Wd2) + bd2_ref[...]                     # (T, 8)


# ----------------------------------------------------------------------------
# Parameter packing (once per forward call): fuse + cast weights to bf16
# ----------------------------------------------------------------------------
def pack_params(P):
    bf16 = jnp.bfloat16
    return (
        P["w_off"].astype(bf16),                                            # (8, 64)
        P["b_off"],                                                         # (1, 64)
        jnp.concatenate([P["wzh"], P["wrh"]], axis=1).astype(bf16),         # (128, 256)
        jnp.concatenate([P["wzx"], P["wrx"], P["wqx"]], axis=1).astype(bf16),  # (64, 384)
        jnp.concatenate([P["bz"], P["br"], P["bq"]], axis=1),               # (1, 384)
        P["wqh"].astype(bf16),                                              # (128, 128)
        P["wd1h"].astype(bf16),                                             # (128, 32)
        P["wd1x"].astype(bf16),                                             # (64, 32)
        P["bd1"],                                                           # (1, 32)
        P["wd2"].astype(bf16),                                              # (32, 8)
        P["bd2"],                                                           # (1, 8)
    )


def _pick_tile(n):
    # Aim for >= 2 grid steps per sample (v7x: 2 TensorCores share the
    # "parallel" grid axis) while keeping tiles in [TILE_MIN, TILE_MAX].
    half = -(-n // 2)
    tile = ((half + TILE_MIN - 1) // TILE_MIN) * TILE_MIN
    return max(TILE_MIN, min(TILE_MAX, tile))


# ----------------------------------------------------------------------------
# Jitted per-sample path: gather + pad + pallas_call + slice in one dispatch
# ----------------------------------------------------------------------------
@partial(jax.jit, static_argnames=("tile",))
def _forward_single_jit(before_hwc, after_hwc, point_offsets, voxel_coords,
                        plist, tile):
    r = voxel_coords[:, 1].astype(jnp.int32)
    c = voxel_coords[:, 2].astype(jnp.int32)
    before_vec = before_hwc[r, c]                      # (N, C) contiguous rows
    after_vec = after_hwc[r, c]                        # (N, C)
    vox = jnp.concatenate([before_vec, after_vec], axis=1)   # (N, 128)

    n = vox.shape[0]
    n_tiles = max(1, pl.cdiv(n, tile))
    n_pad = n_tiles * tile

    # Padded rows (h0 = 0, pts = 0) pass independently through the pointwise
    # GRU math and are sliced off below; no masking needed.
    vox_pad = jnp.zeros((n_pad, D_HID), jnp.float32).at[:n].set(vox)
    pts_pad = jnp.zeros((n_pad, PTS_LANES), jnp.float32).at[:n, :3].set(point_offsets)

    act_spec = pl.BlockSpec((tile, D_HID), lambda i: (i, 0))
    pts_spec = pl.BlockSpec((tile, PTS_LANES), lambda i: (i, 0))
    out_spec = pl.BlockSpec((tile, OUT_LANES), lambda i: (i, 0))

    def resident(p):   # full-array block, constant index -> loaded once per kernel
        return pl.BlockSpec(p.shape, lambda i: (0, 0))

    out = pl.pallas_call(
        convgru_kernel,
        out_shape=jax.ShapeDtypeStruct((n_pad, OUT_LANES), jnp.float32),
        grid=(n_tiles,),
        in_specs=[act_spec, pts_spec] + [resident(p) for p in plist],
        out_specs=out_spec,
        compiler_params=pltpu.CompilerParams(
            dimension_semantics=("parallel",),
            vmem_limit_bytes=32 * 1024 * 1024),
    )(vox_pad, pts_pad, *plist)
    return out[:n, :3]


def forward(before_pseudoimages, after_pseudoimages, voxelizer_infos, params):
    plist = pack_params(params)                                   # cast/fuse ONCE
    before_hwc = jnp.transpose(before_pseudoimages, (0, 2, 3, 1))  # (B, H, W, C)
    after_hwc = jnp.transpose(after_pseudoimages, (0, 2, 3, 1))
    # TODO(synk): if many same-length samples arrive per step, fold them into a
    # single 2D-grid pallas_call instead of this per-sample loop.
    flow_results = []
    for i, info in enumerate(voxelizer_infos):
        n = info["point_offsets"].shape[0]
        flow_results.append(
            _forward_single_jit(before_hwc[i], after_hwc[i],
                                info["point_offsets"], info["voxel_coords"],
                                plist, _pick_tile(n)))
    return flow_results


# ----------------------------------------------------------------------------
# Deterministic synthetic parameters (split-weight layout of the nn.Module)
# ----------------------------------------------------------------------------
def init_params(key):
    keys = iter(jax.random.split(key, 32))

    def w(shape, scale=0.05):
        return (scale * jax.random.normal(next(keys), shape)).astype(jnp.float32)

    P = {}
    # offset_encoder: Linear(3, 64), input rows padded to 8 (rows >= 3 zero).
    P["w_off"] = jnp.zeros((PTS_LANES, D_IN), jnp.float32).at[:3].set(w((3, D_IN)))
    P["b_off"] = w((1, D_IN), 0.02)
    # ConvGRU 1x1 convs == Linear(192, 128), split into h-part / x-part.
    for nm in ("z", "r", "q"):
        P[f"w{nm}h"] = w((D_HID, D_HID))
        P[f"w{nm}x"] = w((D_IN, D_HID))
        P[f"b{nm}"] = w((1, D_HID), 0.02)
    # decoder: Linear(192, 32) split + GELU + Linear(32, 3) (padded to 8 lanes).
    P["wd1h"] = w((D_HID, 32))
    P["wd1x"] = w((D_IN, 32))
    P["bd1"] = w((1, 32), 0.02)
    P["wd2"] = jnp.zeros((32, OUT_LANES), jnp.float32).at[:, :3].set(w((32, 3)))
    P["bd2"] = jnp.zeros((1, OUT_LANES), jnp.float32).at[:, :3].set(w((1, 3), 0.02))
    return P


# ----------------------------------------------------------------------------
# Pure-JAX f32 reference (mirrors the PyTorch module math)
# ----------------------------------------------------------------------------
def ref_forward_single(before_img, after_img, point_offsets, voxel_coords, P):
    r = voxel_coords[:, 1].astype(jnp.int32)
    c = voxel_coords[:, 2].astype(jnp.int32)
    vox = jnp.concatenate([before_img[:, r, c].T, after_img[:, r, c].T], axis=1)  # (N, 128)
    x = point_offsets @ P["w_off"][:3] + P["b_off"]                               # (N, 64)
    h = vox
    for _ in range(NUM_ITERS):
        z = _sigmoid(h @ P["wzh"] + x @ P["wzx"] + P["bz"])
        r_g = _sigmoid(h @ P["wrh"] + x @ P["wrx"] + P["br"])
        q = jnp.tanh((r_g * h) @ P["wqh"] + x @ P["wqx"] + P["bq"])
        h = (1.0 - z) * h + z * q
    hid = _gelu_exact(h @ P["wd1h"] + x @ P["wd1x"] + P["bd1"])
    return (hid @ P["wd2"] + P["bd2"])[:, :3]


if __name__ == "__main__":
    root = jax.random.PRNGKey(0)
    kp, kb, ka, k0, k1 = jax.random.split(root, 5)

    B, C, H, W = 2, PSEUDOIMAGE_CHANNELS, 16, 16
    params = init_params(kp)
    before_pseudoimages = jax.random.normal(kb, (B, C, H, W), jnp.float32)
    after_pseudoimages = jax.random.normal(ka, (B, C, H, W), jnp.float32)

    voxelizer_infos = []
    for n, k in ((300, k0), (100, k1)):   # 300 exercises a 2-step grid, 100 a 1-step grid
        kr, kc, ko = jax.random.split(k, 3)
        coords = jnp.stack([
            jnp.zeros((n,), jnp.int32),
            jax.random.randint(kr, (n,), 0, H, dtype=jnp.int32),
            jax.random.randint(kc, (n,), 0, W, dtype=jnp.int32),
        ], axis=1)
        offsets = jax.random.normal(ko, (n, 3), jnp.float32)
        voxelizer_infos.append({"point_offsets": offsets, "voxel_coords": coords})

    flows = forward(before_pseudoimages, after_pseudoimages, voxelizer_infos, params)
    flows = [jax.block_until_ready(f) for f in flows]

    for i, flow in enumerate(flows):
        ref = ref_forward_single(before_pseudoimages[i], after_pseudoimages[i],
                                 voxelizer_infos[i]["point_offsets"],
                                 voxelizer_infos[i]["voxel_coords"], params)
        err = float(jnp.max(jnp.abs(flow - ref)))
        n = voxelizer_infos[i]["point_offsets"].shape[0]
        if flow.shape != (n, 3) or not (err < 5e-2):
            raise RuntimeError(f"mismatch on sample {i}: max abs err {err}, shape {flow.shape}")

    print("KERNEL_OK")
</pallas_src>

<mosaic_0001>
module attributes {stable_mosaic.version = 11 : i64} {
  func.func @convgru_kernel(%arg0: i32, %arg1: memref<256x128xf32, #tpu.memory_space<vmem>>, %arg2: memref<256x8xf32, #tpu.memory_space<vmem>>, %arg3: memref<8x64xbf16, #tpu.memory_space<vmem>>, %arg4: memref<1x64xf32, #tpu.memory_space<vmem>>, %arg5: memref<128x256xbf16, #tpu.memory_space<vmem>>, %arg6: memref<64x384xbf16, #tpu.memory_space<vmem>>, %arg7: memref<1x384xf32, #tpu.memory_space<vmem>>, %arg8: memref<128x128xbf16, #tpu.memory_space<vmem>>, %arg9: memref<128x32xbf16, #tpu.memory_space<vmem>>, %arg10: memref<64x32xbf16, #tpu.memory_space<vmem>>, %arg11: memref<1x32xf32, #tpu.memory_space<vmem>>, %arg12: memref<32x8xbf16, #tpu.memory_space<vmem>>, %arg13: memref<1x8xf32, #tpu.memory_space<vmem>>, %arg14: memref<256x8xf32, #tpu.memory_space<vmem>>) attributes {dimension_semantics = [#tpu.dimension_semantics<parallel>], iteration_bounds = array<i64: 2>, scalar_prefetch = 0 : i64, scratch_operands = 0 : i64, tpu.core_type = #tpu.core_type<tc>, window_params = [{transform_indices = @transform_0, window_bounds = array<i64: 256, 128>}, {transform_indices = @transform_1, window_bounds = array<i64: 256, 8>}, {pipeline_mode = #tpu.pipeline_mode<synchronous>, transform_indices = @transform_2, window_bounds = array<i64: 8, 64>}, {pipeline_mode = #tpu.pipeline_mode<synchronous>, transform_indices = @transform_3, window_bounds = array<i64: 1, 64>}, {pipeline_mode = #tpu.pipeline_mode<synchronous>, transform_indices = @transform_4, window_bounds = array<i64: 128, 256>}, {pipeline_mode = #tpu.pipeline_mode<synchronous>, transform_indices = @transform_5, window_bounds = array<i64: 64, 384>}, {pipeline_mode = #tpu.pipeline_mode<synchronous>, transform_indices = @transform_6, window_bounds = array<i64: 1, 384>}, {pipeline_mode = #tpu.pipeline_mode<synchronous>, transform_indices = @transform_7, window_bounds = array<i64: 128, 128>}, {pipeline_mode = #tpu.pipeline_mode<synchronous>, transform_indices = @transform_8, window_bounds = array<i64: 128, 32>}, {pipeline_mode = #tpu.pipeline_mode<synchronous>, transform_indices = @transform_9, window_bounds = array<i64: 64, 32>}, {pipeline_mode = #tpu.pipeline_mode<synchronous>, transform_indices = @transform_10, window_bounds = array<i64: 1, 32>}, {pipeline_mode = #tpu.pipeline_mode<synchronous>, transform_indices = @transform_11, window_bounds = array<i64: 32, 8>}, {pipeline_mode = #tpu.pipeline_mode<synchronous>, transform_indices = @transform_12, window_bounds = array<i64: 1, 8>}, {transform_indices = @transform_13, window_bounds = array<i64: 256, 8>}]} {
    %c0 = arith.constant 0 : index
    %c0_0 = arith.constant 0 : index
    %0 = vector.load %arg3[%c0, %c0_0] : memref<8x64xbf16, #tpu.memory_space<vmem>>, vector<8x64xbf16>
    %c0_1 = arith.constant 0 : index
    %c0_2 = arith.constant 0 : index
    %1 = vector.load %arg5[%c0_1, %c0_2] : memref<128x256xbf16, #tpu.memory_space<vmem>>, vector<128x256xbf16>
    %c0_3 = arith.constant 0 : index
    %c0_4 = arith.constant 0 : index
    %2 = vector.load %arg6[%c0_3, %c0_4] : memref<64x384xbf16, #tpu.memory_space<vmem>>, vector<64x384xbf16>
    %c0_5 = arith.constant 0 : index
    %c0_6 = arith.constant 0 : index
    %3 = vector.load %arg8[%c0_5, %c0_6] : memref<128x128xbf16, #tpu.memory_space<vmem>>, vector<128x128xbf16>
    %c0_7 = arith.constant 0 : index
    %c0_8 = arith.constant 0 : index
    %4 = vector.load %arg9[%c0_7, %c0_8] : memref<128x32xbf16, #tpu.memory_space<vmem>>, vector<128x32xbf16>
    %c0_9 = arith.constant 0 : index
    %c0_10 = arith.constant 0 : index
    %5 = vector.load %arg10[%c0_9, %c0_10] : memref<64x32xbf16, #tpu.memory_space<vmem>>, vector<64x32xbf16>
    %c0_11 = arith.constant 0 : index
    %c0_12 = arith.constant 0 : index
    %6 = vector.load %arg12[%c0_11, %c0_12] : memref<32x8xbf16, #tpu.memory_space<vmem>>, vector<32x8xbf16>
    %c0_13 = arith.constant 0 : index
    %c0_14 = arith.constant 0 : index
    %7 = vector.load %arg1[%c0_13, %c0_14] : memref<256x128xf32, #tpu.memory_space<vmem>>, vector<256x128xf32>
    %c0_15 = arith.constant 0 : index
    %c0_16 = arith.constant 0 : index
    %8 = vector.load %arg2[%c0_15, %c0_16] : memref<256x8xf32, #tpu.memory_space<vmem>>, vector<256x8xf32>
    %9 = arith.truncf %8 : vector<256x8xf32> to vector<256x8xbf16>
    %cst = arith.constant dense<0.000000e+00> : vector<256x64xf32>
    %10 = tpu.matmul %9, %0, %cst {dimension_numbers = #tpu.dot_dimension_numbers<[1], [0], [0], [1], [0, 0, 1, 1], [], []>} : vector<256x8xbf16>, vector<8x64xbf16>, vector<256x64xf32> -> vector<256x64xf32>
    %c0_17 = arith.constant 0 : index
    %c0_18 = arith.constant 0 : index
    %11 = vector.load %arg4[%c0_17, %c0_18] : memref<1x64xf32, #tpu.memory_space<vmem>>, vector<1x64xf32>
    %12 = vector.broadcast %11 : vector<1x64xf32> to vector<256x64xf32>
    %13 = arith.addf %10, %12 : vector<256x64xf32>
    %14 = arith.truncf %13 : vector<256x64xf32> to vector<256x64xbf16>
    %cst_19 = arith.constant dense<0.000000e+00> : vector<256x384xf32>
    %15 = tpu.matmul %14, %2, %cst_19 {dimension_numbers = #tpu.dot_dimension_numbers<[1], [0], [0], [1], [0, 0, 1, 1], [], []>} : vector<256x64xbf16>, vector<64x384xbf16>, vector<256x384xf32> -> vector<256x384xf32>
    %c0_20 = arith.constant 0 : index
    %c0_21 = arith.constant 0 : index
    %16 = vector.load %arg7[%c0_20, %c0_21] : memref<1x384xf32, #tpu.memory_space<vmem>>, vector<1x384xf32>
    %17 = vector.broadcast %16 : vector<1x384xf32> to vector<256x384xf32>
    %18 = arith.addf %15, %17 : vector<256x384xf32>
    %19 = vector.extract_strided_slice %18 {offsets = [0, 0], sizes = [256, 128], strides = [1, 1]} : vector<256x384xf32> to vector<256x128xf32>
    %20 = arith.truncf %19 : vector<256x128xf32> to vector<256x128xbf16>
    %21 = vector.extract_strided_slice %18 {offsets = [0, 128], sizes = [256, 128], strides = [1, 1]} : vector<256x384xf32> to vector<256x128xf32>
    %22 = arith.truncf %21 : vector<256x128xf32> to vector<256x128xbf16>
    %23 = vector.extract_strided_slice %18 {offsets = [0, 256], sizes = [256, 128], strides = [1, 1]} : vector<256x384xf32> to vector<256x128xf32>
    %24 = arith.truncf %23 : vector<256x128xf32> to vector<256x128xbf16>
    %c0_i32 = arith.constant 0 : i32
    %25 = arith.truncf %7 : vector<256x128xf32> to vector<256x128xbf16>
    %cst_22 = arith.constant dense<0.000000e+00> : vector<256x256xf32>
    %26 = tpu.matmul %25, %1, %cst_22 {dimension_numbers = #tpu.dot_dimension_numbers<[1], [0], [0], [1], [0, 0, 1, 1], [], []>} : vector<256x128xbf16>, vector<128x256xbf16>, vector<256x256xf32> -> vector<256x256xf32>
    %27 = vector.extract_strided_slice %26 {offsets = [0, 0], sizes = [256, 128], strides = [1, 1]} : vector<256x256xf32> to vector<256x128xf32>
    %28 = arith.extf %20 : vector<256x128xbf16> to vector<256x128xf32>
    %29 = arith.addf %27, %28 : vector<256x128xf32>
    %cst_23 = arith.constant 5.000000e-01 : f32
    %30 = vector.broadcast %cst_23 : f32 to vector<256x128xf32>
    %31 = arith.mulf %30, %29 : vector<256x128xf32>
    %32 = math.tanh %31 : vector<256x128xf32>
    %cst_24 = arith.constant 1.000000e+00 : f32
    %33 = vector.broadcast %cst_24 : f32 to vector<256x128xf32>
    %34 = arith.addf %32, %33 : vector<256x128xf32>
    %cst_25 = arith.constant 5.000000e-01 : f32
    %35 = vector.broadcast %cst_25 : f32 to vector<256x128xf32>
    %36 = arith.mulf %35, %34 : vector<256x128xf32>
    %37 = vector.extract_strided_slice %26 {offsets = [0, 128], sizes = [256, 128], strides = [1, 1]} : vector<256x256xf32> to vector<256x128xf32>
    %38 = arith.extf %22 : vector<256x128xbf16> to vector<256x128xf32>
    %39 = arith.addf %37, %38 : vector<256x128xf32>
    %cst_26 = arith.constant 5.000000e-01 : f32
    %40 = vector.broadcast %cst_26 : f32 to vector<256x128xf32>
    %41 = arith.mulf %40, %39 : vector<256x128xf32>
    %42 = math.tanh %41 : vector<256x128xf32>
    %cst_27 = arith.constant 1.000000e+00 : f32
    %43 = vector.broadcast %cst_27 : f32 to vector<256x128xf32>
    %44 = arith.addf %42, %43 : vector<256x128xf32>
    %cst_28 = arith.constant 5.000000e-01 : f32
    %45 = vector.broadcast %cst_28 : f32 to vector<256x128xf32>
    %46 = arith.mulf %45, %44 : vector<256x128xf32>
    %47 = arith.mulf %46, %7 : vector<256x128xf32>
    %48 = arith.truncf %47 : vector<256x128xf32> to vector<256x128xbf16>
    %cst_29 = arith.constant dense<0.000000e+00> : vector<256x128xf32>
    %49 = tpu.matmul %48, %3, %cst_29 {dimension_numbers = #tpu.dot_dimension_numbers<[1], [0], [0], [1], [0, 0, 1, 1], [], []>} : vector<256x128xbf16>, vector<128x128xbf16>, vector<256x128xf32> -> vector<256x128xf32>
    %50 = arith.extf %24 : vector<256x128xbf16> to vector<256x128xf32>
    %51 = arith.addf %49, %50 : vector<256x128xf32>
    %52 = math.tanh %51 : vector<256x128xf32>
    %cst_30 = arith.constant 1.000000e+00 : f32
    %53 = vector.broadcast %cst_30 : f32 to vector<256x128xf32>
    %54 = arith.subf %53, %36 : vector<256x128xf32>
    %55 = arith.mulf %54, %7 : vector<256x128xf32>
    %56 = arith.mulf %36, %52 : vector<256x128xf32>
    %57 = arith.addf %55, %56 : vector<256x128xf32>
    %c1_i32 = arith.constant 1 : i32
    %58 = arith.truncf %57 : vector<256x128xf32> to vector<256x128xbf16>
    %cst_31 = arith.constant dense<0.000000e+00> : vector<256x256xf32>
    %59 = tpu.matmul %58, %1, %cst_31 {dimension_numbers = #tpu.dot_dimension_numbers<[1], [0], [0], [1], [0, 0, 1, 1], [], []>} : vector<256x128xbf16>, vector<128x256xbf16>, vector<256x256xf32> -> vector<256x256xf32>
    %60 = vector.extract_strided_slice %59 {offsets = [0, 0], sizes = [256, 128], strides = [1, 1]} : vector<256x256xf32> to vector<256x128xf32>
    %61 = arith.extf %20 : vector<256x128xbf16> to vector<256x128xf32>
    %62 = arith.addf %60, %61 : vector<256x128xf32>
    %cst_32 = arith.constant 5.000000e-01 : f32
    %63 = vector.broadcast %cst_32 : f32 to vector<256x128xf32>
    %64 = arith.mulf %63, %62 : vector<256x128xf32>
    %65 = math.tanh %64 : vector<256x128xf32>
    %cst_33 = arith.constant 1.000000e+00 : f32
    %66 = vector.broadcast %cst_33 : f32 to vector<256x128xf32>
    %67 = arith.addf %65, %66 : vector<256x128xf32>
    %cst_34 = arith.constant 5.000000e-01 : f32
    %68 = vector.broadcast %cst_34 : f32 to vector<256x128xf32>
    %69 = arith.mulf %68, %67 : vector<256x128xf32>
    %70 = vector.extract_strided_slice %59 {offsets = [0, 128], sizes = [256, 128], strides = [1, 1]} : vector<256x256xf32> to vector<256x128xf32>
    %71 = arith.extf %22 : vector<256x128xbf16> to vector<256x128xf32>
    %72 = arith.addf %70, %71 : vector<256x128xf32>
    %cst_35 = arith.constant 5.000000e-01 : f32
    %73 = vector.broadcast %cst_35 : f32 to vector<256x128xf32>
    %74 = arith.mulf %73, %72 : vector<256x128xf32>
    %75 = math.tanh %74 : vector<256x128xf32>
    %cst_36 = arith.constant 1.000000e+00 : f32
    %76 = vector.broadcast %cst_36 : f32 to vector<256x128xf32>
    %77 = arith.addf %75, %76 : vector<256x128xf32>
    %cst_37 = arith.constant 5.000000e-01 : f32
    %78 = vector.broadcast %cst_37 : f32 to vector<256x128xf32>
    %79 = arith.mulf %78, %77 : vector<256x128xf32>
    %80 = arith.mulf %79, %57 : vector<256x128xf32>
    %81 = arith.truncf %80 : vector<256x128xf32> to vector<256x128xbf16>
    %cst_38 = arith.constant dense<0.000000e+00> : vector<256x128xf32>
    %82 = tpu.matmul %81, %3, %cst_38 {dimension_numbers = #tpu.dot_dimension_numbers<[1], [0], [0], [1], [0, 0, 1, 1], [], []>} : vector<256x128xbf16>, vector<128x128xbf16>, vector<256x128xf32> -> vector<256x128xf32>
    %83 = arith.extf %24 : vector<256x128xbf16> to vector<256x128xf32>
    %84 = arith.addf %82, %83 : vector<256x128xf32>
    %85 = math.tanh %84 : vector<256x128xf32>
    %cst_39 = arith.constant 1.000000e+00 : f32
    %86 = vector.broadcast %cst_39 : f32 to vector<256x128xf32>
    %87 = arith.subf %86, %69 : vector<256x128xf32>
    %88 = arith.mulf %87, %57 : vector<256x128xf32>
    %89 = arith.mulf %69, %85 : vector<256x128xf32>
    %90 = arith.addf %88, %89 : vector<256x128xf32>
    %c2_i32 = arith.constant 2 : i32
    %91 = arith.truncf %90 : vector<256x128xf32> to vector<256x128xbf16>
    %cst_40 = arith.constant dense<0.000000e+00> : vector<256x256xf32>
    %92 = tpu.matmul %91, %1, %cst_40 {dimension_numbers = #tpu.dot_dimension_numbers<[1], [0], [0], [1], [0, 0, 1, 1], [], []>} : vector<256x128xbf16>, vector<128x256xbf16>, vector<256x256xf32> -> vector<256x256xf32>
    %93 = vector.extract_strided_slice %92 {offsets = [0, 0], sizes = [256, 128], strides = [1, 1]} : vector<256x256xf32> to vector<256x128xf32>
    %94 = arith.extf %20 : vector<256x128xbf16> to vector<256x128xf32>
    %95 = arith.addf %93, %94 : vector<256x128xf32>
    %cst_41 = arith.constant 5.000000e-01 : f32
    %96 = vector.broadcast %cst_41 : f32 to vector<256x128xf32>
    %97 = arith.mulf %96, %95 : vector<256x128xf32>
    %98 = math.tanh %97 : vector<256x128xf32>
    %cst_42 = arith.constant 1.000000e+00 : f32
    %99 = vector.broadcast %cst_42 : f32 to vector<256x128xf32>
    %100 = arith.addf %98, %99 : vector<256x128xf32>
    %cst_43 = arith.constant 5.000000e-01 : f32
    %101 = vector.broadcast %cst_43 : f32 to vector<256x128xf32>
    %102 = arith.mulf %101, %100 : vector<256x128xf32>
    %103 = vector.extract_strided_slice %92 {offsets = [0, 128], sizes = [256, 128], strides = [1, 1]} : vector<256x256xf32> to vector<256x128xf32>
    %104 = arith.extf %22 : vector<256x128xbf16> to vector<256x128xf32>
    %105 = arith.addf %103, %104 : vector<256x128xf32>
    %cst_44 = arith.constant 5.000000e-01 : f32
    %106 = vector.broadcast %cst_44 : f32 to vector<256x128xf32>
    %107 = arith.mulf %106, %105 : vector<256x128xf32>
    %108 = math.tanh %107 : vector<256x128xf32>
    %cst_45 = arith.constant 1.000000e+00 : f32
    %109 = vector.broadcast %cst_45 : f32 to vector<256x128xf32>
    %110 = arith.addf %108, %109 : vector<256x128xf32>
    %cst_46 = arith.constant 5.000000e-01 : f32
    %111 = vector.broadcast %cst_46 : f32 to vector<256x128xf32>
    %112 = arith.mulf %111, %110 : vector<256x128xf32>
    %113 = arith.mulf %112, %90 : vector<256x128xf32>
    %114 = arith.truncf %113 : vector<256x128xf32> to vector<256x128xbf16>
    %cst_47 = arith.constant dense<0.000000e+00> : vector<256x128xf32>
    %115 = tpu.matmul %114, %3, %cst_47 {dimension_numbers = #tpu.dot_dimension_numbers<[1], [0], [0], [1], [0, 0, 1, 1], [], []>} : vector<256x128xbf16>, vector<128x128xbf16>, vector<256x128xf32> -> vector<256x128xf32>
    %116 = arith.extf %24 : vector<256x128xbf16> to vector<256x128xf32>
    %117 = arith.addf %115, %116 : vector<256x128xf32>
    %118 = math.tanh %117 : vector<256x128xf32>
    %cst_48 = arith.constant 1.000000e+00 : f32
    %119 = vector.broadcast %cst_48 : f32 to vector<256x128xf32>
    %120 = arith.subf %119, %102 : vector<256x128xf32>
    %121 = arith.mulf %120, %90 : vector<256x128xf32>
    %122 = arith.mulf %102, %118 : vector<256x128xf32>
    %123 = arith.addf %121, %122 : vector<256x128xf32>
    %c3_i32 = arith.constant 3 : i32
    %124 = arith.truncf %123 : vector<256x128xf32> to vector<256x128xbf16>
    %cst_49 = arith.constant dense<0.000000e+00> : vector<256x256xf32>
    %125 = tpu.matmul %124, %1, %cst_49 {dimension_numbers = #tpu.dot_dimension_numbers<[1], [0], [0], [1], [0, 0, 1, 1], [], []>} : vector<256x128xbf16>, vector<128x256xbf16>, vector<256x256xf32> -> vector<256x256xf32>
    %126 = vector.extract_strided_slice %125 {offsets = [0, 0], sizes = [256, 128], strides = [1, 1]} : vector<256x256xf32> to vector<256x128xf32>
    %127 = arith.extf %20 : vector<256x128xbf16> to vector<256x128xf32>
    %128 = arith.addf %126, %127 : vector<256x128xf32>
    %cst_50 = arith.constant 5.000000e-01 : f32
    %129 = vector.broadcast %cst_50 : f32 to vector<256x128xf32>
    %130 = arith.mulf %129, %128 : vector<256x128xf32>
    %131 = math.tanh %130 : vector<256x128xf32>
    %cst_51 = arith.constant 1.000000e+00 : f32
    %132 = vector.broadcast %cst_51 : f32 to vector<256x128xf32>
    %133 = arith.addf %131, %132 : vector<256x128xf32>
    %cst_52 = arith.constant 5.000000e-01 : f32
    %134 = vector.broadcast %cst_52 : f32 to vector<256x128xf32>
    %135 = arith.mulf %134, %133 : vector<256x128xf32>
    %136 = vector.extract_strided_slice %125 {offsets = [0, 128], sizes = [256, 128], strides = [1, 1]} : vector<256x256xf32> to vector<256x128xf32>
    %137 = arith.extf %22 : vector<256x128xbf16> to vector<256x128xf32>
    %138 = arith.addf %136, %137 : vector<256x128xf32>
    %cst_53 = arith.constant 5.000000e-01 : f32
    %139 = vector.broadcast %cst_53 : f32 to vector<256x128xf32>
    %140 = arith.mulf %139, %138 : vector<256x128xf32>
    %141 = math.tanh %140 : vector<256x128xf32>
    %cst_54 = arith.constant 1.000000e+00 : f32
    %142 = vector.broadcast %cst_54 : f32 to vector<256x128xf32>
    %143 = arith.addf %141, %142 : vector<256x128xf32>
    %cst_55 = arith.constant 5.000000e-01 : f32
    %144 = vector.broadcast %cst_55 : f32 to vector<256x128xf32>
    %145 = arith.mulf %144, %143 : vector<256x128xf32>
    %146 = arith.mulf %145, %123 : vector<256x128xf32>
    %147 = arith.truncf %146 : vector<256x128xf32> to vector<256x128xbf16>
    %cst_56 = arith.constant dense<0.000000e+00> : vector<256x128xf32>
    %148 = tpu.matmul %147, %3, %cst_56 {dimension_numbers = #tpu.dot_dimension_numbers<[1], [0], [0], [1], [0, 0, 1, 1], [], []>} : vector<256x128xbf16>, vector<128x128xbf16>, vector<256x128xf32> -> vector<256x128xf32>
    %149 = arith.extf %24 : vector<256x128xbf16> to vector<256x128xf32>
    %150 = arith.addf %148, %149 : vector<256x128xf32>
    %151 = math.tanh %150 : vector<256x128xf32>
    %cst_57 = arith.constant 1.000000e+00 : f32
    %152 = vector.broadcast %cst_57 : f32 to vector<256x128xf32>
    %153 = arith.subf %152, %135 : vector<256x128xf32>
    %154 = arith.mulf %153, %123 : vector<256x128xf32>
    %155 = arith.mulf %135, %151 : vector<256x128xf32>
    %156 = arith.addf %154, %155 : vector<256x128xf32>
    %157 = arith.truncf %156 : vector<256x128xf32> to vector<256x128xbf16>
    %cst_58 = arith.constant dense<0.000000e+00> : vector<256x32xf32>
    %158 = tpu.matmul %157, %4, %cst_58 {dimension_numbers = #tpu.dot_dimension_numbers<[1], [0], [0], [1], [0, 0, 1, 1], [], []>} : vector<256x128xbf16>, vector<128x32xbf16>, vector<256x32xf32> -> vector<256x32xf32>
    %cst_59 = arith.constant dense<0.000000e+00> : vector<256x32xf32>
    %159 = tpu.matmul %14, %5, %cst_59 {dimension_numbers = #tpu.dot_dimension_numbers<[1], [0], [0], [1], [0, 0, 1, 1], [], []>} : vector<256x64xbf16>, vector<64x32xbf16>, vector<256x32xf32> -> vector<256x32xf32>
    %160 = arith.addf %158, %159 : vector<256x32xf32>
    %c0_60 = arith.constant 0 : index
    %c0_61 = arith.constant 0 : index
    %161 = vector.load %arg11[%c0_60, %c0_61] : memref<1x32xf32, #tpu.memory_space<vmem>>, vector<1x32xf32>
    %162 = vector.broadcast %161 : vector<1x32xf32> to vector<256x32xf32>
    %163 = arith.addf %160, %162 : vector<256x32xf32>
    %cst_62 = arith.constant 5.000000e-01 : f32
    %164 = vector.broadcast %cst_62 : f32 to vector<256x32xf32>
    %165 = arith.mulf %164, %163 : vector<256x32xf32>
    %cst_63 = arith.constant 0.707106769 : f32
    %166 = vector.broadcast %cst_63 : f32 to vector<256x32xf32>
    %167 = arith.mulf %163, %166 : vector<256x32xf32>
    %cst_64 = arith.constant 0.000000e+00 : f32
    %168 = vector.broadcast %cst_64 : f32 to vector<256x32xf32>
    %169 = arith.cmpf oge, %167, %168 : vector<256x32xf32>
    %cst_65 = arith.constant 1.000000e+00 : f32
    %cst_66 = arith.constant -1.000000e+00 : f32
    %170 = vector.broadcast %cst_65 : f32 to vector<256x32xf32>
    %171 = vector.broadcast %cst_66 : f32 to vector<256x32xf32>
    %172 = arith.select %169, %170, %171 : vector<256x32xi1>, vector<256x32xf32>
    %173 = math.absf %167 : vector<256x32xf32>
    %cst_67 = arith.constant 0.327591091 : f32
    %174 = vector.broadcast %cst_67 : f32 to vector<256x32xf32>
    %175 = arith.mulf %174, %173 : vector<256x32xf32>
    %cst_68 = arith.constant 1.000000e+00 : f32
    %176 = vector.broadcast %cst_68 : f32 to vector<256x32xf32>
    %177 = arith.addf %176, %175 : vector<256x32xf32>
    %cst_69 = arith.constant 1.000000e+00 : f32
    %178 = vector.broadcast %cst_69 : f32 to vector<256x32xf32>
    %179 = arith.divf %178, %177 : vector<256x32xf32>
    %cst_70 = arith.constant 1.06140542 : f32
    %180 = vector.broadcast %cst_70 : f32 to vector<256x32xf32>
    %181 = arith.mulf %180, %179 : vector<256x32xf32>
    %cst_71 = arith.constant -1.45315206 : f32
    %182 = vector.broadcast %cst_71 : f32 to vector<256x32xf32>
    %183 = arith.addf %181, %182 : vector<256x32xf32>
    %184 = arith.mulf %183, %179 : vector<256x32xf32>
    %cst_72 = arith.constant 1.42141378 : f32
    %185 = vector.broadcast %cst_72 : f32 to vector<256x32xf32>
    %186 = arith.addf %184, %185 : vector<256x32xf32>
    %187 = arith.mulf %186, %179 : vector<256x32xf32>
    %cst_73 = arith.constant -0.284496725 : f32
    %188 = vector.broadcast %cst_73 : f32 to vector<256x32xf32>
    %189 = arith.addf %187, %188 : vector<256x32xf32>
    %190 = arith.mulf %189, %179 : vector<256x32xf32>
    %cst_74 = arith.constant 0.254829586 : f32
    %191 = vector.broadcast %cst_74 : f32 to vector<256x32xf32>
    %192 = arith.addf %190, %191 : vector<256x32xf32>
    %193 = arith.mulf %192, %179 : vector<256x32xf32>
    %cst_75 = arith.constant 0.000000e+00 : f32
    %194 = vector.broadcast %cst_75 : f32 to vector<256x32xf32>
    %195 = arith.subf %194, %173 : vector<256x32xf32>
    %196 = arith.mulf %195, %173 : vector<256x32xf32>
    %197 = math.exp %196 : vector<256x32xf32>
    %198 = arith.mulf %193, %197 : vector<256x32xf32>
    %cst_76 = arith.constant 1.000000e+00 : f32
    %199 = vector.broadcast %cst_76 : f32 to vector<256x32xf32>
    %200 = arith.subf %199, %198 : vector<256x32xf32>
    %201 = arith.mulf %172, %200 : vector<256x32xf32>
    %cst_77 = arith.constant 1.000000e+00 : f32
    %202 = vector.broadcast %cst_77 : f32 to vector<256x32xf32>
    %203 = arith.addf %202, %201 : vector<256x32xf32>
    %204 = arith.mulf %165, %203 : vector<256x32xf32>
    %205 = arith.truncf %204 : vector<256x32xf32> to vector<256x32xbf16>
    %cst_78 = arith.constant dense<0.000000e+00> : vector<256x8xf32>
    %206 = tpu.matmul %205, %6, %cst_78 {dimension_numbers = #tpu.dot_dimension_numbers<[1], [0], [0], [1], [0, 0, 1, 1], [], []>} : vector<256x32xbf16>, vector<32x8xbf16>, vector<256x8xf32> -> vector<256x8xf32>
    %c0_79 = arith.constant 0 : index
    %c0_80 = arith.constant 0 : index
    %207 = vector.load %arg13[%c0_79, %c0_80] : memref<1x8xf32, #tpu.memory_space<vmem>>, vector<1x8xf32>
    %208 = vector.broadcast %207 : vector<1x8xf32> to vector<256x8xf32>
    %209 = arith.addf %206, %208 : vector<256x8xf32>
    %c0_81 = arith.constant 0 : index
    %c0_82 = arith.constant 0 : index
    %210 = vector.load %arg14[%c0_81, %c0_82] : memref<256x8xf32, #tpu.memory_space<vmem>>, vector<256x8xf32>
    tpu.vector_store %arg14[%c0_81, %c0_82], %209 {strides = array<i32>} : memref<256x8xf32, #tpu.memory_space<vmem>>, vector<256x8xf32>,
    return
  }
  func.func @transform_0(%arg0: i32) -> (i32, i32) {
    %c0_i32 = arith.constant 0 : i32
    %c0_i32_0 = arith.constant 0 : i32
    return %arg0, %c0_i32 : i32, i32
  }
  func.func @transform_1(%arg0: i32) -> (i32, i32) {
    %c0_i32 = arith.constant 0 : i32
    %c0_i32_0 = arith.constant 0 : i32
    return %arg0, %c0_i32 : i32, i32
  }
  func.func @transform_2(%arg0: i32) -> (i32, i32) {
    %c0_i32 = arith.constant 0 : i32
    %c0_i32_0 = arith.constant 0 : i32
    %c0_i32_1 = arith.constant 0 : i32
    return %c0_i32, %c0_i32_0 : i32, i32
  }
  func.func @transform_3(%arg0: i32) -> (i32, i32) {
    %c0_i32 = arith.constant 0 : i32
    %c0_i32_0 = arith.constant 0 : i32
    %c0_i32_1 = arith.constant 0 : i32
    return %c0_i32, %c0_i32_0 : i32, i32
  }
  func.func @transform_4(%arg0: i32) -> (i32, i32) {
    %c0_i32 = arith.constant 0 : i32
    %c0_i32_0 = arith.constant 0 : i32
    %c0_i32_1 = arith.constant 0 : i32
    return %c0_i32, %c0_i32_0 : i32, i32
  }
  func.func @transform_5(%arg0: i32) -> (i32, i32) {
    %c0_i32 = arith.constant 0 : i32
    %c0_i32_0 = arith.constant 0 : i32
    %c0_i32_1 = arith.constant 0 : i32
    return %c0_i32, %c0_i32_0 : i32, i32
  }
  func.func @transform_6(%arg0: i32) -> (i32, i32) {
    %c0_i32 = arith.constant 0 : i32
    %c0_i32_0 = arith.constant 0 : i32
    %c0_i32_1 = arith.constant 0 : i32
    return %c0_i32, %c0_i32_0 : i32, i32
  }
  func.func @transform_7(%arg0: i32) -> (i32, i32) {
    %c0_i32 = arith.constant 0 : i32
    %c0_i32_0 = arith.constant 0 : i32
    %c0_i32_1 = arith.constant 0 : i32
    return %c0_i32, %c0_i32_0 : i32, i32
  }
  func.func @transform_8(%arg0: i32) -> (i32, i32) {
    %c0_i32 = arith.constant 0 : i32
    %c0_i32_0 = arith.constant 0 : i32
    %c0_i32_1 = arith.constant 0 : i32
    return %c0_i32, %c0_i32_0 : i32, i32
  }
  func.func @transform_9(%arg0: i32) -> (i32, i32) {
    %c0_i32 = arith.constant 0 : i32
    %c0_i32_0 = arith.constant 0 : i32
    %c0_i32_1 = arith.constant 0 : i32
    return %c0_i32, %c0_i32_0 : i32, i32
  }
  func.func @transform_10(%arg0: i32) -> (i32, i32) {
    %c0_i32 = arith.constant 0 : i32
    %c0_i32_0 = arith.constant 0 : i32
    %c0_i32_1 = arith.constant 0 : i32
    return %c0_i32, %c0_i32_0 : i32, i32
  }
  func.func @transform_11(%arg0: i32) -> (i32, i32) {
    %c0_i32 = arith.constant 0 : i32
    %c0_i32_0 = arith.constant 0 : i32
    %c0_i32_1 = arith.constant 0 : i32
    return %c0_i32, %c0_i32_0 : i32, i32
  }
  func.func @transform_12(%arg0: i32) -> (i32, i32) {
    %c0_i32 = arith.constant 0 : i32
    %c0_i32_0 = arith.constant 0 : i32
    %c0_i32_1 = arith.constant 0 : i32
    return %c0_i32, %c0_i32_0 : i32, i32
  }
  func.func @transform_13(%arg0: i32) -> (i32, i32) {
    %c0_i32 = arith.constant 0 : i32
    %c0_i32_0 = arith.constant 0 : i32
    return %arg0, %c0_i32 : i32, i32
  }
}

</mosaic_0001>

<bundles_post_ra>
// kernel: _forward_single_jit.1
= control target key start
LH: loop header
LB: loop body
LE: loop exit
PB: predicated region body
PF: predicated region fallthrough
CT: control target
= control target key end

     0   :  { %s8788_s25 = smov 0   ;;  %s12350_s0 = inlined_call_operand.vmem [shape: f32[512,128], index: 0, kind: input, shape index: {}]   ;;  %s12351_s1 = inlined_call_operand.vmem [shape: f32[512,8], index: 1, kind: input, shape index: {}]   ;;  %s12352_s2 = inlined_call_operand.vmem [shape: bf16[8,64], index: 2, kind: input, shape index: {}]   ;;  %s12353_s3 = inlined_call_operand.vmem [shape: f32[1,64], index: 3, kind: input, shape index: {}]   ;;  %s12354_s4 = inlined_call_operand.vmem [shape: bf16[128,256], index: 4, kind: input, shape index: {}]   ;;  %s12355_s5 = inlined_call_operand.vmem [shape: bf16[64,384], index: 5, kind: input, shape index: {}]   ;;  %s12356_s6 = inlined_call_operand.vmem [shape: f32[1,384], index: 6, kind: input, shape index: {}]   ;;  %s12357_s7 = inlined_call_operand.vmem [shape: bf16[128,128], index: 7, kind: input, shape index: {}]   ;;  %s12358_s8 = inlined_call_operand.vmem [shape: bf16[128,32], index: 8, kind: input, shape index: {}]   ;;  %s12359_s9 = inlined_call_operand.vmem [shape: bf16[64,32], index: 9, kind: input, shape index: {}]   ;;  %s12360_s10 = inlined_call_operand.vmem [shape: f32[1,32], index: 10, kind: input, shape index: {}]   ;;  %s12361_s11 = inlined_call_operand.vmem [shape: bf16[32,8], index: 11, kind: input, shape index: {}]   ;;  %s12362_s12 = inlined_call_operand.vmem [shape: f32[1,8], index: 12, kind: input, shape index: {}]   ;;  %s12363_s13 = inlined_call_operand.vmem [shape: f32[512,8], index: 13, kind: output, shape index: {}]  }
   0x1 LB: > { %s6867_s26 = sadd.s32 4294967295, %s8714_s25   ;;  %p6871_p0 = scmp.ge.s32.totalorder %s8714_s25, 1  ;;  %s8714_s25 = sphi %s8788_s25, %s23_s25  }
   0x2   : > { %p399_p1 = scmp.lt.s32.totalorder %s8714_s25, 3 }
   0x4   : > { %p400_p2 = pnand %p6871_p0, %p399_p1 }
   0x6   : > { %403 = sbr.rel (%p400_p2) target bundleno = 2908 (0xb5c), region = 72 }
   0xd   : > { %v467_v0 = vld [vmem:[%s12352_s2] sm:$0xf]  ;;  %vm680_vm0 = vcmask 1043456   ;;  %s6872_s29 = sshll.u32 %s6867_s26, 5  ;;  %v7644_v2 = vld [vmem:[%s12355_s5 + $0x8] ss:$12 sps:$4 sm:$0xff]  }
   0xe   : > { %7632 = vmatprep.subr.msk.bf16.mxu0 %vm680_vm0, %v467_v0  ;;  %v682_v1 = vsel %vm680_vm0, %v467_v0, 0  ;;  %p449_p3 = scmp.lt.s32.totalorder %s6872_s29, 63  ;;  %7633 = vmatprep.subr.msk.bf16.mxu1 %vm680_vm0, %v467_v0  ;;  %v7648_v3 = vld [vmem:[%s12355_s5 + $0x4] ss:$12 sps:$4 sm:$0xff]   ;;  %vm631_vm1 = vcmask 64512   ;;  %v12364_v62 = vmov 0  }
   0xf   : > { %7209 = vmatpush3.bf16.msra.mxu0 %v682_v1  ;;  %7599 = vmatpush3.bf16.msra.mxu1 %v682_v1  ;;  %v7645_v13 = vld [vmem:[%s12355_s5 + $0x20] ss:$12 sps:$4 sm:$0xff]   ;;  %v7649_v17 = vld [vmem:[%s12355_s5 + $0x38] ss:$12 sps:$4 sm:$0xff]   ;;  %v7652_v30 = vld [vmem:[%s12355_s5 + $0x1c] ss:$12 sps:$4 sm:$0xff]  }
  0x10   : > { %s13270_s29 = smov (!%p449_p3, %s6872_s29), 63  ;;  %7242 = vmatprep.subr.bf16.mxu0 %v7644_v2  ;;  %991 = vmatprep.subr.bf16.mxu1 %v7648_v3  ;;  %v7646_v27 = vld [vmem:[%s12355_s5] ss:$12 sps:$4 sm:$0xff]   ;;  %v7650_v34 = vld [vmem:[%s12355_s5 + $0x18] ss:$12 sps:$4 sm:$0xff]   ;;  %vm942_vm2 = vcmask 523264  }
  0x11   : > { %s8805_s17 = sshll.u32 %s13270_s29, 3  ;;  %v7655_v57 = vld [vmem:[%s12355_s5 + $0x34] ss:$12 sps:$4 sm:$0xff]   ;;  %v7653_v58 = vld [vmem:[%s12355_s5 + $0x30] ss:$12 sps:$4 sm:$0xff]   ;;  %vm6557_vm7 = vcmask 261120  }
  0x12   : > { %s8811_s20 = scalar_lea.vmem %s12351_s1, %s8805_s17  ;;  %v7656_v59 = vld [vmem:[%s12355_s5 + $0x50] ss:$12 sps:$4 sm:$0xff]   ;;  %v7659_v60 = vld [vmem:[%s12355_s5 + $0x4c] ss:$12 sps:$4 sm:$0xff]   ;;  %v7657_v61 = vld [vmem:[%s12355_s5 + $0x48] ss:$12 sps:$4 sm:$0xff]   ;;  %s9070_s19 = scalar_lea.vmem %s12350_s0, %s8805_s17 }
  0x13   : > { %v576_v4 = vld [vmem:[%s8811_s20] sm:$0xff]  ;;  %v577_v5 = vld [vmem:[%s8811_s20 + $0x8] sm:$0xff]  ;;  %v578_v6 = vld [vmem:[%s8811_s20 + $0x10] sm:$0xff]  ;;  %s12249_s21 = scalar_lea.vmem %s12363_s13, %s8805_s17 }
  0x14   : > { %v608_v7 = vpack.c.bf16 %v577_v5, %v576_v4  ;;  %v579_v8 = vld [vmem:[%s8811_s20 + $0x18] sm:$0xff]  ;;  %v580_v9 = vld [vmem:[%s8811_s20 + $0x20] sm:$0xff]  ;;  %v581_v10 = vld [vmem:[%s8811_s20 + $0x28] sm:$0xff] }
  0x15   : > { %v609_v11 = vpack.c.bf16 %v579_v8, %v578_v6  ;;  %v610_v12 = vpack.c.bf16 %v581_v10, %v580_v9  ;;  %v582_v14 = vld [vmem:[%s8811_s20 + $0x30] sm:$0xff]  ;;  %v583_v15 = vld [vmem:[%s8811_s20 + $0x38] sm:$0xff]  ;;  %v584_v16 = vld [vmem:[%s8811_s20 + $0x40] sm:$0xff] }
  0x16   : > { %7210 = vmatprep.mubr.msk.bf16.mxu0 %vm631_vm1, %v608_v7  ;;  %v585_v18 = vld [vmem:[%s8811_s20 + $0x48] sm:$0xff]  ;;  %v592_v19 = vld [vmem:[%s8811_s20 + $0x80] sm:$0xff]  ;;  %v594_v22 = vld [vmem:[%s8811_s20 + $0x90] sm:$0xff]  ;;  %v611_v28 = vpack.c.bf16 %v583_v15, %v582_v14 }
  0x17   : > { %7211 = vmatmul.mubr.msk.bf16.vlgmr.msra.gmra.mrb[0].mxu0 %vm631_vm1, %v609_v11  ;;  %v593_v20 = vld [vmem:[%s8811_s20 + $0x88] sm:$0xff]  ;;  %v595_v23 = vld [vmem:[%s8811_s20 + $0x98] sm:$0xff]  ;;  %v596_v24 = vld [vmem:[%s8811_s20 + $0xa0] sm:$0xff]  ;;  %v612_v31 = vpack.c.bf16 %v585_v18, %v584_v16 }
  0x18   : > { %7214 = vmatprep.mubr.msk.bf16.mxu0 %vm631_vm1, %v610_v12  ;;  %7243 = vmatpush3.bf16.msra.mxu0 %v7644_v2  ;;  %v616_v21 = vpack.c.bf16 %v593_v20, %v592_v19  ;;  %v617_v25 = vpack.c.bf16 %v595_v23, %v594_v22  ;;  %v597_v26 = vld [vmem:[%s8811_s20 + $0xa8] sm:$0xff]  ;;  %v598_v32 = vld [vmem:[%s8811_s20 + $0xb0] sm:$0xff]  ;;  %v599_v33 = vld [vmem:[%s8811_s20 + $0xb8] sm:$0xff] }
  0x19   : > { %7244 = vmatprep.subr.bf16.mxu0 %v7645_v13  ;;  %v618_v29 = vpack.c.bf16 %v597_v26, %v596_v24  ;;  %v600_v35 = vld [vmem:[%s8811_s20 + $0xc0] sm:$0xff]  ;;  %v601_v36 = vld [vmem:[%s8811_s20 + $0xc8] sm:$0xff]  ;;  %v586_v37 = vld [vmem:[%s8811_s20 + $0x50] sm:$0xff]  ;;  %v619_v41 = vpack.c.bf16 %v599_v33, %v598_v32 }
  0x1a   : > { %7226 = vmatprep.mubr.msk.bf16.mxu1 %vm631_vm1, %v616_v21  ;;  %v587_v38 = vld [vmem:[%s8811_s20 + $0x58] sm:$0xff]  ;;  %v588_v39 = vld [vmem:[%s8811_s20 + $0x60] sm:$0xff]  ;;  %v589_v40 = vld [vmem:[%s8811_s20 + $0x68] sm:$0xff]  ;;  %v620_v42 = vpack.c.bf16 %v601_v36, %v600_v35 }
  0x1b   : > { %7227 = vmatmul.mubr.msk.bf16.vlgmr.msra.gmra.mrb[0].mxu1 %vm631_vm1, %v617_v25  ;;  %v613_v43 = vpack.c.bf16 %v587_v38, %v586_v37  ;;  %v602_v44 = vld [vmem:[%s8811_s20 + $0xd0] sm:$0xff]  ;;  %v603_v45 = vld [vmem:[%s8811_s20 + $0xd8] sm:$0xff]  ;;  %v614_v46 = vpack.c.bf16 %v589_v40, %v588_v39  ;;  %v604_v47 = vld [vmem:[%s8811_s20 + $0xe0] sm:$0xff] }
  0x1c   : > { %7245 = vmatpush3.bf16.msra.mxu0 %v7645_v13  ;;  %7230 = vmatprep.mubr.msk.bf16.mxu1 %vm631_vm1, %v618_v29  ;;  %v605_v48 = vld [vmem:[%s8811_s20 + $0xe8] sm:$0xff]  ;;  %v590_v49 = vld [vmem:[%s8811_s20 + $0x70] sm:$0xff]  ;;  %v591_v50 = vld [vmem:[%s8811_s20 + $0x78] sm:$0xff]  ;;  %v621_v51 = vpack.c.bf16 %v603_v45, %v602_v44 }
  0x1d   : > { %7246 = vmatprep.subr.bf16.mxu0 %v7649_v17  ;;  %992 = vmatpush1.bf16.msra.mxu1 %v7646_v27  ;;  %v622_v52 = vpack.c.bf16 %v605_v48, %v604_v47  ;;  %v615_v53 = vpack.c.bf16 %v591_v50, %v590_v49  ;;  %v606_v54 = vld [vmem:[%s8811_s20 + $0xf0] sm:$0xff]  ;;  %v607_v55 = vld [vmem:[%s8811_s20 + $0xf8] sm:$0xff]  ;;  %v8895_v63 = vld [vmem:[%s12354_s4 + $0x4] ss:$8 sps:$4 sm:$0xff]  }
  0x1e   : > { %993 = vmatprep.subr.bf16.mxu1 %v7652_v30  ;;  %v623_v56 = vpack.c.bf16 %v607_v55, %v606_v54  ;;  %v8901_v1 = vld [vmem:[%s12353_s3] ss:$0 sm:$0xff]  ;;  %v7663_v15 = vld [vmem:[%s12354_s4 + $0x14] ss:$8 sps:$4 sm:$0xff]   ;;  %v7665_v24 = vld [vmem:[%s12354_s4 + $0x10] ss:$8 sps:$4 sm:$0xff]  }
  0x1f   : > { %7215 = vmatmul.mubr.msk.bf16.gmra.mrb[4].mxu0 %vm631_vm1, %v611_v28  ;;  %v7662_v12 = vld [vmem:[%s12354_s4] ss:$8 sps:$4 sm:$0xff]   ;;  %v7666_v29 = vld [vmem:[%s12354_s4 + $0x24] ss:$8 sps:$4 sm:$0xff]   ;;  %v7669_v39 = vld [vmem:[%s12354_s4 + $0x34] ss:$8 sps:$4 sm:$0xff]  }
  0x20   : > { %7218 = vmatprep.mubr.msk.bf16.mxu0 %vm631_vm1, %v612_v31  ;;  %7247 = vmatpush3.bf16.msra.mxu0 %v7649_v17  ;;  %v7668_v36 = vld [vmem:[%s12354_s4 + $0x20] ss:$8 sps:$4 sm:$0xff]   ;;  %v7671_v48 = vld [vmem:[%s12354_s4 + $0x30] ss:$8 sps:$4 sm:$0xff]   ;;  %v7672_v54 = vld [vmem:[%s12354_s4 + $0x44] ss:$8 sps:$4 sm:$0xff]  }
  0x21   : > { %994 = vmatpush1.bf16.msra.mxu1 %v7650_v34  ;;  %7248 = vmatprep.subr.bf16.mxu0 %v7656_v59 }
  0x22   : > { %995 = vmatprep.subr.bf16.mxu1 %v7655_v57 }
  0x23   : > { %7231 = vmatmul.mubr.msk.bf16.gmra.mrb[4].mxu1 %vm631_vm1, %v619_v41 }
  0x24   : > { %7234 = vmatprep.mubr.msk.bf16.mxu1 %vm631_vm1, %v620_v42  ;;  %7249 = vmatpush3.bf16.msra.mxu0 %v7656_v59 }
  0x25   : > { %996 = vmatpush1.bf16.msra.mxu1 %v7653_v58  ;;  %1489 = vmatprep.subr.bf16.mxu0 %v8895_v63 }
  0x26   : > { %997 = vmatprep.subr.bf16.mxu1 %v7659_v60  ;;  %v7674_v60 = vld [vmem:[%s12354_s4 + $0x40] ss:$8 sps:$4 sm:$0xff]  }
  0x27   : > { %7219 = vmatmul.mubr.msk.bf16.gmra.mrb[8].mxu0 %vm631_vm1, %v613_v43 }
  0x28   : > { %7222 = vmatprep.mubr.msk.bf16.mxu0 %vm631_vm1, %v614_v46 }
  0x29   : > { %998 = vmatpush1.bf16.msra.mxu1 %v7657_v61 }
  0x2b   : > { %7235 = vmatmul.mubr.msk.bf16.gmra.mrb[8].mxu1 %vm631_vm1, %v621_v51 }
  0x2c   : > { %7238 = vmatprep.mubr.msk.bf16.mxu1 %vm631_vm1, %v622_v52 }
  0x2f   : > { %7223 = vmatmul.mubr.msk.bf16.gmra.mrb[12].mxu0 %vm631_vm1, %v615_v53 }
  0x33   : > { %7239 = vmatmul.mubr.msk.bf16.gmra.mrb[12].mxu1 %vm631_vm1, %v623_v56 }
  0x34   : > { %1023 = vmatprep.mubr.bf16.mxu1 %v12364_v62 }
  0xea   : > { %v7212_v0 = vpop.f32.mrb[0].mxu0 }
  0xeb   : > { %v718_v2 = vpop.f32.mrb[1].mxu0  ;;  %v727_v4 = vadd.f32 %v7212_v0, %v8901_v1 }
  0xec   : > { %v7213_v3 = vpop.f32.mrb[2].mxu0  ;;  %v719_v7 = vadd.f32 %v8901_v1, %v718_v2 }
  0xed   : > { %v730_v5 = vadd.f32 %v7213_v3, %v8901_v1  ;;  %v721_v6 = vpop.f32.mrb[3].mxu0 }
  0xee   : > { %v722_v8 = vadd.f32 %v8901_v1, %v721_v6  ;;  %v7228_v10 = vpop.f32.mrb[0].mxu1 }
  0xef   : > { %v8907_v9 = vpack.c.bf16 %v730_v5, %v727_v4  ;;  %v791_v13 = vadd.f32 %v7228_v10, %v8901_v1  ;;  %v782_v14 = vpop.f32.mrb[1].mxu1  ;;  %v7675_v4 = vld [vmem:[%s12354_s4 + $0x54] ss:$8 sps:$4 sm:$0xff]  }
  0xf0   : > { %v8909_v11 = vpack.c.bf16 %v722_v8, %v719_v7  ;;  %v783_v16 = vadd.f32 %v8901_v1, %v782_v14  ;;  %v7229_v17 = vpop.f32.mrb[2].mxu1  ;;  %v7677_v14 = vld [vmem:[%s12354_s4 + $0x50] ss:$8 sps:$4 sm:$0xff]  }
  0xf1   : > { %12657 = vst [vmem:[#allocation2_spill] sm:$0xff] %v8907_v9  ;;  %v794_v19 = vadd.f32 %v7229_v17, %v8901_v1  ;;  %v785_v20 = vpop.f32.mrb[3].mxu1 }
  0xf2   : > { %12658 = vst [vmem:[#allocation3_spill] sm:$0xff] %v8909_v11  ;;  %v7216_v18 = vpop.f32.mrb[4].mxu0  ;;  %6907 = vmatmul.mubr.msk.bf16.vlgmr.msra.gmra.mrb[16].mxu1 %vm942_vm2, %v8909_v11  ;;  %7250 = vmatprep.mubr.msk.bf16.mxu0 %vm942_vm2, %v8909_v11  ;;  %v786_v22 = vadd.f32 %v8901_v1, %v785_v20 }
  0xf3   : > { %v734_v21 = vpop.f32.mrb[5].mxu0  ;;  %7251 = vmatmul.mubr.msk.bf16.vlgmr.msra.gmra.mrb[16].mxu0 %vm942_vm2, %v8907_v9  ;;  %1033 = vmatprep.mubr.bf16.mxu1 %v12364_v62  ;;  %v8931_v25 = vpack.c.bf16 %v794_v19, %v791_v13  ;;  %v743_v26 = vadd.f32 %v7216_v18, %v8901_v1  ;;  %v7678_v19 = vld [vmem:[%s12354_s4 + $0x64] ss:$8 sps:$4 sm:$0xff]  }
  0xf4   : > { %1490 = vmatpush1.bf16.msra.mxu0 %v7662_v12  ;;  %v7217_v23 = vpop.f32.mrb[6].mxu0  ;;  %v8938_v30 = vpack.c.bf16 %v786_v22, %v783_v16  ;;  %v735_v31 = vadd.f32 %v8901_v1, %v734_v21 }
  0xf5   : > { %12659 = vst [vmem:[#allocation4_spill] sm:$0xff] %v8931_v25  ;;  %v746_v27 = vadd.f32 %v7217_v23, %v8901_v1  ;;  %v737_v28 = vpop.f32.mrb[7].mxu0  ;;  %1491 = vmatprep.subr.bf16.mxu0 %v7663_v15 }
  0xf6   : > { %12660 = vst [vmem:[#allocation5_spill] sm:$0xff] %v8938_v30  ;;  %v738_v32 = vadd.f32 %v8901_v1, %v737_v28  ;;  %v7232_v34 = vpop.f32.mrb[4].mxu1  ;;  %v7680_v28 = vld [vmem:[%s12354_s4 + $0x60] ss:$8 sps:$4 sm:$0xff]  }
  0xf7   : > { %v8942_v33 = vpack.c.bf16 %v746_v27, %v743_v26  ;;  %v807_v37 = vadd.f32 %v7232_v34, %v8901_v1  ;;  %v798_v38 = vpop.f32.mrb[5].mxu1 }
  0xf8   : > { %v8944_v35 = vpack.c.bf16 %v738_v32, %v735_v31  ;;  %1492 = vmatpush1.bf16.msra.mxu0 %v7665_v24  ;;  %v799_v40 = vadd.f32 %v8901_v1, %v798_v38  ;;  %v7233_v41 = vpop.f32.mrb[6].mxu1  ;;  %v7681_v32 = vld [vmem:[%s12354_s4 + $0x74] ss:$8 sps:$4 sm:$0xff]  }
  0xf9   : > { %12661 = vst [vmem:[#allocation6_spill] sm:$0xff] %v8942_v33  ;;  %1493 = vmatprep.subr.bf16.mxu0 %v7666_v29  ;;  %v810_v43 = vadd.f32 %v7233_v41, %v8901_v1  ;;  %v801_v44 = vpop.f32.mrb[7].mxu1  ;;  %v7685_v41 = vld [vmem:[%s12357_s7 + $0x8] sm:$0xff]  }
  0xfa   : > { %12662 = vst [vmem:[#allocation7_spill] sm:$0xff] %v8944_v35  ;;  %v7220_v42 = vpop.f32.mrb[8].mxu0  ;;  %6908 = vmatmul.mubr.msk.bf16.gmra.mrb[20].mxu1 %vm942_vm2, %v8907_v9  ;;  %7254 = vmatprep.mubr.msk.bf16.mxu0 %vm942_vm2, %v8944_v35  ;;  %v802_v46 = vadd.f32 %v8901_v1, %v801_v44  ;;  %v9085_v44 = vld [vmem:[%s9070_s19 + $0x8] sm:$0xff] }
  0xfb   : > { %v750_v45 = vpop.f32.mrb[9].mxu0  ;;  %7255 = vmatmul.mubr.msk.bf16.gmra.mrb[20].mxu0 %vm942_vm2, %v8942_v33  ;;  %1043 = vmatprep.mubr.bf16.mxu1 %v12364_v62  ;;  %v8966_v49 = vpack.c.bf16 %v810_v43, %v807_v37  ;;  %v759_v50 = vadd.f32 %v7220_v42, %v8901_v1  ;;  %v863_v42 = vlaneseq  ;;  %v9082_v43 = vld [vmem:[%s9070_s19] sm:$0xff] }
  0xfc   : > { %v7221_v47 = vpop.f32.mrb[10].mxu0  ;;  %1494 = vmatpush1.bf16.msra.mxu0 %v7668_v36  ;;  %v8970_v53 = vpack.c.bf16 %v802_v46, %v799_v40  ;;  %v751_v55 = vadd.f32 %v8901_v1, %v750_v45  ;;  %v9092_v46 = vld [vmem:[%s12356_s6] sm:$0x7] }
  0xfd   : > { %12663 = vst [vmem:[#allocation8_spill] sm:$0xff] %v8966_v49  ;;  %v762_v51 = vadd.f32 %v7221_v47, %v8901_v1  ;;  %v753_v52 = vpop.f32.mrb[11].mxu0  ;;  %1495 = vmatprep.subr.bf16.mxu0 %v7669_v39  ;;  %v7683_v39 = vld [vmem:[%s12354_s4 + $0x70] ss:$8 sps:$4 sm:$0xff]   ;;  %v9087_v45 = vshrl.u32 %v863_v42, 7  ;;  %v1393_v47 = vpack.c.bf16 %v9085_v44, %v9082_v43 }
  0xfe   : > { %12664 = vst [vmem:[#allocation9_spill] sm:$0xff] %v8970_v53  ;;  %v754_v56 = vadd.f32 %v8901_v1, %v753_v52  ;;  %v7236_v58 = vpop.f32.mrb[8].mxu1  ;;  %v9108_v52 = vld [vmem:[%s9070_s19 + $0x18] sm:$0xff] }
  0xff   : > { %v8977_v57 = vpack.c.bf16 %v762_v51, %v759_v50  ;;  %v823_v61 = vadd.f32 %v7236_v58, %v8901_v1  ;;  %v814_v0 = vpop.f32.mrb[9].mxu1  ;;  %v9105_v51 = vld [vmem:[%s9070_s19 + $0x10] sm:$0xff] }
 0x100   : > { %v8979_v59 = vpack.c.bf16 %v754_v56, %v751_v55  ;;  %1496 = vmatpush1.bf16.msra.mxu0 %v7671_v48  ;;  %v815_v2 = vadd.f32 %v8901_v1, %v814_v0  ;;  %v7237_v3 = vpop.f32.mrb[10].mxu1  ;;  %v865_v48 = vsub.s32 0, %v9087_v45  ;;  %v9117_v55 = vld [vmem:[%s9070_s19 + $0x20] sm:$0xff]  ;;  %v9120_v56 = vld [vmem:[%s9070_s19 + $0x28] sm:$0xff]  ;;  %v9133_v0 = vld [vmem:[%s9070_s19 + $0x38] sm:$0xff] }
 0x101   : > { %12665 = vst [vmem:[#allocation10_spill] sm:$0xff] %v8977_v57  ;;  %1497 = vmatprep.subr.bf16.mxu0 %v7672_v54  ;;  %v826_v6 = vadd.f32 %v7237_v3, %v8901_v1  ;;  %v817_v7 = vpop.f32.mrb[11].mxu1  ;;  %v1394_v54 = vpack.c.bf16 %v9108_v52, %v9105_v51  ;;  %v1395_v58 = vpack.c.bf16 %v9120_v56, %v9117_v55 }
 0x102   : > { %12666 = vst [vmem:[#allocation11_spill] sm:$0xff] %v8979_v59  ;;  %v7224_v5 = vpop.f32.mrb[12].mxu0  ;;  %6909 = vmatmul.mubr.msk.bf16.gmra.mrb[24].mxu1 %vm942_vm2, %v8944_v35  ;;  %7258 = vmatprep.mubr.msk.bf16.mxu0 %vm942_vm2, %v8979_v59  ;;  %v818_v10 = vadd.f32 %v8901_v1, %v817_v7  ;;  %v9098_v50 = vrot.slane %v9092_v46, %v865_v48  ;;  %v569_v48 = vld [vmem:[%s9070_s19 + $0xc8] sm:$0xff] }
 0x103   : > { %v766_v8 = vpop.f32.mrb[13].mxu0  ;;  %7259 = vmatmul.mubr.msk.bf16.gmra.mrb[24].mxu0 %vm942_vm2, %v8977_v57  ;;  %1053 = vmatprep.mubr.bf16.mxu1 %v12364_v62  ;;  %v8998_v13 = vpack.c.bf16 %v826_v6, %v823_v61  ;;  %v775_v15 = vadd.f32 %v7224_v5, %v8901_v1  ;;  %v9130_v61 = vld [vmem:[%s9070_s19 + $0x30] sm:$0xff]  ;;  %v9148_v5 = vld [vmem:[%s9070_s19 + $0x48] sm:$0xff] }
 0x104   : > { %v7225_v12 = vpop.f32.mrb[14].mxu0  ;;  %1498 = vmatpush1.bf16.msra.mxu0 %v7674_v60  ;;  %v9005_v18 = vpack.c.bf16 %v818_v10, %v815_v2  ;;  %v767_v20 = vadd.f32 %v8901_v1, %v766_v8  ;;  %v873_v60 = vsub.s32 2, %v9087_v45  ;;  %v1396_v3 = vpack.c.bf16 %v9133_v0, %v9130_v61  ;;  %v7686_v6 = vld [vmem:[%s12357_s7 + $0x10] sm:$0xff]   ;;  %v555_v10 = vld [vmem:[%s9070_s19 + $0x58] sm:$0xff] }
 0x105   : > { %12667 = vst [vmem:[#allocation12_spill] sm:$0xff] %v8998_v13  ;;  %v778_v16 = vadd.f32 %v7225_v12, %v8901_v1  ;;  %v769_v17 = vpop.f32.mrb[15].mxu0  ;;  %1499 = vmatprep.subr.bf16.mxu0 %v7675_v4  ;;  %v9145_v4 = vld [vmem:[%s9070_s19 + $0x40] sm:$0xff]  ;;  %v554_v8 = vld [vmem:[%s9070_s19 + $0x50] sm:$0xff] }
 0x106   : > { %12668 = vst [vmem:[#allocation13_spill] sm:$0xff] %v9005_v18  ;;  %v770_v21 = vadd.f32 %v8901_v1, %v769_v17  ;;  %v7240_v23 = vpop.f32.mrb[12].mxu1  ;;  %v9136_v2 = vrot.slane %v9092_v46, %v873_v60  ;;  %v1397_v7 = vpack.c.bf16 %v9148_v5, %v9145_v4  ;;  %v1398_v12 = vpack.c.bf16 %v555_v10, %v554_v8  ;;  %v571_v60 = vld [vmem:[%s9070_s19 + $0xd8] sm:$0xff]  ;;  %v7690_v8 = vld [vmem:[%s12357_s7 + $0x30] sm:$0xff]  }
 0x107   : > { %v9012_v22 = vpack.c.bf16 %v778_v16, %v775_v15  ;;  %v839_v26 = vadd.f32 %v7240_v23, %v8901_v1  ;;  %v830_v27 = vpop.f32.mrb[13].mxu1  ;;  %v557_v15 = vld [vmem:[%s9070_s19 + $0x68] sm:$0xff]  ;;  %v7687_v16 = vld [vmem:[%s12357_s7 + $0x18] sm:$0xff]   ;;  %v560_v23 = vld [vmem:[%s9070_s19 + $0x80] sm:$0xff] }
 0x108   : > { %v9014_v24 = vpack.c.bf16 %v770_v21, %v767_v20  ;;  %1500 = vmatpush1.bf16.msra.mxu0 %v7677_v14  ;;  %v831_v29 = vadd.f32 %v8901_v1, %v830_v27  ;;  %v7241_v31 = vpop.f32.mrb[14].mxu1  ;;  %v556_v14 = vld [vmem:[%s9070_s19 + $0x60] sm:$0xff]  ;;  %v559_v20 = vld [vmem:[%s9070_s19 + $0x78] sm:$0xff] }
 0x109   : > { %12669 = vst [vmem:[#allocation14_spill] sm:$0xff] %v9012_v22  ;;  %1501 = vmatprep.subr.bf16.mxu0 %v7678_v19  ;;  %v842_v34 = vadd.f32 %v7241_v31, %v8901_v1  ;;  %v833_v36 = vpop.f32.mrb[15].mxu1  ;;  %v1399_v17 = vpack.c.bf16 %v557_v15, %v556_v14  ;;  %v558_v19 = vld [vmem:[%s9070_s19 + $0x70] sm:$0xff]  ;;  %v7688_v27 = vld [vmem:[%s12357_s7 + $0x20] sm:$0xff]   ;;  %v563_v31 = vld [vmem:[%s9070_s19 + $0x98] sm:$0xff] }
 0x10a   : > { %12670 = vst [vmem:[#allocation15_spill] sm:$0xff] %v9014_v24  ;;  %6910 = vmatmul.mubr.msk.bf16.gmra.mrb[28].mxu1 %vm942_vm2, %v8942_v33  ;;  %7262 = vmatprep.mubr.msk.bf16.mxu0 %vm942_vm2, %v9014_v24  ;;  %v834_v37 = vadd.f32 %v8901_v1, %v833_v36  ;;  %v7684_v1 = vld [vmem:[%s12357_s7] sm:$0xff]   ;;  %v1400_v21 = vpack.c.bf16 %v559_v20, %v558_v19  ;;  %v565_v36 = vld [vmem:[%s9070_s19 + $0xa8] sm:$0xff]  ;;  %v575_v14 = vld [vmem:[%s9070_s19 + $0xf8] sm:$0xff] }
 0x10b   : > { %7263 = vmatmul.mubr.msk.bf16.gmra.mrb[28].mxu0 %vm942_vm2, %v9012_v22  ;;  %1063 = vmatprep.mubr.bf16.mxu1 %v12364_v62  ;;  %v9035_v38 = vpack.c.bf16 %v842_v34, %v839_v26  ;;  %v561_v26 = vld [vmem:[%s9070_s19 + $0x88] sm:$0xff]  ;;  %v564_v34 = vld [vmem:[%s9070_s19 + $0xa0] sm:$0xff]  ;;  %v7691_v15 = vld [vmem:[%s12357_s7 + $0x38] sm:$0xff]  }
 0x10c   : > { %7266 = vmatprep.mubr.msk.bf16.mxu0 %vm942_vm2, %v8938_v30  ;;  %1502 = vmatpush1.bf16.msra.mxu0 %v7680_v28  ;;  %v9040_v40 = vpack.c.bf16 %v834_v37, %v831_v29  ;;  %v1401_v28 = vpack.c.bf16 %v561_v26, %v560_v23  ;;  %v562_v29 = vld [vmem:[%s9070_s19 + $0x90] sm:$0xff]  ;;  %v7689_v37 = vld [vmem:[%s12357_s7 + $0x28] sm:$0xff]  }
 0x10d   : > { %12671 = vst [vmem:[#allocation16_spill] sm:$0xff] %v9035_v38  ;;  %1503 = vmatprep.subr.bf16.mxu0 %v7681_v32  ;;  %7282 = vmatprep.subr.bf16.mxu1 %v7684_v1  ;;  %v1402_v32 = vpack.c.bf16 %v563_v31, %v562_v29 }
 0x10e   : > { %12672 = vst [vmem:[#allocation17_spill] sm:$0xff] %v9040_v40  ;;  %7283 = vmatpush3.bf16.msra.mxu1 %v7684_v1 }
 0x10f   : > { %7284 = vmatprep.subr.bf16.mxu1 %v7685_v41 }
 0x110   : > { %1504 = vmatpush1.bf16.msra.mxu0 %v7683_v39  ;;  %v1403_v39 = vpack.c.bf16 %v565_v36, %v564_v34 }
 0x111   : > { %7330 = vmatprep.subr.bf16.mxu0 %v7684_v1 }
 0x112   : > { %6911 = vmatmul.mubr.msk.bf16.gmra.mrb[32].mxu1 %vm942_vm2, %v8979_v59 }
 0x113   : > { %7267 = vmatmul.mubr.msk.bf16.gmra.mrb[32].mxu0 %vm942_vm2, %v8931_v25  ;;  %1073 = vmatprep.mubr.bf16.mxu1 %v12364_v62 }
 0x114   : > { %7270 = vmatprep.mubr.msk.bf16.mxu0 %vm942_vm2, %v8970_v53  ;;  %7285 = vmatpush3.bf16.msra.mxu1 %v7685_v41 }
 0x115   : > { %7286 = vmatprep.subr.bf16.mxu1 %v7686_v6 }
 0x118   : > { %7287 = vmatpush3.bf16.msra.mxu1 %v7686_v6 }
 0x119   : > { %7288 = vmatprep.subr.bf16.mxu1 %v7687_v16 }
 0x11a   : > { %6912 = vmatmul.mubr.msk.bf16.gmra.mrb[36].mxu1 %vm942_vm2, %v8977_v57 }
 0x11b   : > { %7271 = vmatmul.mubr.msk.bf16.gmra.mrb[36].mxu0 %vm942_vm2, %v8966_v49  ;;  %1083 = vmatprep.mubr.bf16.mxu1 %v12364_v62 }
 0x11c   : > { %7274 = vmatprep.mubr.msk.bf16.mxu0 %vm942_vm2, %v9005_v18  ;;  %7289 = vmatpush3.bf16.msra.mxu1 %v7687_v16 }
 0x11d   : > { %7290 = vmatprep.subr.bf16.mxu1 %v7688_v27 }
 0x120   : > { %7291 = vmatpush3.bf16.msra.mxu1 %v7688_v27 }
 0x121   : > { %7292 = vmatprep.subr.bf16.mxu1 %v7689_v37 }
 0x122   : > { %6913 = vmatmul.mubr.msk.bf16.gmra.mrb[40].mxu1 %vm942_vm2, %v9014_v24 }
 0x123   : > { %7275 = vmatmul.mubr.msk.bf16.gmra.mrb[40].mxu0 %vm942_vm2, %v8998_v13  ;;  %1093 = vmatprep.mubr.bf16.mxu1 %v12364_v62 }
 0x124   : > { %7278 = vmatprep.mubr.msk.bf16.mxu0 %vm942_vm2, %v9040_v40  ;;  %7293 = vmatpush3.bf16.msra.mxu1 %v7689_v37 }
 0x125   : > { %7294 = vmatprep.subr.bf16.mxu1 %v7690_v8 }
 0x128   : > { %7295 = vmatpush3.bf16.msra.mxu1 %v7690_v8 }
 0x129   : > { %7296 = vmatprep.subr.bf16.mxu1 %v7691_v15 }
 0x12a   : > { %6914 = vmatmul.mubr.msk.bf16.gmra.mrb[44].mxu1 %vm942_vm2, %v9012_v22 }
 0x12b   : > { %7279 = vmatmul.mubr.msk.bf16.gmra.mrb[44].mxu0 %vm942_vm2, %v9035_v38  ;;  %1103 = vmatprep.mubr.bf16.mxu1 %v12364_v62 }
 0x12c   : > { %1521 = vmatprep.mubr.bf16.mxu0 %v12364_v62  ;;  %7297 = vmatpush3.bf16.msra.mxu1 %v7691_v15 }
 0x12d   : > { %2531 = vmatprep.subr.bf16.mxu1 %v8895_v63 }
 0x132   : > { %6915 = vmatmul.mubr.msk.bf16.gmra.mrb[48].mxu1 %vm942_vm2, %v8938_v30 }
 0x133   : > { %1522 = vmatmul.mubr.bf16.vlgmr.msra.gmra.mrb[48].mxu0 %v1393_v47  ;;  %1113 = vmatprep.mubr.bf16.mxu1 %v12364_v62  ;;  %v568_v47 = vld [vmem:[%s9070_s19 + $0xc0] sm:$0xff] }
 0x134   : > { %1531 = vmatprep.mubr.bf16.mxu0 %v12364_v62  ;;  %7331 = vmatpush3.bf16.msra.mxu0 %v7684_v1  ;;  %v566_v1 = vld [vmem:[%s9070_s19 + $0xb0] sm:$0xff] }
 0x135   : > { %7332 = vmatprep.subr.bf16.mxu0 %v7685_v41 }
 0x138   : > { %7333 = vmatpush3.bf16.msra.mxu0 %v7685_v41  ;;  %v567_v41 = vld [vmem:[%s9070_s19 + $0xb8] sm:$0xff] }
 0x139   : > { %7334 = vmatprep.subr.bf16.mxu0 %v7686_v6  ;;  %v1404_v42 = vpack.c.bf16 %v567_v41, %v566_v1 }
 0x13a   : > { %6916 = vmatmul.mubr.msk.bf16.gmra.mrb[52].mxu1 %vm942_vm2, %v8931_v25 }
 0x13b   : > { %1532 = vmatmul.mubr.bf16.gmra.mrb[52].mxu0 %v1394_v54  ;;  %1123 = vmatprep.mubr.bf16.mxu1 %v12364_v62  ;;  %v1405_v54 = vpack.c.bf16 %v569_v48, %v568_v47 }
 0x13c   : > { %1541 = vmatprep.mubr.bf16.mxu0 %v12364_v62  ;;  %7335 = vmatpush3.bf16.msra.mxu0 %v7686_v6  ;;  %v572_v6 = vld [vmem:[%s9070_s19 + $0xe0] sm:$0xff] }
 0x13d   : > { %7336 = vmatprep.subr.bf16.mxu0 %v7687_v16 }
 0x140   : > { %7337 = vmatpush3.bf16.msra.mxu0 %v7687_v16 }
 0x141   : > { %7338 = vmatprep.subr.bf16.mxu0 %v7688_v27 }
 0x142   : > { %6917 = vmatmul.mubr.msk.bf16.gmra.mrb[56].mxu1 %vm942_vm2, %v8970_v53 }
 0x143   : > { %1542 = vmatmul.mubr.bf16.gmra.mrb[56].mxu0 %v1395_v58  ;;  %1133 = vmatprep.mubr.bf16.mxu1 %v12364_v62  ;;  %v570_v58 = vld [vmem:[%s9070_s19 + $0xd0] sm:$0xff] }
 0x144   : > { %1551 = vmatprep.mubr.bf16.mxu0 %v12364_v62  ;;  %7339 = vmatpush3.bf16.msra.mxu0 %v7688_v27 }
 0x145   : > { %7340 = vmatprep.subr.bf16.mxu0 %v7689_v37 }
 0x148   : > { %7341 = vmatpush3.bf16.msra.mxu0 %v7689_v37 }
 0x149   : > { %7342 = vmatprep.subr.bf16.mxu0 %v7690_v8 }
 0x14a   : > { %6918 = vmatmul.mubr.msk.bf16.gmra.mrb[60].mxu1 %vm942_vm2, %v8966_v49 }
 0x14b   : > { %1552 = vmatmul.mubr.bf16.gmra.mrb[60].mxu0 %v1396_v3  ;;  %1143 = vmatprep.mubr.bf16.mxu1 %v12364_v62  ;;  %v1406_v3 = vpack.c.bf16 %v571_v60, %v570_v58 }
 0x14c   : > { %1561 = vmatprep.mubr.bf16.mxu0 %v12364_v62  ;;  %7343 = vmatpush3.bf16.msra.mxu0 %v7690_v8 }
 0x14d   : > { %7344 = vmatprep.subr.bf16.mxu0 %v7691_v15 }
 0x150   : > { %7345 = vmatpush3.bf16.msra.mxu0 %v7691_v15 }
 0x151   : > { %3429 = vmatprep.subr.bf16.mxu0 %v8895_v63 }
 0x152   : > { %6919 = vmatmul.mubr.msk.bf16.gmra.mrb[64].mxu1 %vm942_vm2, %v9005_v18 }
 0x153   : > { %1562 = vmatmul.mubr.bf16.gmra.mrb[64].mxu0 %v1397_v7  ;;  %1153 = vmatprep.mubr.bf16.mxu1 %v12364_v62  ;;  %v573_v7 = vld [vmem:[%s9070_s19 + $0xe8] sm:$0xff] }
 0x154   : > { %1571 = vmatprep.mubr.bf16.mxu0 %v12364_v62  ;;  %v1407_v10 = vpack.c.bf16 %v573_v7, %v572_v6 }
 0x15a   : > { %6920 = vmatmul.mubr.msk.bf16.gmra.mrb[68].mxu1 %vm942_vm2, %v8998_v13 }
 0x15b   : > { %1572 = vmatmul.mubr.bf16.gmra.mrb[68].mxu0 %v1398_v12  ;;  %1163 = vmatprep.mubr.bf16.mxu1 %v12364_v62  ;;  %v574_v12 = vld [vmem:[%s9070_s19 + $0xf0] sm:$0xff] }
 0x15c   : > { %1581 = vmatprep.mubr.bf16.mxu0 %v12364_v62  ;;  %v1408_v16 = vpack.c.bf16 %v575_v14, %v574_v12 }
 0x162   : > { %6921 = vmatmul.mubr.msk.bf16.gmra.mrb[72].mxu1 %vm942_vm2, %v9040_v40 }
 0x163   : > { %1582 = vmatmul.mubr.bf16.gmra.mrb[72].mxu0 %v1399_v17  ;;  %1173 = vmatprep.mubr.bf16.mxu1 %v12364_v62  ;;  %v869_v17 = vsub.s32 1, %v9087_v45 }
 0x164   : > { %1591 = vmatprep.mubr.bf16.mxu0 %v12364_v62 }
 0x165   : > { %v9218_v20 = vrot.slane %v9092_v46, %v869_v17 }
 0x16a   : > { %6922 = vmatmul.mubr.msk.bf16.gmra.mrb[76].mxu1 %vm942_vm2, %v9035_v38 }
 0x16b   : > { %1592 = vmatmul.mubr.bf16.gmra.mrb[76].mxu0 %v1400_v21 }
 0x16c   : > { %1601 = vmatprep.mubr.bf16.mxu0 %v12364_v62 }
 0x173   : > { %1602 = vmatmul.mubr.bf16.gmra.mrb[80].mxu0 %v1401_v28 }
 0x174   : > { %1611 = vmatprep.mubr.bf16.mxu0 %v12364_v62 }
 0x17b   : > { %1612 = vmatmul.mubr.bf16.gmra.mrb[84].mxu0 %v1402_v32 }
 0x17c   : > { %1621 = vmatprep.mubr.bf16.mxu0 %v12364_v62 }
 0x183   : > { %1622 = vmatmul.mubr.bf16.gmra.mrb[88].mxu0 %v1403_v39 }
 0x184   : > { %1631 = vmatprep.mubr.bf16.mxu0 %v12364_v62 }
 0x18b   : > { %1632 = vmatmul.mubr.bf16.gmra.mrb[92].mxu0 %v1404_v42 }
 0x18c   : > { %1641 = vmatprep.mubr.bf16.mxu0 %v12364_v62 }
 0x193   : > { %1642 = vmatmul.mubr.bf16.gmra.mrb[96].mxu0 %v1405_v54 }
 0x194   : > { %1651 = vmatprep.mubr.bf16.mxu0 %v12364_v62 }
 0x19b   : > { %1652 = vmatmul.mubr.bf16.gmra.mrb[100].mxu0 %v1406_v3 }
 0x19c   : > { %1661 = vmatprep.mubr.bf16.mxu0 %v12364_v62 }
 0x1a3   : > { %1662 = vmatmul.mubr.bf16.gmra.mrb[104].mxu0 %v1407_v10 }
 0x1a4   : > { %1671 = vmatprep.mubr.bf16.mxu0 %v12364_v62 }
 0x1ab   : > { %1672 = vmatmul.mubr.bf16.gmra.mrb[108].mxu0 %v1408_v16 }
 0x1c5   : > { %v1025_v19 = vpop.f32.mrb[16].mxu1 }
 0x1c6   : > { %v1027_v21 = vpop.f32.mrb[17].mxu1  ;;  %v7252_v23 = vpop.f32.mrb[16].mxu0  ;;  %v1026_v29 = vadd.f32 %v1025_v19, %v9098_v50 }
 0x1c7   : > { %v1227_v26 = vadd.f32 %v7252_v23, %v9136_v2  ;;  %v1029_v27 = vpop.f32.mrb[18].mxu1  ;;  %v1218_v28 = vpop.f32.mrb[17].mxu0  ;;  %v1028_v45 = vadd.f32 %v1027_v21, %v9218_v20 }
 0x1c8   : > { %v1030_v31 = vadd.f32 %v1029_v27, %v9098_v50  ;;  %v1219_v32 = vadd.f32 %v1218_v28, %v9136_v2  ;;  %v1031_v63 = vpop.f32.mrb[19].mxu1  ;;  %v7253_v34 = vpop.f32.mrb[18].mxu0 }
 0x1c9   : > { %v1032_v36 = vadd.f32 %v1031_v63, %v9218_v20  ;;  %v1230_v46 = vadd.f32 %v7253_v34, %v9136_v2  ;;  %v1221_v37 = vpop.f32.mrb[19].mxu0 }
 0x1ca   : > { %v9227_v39 = vpack.c.bf16 %v1030_v31, %v1026_v29  ;;  %v1222_v1 = vadd.f32 %v1221_v37, %v9136_v2 }
 0x1cb   : > { %v9230_v41 = vpack.c.bf16 %v1032_v36, %v1028_v45  ;;  %v9232_v42 = vpack.c.bf16 %v1230_v46, %v1227_v26 }
 0x1cc   : > { %v9234_v47 = vpack.c.bf16 %v1222_v1, %v1219_v32 }
 0x1cd   : > { %v1035_v48 = vpop.f32.mrb[20].mxu1 }
 0x1ce   : > { %v1037_v54 = vpop.f32.mrb[21].mxu1  ;;  %v7256_v58 = vpop.f32.mrb[20].mxu0  ;;  %v1036_v7 = vadd.f32 %v1035_v48, %v9098_v50 }
 0x1cf   : > { %v1243_v60 = vadd.f32 %v7256_v58, %v9136_v2  ;;  %v1039_v3 = vpop.f32.mrb[22].mxu1  ;;  %v1234_v6 = vpop.f32.mrb[21].mxu0  ;;  %v1038_v15 = vadd.f32 %v1037_v54, %v9218_v20 }
 0x1d0   : > { %v1040_v8 = vadd.f32 %v1039_v3, %v9098_v50  ;;  %v1235_v10 = vadd.f32 %v1234_v6, %v9136_v2  ;;  %v1041_v12 = vpop.f32.mrb[23].mxu1  ;;  %v7257_v14 = vpop.f32.mrb[22].mxu0 }
 0x1d1   : > { %v1042_v16 = vadd.f32 %v1041_v12, %v9218_v20  ;;  %v1246_v17 = vadd.f32 %v7257_v14, %v9136_v2  ;;  %v1237_v19 = vpop.f32.mrb[23].mxu0 }
 0x1d2   : > { %v9243_v21 = vpack.c.bf16 %v1040_v8, %v1036_v7  ;;  %v1238_v23 = vadd.f32 %v1237_v19, %v9136_v2 }
 0x1d3   : > { %v9246_v26 = vpack.c.bf16 %v1042_v16, %v1038_v15  ;;  %v9248_v27 = vpack.c.bf16 %v1246_v17, %v1243_v60 }
 0x1d4   : > { %v9250_v28 = vpack.c.bf16 %v1238_v23, %v1235_v10 }
 0x1d5   : > { %v1045_v29 = vpop.f32.mrb[24].mxu1 }
 0x1d6   : > { %v1047_v31 = vpop.f32.mrb[25].mxu1  ;;  %v7260_v32 = vpop.f32.mrb[24].mxu0  ;;  %v1046_v36 = vadd.f32 %v1045_v29, %v9098_v50 }
 0x1d7   : > { %v1259_v63 = vadd.f32 %v7260_v32, %v9136_v2  ;;  %v1049_v34 = vpop.f32.mrb[26].mxu1  ;;  %v1250_v45 = vpop.f32.mrb[25].mxu0  ;;  %v1048_v54 = vadd.f32 %v1047_v31, %v9218_v20 }
 0x1d8   : > { %v1050_v46 = vadd.f32 %v1049_v34, %v9098_v50  ;;  %v1251_v37 = vadd.f32 %v1250_v45, %v9136_v2  ;;  %v1051_v1 = vpop.f32.mrb[27].mxu1  ;;  %v7261_v48 = vpop.f32.mrb[26].mxu0 }
 0x1d9   : > { %v1052_v58 = vadd.f32 %v1051_v1, %v9218_v20  ;;  %v1262_v60 = vadd.f32 %v7261_v48, %v9136_v2  ;;  %v1253_v3 = vpop.f32.mrb[27].mxu0 }
 0x1da   : > { %v9259_v6 = vpack.c.bf16 %v1050_v46, %v1046_v36  ;;  %v1254_v7 = vadd.f32 %v1253_v3, %v9136_v2 }
 0x1db   : > { %v9262_v8 = vpack.c.bf16 %v1052_v58, %v1048_v54  ;;  %v9264_v10 = vpack.c.bf16 %v1262_v60, %v1259_v63 }
 0x1dc   : > { %v9266_v12 = vpack.c.bf16 %v1254_v7, %v1251_v37 }
 0x1dd   : > { %12673 = vst [vmem:[#allocation18_spill] sm:$0xff] %v9264_v10  ;;  %v1055_v14 = vpop.f32.mrb[28].mxu1 }
 0x1de   : > { %12674 = vst [vmem:[#allocation19_spill] sm:$0xff] %v9266_v12  ;;  %v1057_v15 = vpop.f32.mrb[29].mxu1  ;;  %v7264_v16 = vpop.f32.mrb[28].mxu0  ;;  %v1056_v29 = vadd.f32 %v1055_v14, %v9098_v50 }
 0x1df   : > { %v1275_v17 = vadd.f32 %v7264_v16, %v9136_v2  ;;  %v1059_v19 = vpop.f32.mrb[30].mxu1  ;;  %v1266_v23 = vpop.f32.mrb[29].mxu0  ;;  %v1058_v63 = vadd.f32 %v1057_v15, %v9218_v20 }
 0x1e0   : > { %v1060_v31 = vadd.f32 %v1059_v19, %v9098_v50  ;;  %v1267_v32 = vadd.f32 %v1266_v23, %v9136_v2  ;;  %v1061_v34 = vpop.f32.mrb[31].mxu1  ;;  %v7265_v45 = vpop.f32.mrb[30].mxu0 }
 0x1e1   : > { %v1062_v36 = vadd.f32 %v1061_v34, %v9218_v20  ;;  %v1278_v46 = vadd.f32 %v7265_v45, %v9136_v2  ;;  %v1269_v37 = vpop.f32.mrb[31].mxu0 }
 0x1e2   : > { %v9275_v1 = vpack.c.bf16 %v1060_v31, %v1056_v29  ;;  %v1270_v48 = vadd.f32 %v1269_v37, %v9136_v2 }
 0x1e3   : > { %v9278_v54 = vpack.c.bf16 %v1062_v36, %v1058_v63  ;;  %v9280_v58 = vpack.c.bf16 %v1278_v46, %v1275_v17 }
 0x1e4   : > { %v9282_v60 = vpack.c.bf16 %v1270_v48, %v1267_v32 }
 0x1e5   : > { %12675 = vst [vmem:[#allocation20_spill] sm:$0xff] %v9280_v58  ;;  %v1065_v3 = vpop.f32.mrb[32].mxu1 }
 0x1e6   : > { %12676 = vst [vmem:[#allocation21_spill] sm:$0xff] %v9282_v60  ;;  %v1067_v7 = vpop.f32.mrb[33].mxu1  ;;  %v7268_v14 = vpop.f32.mrb[32].mxu0  ;;  %v1066_v23 = vadd.f32 %v1065_v3, %v9098_v50 }
 0x1e7   : > { %v1291_v15 = vadd.f32 %v7268_v14, %v9136_v2  ;;  %v1069_v16 = vpop.f32.mrb[34].mxu1  ;;  %v1282_v19 = vpop.f32.mrb[33].mxu0  ;;  %v1068_v17 = vadd.f32 %v1067_v7, %v9218_v20 }
 0x1e8   : > { %v1070_v29 = vadd.f32 %v1069_v16, %v9098_v50  ;;  %v1283_v31 = vadd.f32 %v1282_v19, %v9136_v2  ;;  %v1071_v34 = vpop.f32.mrb[35].mxu1  ;;  %v7269_v45 = vpop.f32.mrb[34].mxu0 }
 0x1e9   : > { %v1072_v32 = vadd.f32 %v1071_v34, %v9218_v20  ;;  %v1294_v63 = vadd.f32 %v7269_v45, %v9136_v2  ;;  %v1285_v36 = vpop.f32.mrb[35].mxu0 }
 0x1ea   : > { %v9291_v46 = vpack.c.bf16 %v1070_v29, %v1066_v23  ;;  %v1286_v37 = vadd.f32 %v1285_v36, %v9136_v2 }
 0x1eb   : > { %v9294_v48 = vpack.c.bf16 %v1072_v32, %v1068_v17  ;;  %v9296_v3 = vpack.c.bf16 %v1294_v63, %v1291_v15 }
 0x1ec   : > { %v9298_v14 = vpack.c.bf16 %v1286_v37, %v1283_v31 }
 0x1ed   : > { %12677 = vst [vmem:[#allocation22_spill] sm:$0xff] %v9296_v3  ;;  %v1075_v16 = vpop.f32.mrb[36].mxu1 }
 0x1ee   : > { %12678 = vst [vmem:[#allocation23_spill] sm:$0xff] %v9298_v14  ;;  %v1077_v19 = vpop.f32.mrb[37].mxu1  ;;  %v7272_v62 = vpop.f32.mrb[36].mxu0  ;;  %v1076_v45 = vadd.f32 %v1075_v16, %v9098_v50 }
 0x1ef   : > { %v1307_v7 = vadd.f32 %v7272_v62, %v9136_v2  ;;  %v1079_v38 = vpop.f32.mrb[38].mxu1  ;;  %v1298_v34 = vpop.f32.mrb[37].mxu0  ;;  %v1078_v15 = vadd.f32 %v1077_v19, %v9218_v20 }
 0x1f0   : > { %v1080_v23 = vadd.f32 %v1079_v38, %v9098_v50  ;;  %v1299_v29 = vadd.f32 %v1298_v34, %v9136_v2  ;;  %v1081_v36 = vpop.f32.mrb[39].mxu1  ;;  %v7273_v17 = vpop.f32.mrb[38].mxu0 }
 0x1f1   : > { %v1082_v31 = vadd.f32 %v1081_v36, %v9218_v20  ;;  %v1310_v32 = vadd.f32 %v7273_v17, %v9136_v2  ;;  %v1301_v63 = vpop.f32.mrb[39].mxu0 }
 0x1f2   : > { %v9307_v37 = vpack.c.bf16 %v1080_v23, %v1076_v45  ;;  %v1302_v62 = vadd.f32 %v1301_v63, %v9136_v2 }
 0x1f3   : > { %v9310_v40 = vpack.c.bf16 %v1082_v31, %v1078_v15  ;;  %v9312_v16 = vpack.c.bf16 %v1310_v32, %v1307_v7 }
 0x1f4   : > { %v9314_v38 = vpack.c.bf16 %v1302_v62, %v1299_v29 }
 0x1f5   : > { %12679 = vst [vmem:[#allocation24_spill] sm:$0xff] %v9312_v16  ;;  %v1085_v34 = vpop.f32.mrb[40].mxu1 }
 0x1f6   : > { %12680 = vst [vmem:[#allocation25_spill] sm:$0xff] %v9314_v38  ;;  %v1087_v13 = vpop.f32.mrb[41].mxu1  ;;  %v7276_v18 = vpop.f32.mrb[40].mxu0  ;;  %v1086_v17 = vadd.f32 %v1085_v34, %v9098_v50 }
 0x1f7   : > { %v1323_v19 = vadd.f32 %v7276_v18, %v9136_v2  ;;  %v1089_v49 = vpop.f32.mrb[42].mxu1  ;;  %v1314_v36 = vpop.f32.mrb[41].mxu0  ;;  %v1088_v7 = vadd.f32 %v1087_v13, %v9218_v20 }
 0x1f8   : > { %v1090_v45 = vadd.f32 %v1089_v49, %v9098_v50  ;;  %v1315_v23 = vadd.f32 %v1314_v36, %v9136_v2  ;;  %v1091_v63 = vpop.f32.mrb[43].mxu1  ;;  %v7277_v15 = vpop.f32.mrb[42].mxu0 }
 0x1f9   : > { %v1092_v29 = vadd.f32 %v1091_v63, %v9218_v20  ;;  %v1326_v31 = vadd.f32 %v7277_v15, %v9136_v2  ;;  %v1317_v32 = vpop.f32.mrb[43].mxu0 }
 0x1fa   : > { %v9323_v62 = vpack.c.bf16 %v1090_v45, %v1086_v17  ;;  %v1318_v18 = vadd.f32 %v1317_v32, %v9136_v2 }
 0x1fb   : > { %v9326_v53 = vpack.c.bf16 %v1092_v29, %v1088_v7  ;;  %v9328_v34 = vpack.c.bf16 %v1326_v31, %v1323_v19 }
 0x1fc   : > { %v9330_v49 = vpack.c.bf16 %v1318_v18, %v1315_v23 }
 0x1fd   : > { %12681 = vst [vmem:[#allocation26_spill] sm:$0xff] %v9328_v34  ;;  %v1095_v36 = vpop.f32.mrb[44].mxu1 }
 0x1fe   : > { %12682 = vst [vmem:[#allocation27_spill] sm:$0xff] %v9330_v49  ;;  %v1097_v25 = vpop.f32.mrb[45].mxu1  ;;  %v7280_v30 = vpop.f32.mrb[44].mxu0  ;;  %v1096_v15 = vadd.f32 %v1095_v36, %v9098_v50 }
 0x1ff   : > { %v1339_v13 = vadd.f32 %v7280_v30, %v9136_v2  ;;  %v1099_v22 = vpop.f32.mrb[46].mxu1  ;;  %v1330_v63 = vpop.f32.mrb[45].mxu0  ;;  %v1098_v19 = vadd.f32 %v1097_v25, %v9218_v20  ;;  %v9351_v25 = vunpack.c.l.bf16 %v9230_v41 }
 0x200   : > { %v1100_v17 = vadd.f32 %v1099_v22, %v9098_v50  ;;  %v1331_v45 = vadd.f32 %v1330_v63, %v9136_v2  ;;  %v1101_v32 = vpop.f32.mrb[47].mxu1  ;;  %v7281_v7 = vpop.f32.mrb[46].mxu0 }
 0x201   : > { %v1102_v23 = vadd.f32 %v1101_v32, %v9218_v20  ;;  %v1342_v29 = vadd.f32 %v7281_v7, %v9136_v2  ;;  %v1333_v31 = vpop.f32.mrb[47].mxu0  ;;  %12685 = vst [vmem:[#allocation30_spill] sm:$0xff] %v9351_v25 }
 0x202   : > { %v9339_v18 = vpack.c.bf16 %v1100_v17, %v1096_v15  ;;  %v1334_v30 = vadd.f32 %v1333_v31, %v9136_v2  ;;  %v9354_v15 = vunpack.c.h.bf16 %v9230_v41 }
 0x203   : > { %v9342_v24 = vpack.c.bf16 %v1102_v23, %v1098_v19  ;;  %v9344_v36 = vpack.c.bf16 %v1342_v29, %v1339_v13 }
 0x204   : > { %v9346_v22 = vpack.c.bf16 %v1334_v30, %v1331_v45  ;;  %12686 = vst [vmem:[#allocation31_spill] sm:$0xff] %v9354_v15 }
 0x205   : > { %12683 = vst [vmem:[#allocation28_spill] sm:$0xff] %v9344_v36  ;;  %v1105_v63 = vpop.f32.mrb[48].mxu1 }
 0x206   : > { %12684 = vst [vmem:[#allocation29_spill] sm:$0xff] %v9346_v22  ;;  %v1107_v57 = vpop.f32.mrb[49].mxu1  ;;  %v9348_v59 = vpop.f32.mrb[48].mxu0  ;;  %v1106_v2 = vadd.f32 %v1105_v63, %v9098_v50 }
 0x207   : > { %v1109_v32 = vpop.f32.mrb[50].mxu1  ;;  %v1525_v7 = vpop.f32.mrb[49].mxu0  ;;  %v1108_v45 = vadd.f32 %v1107_v57, %v9218_v20 }
 0x208   : > { %v1110_v17 = vadd.f32 %v1109_v32, %v9098_v50  ;;  %v1111_v13 = vpop.f32.mrb[51].mxu1  ;;  %v9358_v19 = vpop.f32.mrb[50].mxu0  ;;  %v1906_v23 = vadd.f32 %v9351_v25, %v1525_v7  ;;  %v9369_v32 = vunpack.c.l.bf16 %v9246_v26 }
 0x209   : > { %v1112_v29 = vadd.f32 %v1111_v13, %v9218_v20  ;;  %v1529_v31 = vpop.f32.mrb[51].mxu0  ;;  %v9374_v13 = vunpack.c.h.bf16 %v9246_v26 }
 0x20a   : > { %v9363_v30 = vpack.c.bf16 %v1110_v17, %v1106_v2  ;;  %v1907_v33 = vadd.f32 %v9354_v15, %v1529_v31  ;;  %v1938_v35 = vmul.f32 0.5, %v1906_v23  ;;  %12688 = vst [vmem:[#allocation33_spill] sm:$0xff] %v9369_v32 }
 0x20b   : > { %v9366_v41 = vpack.c.bf16 %v1112_v29, %v1108_v45  ;;  %12689 = vst [vmem:[#allocation34_spill] sm:$0xff] %v9374_v13 }
 0x20c   : > { %12687 = vst [vmem:[#allocation32_spill] sm:$0xff] %v9363_v30  ;;  %v1939_v9 = vmul.f32 0.5, %v1907_v33  ;;  %7706 = vtanh.f32 %v1938_v35  ;;  %v9415_v30 = vunpack.c.l.bf16 %v9278_v54 }
 0x20d   : > { %v1115_v63 = vpop.f32.mrb[52].mxu1 }
 0x20e   : > { %v1117_v11 = vpop.f32.mrb[53].mxu1  ;;  %v9371_v22 = vpop.f32.mrb[52].mxu0  ;;  %v1116_v2 = vadd.f32 %v1115_v63, %v9098_v50  ;;  %7708 = vtanh.f32 %v1939_v9  ;;  %12694 = vst [vmem:[#allocation39_spill] sm:$0xff] %v9415_v30 }
 0x20f   : > { %v1119_v57 = vpop.f32.mrb[54].mxu1  ;;  %v1535_v7 = vpop.f32.mrb[53].mxu0  ;;  %v1118_v33 = vadd.f32 %v1117_v11, %v9218_v20 }
 0x210   : > { %v1120_v17 = vadd.f32 %v1119_v57, %v9098_v50  ;;  %v1908_v45 = vadd.f32 %v9369_v32, %v1535_v7  ;;  %v1121_v23 = vpop.f32.mrb[55].mxu1  ;;  %v9379_v29 = vpop.f32.mrb[54].mxu0 }
 0x211   : > { %v1122_v31 = vadd.f32 %v1121_v23, %v9218_v20  ;;  %v1539_v15 = vpop.f32.mrb[55].mxu0 }
 0x212   : > { %v9383_v25 = vpack.c.bf16 %v1120_v17, %v1116_v2  ;;  %v1940_v26 = vmul.f32 0.5, %v1908_v45  ;;  %v1909_v36 = vadd.f32 %v9374_v13, %v1539_v15  ;;  %v9395_v15 = vunpack.c.l.bf16 %v9262_v8 }
 0x213   : > { %v9386_v63 = vpack.c.bf16 %v1122_v31, %v1118_v33 }
 0x214   : > { %12690 = vst [vmem:[#allocation35_spill] sm:$0xff] %v9383_v25  ;;  %7710 = vtanh.f32 %v1940_v26  ;;  %v1941_v57 = vmul.f32 0.5, %v1909_v36  ;;  %12691 = vst [vmem:[#allocation36_spill] sm:$0xff] %v9395_v15 }
 0x215   : > { %v1125_v7 = vpop.f32.mrb[56].mxu1 }
 0x216   : > { %7712 = vtanh.f32 %v1941_v57  ;;  %v1127_v32 = vpop.f32.mrb[57].mxu1  ;;  %v9388_v49 = vpop.f32.mrb[56].mxu0  ;;  %v1126_v23 = vadd.f32 %v1125_v7, %v9098_v50 }
 0x217   : > { %v1129_v35 = vpop.f32.mrb[58].mxu1  ;;  %v1545_v11 = vpop.f32.mrb[57].mxu0  ;;  %v1128_v45 = vadd.f32 %v1127_v32, %v9218_v20 }
 0x218   : > { %v1130_v9 = vadd.f32 %v1129_v35, %v9098_v50  ;;  %v1131_v2 = vpop.f32.mrb[59].mxu1  ;;  %v9392_v17 = vpop.f32.mrb[58].mxu0  ;;  %v1910_v57 = vadd.f32 %v9395_v15, %v1545_v11  ;;  %v9405_v35 = vunpack.c.h.bf16 %v9262_v8 }
 0x219   : > { %v1132_v36 = vadd.f32 %v1131_v2, %v9218_v20  ;;  %v1549_v33 = vpop.f32.mrb[59].mxu0  ;;  %v7707_v26 = vpop.eup %7706 }
 0x21a   : > { %v9399_v31 = vpack.c.bf16 %v1130_v9, %v1126_v23  ;;  %v7709_v7 = vpop.eup %7708  ;;  %12693 = vst [vmem:[#allocation38_spill] sm:$0xff] %v9405_v35  ;;  %v1911_v16 = vadd.f32 %v9405_v35, %v1549_v33  ;;  %v2002_v2 = vadd.f32 1.0, %v7707_v26  ;;  %v1942_v9 = vmul.f32 0.5, %v1910_v57 }
 0x21b   : > { %v9402_v13 = vpack.c.bf16 %v1132_v36, %v1128_v45  ;;  %v2003_v3 = vadd.f32 1.0, %v7709_v7 }
 0x21c   : > { %12692 = vst [vmem:[#allocation37_spill] sm:$0xff] %v9399_v31  ;;  %v1943_v45 = vmul.f32 0.5, %v1911_v16  ;;  %7714 = vtanh.f32 %v1942_v9  ;;  %v9420_v16 = vunpack.c.h.bf16 %v9278_v54 }
 0x21d   : > { %v1135_v34 = vpop.f32.mrb[60].mxu1  ;;  %v2035_v57 = vmul.f32 0.5, %v2003_v3 }
 0x21e   : > { %v7711_v38 = vpop.eup %7710  ;;  %v1137_v14 = vpop.f32.mrb[61].mxu1  ;;  %v1136_v36 = vadd.f32 %v1135_v34, %v9098_v50  ;;  %12696 = vst [vmem:[#allocation41_spill] sm:$0xff] %v9420_v16  ;;  %7716 = vtanh.f32 %v1943_v45 }
 0x21f   : > { %v9408_v32 = vpop.f32.mrb[60].mxu0  ;;  %v2004_v23 = vadd.f32 1.0, %v7711_v38  ;;  %v1139_v31 = vpop.f32.mrb[62].mxu1  ;;  %v2034_v38 = vmul.f32 0.5, %v2002_v2  ;;  %v1138_v34 = vadd.f32 %v1137_v14, %v9218_v20  ;;  %v2067_v14 = vmul.f32 %v2035_v57, %v9085_v44 }
 0x220   : > { %v1555_v60 = vpop.f32.mrb[61].mxu0  ;;  %v7713_v11 = vpop.eup %7712  ;;  %v1140_v8 = vadd.f32 %v1139_v31, %v9098_v50 }
 0x221   : > { %v1141_v15 = vpop.f32.mrb[63].mxu1  ;;  %v9412_v58 = vpop.f32.mrb[62].mxu0  ;;  %v2036_v25 = vmul.f32 0.5, %v2004_v23  ;;  %v2005_v33 = vadd.f32 1.0, %v7713_v11  ;;  %v1912_v11 = vadd.f32 %v9415_v30, %v1555_v60  ;;  %v2066_v45 = vmul.f32 %v2034_v38, %v9082_v43 }
 0x222   : > { %v1559_v35 = vpop.f32.mrb[63].mxu0  ;;  %v9417_v26 = vpack.c.bf16 %v1140_v8, %v1136_v36  ;;  %v1142_v12 = vadd.f32 %v1141_v15, %v9218_v20 }
 0x223   : > { %v2037_v7 = vmul.f32 0.5, %v2005_v33  ;;  %v2068_v31 = vmul.f32 %v2036_v25, %v9105_v51  ;;  %v1913_v2 = vadd.f32 %v9420_v16, %v1559_v35  ;;  %v1944_v60 = vmul.f32 0.5, %v1912_v11 }
 0x224   : > { %12695 = vst [vmem:[#allocation40_spill] sm:$0xff] %v9417_v26  ;;  %v9430_v54 = vpack.c.bf16 %v1142_v12, %v1138_v34  ;;  %v2098_v15 = vpack.c.bf16 %v2067_v14, %v2066_v45  ;;  %v9439_v12 = vunpack.c.l.bf16 %v9294_v48  ;;  %v9457_v14 = vunpack.c.h.bf16 %v9294_v48 }
 0x225   : > { %v2069_v23 = vmul.f32 %v2037_v7, %v9108_v52  ;;  %v1145_v36 = vpop.f32.mrb[64].mxu1  ;;  %v1945_v30 = vmul.f32 0.5, %v1913_v2  ;;  %7718 = vtanh.f32 %v1944_v60 }
 0x226   : > { %v1147_v3 = vpop.f32.mrb[65].mxu1  ;;  %v9428_v8 = vpop.f32.mrb[64].mxu0  ;;  %7298 = vmatprep.mubr.bf16.mxu1 %v2098_v15  ;;  %v1146_v35 = vadd.f32 %v1145_v36, %v9098_v50  ;;  %12697 = vst [vmem:[#allocation42_spill] sm:$0xff] %v9439_v12  ;;  %12699 = vst [vmem:[#allocation44_spill] sm:$0xff] %v9457_v14 }
 0x227   : > { %v2099_v9 = vpack.c.bf16 %v2069_v23, %v2068_v31  ;;  %v1149_v51 = vpop.f32.mrb[66].mxu1  ;;  %v1565_v25 = vpop.f32.mrb[65].mxu0  ;;  %v1148_v43 = vadd.f32 %v1147_v3, %v9218_v20  ;;  %v8602_v23 = vld [vmem:[%s12354_s4] ss:$8 sps:$4 sm:$0xff]   ;;  %7720 = vtanh.f32 %v1945_v30 }
 0x228   : > { %v1151_v52 = vpop.f32.mrb[67].mxu1  ;;  %v9434_v33 = vpop.f32.mrb[66].mxu0  ;;  %v1150_v31 = vadd.f32 %v1149_v51, %v9098_v50  ;;  %v1914_v36 = vadd.f32 %v9439_v12, %v1565_v25 }
 0x229   : > { %v1569_v7 = vpop.f32.mrb[67].mxu0  ;;  %v1152_v44 = vadd.f32 %v1151_v52, %v9218_v20  ;;  %7299 = vmatmul.mubr.bf16.vlgmr.msra.gmra.mrb[80].mxu1 %v2099_v9  ;;  %v7715_v38 = vpop.eup %7714  ;;  %v8603_v9 = vld [vmem:[%s12354_s4 + $0x14] ss:$8 sps:$4 sm:$0xff]  }
 0x22a   : > { %v9443_v57 = vpack.c.bf16 %v1150_v31, %v1146_v35  ;;  %2532 = vmatpush1.bf16.msra.mxu1 %v8602_v23  ;;  %v7717_v11 = vpop.eup %7716  ;;  %v2006_v30 = vadd.f32 1.0, %v7715_v38  ;;  %v1915_v35 = vadd.f32 %v9457_v14, %v1569_v7  ;;  %v1946_v48 = vmul.f32 0.5, %v1914_v36  ;;  %v8605_v23 = vld [vmem:[%s12354_s4 + $0x24] ss:$8 sps:$4 sm:$0xff]  }
 0x22b   : > { %v9449_v2 = vpack.c.bf16 %v1152_v44, %v1148_v43  ;;  %2533 = vmatprep.subr.bf16.mxu1 %v8603_v9  ;;  %v2007_v25 = vadd.f32 1.0, %v7717_v11  ;;  %v8604_v43 = vld [vmem:[%s12354_s4 + $0x10] ss:$8 sps:$4 sm:$0xff]   ;;  %v9466_v44 = vunpack.c.l.bf16 %v9310_v40 }
 0x22c   : > { %12698 = vst [vmem:[#allocation43_spill] sm:$0xff] %v9443_v57  ;;  %v1947_v9 = vmul.f32 0.5, %v1915_v35  ;;  %v2038_v12 = vmul.f32 0.5, %v2006_v30  ;;  %7722 = vtanh.f32 %v1946_v48 }
 0x22d   : > { %v1155_v34 = vpop.f32.mrb[68].mxu1  ;;  %12700 = vst [vmem:[#allocation45_spill] sm:$0xff] %v9466_v44  ;;  %v2039_v16 = vmul.f32 0.5, %v2007_v25 }
 0x22e   : > { %v1157_v3 = vpop.f32.mrb[69].mxu1  ;;  %v9451_v45 = vpop.f32.mrb[68].mxu0  ;;  %2534 = vmatpush1.bf16.msra.mxu1 %v8604_v43  ;;  %v1156_v38 = vadd.f32 %v1155_v34, %v9098_v50  ;;  %7724 = vtanh.f32 %v1947_v9  ;;  %v9500_v9 = vunpack.c.l.bf16 %v9326_v53 }
 0x22f   : > { %v1159_v51 = vpop.f32.mrb[70].mxu1  ;;  %v1575_v52 = vpop.f32.mrb[69].mxu0  ;;  %2535 = vmatprep.subr.bf16.mxu1 %v8605_v23  ;;  %v1158_v11 = vadd.f32 %v1157_v3, %v9218_v20  ;;  %v8606_v23 = vld [vmem:[%s12354_s4 + $0x20] ss:$8 sps:$4 sm:$0xff]   ;;  %v8607_v3 = vld [vmem:[%s12354_s4 + $0x34] ss:$8 sps:$4 sm:$0xff]  }
 0x230   : > { %v1161_v60 = vpop.f32.mrb[71].mxu1  ;;  %v9459_v15 = vpop.f32.mrb[70].mxu0  ;;  %v1160_v7 = vadd.f32 %v1159_v51, %v9098_v50  ;;  %v1916_v14 = vadd.f32 %v9466_v44, %v1575_v52  ;;  %v2071_v44 = vmul.f32 %v2039_v16, %v9120_v56  ;;  %12703 = vst [vmem:[#allocation48_spill] sm:$0xff] %v9500_v9 }
 0x231   : > { %v1579_v31 = vpop.f32.mrb[71].mxu0  ;;  %v1162_v43 = vadd.f32 %v1161_v60, %v9218_v20  ;;  %v7719_v52 = vpop.eup %7718  ;;  %v9489_v60 = vunpack.c.h.bf16 %v9310_v40  ;;  %v8608_v40 = vld [vmem:[%s12354_s4 + $0x30] ss:$8 sps:$4 sm:$0xff]  }
 0x232   : > { %v9476_v57 = vpack.c.bf16 %v1160_v7, %v1156_v38  ;;  %2536 = vmatpush1.bf16.msra.mxu1 %v8606_v23  ;;  %v7721_v38 = vpop.eup %7720  ;;  %v1948_v7 = vmul.f32 0.5, %v1916_v14  ;;  %v2070_v23 = vmul.f32 %v2038_v12, %v9117_v55  ;;  %v8609_v14 = vld [vmem:[%s12354_s4 + $0x44] ss:$8 sps:$4 sm:$0xff]  }
 0x233   : > { %v9481_v34 = vpack.c.bf16 %v1162_v43, %v1158_v11  ;;  %2537 = vmatprep.subr.bf16.mxu1 %v8607_v3  ;;  %12702 = vst [vmem:[#allocation47_spill] sm:$0xff] %v9489_v60  ;;  %v1917_v43 = vadd.f32 %v9489_v60, %v1579_v31  ;;  %v2008_v3 = vadd.f32 1.0, %v7719_v52  ;;  %v2009_v31 = vadd.f32 1.0, %v7721_v38 }
 0x234   : > { %12701 = vst [vmem:[#allocation46_spill] sm:$0xff] %v9476_v57  ;;  %v2100_v55 = vpack.c.bf16 %v2071_v44, %v2070_v23  ;;  %7726 = vtanh.f32 %v1948_v7  ;;  %v8610_v44 = vld [vmem:[%s12354_s4 + $0x40] ss:$8 sps:$4 sm:$0xff]  }
 0x235   : > { %v1165_v36 = vpop.f32.mrb[72].mxu1  ;;  %v1949_v60 = vmul.f32 0.5, %v1917_v43 }
 0x236   : > { %v1167_v51 = vpop.f32.mrb[73].mxu1  ;;  %v9483_v35 = vpop.f32.mrb[72].mxu0  ;;  %2538 = vmatpush1.bf16.msra.mxu1 %v8608_v40  ;;  %v1166_v56 = vadd.f32 %v1165_v36, %v9098_v50  ;;  %v9509_v40 = vunpack.c.h.bf16 %v9326_v53  ;;  %7302 = vmatprep.mubr.bf16.mxu1 %v2100_v55  ;;  %v2040_v36 = vmul.f32 0.5, %v2008_v3  ;;  %v8611_v53 = vld [vmem:[%s12354_s4 + $0x54] ss:$8 sps:$4 sm:$0xff]  }
 0x237   : > { %v1169_v30 = vpop.f32.mrb[74].mxu1  ;;  %v1585_v25 = vpop.f32.mrb[73].mxu0  ;;  %2539 = vmatprep.subr.bf16.mxu1 %v8609_v14  ;;  %7728 = vtanh.f32 %v1949_v60  ;;  %v1168_v52 = vadd.f32 %v1167_v51, %v9218_v20  ;;  %v2041_v51 = vmul.f32 0.5, %v2009_v31 }
 0x238   : > { %v1171_v48 = vpop.f32.mrb[75].mxu1  ;;  %v9491_v11 = vpop.f32.mrb[74].mxu0  ;;  %v1170_v16 = vadd.f32 %v1169_v30, %v9098_v50  ;;  %v1918_v12 = vadd.f32 %v9500_v9, %v1585_v25  ;;  %12704 = vst [vmem:[#allocation49_spill] sm:$0xff] %v9509_v40  ;;  %v8612_v9 = vld [vmem:[%s12354_s4 + $0x50] ss:$8 sps:$4 sm:$0xff]   ;;  %v2072_v31 = vmul.f32 %v2040_v36, %v9130_v61 }
 0x239   : > { %v1589_v57 = vpop.f32.mrb[75].mxu0  ;;  %v1172_v26 = vadd.f32 %v1171_v48, %v9218_v20  ;;  %v7723_v55 = vpop.eup %7722 }
 0x23a   : > { %2540 = vmatpush1.bf16.msra.mxu1 %v8610_v44  ;;  %v9516_v38 = vpack.c.bf16 %v1170_v16, %v1166_v56  ;;  %v1950_v60 = vmul.f32 0.5, %v1918_v12  ;;  %v1919_v48 = vadd.f32 %v9509_v40, %v1589_v57  ;;  %v7725_v16 = vpop.eup %7724  ;;  %v2073_v12 = vmul.f32 %v2041_v51, %v9133_v0  ;;  %v8615_v0 = vld [vmem:[%s12354_s4 + $0x74] ss:$8 sps:$4 sm:$0xff]  }
 0x23b   : > { %2541 = vmatprep.subr.bf16.mxu1 %v8611_v53  ;;  %v9523_v7 = vpack.c.bf16 %v1172_v26, %v1168_v52  ;;  %v8613_v26 = vld [vmem:[%s12354_s4 + $0x64] ss:$8 sps:$4 sm:$0xff]   ;;  %v2010_v52 = vadd.f32 1.0, %v7723_v55  ;;  %v2011_v53 = vadd.f32 1.0, %v7725_v16  ;;  %v9537_v40 = vunpack.c.l.bf16 %v9342_v24 }
 0x23c   : > { %12705 = vst [vmem:[#allocation50_spill] sm:$0xff] %v9516_v38  ;;  %7730 = vtanh.f32 %v1950_v60  ;;  %v1951_v57 = vmul.f32 0.5, %v1919_v48  ;;  %v2101_v38 = vpack.c.bf16 %v2073_v12, %v2072_v31  ;;  %v9543_v60 = vunpack.c.h.bf16 %v9342_v24 }
 0x23d   : > { %v1175_v14 = vpop.f32.mrb[76].mxu1  ;;  %12706 = vst [vmem:[#allocation51_spill] sm:$0xff] %v9537_v40 }
 0x23e   : > { %v1177_v30 = vpop.f32.mrb[77].mxu1  ;;  %v9518_v25 = vpop.f32.mrb[76].mxu0  ;;  %2542 = vmatpush1.bf16.msra.mxu1 %v8612_v9  ;;  %7732 = vtanh.f32 %v1951_v57  ;;  %v8614_v9 = vld [vmem:[%s12354_s4 + $0x60] ss:$8 sps:$4 sm:$0xff]   ;;  %12707 = vst [vmem:[#allocation52_spill] sm:$0xff] %v9543_v60  ;;  %v1176_v48 = vadd.f32 %v1175_v14, %v9098_v50  ;;  %v2042_v57 = vmul.f32 0.5, %v2010_v52 }
 0x23f   : > { %v1179_v43 = vpop.f32.mrb[78].mxu1  ;;  %v1595_v23 = vpop.f32.mrb[77].mxu0  ;;  %2543 = vmatprep.subr.bf16.mxu1 %v8613_v26  ;;  %7303 = vmatmul.mubr.bf16.gmra.mrb[84].mxu1 %v2101_v38  ;;  %v1178_v55 = vadd.f32 %v1177_v30, %v9218_v20  ;;  %v9568_v30 = vld [vmem:[%s12357_s7] sm:$0xff]  }
 0x240   : > { %v1181_v3 = vpop.f32.mrb[79].mxu1  ;;  %v9526_v56 = vpop.f32.mrb[78].mxu0  ;;  %v1180_v61 = vadd.f32 %v1179_v43, %v9098_v50  ;;  %v1920_v16 = vadd.f32 %v9537_v40, %v1595_v23  ;;  %v2043_v43 = vmul.f32 0.5, %v2011_v53  ;;  %v8616_v50 = vld [vmem:[%s12354_s4 + $0x70] ss:$8 sps:$4 sm:$0xff]   ;;  %v9572_v23 = vunpack.c.l.bf16 %v9366_v41 }
 0x241   : > { %v1599_v44 = vpop.f32.mrb[79].mxu0  ;;  %v7727_v10 = vpop.eup %7726  ;;  %v1182_v24 = vadd.f32 %v1181_v3, %v9218_v20  ;;  %v2074_v52 = vmul.f32 %v2042_v57, %v9145_v4 }
 0x242   : > { %2544 = vmatpush1.bf16.msra.mxu1 %v8614_v9  ;;  %v7729_v51 = vpop.eup %7728  ;;  %v9557_v12 = vpack.c.bf16 %v1180_v61, %v1176_v48  ;;  %v1952_v9 = vmul.f32 0.5, %v1920_v16  ;;  %v1921_v38 = vadd.f32 %v9543_v60, %v1599_v44  ;;  %v2012_v14 = vadd.f32 1.0, %v7727_v10  ;;  %12710 = vst [vmem:[#allocation55_spill] sm:$0xff] %v9572_v23 }
 0x243   : > { %2545 = vmatprep.subr.bf16.mxu1 %v8615_v0  ;;  %v2013_v20 = vadd.f32 1.0, %v7729_v51  ;;  %v2075_v53 = vmul.f32 %v2043_v43, %v9148_v5  ;;  %v9580_v16 = vunpack.c.h.bf16 %v9366_v41  ;;  %v9585_v5 = vunpack.c.l.bf16 %v9386_v63  ;;  %v9592_v41 = vld [vmem:[%s9070_s19 + $0x50] sm:$0xff] }
 0x244   : > { %12709 = vst [vmem:[#allocation54_spill] sm:$0xff] %v9557_v12  ;;  %7734 = vtanh.f32 %v1952_v9  ;;  %v1953_v44 = vmul.f32 0.5, %v1921_v38  ;;  %v2044_v61 = vmul.f32 0.5, %v2012_v14  ;;  %v9589_v14 = vunpack.c.h.bf16 %v9386_v63 }
 0x245   : > { %v2045_v10 = vmul.f32 0.5, %v2013_v20  ;;  %12711 = vst [vmem:[#allocation56_spill] sm:$0xff] %v9580_v16  ;;  %12712 = vst [vmem:[#allocation57_spill] sm:$0xff] %v9585_v5 }
 0x246   : > { %v9546_v36 = vpop.f32.mrb[80].mxu0  ;;  %2546 = vmatpush1.bf16.msra.mxu1 %v8616_v50  ;;  %v7731_v3 = vpop.eup %7730  ;;  %7736 = vtanh.f32 %v1953_v44  ;;  %12713 = vst [vmem:[#allocation58_spill] sm:$0xff] %v9589_v14  ;;  %v2076_v20 = vmul.f32 %v9592_v41, %v2044_v61 }
 0x247   : > { %12708 = vst [vmem:[#allocation53_spill] sm:$0xff] %v9546_v36  ;;  %v1605_v26 = vpop.f32.mrb[81].mxu0  ;;  %v9559_v36 = vpack.c.bf16 %v1182_v24, %v1178_v55  ;;  %7378 = vmatprep.subr.bf16.mxu1 %v9568_v30  ;;  %v2102_v24 = vpack.c.bf16 %v2075_v53, %v2074_v52  ;;  %v2014_v38 = vadd.f32 1.0, %v7731_v3  ;;  %v9596_v3 = vld [vmem:[%s9070_s19 + $0x58] sm:$0xff] }
 0x248   : > { %v9555_v31 = vpop.f32.mrb[82].mxu0  ;;  %v1922_v51 = vadd.f32 %v9572_v23, %v1605_v26  ;;  %v7733_v55 = vpop.eup %7732  ;;  %v2077_v44 = vmul.f32 %v9596_v3, %v2045_v10  ;;  %v9604_v23 = vunpack.c.l.bf16 %v9402_v13 }
 0x249   : > { %v1609_v0 = vpop.f32.mrb[83].mxu0  ;;  %v2015_v50 = vadd.f32 1.0, %v7733_v55  ;;  %7306 = vmatprep.mubr.bf16.mxu1 %v2102_v24 }
 0x24a   : > { %v1954_v4 = vmul.f32 0.5, %v1922_v51  ;;  %v1923_v26 = vadd.f32 %v9580_v16, %v1609_v0  ;;  %v2046_v51 = vmul.f32 0.5, %v2014_v38  ;;  %v2103_v55 = vpack.c.bf16 %v2077_v44, %v2076_v20  ;;  %12714 = vst [vmem:[#allocation59_spill] sm:$0xff] %v9604_v23 }
 0x24b   : > { %v2047_v0 = vmul.f32 0.5, %v2015_v50  ;;  %v9611_v50 = vld [vmem:[%s9070_s19 + $0x68] sm:$0xff] }
 0x24c   : > { %7738 = vtanh.f32 %v1954_v4  ;;  %v1955_v52 = vmul.f32 0.5, %v1923_v26  ;;  %7307 = vmatmul.mubr.bf16.gmra.mrb[88].mxu1 %v2103_v55 }
 0x24e   : > { %v9577_v48 = vpop.f32.mrb[84].mxu0  ;;  %v7735_v24 = vpop.eup %7734  ;;  %7740 = vtanh.f32 %v1955_v52  ;;  %v9617_v52 = vunpack.c.h.bf16 %v9402_v13  ;;  %v9622_v13 = vunpack.c.l.bf16 %v9430_v54 }
 0x24f   : > { %v1615_v9 = vpop.f32.mrb[85].mxu0  ;;  %v2016_v10 = vadd.f32 1.0, %v7735_v24 }
 0x250   : > { %v9582_v57 = vpop.f32.mrb[86].mxu0  ;;  %v1924_v53 = vadd.f32 %v9585_v5, %v1615_v9  ;;  %v9607_v9 = vld [vmem:[%s9070_s19 + $0x60] sm:$0xff]  ;;  %v7737_v44 = vpop.eup %7736  ;;  %12715 = vst [vmem:[#allocation60_spill] sm:$0xff] %v9617_v52  ;;  %12716 = vst [vmem:[#allocation61_spill] sm:$0xff] %v9622_v13 }
 0x251   : > { %v1619_v43 = vpop.f32.mrb[87].mxu0  ;;  %v2078_v38 = vmul.f32 %v9607_v9, %v2046_v51 }
 0x252   : > { %v1925_v63 = vadd.f32 %v9589_v14, %v1619_v43  ;;  %v1956_v4 = vmul.f32 0.5, %v1924_v53  ;;  %v2079_v43 = vmul.f32 %v9611_v50, %v2047_v0 }
 0x254   : > { %v1957_v16 = vmul.f32 0.5, %v1925_v63  ;;  %7742 = vtanh.f32 %v1956_v4  ;;  %v2017_v63 = vadd.f32 1.0, %v7737_v44  ;;  %v2104_v24 = vpack.c.bf16 %v2079_v43, %v2078_v38  ;;  %v9627_v44 = vld [vmem:[%s9070_s19 + $0x70] sm:$0xff]  ;;  %v9631_v38 = vld [vmem:[%s9070_s19 + $0x78] sm:$0xff] }
 0x255   : > { %v2048_v4 = vmul.f32 0.5, %v2016_v10  ;;  %12717 = vst [vmem:[#allocation62_spill] sm:$0xff] %v9627_v44  ;;  %12718 = vst [vmem:[#allocation63_spill] sm:$0xff] %v9631_v38 }
 0x256   : > { %v9601_v61 = vpop.f32.mrb[88].mxu0  ;;  %7744 = vtanh.f32 %v1957_v16  ;;  %v7739_v5 = vpop.eup %7738  ;;  %v2049_v0 = vmul.f32 0.5, %v2017_v63  ;;  %7310 = vmatprep.mubr.bf16.mxu1 %v2104_v24 }
 0x257   : > { %v1625_v26 = vpop.f32.mrb[89].mxu0  ;;  %v2018_v16 = vadd.f32 1.0, %v7739_v5  ;;  %v2080_v10 = vmul.f32 %v9627_v44, %v2048_v4  ;;  %v9638_v4 = vunpack.c.h.bf16 %v9430_v54 }
 0x258   : > { %v9614_v20 = vpop.f32.mrb[90].mxu0  ;;  %v1926_v53 = vadd.f32 %v9604_v23, %v1625_v26  ;;  %v7741_v26 = vpop.eup %7740  ;;  %v2081_v43 = vmul.f32 %v9631_v38, %v2049_v0 }
 0x259   : > { %v1629_v55 = vpop.f32.mrb[91].mxu0  ;;  %12719 = vst [vmem:[#allocation64_spill] sm:$0xff] %v9638_v4 }
 0x25a   : > { %v1958_v51 = vmul.f32 0.5, %v1926_v53  ;;  %v1927_v14 = vadd.f32 %v9617_v52, %v1629_v55  ;;  %v2019_v55 = vadd.f32 1.0, %v7741_v26  ;;  %v2105_v24 = vpack.c.bf16 %v2081_v43, %v2080_v10 }
 0x25c   : > { %7746 = vtanh.f32 %v1958_v51  ;;  %v1959_v60 = vmul.f32 0.5, %v1927_v14  ;;  %v2051_v52 = vmul.f32 0.5, %v2019_v55  ;;  %7311 = vmatmul.mubr.bf16.gmra.mrb[92].mxu1 %v2105_v24 }
 0x25e   : > { %v9624_v40 = vpop.f32.mrb[92].mxu0  ;;  %7748 = vtanh.f32 %v1959_v60  ;;  %v7743_v5 = vpop.eup %7742  ;;  %v2050_v60 = vmul.f32 0.5, %v2018_v16  ;;  %v9649_v16 = vld [vmem:[%s9070_s19 + $0x88] sm:$0xff] }
 0x25f   : > { %v1635_v53 = vpop.f32.mrb[93].mxu0  ;;  %v2020_v12 = vadd.f32 1.0, %v7743_v5  ;;  %12722 = vst [vmem:[#allocation67_spill] sm:$0xff] %v9649_v16  ;;  %v2083_v43 = vmul.f32 %v9649_v16, %v2051_v52 }
 0x260   : > { %v1928_v14 = vadd.f32 %v9622_v13, %v1635_v53  ;;  %v9635_v63 = vpop.f32.mrb[94].mxu0  ;;  %v7745_v23 = vpop.eup %7744  ;;  %v9642_v53 = vunpack.c.l.bf16 %v9449_v2  ;;  %v9645_v13 = vld [vmem:[%s9070_s19 + $0x80] sm:$0xff] }
 0x261   : > { %v1639_v51 = vpop.f32.mrb[95].mxu0  ;;  %v2021_v38 = vadd.f32 1.0, %v7745_v23  ;;  %12721 = vst [vmem:[#allocation66_spill] sm:$0xff] %v9645_v13  ;;  %v2082_v10 = vmul.f32 %v9645_v13, %v2050_v60  ;;  %v2052_v5 = vmul.f32 0.5, %v2020_v12  ;;  %v9658_v13 = vunpack.c.h.bf16 %v9449_v2 }
 0x262   : > { %v1960_v0 = vmul.f32 0.5, %v1928_v14  ;;  %v1929_v26 = vadd.f32 %v9638_v4, %v1639_v51  ;;  %12720 = vst [vmem:[#allocation65_spill] sm:$0xff] %v9642_v53 }
 0x263   : > { %v2053_v24 = vmul.f32 0.5, %v2021_v38  ;;  %12724 = vst [vmem:[#allocation69_spill] sm:$0xff] %v9658_v13 }
 0x264   : > { %7750 = vtanh.f32 %v1960_v0  ;;  %v1961_v14 = vmul.f32 0.5, %v1929_v26  ;;  %v2106_v0 = vpack.c.bf16 %v2083_v43, %v2082_v10  ;;  %v9662_v10 = vld [vmem:[%s9070_s19 + $0x90] sm:$0xff] }
 0x265   : > { %12725 = vst [vmem:[#allocation70_spill] sm:$0xff] %v9662_v10  ;;  %v2084_v43 = vmul.f32 %v9662_v10, %v2052_v5  ;;  %v9677_v5 = vunpack.c.h.bf16 %v9481_v34 }
 0x266   : > { %v9652_v54 = vpop.f32.mrb[96].mxu0  ;;  %v7747_v55 = vpop.eup %7746  ;;  %7752 = vtanh.f32 %v1961_v14  ;;  %7314 = vmatprep.mubr.bf16.mxu1 %v2106_v0  ;;  %v9670_v14 = vunpack.c.l.bf16 %v9481_v34  ;;  %v9684_v34 = vunpack.c.l.bf16 %v9523_v7 }
 0x267   : > { %v1645_v23 = vpop.f32.mrb[97].mxu0  ;;  %v2022_v51 = vadd.f32 1.0, %v7747_v55  ;;  %12729 = vst [vmem:[#allocation74_spill] sm:$0xff] %v9677_v5 }
 0x268   : > { %v1930_v4 = vadd.f32 %v9642_v53, %v1645_v23  ;;  %v9655_v44 = vpop.f32.mrb[98].mxu0  ;;  %v7749_v60 = vpop.eup %7748  ;;  %v9666_v23 = vld [vmem:[%s9070_s19 + $0x98] sm:$0xff]  ;;  %12727 = vst [vmem:[#allocation72_spill] sm:$0xff] %v9670_v14  ;;  %12730 = vst [vmem:[#allocation75_spill] sm:$0xff] %v9684_v34 }
 0x269   : > { %12723 = vst [vmem:[#allocation68_spill] sm:$0xff] %v9655_v44  ;;  %v1649_v52 = vpop.f32.mrb[99].mxu0  ;;  %v2023_v16 = vadd.f32 1.0, %v7749_v60  ;;  %v2054_v26 = vmul.f32 0.5, %v2022_v51  ;;  %12726 = vst [vmem:[#allocation71_spill] sm:$0xff] %v9666_v23  ;;  %v2085_v2 = vmul.f32 %v9666_v23, %v2053_v24 }
 0x26a   : > { %v1962_v12 = vmul.f32 0.5, %v1930_v4  ;;  %v1931_v38 = vadd.f32 %v9658_v13, %v1649_v52  ;;  %v8628_v52 = vld [vmem:[%s9070_s19 + $0xa0] sm:$0xff]  ;;  %v8629_v13 = vld [vmem:[%s9070_s19 + $0xa8] sm:$0xff] }
 0x26b   : > { %v2055_v55 = vmul.f32 0.5, %v2023_v16  ;;  %v2107_v60 = vpack.c.bf16 %v2085_v2, %v2084_v43  ;;  %v2086_v16 = vmul.f32 %v8628_v52, %v2054_v26 }
 0x26c   : > { %7754 = vtanh.f32 %v1962_v12  ;;  %v1963_v0 = vmul.f32 0.5, %v1931_v38 }
 0x26d   : > { %v2087_v44 = vmul.f32 %v8629_v13, %v2055_v55  ;;  %7315 = vmatmul.mubr.bf16.gmra.mrb[96].mxu1 %v2107_v60 }
 0x26e   : > { %v9672_v4 = vpop.f32.mrb[100].mxu0  ;;  %v7751_v51 = vpop.eup %7750  ;;  %7756 = vtanh.f32 %v1963_v0 }
 0x26f   : > { %12728 = vst [vmem:[#allocation73_spill] sm:$0xff] %v9672_v4  ;;  %v1655_v53 = vpop.f32.mrb[101].mxu0  ;;  %v2108_v38 = vpack.c.bf16 %v2087_v44, %v2086_v16  ;;  %v2024_v43 = vadd.f32 1.0, %v7751_v51  ;;  %v9689_v51 = vunpack.c.h.bf16 %v9523_v7 }
 0x270   : > { %v1932_v24 = vadd.f32 %v9670_v14, %v1655_v53  ;;  %v9680_v12 = vpop.f32.mrb[102].mxu0  ;;  %v7753_v4 = vpop.eup %7752 }
 0x271   : > { %v1659_v23 = vpop.f32.mrb[103].mxu0  ;;  %7318 = vmatprep.mubr.bf16.mxu1 %v2108_v38  ;;  %v2025_v26 = vadd.f32 1.0, %v7753_v4  ;;  %v2056_v55 = vmul.f32 0.5, %v2024_v43  ;;  %12732 = vst [vmem:[#allocation77_spill] sm:$0xff] %v9689_v51  ;;  %v8630_v4 = vld [vmem:[%s9070_s19 + $0xb8] sm:$0xff] }
 0x272   : > { %v1964_v2 = vmul.f32 0.5, %v1932_v24  ;;  %v1933_v10 = vadd.f32 %v9677_v5, %v1659_v23 }
 0x273   : > { %v2057_v53 = vmul.f32 0.5, %v2025_v26  ;;  %v9697_v26 = vld [vmem:[%s9070_s19 + $0xb0] sm:$0xff] }
 0x274   : > { %7758 = vtanh.f32 %v1964_v2  ;;  %v1965_v13 = vmul.f32 0.5, %v1933_v10  ;;  %12734 = vst [vmem:[#allocation79_spill] sm:$0xff] %v9697_v26 }
 0x275   : > { %v2089_v10 = vmul.f32 %v8630_v4, %v2057_v53  ;;  %v9701_v53 = vunpack.c.l.bf16 %v9559_v36 }
 0x276   : > { %7760 = vtanh.f32 %v1965_v13  ;;  %v9686_v0 = vpop.f32.mrb[104].mxu0  ;;  %v7755_v44 = vpop.eup %7754  ;;  %v2088_v13 = vmul.f32 %v9697_v26, %v2056_v55 }
 0x277   : > { %12731 = vst [vmem:[#allocation76_spill] sm:$0xff] %v9686_v0  ;;  %v1665_v60 = vpop.f32.mrb[105].mxu0  ;;  %v2026_v16 = vadd.f32 1.0, %v7755_v44  ;;  %12735 = vst [vmem:[#allocation80_spill] sm:$0xff] %v9701_v53 }
 0x278   : > { %v1934_v23 = vadd.f32 %v9684_v34, %v1665_v60  ;;  %v9692_v52 = vpop.f32.mrb[106].mxu0  ;;  %v7757_v38 = vpop.eup %7756  ;;  %v2109_v14 = vpack.c.bf16 %v2089_v10, %v2088_v13 }
 0x279   : > { %12733 = vst [vmem:[#allocation78_spill] sm:$0xff] %v9692_v52  ;;  %v1669_v24 = vpop.f32.mrb[107].mxu0  ;;  %v2027_v5 = vadd.f32 1.0, %v7757_v38  ;;  %v2058_v60 = vmul.f32 0.5, %v2026_v16  ;;  %v9707_v38 = vunpack.c.h.bf16 %v9559_v36  ;;  %v8634_v36 = vld [vmem:[%s9070_s19 + $0xd0] sm:$0xff] }
 0x27a   : > { %v1966_v43 = vmul.f32 0.5, %v1934_v23  ;;  %v1935_v2 = vadd.f32 %v9689_v51, %v1669_v24  ;;  %7319 = vmatmul.mubr.bf16.gmra.mrb[100].mxu1 %v2109_v14  ;;  %v8632_v24 = vld [vmem:[%s9070_s19 + $0xc8] sm:$0xff]  ;;  %v8633_v14 = vld [vmem:[%s9070_s19 + $0xc0] sm:$0xff] }
 0x27b   : > { %v2059_v34 = vmul.f32 0.5, %v2027_v5  ;;  %12737 = vst [vmem:[#allocation82_spill] sm:$0xff] %v9707_v38  ;;  %v2090_v13 = vmul.f32 %v8633_v14, %v2058_v60  ;;  %v8637_v14 = vld [vmem:[%s9070_s19 + $0xe8] sm:$0xff] }
 0x27c   : > { %7762 = vtanh.f32 %v1966_v43  ;;  %v1967_v7 = vmul.f32 0.5, %v1935_v2 }
 0x27d   : > { %v2091_v51 = vmul.f32 %v8632_v24, %v2059_v34 }
 0x27e   : > { %v7759_v52 = vpop.eup %7758  ;;  %7764 = vtanh.f32 %v1967_v7  ;;  %v9703_v44 = vpop.f32.mrb[108].mxu0 }
 0x27f   : > { %12736 = vst [vmem:[#allocation81_spill] sm:$0xff] %v9703_v44  ;;  %v2028_v23 = vadd.f32 1.0, %v7759_v52  ;;  %v1675_v4 = vpop.f32.mrb[109].mxu0  ;;  %v2110_v34 = vpack.c.bf16 %v2091_v51, %v2090_v13 }
 0x280   : > { %v7761_v55 = vpop.eup %7760  ;;  %v1936_v5 = vadd.f32 %v9701_v53, %v1675_v4  ;;  %v9710_v10 = vpop.f32.mrb[110].mxu0  ;;  %v8635_v53 = vld [vmem:[%s9070_s19 + $0xd8] sm:$0xff] }
 0x281   : > { %12738 = vst [vmem:[#allocation83_spill] sm:$0xff] %v9710_v10  ;;  %v2060_v16 = vmul.f32 0.5, %v2028_v23  ;;  %v2029_v43 = vadd.f32 1.0, %v7761_v55  ;;  %v1679_v2 = vpop.f32.mrb[111].mxu0  ;;  %7322 = vmatprep.mubr.bf16.mxu1 %v2110_v34 }
 0x282   : > { %v1968_v7 = vmul.f32 0.5, %v1936_v5  ;;  %v1937_v52 = vadd.f32 %v9707_v38, %v1679_v2 }
 0x283   : > { %v2061_v26 = vmul.f32 0.5, %v2029_v43  ;;  %v2092_v4 = vmul.f32 %v8634_v36, %v2060_v16  ;;  %v8636_v43 = vld [vmem:[%s9070_s19 + $0xe0] sm:$0xff]  ;;  %v8639_v36 = vld [vmem:[%s9070_s19 + $0xf8] sm:$0xff] }
 0x284   : > { %7766 = vtanh.f32 %v1968_v7  ;;  %v1969_v24 = vmul.f32 0.5, %v1937_v52 }
 0x285   : > { %v2093_v44 = vmul.f32 %v8635_v53, %v2061_v26 }
 0x286   : > { %v7763_v10 = vpop.eup %7762  ;;  %7768 = vtanh.f32 %v1969_v24 }
 0x287   : > { %v2030_v23 = vadd.f32 1.0, %v7763_v10  ;;  %v2111_v55 = vpack.c.bf16 %v2093_v44, %v2092_v4  ;;  %v8638_v44 = vld [vmem:[%s9070_s19 + $0xf0] sm:$0xff] }
 0x288   : > { %v7765_v0 = vpop.eup %7764 }
 0x289   : > { %v2062_v60 = vmul.f32 0.5, %v2030_v23  ;;  %v2031_v5 = vadd.f32 1.0, %v7765_v0  ;;  %7323 = vmatmul.mubr.bf16.gmra.mrb[104].mxu1 %v2111_v55  ;;  %v12739_v23 = vmov 0   ;;  %v9722_v55 = vunpack.c.l.bf16 %v9227_v39 }
 0x28b   : > { %v2063_v51 = vmul.f32 0.5, %v2031_v5  ;;  %v2094_v2 = vmul.f32 %v8636_v43, %v2062_v60  ;;  %12740 = vst [vmem:[#allocation84_spill] sm:$0xff] %v9722_v55  ;;  %v9725_v60 = vunpack.c.l.bf16 %v9243_v21  ;;  %v9728_v5 = vunpack.c.h.bf16 %v9243_v21 }
 0x28d   : > { %v2095_v13 = vmul.f32 %v8637_v14, %v2063_v51  ;;  %12741 = vst [vmem:[#allocation85_spill] sm:$0xff] %v9728_v5  ;;  %v1714_v51 = vadd.f32 %v9722_v55, %v9348_v59  ;;  %v1716_v43 = vadd.f32 %v9725_v60, %v9371_v22  ;;  %v1717_v14 = vadd.f32 %v9728_v5, %v9379_v29 }
 0x28e   : > { %v7767_v7 = vpop.eup %7766  ;;  %v9742_v22 = vunpack.c.l.bf16 %v9232_v42 }
 0x28f   : > { %v2032_v52 = vadd.f32 1.0, %v7767_v7  ;;  %v2112_v16 = vpack.c.bf16 %v2095_v13, %v2094_v2  ;;  %v9735_v2 = vunpack.c.h.bf16 %v9227_v39  ;;  %v1746_v13 = vmul.f32 0.5, %v1714_v51 }
 0x290   : > { %v7769_v34 = vpop.eup %7768  ;;  %12743 = vst [vmem:[#allocation87_spill] sm:$0xff] %v9742_v22 }
 0x291   : > { %v2064_v26 = vmul.f32 0.5, %v2032_v52  ;;  %v2033_v53 = vadd.f32 1.0, %v7769_v34  ;;  %7326 = vmatprep.mubr.bf16.mxu1 %v2112_v16  ;;  %12742 = vst [vmem:[#allocation86_spill] sm:$0xff] %v9735_v2  ;;  %v1715_v7 = vadd.f32 %v9735_v2, %v9358_v19  ;;  %v1748_v52 = vmul.f32 0.5, %v1716_v43 }
 0x292   : > { %v1749_v16 = vmul.f32 0.5, %v1717_v14  ;;  %7770 = vtanh.f32 %v1746_v13  ;;  %v9756_v43 = vunpack.c.l.bf16 %v9259_v6 }
 0x293   : > { %v2065_v10 = vmul.f32 0.5, %v2033_v53  ;;  %v2096_v24 = vmul.f32 %v8638_v44, %v2064_v26  ;;  %v1747_v21 = vmul.f32 0.5, %v1715_v7  ;;  %7772 = vtanh.f32 %v1748_v52 }
 0x294   : > { %7774 = vtanh.f32 %v1749_v16  ;;  %v9745_v26 = vunpack.c.l.bf16 %v9234_v47  ;;  %v9748_v53 = vunpack.c.h.bf16 %v9232_v42  ;;  %12747 = vst [vmem:[#allocation91_spill] sm:$0xff] %v9756_v43  ;;  %v9760_v7 = vunpack.c.h.bf16 %v9259_v6 }
 0x295   : > { %v2097_v4 = vmul.f32 %v8639_v36, %v2065_v10  ;;  %7776 = vtanh.f32 %v1747_v21  ;;  %v9763_v52 = vunpack.c.l.bf16 %v9275_v1  ;;  %v9767_v16 = vunpack.c.h.bf16 %v9275_v1 }
 0x296   : > { %12744 = vst [vmem:[#allocation88_spill] sm:$0xff] %v9745_v26  ;;  %12745 = vst [vmem:[#allocation89_spill] sm:$0xff] %v9748_v53  ;;  %v1719_v6 = vadd.f32 %v9760_v7, %v9392_v17  ;;  %v9781_v17 = vunpack.c.h.bf16 %v9291_v46 }
 0x297   : > { %v2113_v0 = vpack.c.bf16 %v2097_v4, %v2096_v24  ;;  %v9752_v24 = vunpack.c.h.bf16 %v9234_v47  ;;  %12748 = vst [vmem:[#allocation92_spill] sm:$0xff] %v9760_v7  ;;  %12749 = vst [vmem:[#allocation93_spill] sm:$0xff] %v9763_v52  ;;  %v8642_v7 = vld [vmem:[%s9070_s19 + $0x18] sm:$0xff] }
 0x298   : > { %12750 = vst [vmem:[#allocation94_spill] sm:$0xff] %v9767_v16  ;;  %12752 = vst [vmem:[#allocation96_spill] sm:$0xff] %v9781_v17 }
 0x299   : > { %7327 = vmatmul.mubr.bf16.gmra.mrb[108].mxu1 %v2113_v0  ;;  %12746 = vst [vmem:[#allocation90_spill] sm:$0xff] %v9752_v24 }
 0x29a   : > { %2563 = vmatprep.mubr.bf16.mxu1 %v12739_v23 }
 0x29c   : > { %v7771_v59 = vpop.eup %7770 }
 0x29d   : > { %v7773_v34 = vpop.eup %7772  ;;  %v1810_v36 = vadd.f32 1.0, %v7771_v59  ;;  %v1718_v59 = vadd.f32 %v9756_v43, %v9388_v49 }
 0x29e   : > { %v7775_v39 = vpop.eup %7774  ;;  %v1812_v4 = vadd.f32 1.0, %v7773_v34 }
 0x29f   : > { %v7777_v44 = vpop.eup %7776  ;;  %v1813_v14 = vadd.f32 1.0, %v7775_v39  ;;  %v1842_v34 = vmul.f32 0.5, %v1810_v36 }
 0x2a0   : > { %v1811_v21 = vadd.f32 1.0, %v7777_v44  ;;  %v1844_v39 = vmul.f32 0.5, %v1812_v4  ;;  %v1750_v44 = vmul.f32 0.5, %v1718_v59  ;;  %v8640_v59 = vld [vmem:[%s9070_s19] sm:$0xff] }
 0x2a2   : > { %v1843_v1 = vmul.f32 0.5, %v1811_v21  ;;  %v2389_v49 = vsub.f32 1.0, %v1844_v39 }
 0x2fc   : > { %v7300_v29 = vpop.f32.mrb[80].mxu1 }
 0x2fd   : > { %v2237_v19 = vadd.f32 %v7300_v29, %v9742_v22  ;;  %v2228_v10 = vpop.f32.mrb[81].mxu1  ;;  %v1845_v29 = vmul.f32 0.5, %v1813_v14 }
 0x2fe   : > { %v2229_v0 = vadd.f32 %v2228_v10, %v9745_v26  ;;  %v7301_v51 = vpop.f32.mrb[82].mxu1  ;;  %v1721_v10 = vadd.f32 %v9767_v16, %v9412_v58  ;;  %v9784_v58 = vunpack.c.l.bf16 %v9307_v37 }
 0x2ff   : > { %7778 = vtanh.f32 %v2237_v19  ;;  %v2240_v42 = vadd.f32 %v7301_v51, %v9748_v53  ;;  %v2231_v13 = vpop.f32.mrb[83].mxu1  ;;  %v1720_v19 = vadd.f32 %v9763_v52, %v9408_v32  ;;  %v1751_v51 = vmul.f32 0.5, %v1719_v6 }
 0x300   : > { %7780 = vtanh.f32 %v2229_v0  ;;  %v2232_v47 = vadd.f32 %v2231_v13, %v9752_v24  ;;  %v2387_v0 = vsub.f32 1.0, %v1842_v34  ;;  %v2390_v36 = vsub.f32 1.0, %v1845_v29  ;;  %12753 = vst [vmem:[#allocation97_spill] sm:$0xff] %v9784_v58 }
 0x301   : > { %7782 = vtanh.f32 %v2240_v42  ;;  %v1752_v4 = vmul.f32 0.5, %v1720_v19  ;;  %v9778_v42 = vunpack.c.l.bf16 %v9291_v46  ;;  %v1753_v32 = vmul.f32 0.5, %v1721_v10  ;;  %v8641_v19 = vld [vmem:[%s9070_s19 + $0x10] sm:$0xff] }
 0x302   : > { %7784 = vtanh.f32 %v2232_v47  ;;  %v9787_v13 = vunpack.c.h.bf16 %v9307_v37  ;;  %v2388_v47 = vsub.f32 1.0, %v1843_v1  ;;  %v2419_v6 = vmul.f32 %v8640_v59, %v2387_v0  ;;  %v8643_v59 = vld [vmem:[%s9070_s19 + $0x8] sm:$0xff] }
 0x303   : > { %12751 = vst [vmem:[#allocation95_spill] sm:$0xff] %v9778_v42  ;;  %7786 = vtanh.f32 %v1750_v44  ;;  %v2421_v16 = vmul.f32 %v8641_v19, %v2389_v49  ;;  %v2422_v10 = vmul.f32 %v8642_v7, %v2390_v36  ;;  %v1722_v43 = vadd.f32 %v9778_v42, %v9428_v8 }
 0x304   : > { %12754 = vst [vmem:[#allocation98_spill] sm:$0xff] %v9787_v13  ;;  %7788 = vtanh.f32 %v1751_v51  ;;  %v1723_v44 = vadd.f32 %v9781_v17, %v9434_v33  ;;  %v2420_v49 = vmul.f32 %v8643_v59, %v2388_v47  ;;  %v9826_v47 = vunpack.c.h.bf16 %v9250_v28 }
 0x305   : > { %7790 = vtanh.f32 %v1752_v4  ;;  %v1754_v8 = vmul.f32 0.5, %v1722_v43  ;;  %v8644_v43 = vld [vmem:[%s12357_s7 + $0x8] sm:$0xff]  }
 0x306   : > { %7792 = vtanh.f32 %v1753_v32  ;;  %v1755_v33 = vmul.f32 0.5, %v1723_v44  ;;  %12758 = vst [vmem:[#allocation102_spill] sm:$0xff] %v9826_v47 }
 0x307   : > { %7794 = vtanh.f32 %v1754_v8  ;;  %v8645_v8 = vld [vmem:[%s12357_s7 + $0x10] sm:$0xff]  }
 0x308   : > { %7796 = vtanh.f32 %v1755_v33 }
 0x309   : > { %v7779_v14 = vpop.eup %7778 }
 0x30a   : > { %v7781_v21 = vpop.eup %7780  ;;  %v2453_v52 = vmul.f32 %v7779_v14, %v1844_v39  ;;  %v1724_v39 = vadd.f32 %v9784_v58, %v9451_v45  ;;  %v9823_v14 = vunpack.c.l.bf16 %v9250_v28 }
 0x30b   : > { %v7783_v46 = vpop.eup %7782  ;;  %v2451_v24 = vmul.f32 %v7781_v21, %v1842_v34  ;;  %v1725_v34 = vadd.f32 %v9787_v13, %v9459_v15  ;;  %v9814_v15 = vunpack.c.l.bf16 %v9248_v27  ;;  %v9832_v21 = vunpack.c.h.bf16 %v9323_v62  ;;  %v12775_v13 = vld [vmem:[#allocation53_spill] sm:$0xff] }
 0x30c   : > { %v7785_v37 = vpop.eup %7784  ;;  %v2454_v53 = vmul.f32 %v7783_v46, %v1845_v29  ;;  %v9796_v0 = vadd.f32 %v2453_v52, %v2421_v16  ;;  %v1756_v29 = vmul.f32 0.5, %v1724_v39  ;;  %12757 = vst [vmem:[#allocation101_spill] sm:$0xff] %v9823_v14 }
 0x30d   : > { %v9801_v51 = vadd.f32 %v2451_v24, %v2419_v6  ;;  %v2452_v7 = vmul.f32 %v7785_v37, %v1843_v1  ;;  %v7787_v16 = vpop.eup %7786  ;;  %v1757_v32 = vmul.f32 0.5, %v1725_v34  ;;  %12755 = vst [vmem:[#allocation99_spill] sm:$0xff] %v9814_v15  ;;  %v9817_v24 = vunpack.c.h.bf16 %v9248_v27  ;;  %12760 = vst [vmem:[#allocation104_spill] sm:$0xff] %v9832_v21 }
 0x30e   : > { %v9803_v36 = vadd.f32 %v2454_v53, %v2422_v10  ;;  %v7789_v45 = vpop.eup %7788  ;;  %7798 = vtanh.f32 %v1756_v29  ;;  %v9835_v27 = vunpack.c.l.bf16 %v9339_v18  ;;  %v9838_v6 = vunpack.c.h.bf16 %v9339_v18 }
 0x30f   : > { %v9807_v4 = vadd.f32 %v2452_v7, %v2420_v49  ;;  %v7791_v53 = vpop.eup %7790  ;;  %12756 = vst [vmem:[#allocation100_spill] sm:$0xff] %v9817_v24  ;;  %v1814_v19 = vadd.f32 1.0, %v7787_v16  ;;  %7800 = vtanh.f32 %v1757_v32  ;;  %v1815_v10 = vadd.f32 1.0, %v7789_v45 }
 0x310   : > { %v7793_v1 = vpop.eup %7792  ;;  %12761 = vst [vmem:[#allocation105_spill] sm:$0xff] %v9835_v27  ;;  %12762 = vst [vmem:[#allocation106_spill] sm:$0xff] %v9838_v6  ;;  %v1816_v37 = vadd.f32 1.0, %v7791_v53  ;;  %v1727_v49 = vadd.f32 %v9832_v21, %v9491_v11  ;;  %v2516_v7 = vpack.c.bf16 %v9803_v36, %v9796_v0  ;;  %v1729_v11 = vadd.f32 %v9838_v6, %v9526_v56  ;;  %v8646_v56 = vld [vmem:[%s12357_s7 + $0x18] sm:$0xff]  }
 0x311   : > { %v2515_v52 = vpack.c.bf16 %v9807_v4, %v9801_v51  ;;  %v9854_v29 = vmul.f32 0.5, %v1814_v19  ;;  %v9859_v16 = vmul.f32 0.5, %v1815_v10  ;;  %v12763_v10 = vld [vmem:[#allocation18_spill] sm:$0xff] }
 0x312   : > { %v7304_v46 = vpop.f32.mrb[84].mxu1  ;;  %v1848_v32 = vmul.f32 0.5, %v1816_v37  ;;  %v9869_v37 = vunpack.c.h.bf16 %v12763_v10 }
 0x313   : > { %2564 = vmatmul.mubr.bf16.vlgmr.msra.gmra.mrb[112].mxu1 %v2515_v52  ;;  %v2253_v44 = vadd.f32 %v7304_v46, %v9814_v15  ;;  %v2244_v59 = vpop.f32.mrb[85].mxu1 }
 0x314   : > { %2573 = vmatprep.mubr.bf16.mxu1 %v12739_v23  ;;  %7379 = vmatpush3.bf16.msra.mxu1 %v9568_v30  ;;  %v9829_v30 = vunpack.c.l.bf16 %v9323_v62  ;;  %v1817_v62 = vadd.f32 1.0, %v7793_v1  ;;  %v2245_v39 = vadd.f32 %v2244_v59, %v9823_v14  ;;  %v7305_v18 = vpop.f32.mrb[86].mxu1  ;;  %12765 = vst [vmem:[#allocation107_spill] sm:$0xff] %v9869_v37  ;;  %v8651_v14 = vld [vmem:[%s9070_s19 + $0x38] sm:$0xff] }
 0x315   : > { %7380 = vmatprep.subr.bf16.mxu1 %v8644_v43  ;;  %7802 = vtanh.f32 %v2253_v44  ;;  %v2256_v34 = vadd.f32 %v7305_v18, %v9817_v24  ;;  %v2247_v33 = vpop.f32.mrb[87].mxu1  ;;  %v9866_v44 = vunpack.c.l.bf16 %v12763_v10  ;;  %v2393_v18 = vsub.f32 1.0, %v1848_v32  ;;  %v8650_v24 = vld [vmem:[%s9070_s19 + $0x30] sm:$0xff] }
 0x316   : > { %12759 = vst [vmem:[#allocation103_spill] sm:$0xff] %v9829_v30  ;;  %v1726_v28 = vadd.f32 %v9829_v30, %v9483_v35  ;;  %v1728_v35 = vadd.f32 %v9835_v27, %v9518_v25  ;;  %7804 = vtanh.f32 %v2245_v39  ;;  %v2248_v52 = vadd.f32 %v2247_v33, %v9826_v47  ;;  %v7795_v25 = vpop.eup %7794  ;;  %v8647_v33 = vld [vmem:[%s12357_s7 + $0x20] sm:$0xff]   ;;  %v8649_v30 = vld [vmem:[%s9070_s19 + $0x28] sm:$0xff] }
 0x317   : > { %7806 = vtanh.f32 %v2256_v34  ;;  %v1849_v53 = vmul.f32 0.5, %v1817_v62  ;;  %v7797_v1 = vpop.eup %7796  ;;  %12764 = vst [vmem:[#allocation18_spill] sm:$0xff] %v9866_v44  ;;  %v1761_v62 = vmul.f32 0.5, %v1729_v11  ;;  %v2392_v39 = vsub.f32 1.0, %v9859_v16  ;;  %v12769_v11 = vld [vmem:[#allocation32_spill] sm:$0xff]  ;;  %v8648_v27 = vld [vmem:[%s9070_s19 + $0x20] sm:$0xff] }
 0x318   : > { %7381 = vmatpush3.bf16.msra.mxu1 %v8644_v43  ;;  %v1758_v45 = vmul.f32 0.5, %v1726_v28  ;;  %v1759_v43 = vmul.f32 0.5, %v1727_v49  ;;  %7808 = vtanh.f32 %v2248_v52  ;;  %v1760_v19 = vmul.f32 0.5, %v1728_v35  ;;  %v7799_v46 = vpop.eup %7798  ;;  %v12766_v28 = vld [vmem:[#allocation19_spill] sm:$0xff] }
 0x319   : > { %7382 = vmatprep.subr.bf16.mxu1 %v8645_v8  ;;  %v9872_v59 = vunpack.c.l.bf16 %v12766_v28  ;;  %v2391_v49 = vsub.f32 1.0, %v9854_v29  ;;  %v2394_v35 = vsub.f32 1.0, %v1849_v53  ;;  %v1818_v34 = vadd.f32 1.0, %v7795_v25 }
 0x31a   : > { %7810 = vtanh.f32 %v1758_v45  ;;  %v9883_v52 = vunpack.c.l.bf16 %v12769_v11  ;;  %v1819_v45 = vadd.f32 1.0, %v7797_v1  ;;  %v9886_v10 = vunpack.c.h.bf16 %v12769_v11 }
 0x31b   : > { %2574 = vmatmul.mubr.bf16.gmra.mrb[116].mxu1 %v2516_v7  ;;  %12767 = vst [vmem:[#allocation19_spill] sm:$0xff] %v9872_v59  ;;  %v7801_v7 = vpop.eup %7800  ;;  %7812 = vtanh.f32 %v1759_v43  ;;  %v2423_v21 = vmul.f32 %v8648_v27, %v2391_v49  ;;  %v2424_v47 = vmul.f32 %v8649_v30, %v2392_v39  ;;  %v2425_v1 = vmul.f32 %v8650_v24, %v2393_v18 }
 0x31c   : > { %2583 = vmatprep.mubr.bf16.mxu1 %v12739_v23  ;;  %7383 = vmatpush3.bf16.msra.mxu1 %v8645_v8  ;;  %v9877_v8 = vunpack.c.h.bf16 %v12766_v28  ;;  %12770 = vst [vmem:[#allocation32_spill] sm:$0xff] %v9883_v52  ;;  %7814 = vtanh.f32 %v1760_v19  ;;  %12771 = vst [vmem:[#allocation109_spill] sm:$0xff] %v9886_v10  ;;  %v12772_v28 = vld [vmem:[#allocation35_spill] sm:$0xff]  ;;  %v2426_v11 = vmul.f32 %v8651_v14, %v2394_v35  ;;  %v9898_v15 = vmul.f32 0.5, %v1818_v34 }
 0x31d   : > { %7384 = vmatprep.subr.bf16.mxu1 %v8646_v56  ;;  %v9889_v6 = vunpack.c.l.bf16 %v12772_v28  ;;  %v9892_v25 = vunpack.c.h.bf16 %v12772_v28  ;;  %7816 = vtanh.f32 %v1761_v62  ;;  %v1730_v58 = vadd.f32 %v9883_v52, %v12775_v13  ;;  %v8652_v62 = vld [vmem:[%s12357_s7 + $0x28] sm:$0xff]  }
 0x31e   : > { %12768 = vst [vmem:[#allocation108_spill] sm:$0xff] %v9877_v8  ;;  %v9905_v30 = vmul.f32 0.5, %v1819_v45  ;;  %v1731_v49 = vadd.f32 %v9886_v10, %v9555_v31 }
 0x31f   : > { %12773 = vst [vmem:[#allocation35_spill] sm:$0xff] %v9889_v6  ;;  %12774 = vst [vmem:[#allocation110_spill] sm:$0xff] %v9892_v25  ;;  %v7803_v43 = vpop.eup %7802  ;;  %v7308_v14 = vpop.f32.mrb[88].mxu1  ;;  %v1732_v13 = vadd.f32 %v9889_v6, %v9577_v48 }
 0x320   : > { %7385 = vmatpush3.bf16.msra.mxu1 %v8646_v56  ;;  %v1820_v56 = vadd.f32 1.0, %v7799_v46  ;;  %v1821_v46 = vadd.f32 1.0, %v7801_v7  ;;  %v7805_v19 = vpop.eup %7804  ;;  %v2457_v28 = vmul.f32 %v7803_v43, %v1848_v32  ;;  %v2269_v32 = vadd.f32 %v7308_v14, %v9866_v44  ;;  %v2260_v7 = vpop.f32.mrb[89].mxu1 }
 0x321   : > { %7386 = vmatprep.subr.bf16.mxu1 %v8647_v33  ;;  %v7807_v27 = vpop.eup %7806  ;;  %v2455_v39 = vmul.f32 %v7805_v19, %v9854_v29  ;;  %v2261_v45 = vadd.f32 %v2260_v7, %v9872_v59  ;;  %v1762_v29 = vmul.f32 0.5, %v1730_v58  ;;  %v1764_v58 = vmul.f32 0.5, %v1732_v13 }
 0x322   : > { %v9907_v24 = vmul.f32 0.5, %v1820_v56  ;;  %v7809_v18 = vpop.eup %7808  ;;  %v2458_v35 = vmul.f32 %v7807_v27, %v1849_v53  ;;  %v9915_v34 = vadd.f32 %v2457_v28, %v2425_v1  ;;  %v7309_v56 = vpop.f32.mrb[90].mxu1  ;;  %7818 = vtanh.f32 %v2269_v32  ;;  %v8653_v53 = vld [vmem:[%s12357_s7 + $0x30] sm:$0xff]  }
 0x323   : > { %v2456_v31 = vmul.f32 %v7809_v18, %v9859_v16  ;;  %v9921_v43 = vadd.f32 %v2455_v39, %v2423_v21  ;;  %v2272_v48 = vadd.f32 %v7309_v56, %v9869_v37  ;;  %v2263_v19 = vpop.f32.mrb[91].mxu1  ;;  %7820 = vtanh.f32 %v2261_v45  ;;  %v12780_v27 = vld [vmem:[#allocation20_spill] sm:$0xff]  ;;  %v12829_v37 = vld [vmem:[#allocation71_spill] sm:$0xff] }
 0x324   : > { %7387 = vmatpush3.bf16.msra.mxu1 %v8647_v33  ;;  %12776 = vst [vmem:[#allocation53_spill] sm:$0xff] %v9915_v34  ;;  %v9917_v33 = vmul.f32 0.5, %v1821_v46  ;;  %v9924_v14 = vadd.f32 %v2458_v35, %v2426_v11  ;;  %v7811_v1 = vpop.eup %7810  ;;  %v1763_v46 = vmul.f32 0.5, %v1731_v49  ;;  %v2264_v16 = vadd.f32 %v2263_v19, %v9877_v8 }
 0x325   : > { %7388 = vmatprep.subr.bf16.mxu1 %v8652_v62  ;;  %12777 = vst [vmem:[#allocation111_spill] sm:$0xff] %v9921_v43  ;;  %v9930_v21 = vadd.f32 %v2456_v31, %v2424_v47  ;;  %v7813_v28 = vpop.eup %7812  ;;  %7822 = vtanh.f32 %v2272_v48  ;;  %v9935_v39 = vunpack.c.l.bf16 %v12780_v27  ;;  %v9940_v32 = vunpack.c.h.bf16 %v12780_v27 }
 0x326   : > { %12778 = vst [vmem:[#allocation112_spill] sm:$0xff] %v9924_v14  ;;  %v7815_v11 = vpop.eup %7814  ;;  %7824 = vtanh.f32 %v2264_v16  ;;  %v2395_v47 = vsub.f32 1.0, %v9898_v15  ;;  %v2396_v13 = vsub.f32 1.0, %v9905_v30  ;;  %v2397_v7 = vsub.f32 1.0, %v9907_v24  ;;  %v12786_v16 = vld [vmem:[#allocation37_spill] sm:$0xff] }
 0x327   : > { %12779 = vst [vmem:[#allocation113_spill] sm:$0xff] %v9930_v21  ;;  %12781 = vst [vmem:[#allocation20_spill] sm:$0xff] %v9935_v39  ;;  %v2517_v18 = vpack.c.bf16 %v9930_v21, %v9921_v43  ;;  %v7817_v49 = vpop.eup %7816  ;;  %7826 = vtanh.f32 %v1762_v29  ;;  %v2398_v35 = vsub.f32 1.0, %v9917_v33  ;;  %v1822_v45 = vadd.f32 1.0, %v7811_v1  ;;  %v12783_v29 = vld [vmem:[#allocation21_spill] sm:$0xff] }
 0x328   : > { %7389 = vmatpush3.bf16.msra.mxu1 %v8652_v62  ;;  %v1733_v62 = vadd.f32 %v9892_v25, %v9582_v57  ;;  %12782 = vst [vmem:[#allocation114_spill] sm:$0xff] %v9940_v32  ;;  %v8654_v57 = vld [vmem:[%s12357_s7 + $0x38] sm:$0xff]   ;;  %7828 = vtanh.f32 %v1763_v46  ;;  %v1823_v56 = vadd.f32 1.0, %v7813_v28  ;;  %v1824_v31 = vadd.f32 1.0, %v7815_v11  ;;  %v12789_v28 = vld [vmem:[#allocation40_spill] sm:$0xff]  ;;  %v8657_v25 = vld [vmem:[%s9070_s19 + $0x48] sm:$0xff] }
 0x329   : > { %7390 = vmatprep.subr.bf16.mxu1 %v8653_v53  ;;  %2584 = vmatmul.mubr.bf16.gmra.mrb[120].mxu1 %v2517_v18  ;;  %7830 = vtanh.f32 %v1764_v58  ;;  %v9951_v19 = vunpack.c.l.bf16 %v12783_v29  ;;  %v9957_v27 = vunpack.c.l.bf16 %v12786_v16  ;;  %v1825_v1 = vadd.f32 1.0, %v7817_v49 }
 0x32a   : > { %v1765_v48 = vmul.f32 0.5, %v1733_v62  ;;  %2593 = vmatprep.mubr.bf16.mxu1 %v12739_v23  ;;  %v9960_v46 = vunpack.c.h.bf16 %v12786_v16  ;;  %v9963_v11 = vunpack.c.l.bf16 %v12789_v28  ;;  %v9966_v58 = vunpack.c.h.bf16 %v12789_v28  ;;  %v8655_v62 = vld [vmem:[%s9070_s19 + $0x40] sm:$0xff] }
 0x32b   : > { %12784 = vst [vmem:[#allocation21_spill] sm:$0xff] %v9951_v19  ;;  %12787 = vst [vmem:[#allocation37_spill] sm:$0xff] %v9957_v27  ;;  %v2427_v18 = vmul.f32 %v8655_v62, %v2395_v47  ;;  %v2428_v6 = vmul.f32 %v8657_v25, %v2396_v13  ;;  %v2429_v49 = vmul.f32 %v9592_v41, %v2397_v7  ;;  %v9975_v16 = vmul.f32 0.5, %v1822_v45 }
 0x32c   : > { %7391 = vmatpush3.bf16.msra.mxu1 %v8653_v53  ;;  %v9954_v53 = vunpack.c.h.bf16 %v12783_v29  ;;  %12788 = vst [vmem:[#allocation116_spill] sm:$0xff] %v9960_v46  ;;  %12790 = vst [vmem:[#allocation40_spill] sm:$0xff] %v9963_v11  ;;  %v8656_v29 = vld [vmem:[%s12354_s4 + $0x4] ss:$8 sps:$4 sm:$0xff]   ;;  %v7819_v10 = vpop.eup %7818  ;;  %v9977_v52 = vmul.f32 0.5, %v1823_v56  ;;  %v9979_v28 = vmul.f32 0.5, %v1824_v31  ;;  %7832 = vtanh.f32 %v1765_v48 }
 0x32d   : > { %7392 = vmatprep.subr.bf16.mxu1 %v8654_v57  ;;  %12791 = vst [vmem:[#allocation117_spill] sm:$0xff] %v9966_v58  ;;  %v1734_v47 = vadd.f32 %v9957_v27, %v9601_v61  ;;  %v7821_v8 = vpop.eup %7820  ;;  %v2518_v41 = vpack.c.bf16 %v9924_v14, %v9915_v34  ;;  %v2461_v13 = vmul.f32 %v7819_v10, %v9907_v24 }
 0x32e   : > { %12785 = vst [vmem:[#allocation115_spill] sm:$0xff] %v9954_v53  ;;  %v1736_v45 = vadd.f32 %v9963_v11, %v9624_v40  ;;  %v2459_v31 = vmul.f32 %v7821_v8, %v9898_v15  ;;  %v12808_v11 = vld [vmem:[#allocation63_spill] sm:$0xff] }
 0x32f   : > { %v7312_v62 = vpop.f32.mrb[92].mxu1  ;;  %v7823_v7 = vpop.eup %7822  ;;  %v9997_v24 = vadd.f32 %v2461_v13, %v2429_v49  ;;  %v1766_v8 = vmul.f32 0.5, %v1734_v47  ;;  %v12796_v13 = vld [vmem:[#allocation22_spill] sm:$0xff]  ;;  %v2401_v47 = vsub.f32 1.0, %v9979_v28 }
 0x330   : > { %7393 = vmatpush3.bf16.msra.mxu1 %v8654_v57  ;;  %v2430_v57 = vmul.f32 %v9596_v3, %v2398_v35  ;;  %v2285_v3 = vadd.f32 %v7312_v62, %v9935_v39  ;;  %v2276_v25 = vpop.f32.mrb[93].mxu1  ;;  %v1735_v35 = vadd.f32 %v9960_v46, %v9614_v20  ;;  %v7825_v48 = vpop.eup %7824  ;;  %v2462_v10 = vmul.f32 %v7823_v7, %v9917_v33 }
 0x331   : > { %4327 = vmatprep.subr.bf16.mxu1 %v8656_v29  ;;  %v9983_v29 = vmul.f32 0.5, %v1825_v1  ;;  %v2277_v61 = vadd.f32 %v2276_v25, %v9951_v19  ;;  %v7313_v56 = vpop.f32.mrb[94].mxu1  ;;  %2594 = vmatmul.mubr.bf16.gmra.mrb[124].mxu1 %v2518_v41  ;;  %12792 = vst [vmem:[#allocation118_spill] sm:$0xff] %v9997_v24  ;;  %v7827_v27 = vpop.eup %7826  ;;  %v2460_v40 = vmul.f32 %v7825_v48, %v9905_v30  ;;  %v10011_v7 = vunpack.c.l.bf16 %v12796_v13 }
 0x332   : > { %7834 = vtanh.f32 %v2285_v3  ;;  %v2288_v1 = vadd.f32 %v7313_v56, %v9940_v32  ;;  %v2279_v62 = vpop.f32.mrb[95].mxu1  ;;  %2603 = vmatprep.mubr.bf16.mxu1 %v12739_v23  ;;  %v10002_v25 = vadd.f32 %v2459_v31, %v2427_v18  ;;  %v7829_v15 = vpop.eup %7828  ;;  %v10004_v41 = vadd.f32 %v2462_v10, %v2430_v57 }
 0x333   : > { %7836 = vtanh.f32 %v2277_v61  ;;  %v2280_v20 = vadd.f32 %v2279_v62, %v9954_v53  ;;  %v7831_v3 = vpop.eup %7830  ;;  %v1767_v56 = vmul.f32 0.5, %v1735_v35  ;;  %v1737_v33 = vadd.f32 %v9966_v58, %v9635_v63  ;;  %12797 = vst [vmem:[#allocation22_spill] sm:$0xff] %v10011_v7  ;;  %v12799_v62 = vld [vmem:[#allocation23_spill] sm:$0xff] }
 0x334   : > { %12793 = vst [vmem:[#allocation119_spill] sm:$0xff] %v10002_v25  ;;  %7838 = vtanh.f32 %v2288_v1  ;;  %12794 = vst [vmem:[#allocation120_spill] sm:$0xff] %v10004_v41  ;;  %v10008_v49 = vadd.f32 %v2460_v40, %v2428_v6  ;;  %v2399_v30 = vsub.f32 1.0, %v9975_v16  ;;  %v1768_v18 = vmul.f32 0.5, %v1736_v45  ;;  %v12802_v40 = vld [vmem:[#allocation43_spill] sm:$0xff] }
 0x335   : > { %7840 = vtanh.f32 %v2280_v20  ;;  %v2400_v61 = vsub.f32 1.0, %v9977_v52  ;;  %v2402_v57 = vsub.f32 1.0, %v9983_v29  ;;  %v1826_v31 = vadd.f32 1.0, %v7827_v27 }
 0x336   : > { %12795 = vst [vmem:[#allocation121_spill] sm:$0xff] %v10008_v49  ;;  %v2519_v35 = vpack.c.bf16 %v10008_v49, %v10002_v25  ;;  %v1827_v63 = vadd.f32 1.0, %v7829_v15  ;;  %v1828_v48 = vadd.f32 1.0, %v7831_v3  ;;  %7842 = vtanh.f32 %v1766_v8  ;;  %v7833_v6 = vpop.eup %7832  ;;  %v12805_v15 = vld [vmem:[#allocation46_spill] sm:$0xff] }
 0x337   : > { %v10020_v1 = vunpack.c.h.bf16 %v12796_v13  ;;  %v10023_v10 = vunpack.c.l.bf16 %v12799_v62  ;;  %7844 = vtanh.f32 %v1767_v56  ;;  %v1769_v45 = vmul.f32 0.5, %v1737_v33  ;;  %v12807_v56 = vld [vmem:[#allocation62_spill] sm:$0xff] }
 0x338   : > { %v10026_v20 = vunpack.c.h.bf16 %v12799_v62  ;;  %v10029_v58 = vunpack.c.l.bf16 %v12802_v40  ;;  %v10032_v27 = vunpack.c.h.bf16 %v12802_v40  ;;  %7846 = vtanh.f32 %v1768_v18 }
 0x339   : > { %12798 = vst [vmem:[#allocation122_spill] sm:$0xff] %v10020_v1  ;;  %12800 = vst [vmem:[#allocation23_spill] sm:$0xff] %v10023_v10  ;;  %2604 = vmatmul.mubr.bf16.gmra.mrb[128].mxu1 %v2519_v35  ;;  %v10035_v8 = vunpack.c.l.bf16 %v12805_v15  ;;  %v2431_v3 = vmul.f32 %v9607_v9, %v2399_v30  ;;  %v2432_v13 = vmul.f32 %v9611_v50, %v2400_v61  ;;  %v10042_v53 = vmul.f32 0.5, %v1826_v31 }
 0x33a   : > { %12801 = vst [vmem:[#allocation123_spill] sm:$0xff] %v10026_v20  ;;  %12803 = vst [vmem:[#allocation43_spill] sm:$0xff] %v10029_v58  ;;  %v2433_v33 = vmul.f32 %v12807_v56, %v2401_v47  ;;  %2613 = vmatprep.mubr.bf16.mxu1 %v12739_v23  ;;  %v2434_v46 = vmul.f32 %v12808_v11, %v2402_v57  ;;  %v10044_v40 = vmul.f32 0.5, %v1827_v63  ;;  %v10046_v18 = vmul.f32 0.5, %v1828_v48 }
 0x33b   : > { %12804 = vst [vmem:[#allocation124_spill] sm:$0xff] %v10032_v27  ;;  %12806 = vst [vmem:[#allocation46_spill] sm:$0xff] %v10035_v8  ;;  %v1829_v19 = vadd.f32 1.0, %v7833_v6  ;;  %7848 = vtanh.f32 %v1769_v45  ;;  %v1738_v47 = vadd.f32 %v10029_v58, %v9652_v54  ;;  %v2520_v11 = vpack.c.bf16 %v10004_v41, %v9997_v24  ;;  %v12811_v58 = vld [vmem:[#allocation68_spill] sm:$0xff] }
 0x33c   : > { %v7835_v62 = vpop.eup %7834 }
 0x33d   : > { %v7837_v32 = vpop.eup %7836  ;;  %v2465_v30 = vmul.f32 %v7835_v62, %v9979_v28 }
 0x33e   : > { %v7839_v61 = vpop.eup %7838  ;;  %v2463_v63 = vmul.f32 %v7837_v32, %v9975_v16  ;;  %v1739_v32 = vadd.f32 %v10032_v27, %v12811_v58 }
 0x33f   : > { %v7841_v48 = vpop.eup %7840  ;;  %v2466_v56 = vmul.f32 %v7839_v61, %v9983_v29  ;;  %v10058_v28 = vadd.f32 %v2465_v30, %v2433_v33  ;;  %v12814_v29 = vld [vmem:[#allocation73_spill] sm:$0xff]  ;;  %v1770_v61 = vmul.f32 0.5, %v1738_v47 }
 0x340   : > { %v7316_v35 = vpop.f32.mrb[96].mxu1  ;;  %v2464_v62 = vmul.f32 %v7841_v48, %v9977_v52  ;;  %v1740_v33 = vadd.f32 %v10035_v8, %v12814_v29  ;;  %v1771_v48 = vmul.f32 0.5, %v1739_v32  ;;  %v12819_v29 = vld [vmem:[#allocation25_spill] sm:$0xff]  ;;  %v12824_v8 = vld [vmem:[#allocation54_spill] sm:$0xff] }
 0x341   : > { %v2301_v9 = vadd.f32 %v7316_v35, %v10011_v7  ;;  %v2292_v50 = vpop.f32.mrb[97].mxu1  ;;  %12809 = vst [vmem:[#allocation62_spill] sm:$0xff] %v10058_v28  ;;  %v10062_v35 = vadd.f32 %v2463_v63, %v2431_v3  ;;  %v10066_v16 = vadd.f32 %v2466_v56, %v2434_v46  ;;  %2614 = vmatmul.mubr.bf16.gmra.mrb[132].mxu1 %v2520_v11  ;;  %v12816_v3 = vld [vmem:[#allocation24_spill] sm:$0xff]  ;;  %v2404_v11 = vsub.f32 1.0, %v10044_v40  ;;  %v12826_v32 = vld [vmem:[#allocation66_spill] sm:$0xff] }
 0x342   : > { %v2293_v57 = vadd.f32 %v2292_v50, %v10023_v10  ;;  %v7317_v31 = vpop.f32.mrb[98].mxu1  ;;  %v1861_v50 = vmul.f32 0.5, %v1829_v19  ;;  %v10073_v30 = vadd.f32 %v2464_v62, %v2432_v13  ;;  %v10076_v19 = vunpack.c.l.bf16 %v12816_v3  ;;  %2623 = vmatprep.mubr.bf16.mxu1 %v12739_v23  ;;  %v12828_v7 = vld [vmem:[#allocation70_spill] sm:$0xff] }
 0x343   : > { %7850 = vtanh.f32 %v2301_v9  ;;  %v2304_v6 = vadd.f32 %v7317_v31, %v10020_v1  ;;  %v2295_v45 = vpop.f32.mrb[99].mxu1  ;;  %12810 = vst [vmem:[#allocation63_spill] sm:$0xff] %v10062_v35  ;;  %12812 = vst [vmem:[#allocation68_spill] sm:$0xff] %v10066_v16  ;;  %v7843_v9 = vpop.eup %7842  ;;  %v10069_v31 = vunpack.c.h.bf16 %v12805_v15  ;;  %v10080_v46 = vunpack.c.h.bf16 %v12816_v3  ;;  %v12827_v1 = vld [vmem:[#allocation67_spill] sm:$0xff] }
 0x344   : > { %7852 = vtanh.f32 %v2293_v57  ;;  %v2296_v54 = vadd.f32 %v2295_v45, %v10026_v20  ;;  %12815 = vst [vmem:[#allocation73_spill] sm:$0xff] %v10073_v30  ;;  %v7845_v52 = vpop.eup %7844  ;;  %12817 = vst [vmem:[#allocation24_spill] sm:$0xff] %v10076_v19  ;;  %v2403_v15 = vsub.f32 1.0, %v10042_v53  ;;  %v2405_v13 = vsub.f32 1.0, %v10046_v18 }
 0x345   : > { %7854 = vtanh.f32 %v2304_v6  ;;  %12813 = vst [vmem:[#allocation125_spill] sm:$0xff] %v10069_v31  ;;  %v7847_v58 = vpop.eup %7846  ;;  %12818 = vst [vmem:[#allocation126_spill] sm:$0xff] %v10080_v46  ;;  %v1741_v57 = vadd.f32 %v10069_v31, %v9680_v12  ;;  %v2406_v63 = vsub.f32 1.0, %v1861_v50  ;;  %v1830_v6 = vadd.f32 1.0, %v7843_v9  ;;  %v12822_v12 = vld [vmem:[#allocation50_spill] sm:$0xff] }
 0x346   : > { %7856 = vtanh.f32 %v2296_v54  ;;  %v1831_v45 = vadd.f32 1.0, %v7845_v52  ;;  %v1772_v56 = vmul.f32 0.5, %v1740_v33  ;;  %v2521_v54 = vpack.c.bf16 %v10073_v30, %v10062_v35  ;;  %v7849_v62 = vpop.eup %7848 }
 0x347   : > { %v10090_v3 = vunpack.c.l.bf16 %v12819_v29  ;;  %v10093_v47 = vunpack.c.h.bf16 %v12819_v29  ;;  %v10096_v27 = vunpack.c.l.bf16 %v12822_v12  ;;  %v1832_v31 = vadd.f32 1.0, %v7847_v58 }
 0x348   : > { %v10099_v20 = vunpack.c.l.bf16 %v12824_v8  ;;  %v2435_v9 = vmul.f32 %v12826_v32, %v2403_v15  ;;  %7858 = vtanh.f32 %v1770_v61  ;;  %v1773_v33 = vmul.f32 0.5, %v1741_v57 }
 0x349   : > { %12820 = vst [vmem:[#allocation25_spill] sm:$0xff] %v10090_v3  ;;  %12821 = vst [vmem:[#allocation127_spill] sm:$0xff] %v10093_v47  ;;  %v2436_v10 = vmul.f32 %v12827_v1, %v2404_v11  ;;  %v2437_v39 = vmul.f32 %v12828_v7, %v2405_v13  ;;  %v2438_v59 = vmul.f32 %v12829_v37, %v2406_v63  ;;  %7860 = vtanh.f32 %v1771_v48 }
 0x34a   : > { %12823 = vst [vmem:[#allocation50_spill] sm:$0xff] %v10096_v27  ;;  %12825 = vst [vmem:[#allocation54_spill] sm:$0xff] %v10099_v20  ;;  %v10105_v44 = vmul.f32 0.5, %v1830_v6  ;;  %v10107_v17 = vmul.f32 0.5, %v1831_v45  ;;  %7862 = vtanh.f32 %v1772_v56  ;;  %2624 = vmatmul.mubr.bf16.gmra.mrb[136].mxu1 %v2521_v54  ;;  %v10110_v57 = vmul.f32 0.5, %v1832_v31  ;;  %v12831_v54 = vld [vmem:[#allocation76_spill] sm:$0xff] }
 0x34b   : > { %v1833_v32 = vadd.f32 1.0, %v7849_v62  ;;  %2633 = vmatprep.mubr.bf16.mxu1 %v12739_v23  ;;  %7864 = vtanh.f32 %v1773_v33  ;;  %v1742_v62 = vadd.f32 %v10096_v27, %v12831_v54 }
 0x34d   : > { %v7851_v52 = vpop.eup %7850  ;;  %v7320_v58 = vpop.f32.mrb[100].mxu1 }
 0x34e   : > { %v7853_v29 = vpop.eup %7852  ;;  %v2469_v15 = vmul.f32 %v7851_v52, %v10046_v18  ;;  %v2317_v7 = vadd.f32 %v7320_v58, %v10076_v19  ;;  %v2308_v37 = vpop.f32.mrb[101].mxu1  ;;  %v12833_v52 = vld [vmem:[#allocation81_spill] sm:$0xff]  ;;  %v2408_v58 = vsub.f32 1.0, %v10107_v17 }
 0x34f   : > { %v7855_v61 = vpop.eup %7854  ;;  %v2467_v1 = vmul.f32 %v7853_v29, %v10042_v53  ;;  %v2309_v13 = vadd.f32 %v2308_v37, %v10090_v3  ;;  %v7321_v63 = vpop.f32.mrb[102].mxu1  ;;  %v2407_v29 = vsub.f32 1.0, %v10105_v44 }
 0x350   : > { %v7857_v11 = vpop.eup %7856  ;;  %v2470_v48 = vmul.f32 %v7855_v61, %v1861_v50  ;;  %v10116_v6 = vadd.f32 %v2469_v15, %v2437_v39  ;;  %7866 = vtanh.f32 %v2317_v7  ;;  %v2320_v18 = vadd.f32 %v7321_v63, %v10080_v46  ;;  %v2311_v31 = vpop.f32.mrb[103].mxu1 }
 0x351   : > { %v2468_v45 = vmul.f32 %v7857_v11, %v10044_v40  ;;  %v10120_v56 = vadd.f32 %v2467_v1, %v2435_v9  ;;  %7868 = vtanh.f32 %v2309_v13  ;;  %v2312_v53 = vadd.f32 %v2311_v31, %v10093_v47  ;;  %v12837_v1 = vld [vmem:[#allocation26_spill] sm:$0xff] }
 0x352   : > { %v10125_v33 = vadd.f32 %v2470_v48, %v2438_v59  ;;  %v1744_v39 = vadd.f32 %v10099_v20, %v12833_v52  ;;  %7870 = vtanh.f32 %v2320_v18  ;;  %v2522_v40 = vpack.c.bf16 %v10066_v16, %v10058_v28  ;;  %v7859_v61 = vpop.eup %7858  ;;  %v12840_v13 = vld [vmem:[#allocation78_spill] sm:$0xff]  ;;  %v12841_v18 = vld [vmem:[#allocation27_spill] sm:$0xff] }
 0x353   : > { %12830 = vst [vmem:[#allocation66_spill] sm:$0xff] %v10120_v56  ;;  %v10129_v50 = vadd.f32 %v2468_v45, %v2436_v10  ;;  %7872 = vtanh.f32 %v2312_v53  ;;  %v10135_v9 = vunpack.c.h.bf16 %v12822_v12  ;;  %v2409_v59 = vsub.f32 1.0, %v10110_v57  ;;  %v7861_v37 = vpop.eup %7860  ;;  %v8658_v45 = vld [vmem:[%s9070_s19 + $0xa0] sm:$0xff]  ;;  %v8659_v52 = vld [vmem:[%s9070_s19 + $0xa8] sm:$0xff] }
 0x354   : > { %12832 = vst [vmem:[#allocation67_spill] sm:$0xff] %v10125_v33  ;;  %v1865_v15 = vmul.f32 0.5, %v1833_v32  ;;  %v10140_v10 = vunpack.c.h.bf16 %v12824_v8  ;;  %v1774_v7 = vmul.f32 0.5, %v1742_v62  ;;  %2634 = vmatmul.mubr.bf16.gmra.mrb[140].mxu1 %v2522_v40  ;;  %v10143_v11 = vunpack.c.l.bf16 %v12837_v1  ;;  %v7863_v32 = vpop.eup %7862  ;;  %v12844_v62 = vld [vmem:[#allocation83_spill] sm:$0xff] }
 0x355   : > { %12834 = vst [vmem:[#allocation70_spill] sm:$0xff] %v10129_v50  ;;  %12835 = vst [vmem:[#allocation71_spill] sm:$0xff] %v10135_v9  ;;  %v10146_v12 = vunpack.c.h.bf16 %v12837_v1  ;;  %v1743_v63 = vadd.f32 %v10135_v9, %v12840_v13  ;;  %v1776_v48 = vmul.f32 0.5, %v1744_v39  ;;  %2643 = vmatprep.mubr.bf16.mxu1 %v12739_v23  ;;  %v10152_v31 = vunpack.c.l.bf16 %v12841_v18  ;;  %v12845_v1 = vld [vmem:[#allocation79_spill] sm:$0xff]  ;;  %v7865_v27 = vpop.eup %7864 }
 0x356   : > { %12836 = vst [vmem:[#allocation76_spill] sm:$0xff] %v10140_v10  ;;  %12838 = vst [vmem:[#allocation81_spill] sm:$0xff] %v10143_v11  ;;  %v10155_v8 = vunpack.c.h.bf16 %v12841_v18  ;;  %v2439_v54 = vmul.f32 %v8658_v45, %v2407_v29  ;;  %v1745_v53 = vadd.f32 %v10140_v10, %v12844_v62  ;;  %v2440_v40 = vmul.f32 %v8659_v52, %v2408_v58 }
 0x357   : > { %12839 = vst [vmem:[#allocation26_spill] sm:$0xff] %v10146_v12  ;;  %12842 = vst [vmem:[#allocation78_spill] sm:$0xff] %v10152_v31  ;;  %v2441_v20 = vmul.f32 %v12845_v1, %v2409_v59  ;;  %v2410_v13 = vsub.f32 1.0, %v1865_v15  ;;  %v1834_v39 = vadd.f32 1.0, %v7859_v61  ;;  %v1835_v47 = vadd.f32 1.0, %v7861_v37 }
 0x358   : > { %12843 = vst [vmem:[#allocation27_spill] sm:$0xff] %v10155_v8  ;;  %7874 = vtanh.f32 %v1774_v7  ;;  %v2523_v46 = vpack.c.bf16 %v10129_v50, %v10120_v56  ;;  %v1836_v45 = vadd.f32 1.0, %v7863_v32  ;;  %v1775_v19 = vmul.f32 0.5, %v1743_v63 }
 0x359   : > { %7876 = vtanh.f32 %v1776_v48  ;;  %v1777_v61 = vmul.f32 0.5, %v1745_v53  ;;  %v1837_v10 = vadd.f32 1.0, %v7865_v27  ;;  %v8660_v48 = vld [vmem:[%s9070_s19 + $0xb8] sm:$0xff] }
 0x35a   : > { %v7867_v29 = vpop.eup %7866 }
 0x35b   : > { %v7869_v62 = vpop.eup %7868  ;;  %v2473_v52 = vmul.f32 %v7867_v29, %v10110_v57  ;;  %v1866_v29 = vmul.f32 0.5, %v1834_v39 }
 0x35c   : > { %v7324_v9 = vpop.f32.mrb[104].mxu1  ;;  %v7871_v1 = vpop.eup %7870  ;;  %v2471_v63 = vmul.f32 %v7869_v62, %v10105_v44  ;;  %2644 = vmatmul.mubr.bf16.gmra.mrb[144].mxu1 %v2523_v46  ;;  %v1867_v44 = vmul.f32 0.5, %v1835_v47  ;;  %v12849_v47 = vld [vmem:[#allocation28_spill] sm:$0xff] }
 0x35d   : > { %v2333_v18 = vadd.f32 %v7324_v9, %v10143_v11  ;;  %v2324_v3 = vpop.f32.mrb[105].mxu1  ;;  %v7873_v32 = vpop.eup %7872  ;;  %v2442_v11 = vmul.f32 %v8660_v48, %v2410_v13  ;;  %v10171_v53 = vadd.f32 %v2473_v52, %v2441_v20  ;;  %2653 = vmatprep.mubr.bf16.mxu1 %v12739_v23  ;;  %v1869_v13 = vmul.f32 0.5, %v1837_v10  ;;  %v12852_v52 = vld [vmem:[#allocation29_spill] sm:$0xff] }
 0x35e   : > { %v2325_v58 = vadd.f32 %v2324_v3, %v10152_v31  ;;  %v7325_v59 = vpop.f32.mrb[106].mxu1  ;;  %v2474_v3 = vmul.f32 %v7871_v1, %v1865_v15  ;;  %v2472_v57 = vmul.f32 %v7873_v32, %v10107_v17  ;;  %v10175_v27 = vadd.f32 %v2471_v63, %v2439_v54 }
 0x35f   : > { %7878 = vtanh.f32 %v2333_v18  ;;  %v2336_v37 = vadd.f32 %v7325_v59, %v10146_v12  ;;  %v2327_v7 = vpop.f32.mrb[107].mxu1  ;;  %v1868_v18 = vmul.f32 0.5, %v1836_v45  ;;  %v2411_v45 = vsub.f32 1.0, %v1866_v29 }
 0x360   : > { %7880 = vtanh.f32 %v2325_v58  ;;  %v2328_v9 = vadd.f32 %v2327_v7, %v10155_v8  ;;  %12846 = vst [vmem:[#allocation83_spill] sm:$0xff] %v10175_v27  ;;  %v10177_v58 = vadd.f32 %v2474_v3, %v2442_v11  ;;  %v10179_v46 = vadd.f32 %v2472_v57, %v2440_v40  ;;  %v8663_v3 = vld [vmem:[%s9070_s19 + $0xc8] sm:$0xff] }
 0x361   : > { %7882 = vtanh.f32 %v2336_v37  ;;  %v2413_v20 = vsub.f32 1.0, %v1868_v18  ;;  %v2524_v59 = vpack.c.bf16 %v10125_v33, %v10116_v6  ;;  %v2412_v54 = vsub.f32 1.0, %v1867_v44 }
 0x362   : > { %7884 = vtanh.f32 %v2328_v9  ;;  %12847 = vst [vmem:[#allocation79_spill] sm:$0xff] %v10177_v58  ;;  %12848 = vst [vmem:[#allocation128_spill] sm:$0xff] %v10179_v46  ;;  %v7875_v15 = vpop.eup %7874  ;;  %v2414_v62 = vsub.f32 1.0, %v1869_v13  ;;  %v10184_v10 = vunpack.c.l.bf16 %v12849_v47  ;;  %v10189_v7 = vunpack.c.h.bf16 %v12849_v47  ;;  %v8662_v9 = vld [vmem:[%s9070_s19 + $0xc0] sm:$0xff] }
 0x363   : > { %7886 = vtanh.f32 %v1777_v61  ;;  %v7877_v17 = vpop.eup %7876  ;;  %v10192_v1 = vunpack.c.l.bf16 %v12852_v52  ;;  %v2443_v63 = vmul.f32 %v8662_v9, %v2411_v45  ;;  %v2444_v57 = vmul.f32 %v8663_v3, %v2412_v54 }
 0x364   : > { %7888 = vtanh.f32 %v1775_v19  ;;  %2654 = vmatmul.mubr.bf16.gmra.mrb[148].mxu1 %v2524_v59  ;;  %12850 = vst [vmem:[#allocation28_spill] sm:$0xff] %v10184_v10  ;;  %v8661_v19 = vld [vmem:[%s9070_s19 + $0xd0] sm:$0xff]  ;;  %12851 = vst [vmem:[#allocation129_spill] sm:$0xff] %v10189_v7  ;;  %v8664_v59 = vld [vmem:[%s9070_s19 + $0xd8] sm:$0xff]  ;;  %v10205_v45 = vunpack.c.h.bf16 %v12852_v52  ;;  %v1840_v54 = vadd.f32 1.0, %v7877_v17 }
 0x365   : > { %v2445_v40 = vmul.f32 %v8661_v19, %v2413_v20  ;;  %2663 = vmatprep.mubr.bf16.mxu1 %v12739_v23  ;;  %12853 = vst [vmem:[#allocation29_spill] sm:$0xff] %v10192_v1  ;;  %v2446_v8 = vmul.f32 %v8664_v59, %v2414_v62 }
 0x366   : > { %12854 = vst [vmem:[#allocation130_spill] sm:$0xff] %v10205_v45  ;;  %v1872_v17 = vmul.f32 0.5, %v1840_v54 }
 0x368   : > { %v2417_v52 = vsub.f32 1.0, %v1872_v17 }
 0x369   : > { %v7879_v39 = vpop.eup %7878 }
 0x36a   : > { %v7881_v11 = vpop.eup %7880  ;;  %v2477_v61 = vmul.f32 %v7879_v39, %v1868_v18  ;;  %v2525_v39 = vpack.c.bf16 %v10179_v46, %v10175_v27 }
 0x36b   : > { %v7883_v37 = vpop.eup %7882  ;;  %v2475_v32 = vmul.f32 %v7881_v11, %v1866_v29 }
 0x36c   : > { %v7885_v48 = vpop.eup %7884  ;;  %v7328_v12 = vpop.f32.mrb[108].mxu1  ;;  %v2478_v20 = vmul.f32 %v7883_v37, %v1869_v13  ;;  %v10197_v19 = vadd.f32 %v2477_v61, %v2445_v40  ;;  %v1838_v40 = vadd.f32 1.0, %v7875_v15  ;;  %2664 = vmatmul.mubr.bf16.gmra.mrb[152].mxu1 %v2525_v39 }
 0x36d   : > { %v7887_v18 = vpop.eup %7886  ;;  %v2349_v47 = vadd.f32 %v7328_v12, %v10184_v10  ;;  %v2340_v31 = vpop.f32.mrb[109].mxu1  ;;  %v2476_v42 = vmul.f32 %v7885_v48, %v1867_v44  ;;  %v10202_v26 = vadd.f32 %v2475_v32, %v2443_v63  ;;  %2673 = vmatprep.mubr.bf16.mxu1 %v12739_v23 }
 0x36e   : > { %v7889_v29 = vpop.eup %7888  ;;  %v2341_v62 = vadd.f32 %v2340_v31, %v10192_v1  ;;  %v7329_v13 = vpop.f32.mrb[110].mxu1  ;;  %v10208_v11 = vadd.f32 %v2478_v20, %v2446_v8  ;;  %v1841_v44 = vadd.f32 1.0, %v7887_v18  ;;  %v1870_v31 = vmul.f32 0.5, %v1838_v40  ;;  %v8665_v20 = vld [vmem:[%s9070_s19 + $0xf0] sm:$0xff]  ;;  %v8667_v40 = vld [vmem:[%s9070_s19 + $0xf8] sm:$0xff] }
 0x36f   : > { %7890 = vtanh.f32 %v2349_v47  ;;  %v2352_v61 = vadd.f32 %v7329_v13, %v10189_v7  ;;  %v2343_v37 = vpop.f32.mrb[111].mxu1  ;;  %v10211_v12 = vadd.f32 %v2476_v42, %v2444_v57  ;;  %v1839_v63 = vadd.f32 1.0, %v7889_v29  ;;  %v8666_v29 = vld [vmem:[%s9070_s19 + $0xe0] sm:$0xff] }
 0x370   : > { %7892 = vtanh.f32 %v2341_v62  ;;  %v2344_v9 = vadd.f32 %v2343_v37, %v10205_v45  ;;  %v1873_v8 = vmul.f32 0.5, %v1841_v44  ;;  %v2415_v32 = vsub.f32 1.0, %v1870_v31 }
 0x371   : > { %12855 = vst [vmem:[#allocation131_spill] sm:$0xff] %v10211_v12  ;;  %7894 = vtanh.f32 %v2352_v61  ;;  %v1871_v15 = vmul.f32 0.5, %v1839_v63  ;;  %v2526_v42 = vpack.c.bf16 %v10177_v58, %v10171_v53  ;;  %v2449_v18 = vmul.f32 %v8665_v20, %v2417_v52 }
 0x372   : > { %7896 = vtanh.f32 %v2344_v9  ;;  %v2418_v48 = vsub.f32 1.0, %v1873_v8  ;;  %v2447_v54 = vmul.f32 %v8666_v29, %v2415_v32  ;;  %v8668_v9 = vld [vmem:[%s9070_s19 + $0xe8] sm:$0xff] }
 0x373   : > { %v2416_v57 = vsub.f32 1.0, %v1871_v15 }
 0x374   : > { %2674 = vmatmul.mubr.bf16.gmra.mrb[156].mxu1 %v2526_v42  ;;  %v2450_v61 = vmul.f32 %v8667_v40, %v2418_v48  ;;  %v2527_v42 = vpack.c.bf16 %v10211_v12, %v10202_v26  ;;  %v12856_v48 = vld [vmem:[#allocation30_spill] sm:$0xff] }
 0x375   : > { %2683 = vmatprep.mubr.bf16.mxu1 %v12739_v23  ;;  %v2448_v63 = vmul.f32 %v8668_v9, %v2416_v57 }
 0x379   : > { %v7891_v3 = vpop.eup %7890 }
 0x37a   : > { %v7893_v59 = vpop.eup %7892  ;;  %v2481_v39 = vmul.f32 %v7891_v3, %v1872_v17 }
 0x37b   : > { %v7895_v47 = vpop.eup %7894  ;;  %v2479_v62 = vmul.f32 %v7893_v59, %v1870_v31  ;;  %v2528_v31 = vpack.c.bf16 %v10208_v11, %v10197_v19 }
 0x37c   : > { %v7897_v13 = vpop.eup %7896  ;;  %v2482_v37 = vmul.f32 %v7895_v47, %v1873_v8  ;;  %v10221_v44 = vadd.f32 %v2481_v39, %v2449_v18  ;;  %2684 = vmatmul.mubr.bf16.gmra.mrb[160].mxu1 %v2527_v42  ;;  %v12857_v39 = vld [vmem:[#allocation31_spill] sm:$0xff] }
 0x37d   : > { %v2480_v45 = vmul.f32 %v7897_v13, %v1871_v15  ;;  %v10226_v52 = vadd.f32 %v2479_v62, %v2447_v54  ;;  %2693 = vmatprep.mubr.bf16.mxu1 %v12739_v23  ;;  %v12858_v13 = vld [vmem:[#allocation33_spill] sm:$0xff] }
 0x37e   : > { %v10228_v20 = vadd.f32 %v2482_v37, %v2450_v61 }
 0x37f   : > { %v10230_v17 = vadd.f32 %v2480_v45, %v2448_v63  ;;  %v12859_v63 = vld [vmem:[#allocation34_spill] sm:$0xff] }
 0x380   : > { %v2530_v15 = vpack.c.bf16 %v10228_v20, %v10221_v44 }
 0x381   : > { %v2529_v8 = vpack.c.bf16 %v10230_v17, %v10226_v52 }
 0x384   : > { %2694 = vmatmul.mubr.bf16.gmra.mrb[164].mxu1 %v2528_v31 }
 0x385   : > { %2703 = vmatprep.mubr.bf16.mxu1 %v12739_v23 }
 0x38c   : > { %2704 = vmatmul.mubr.bf16.gmra.mrb[168].mxu1 %v2529_v8 }
 0x38d   : > { %2713 = vmatprep.mubr.bf16.mxu1 %v12739_v23 }
 0x394   : > { %2714 = vmatmul.mubr.bf16.gmra.mrb[172].mxu1 %v2530_v15 }
 0x3e6   : > { %v10241_v45 = vpop.f32.mrb[112].mxu1 }
 0x3e7   : > { %v2567_v32 = vpop.f32.mrb[113].mxu1 }
 0x3e8   : > { %v2884_v3 = vadd.f32 %v2567_v32, %v12856_v48  ;;  %v10244_v57 = vpop.f32.mrb[114].mxu1 }
 0x3e9   : > { %v2571_v59 = vpop.f32.mrb[115].mxu1 }
 0x3ea   : > { %v2916_v18 = vmul.f32 0.5, %v2884_v3  ;;  %v2885_v47 = vadd.f32 %v2571_v59, %v12857_v39 }
 0x3ec   : > { %7898 = vtanh.f32 %v2916_v18  ;;  %v2917_v29 = vmul.f32 0.5, %v2885_v47 }
 0x3ee   : > { %7900 = vtanh.f32 %v2917_v29  ;;  %v10247_v54 = vpop.f32.mrb[116].mxu1 }
 0x3ef   : > { %v2577_v62 = vpop.f32.mrb[117].mxu1 }
 0x3f0   : > { %v2886_v40 = vadd.f32 %v2577_v62, %v12858_v13  ;;  %v10250_v61 = vpop.f32.mrb[118].mxu1 }
 0x3f1   : > { %v2581_v37 = vpop.f32.mrb[119].mxu1 }
 0x3f2   : > { %v2918_v9 = vmul.f32 0.5, %v2886_v40  ;;  %v2887_v42 = vadd.f32 %v2581_v37, %v12859_v63 }
 0x3f4   : > { %7902 = vtanh.f32 %v2918_v9  ;;  %v2919_v31 = vmul.f32 0.5, %v2887_v42 }
 0x3f6   : > { %v7899_v8 = vpop.eup %7898  ;;  %7904 = vtanh.f32 %v2919_v31  ;;  %v12860_v31 = vld [vmem:[#allocation36_spill] sm:$0xff] }
 0x3f7   : > { %v2980_v15 = vadd.f32 1.0, %v7899_v8 }
 0x3f8   : > { %v7901_v32 = vpop.eup %7900 }
 0x3f9   : > { %v3012_v3 = vmul.f32 0.5, %v2980_v15  ;;  %v2981_v59 = vadd.f32 1.0, %v7901_v32 }
 0x3fb   : > { %v3013_v18 = vmul.f32 0.5, %v2981_v59  ;;  %v3044_v47 = vmul.f32 %v3012_v3, %v9801_v51 }
 0x3fc   : > { %v10255_v37 = vpop.f32.mrb[120].mxu1 }
 0x3fd   : > { %v3045_v29 = vmul.f32 %v3013_v18, %v9807_v4  ;;  %v2587_v9 = vpop.f32.mrb[121].mxu1 }
 0x3fe   : > { %v7903_v62 = vpop.eup %7902  ;;  %v2888_v8 = vadd.f32 %v2587_v9, %v12860_v31  ;;  %v10258_v15 = vpop.f32.mrb[122].mxu1  ;;  %v12862_v9 = vld [vmem:[#allocation39_spill] sm:$0xff] }
 0x3ff   : > { %v2982_v13 = vadd.f32 1.0, %v7903_v62  ;;  %v3076_v39 = vpack.c.bf16 %v3045_v29, %v3044_v47  ;;  %v2591_v32 = vpop.f32.mrb[123].mxu1  ;;  %v12861_v62 = vld [vmem:[#allocation38_spill] sm:$0xff] }
 0x400   : > { %v7905_v48 = vpop.eup %7904  ;;  %v2920_v18 = vmul.f32 0.5, %v2888_v8  ;;  %v2889_v47 = vadd.f32 %v2591_v32, %v12861_v62  ;;  %v12865_v62 = vld [vmem:[#allocation44_spill] sm:$0xff] }
 0x401   : > { %v3014_v40 = vmul.f32 0.5, %v2982_v13  ;;  %v2983_v7 = vadd.f32 1.0, %v7905_v48  ;;  %7346 = vmatprep.mubr.bf16.mxu0 %v3076_v39  ;;  %v8669_v39 = vld [vmem:[%s12354_s4] ss:$8 sps:$4 sm:$0xff]  }
 0x402   : > { %7906 = vtanh.f32 %v2920_v18  ;;  %v2921_v48 = vmul.f32 0.5, %v2889_v47  ;;  %v8671_v18 = vld [vmem:[%s12354_s4 + $0x10] ss:$8 sps:$4 sm:$0xff]  }
 0x403   : > { %v3015_v42 = vmul.f32 0.5, %v2983_v7  ;;  %v3046_v3 = vmul.f32 %v3014_v40, %v9796_v0 }
 0x404   : > { %7908 = vtanh.f32 %v2921_v48  ;;  %v10263_v13 = vpop.f32.mrb[124].mxu1 }
 0x405   : > { %v3047_v59 = vmul.f32 %v3015_v42, %v9803_v36  ;;  %v2597_v7 = vpop.f32.mrb[125].mxu1  ;;  %v8670_v42 = vld [vmem:[%s12354_s4 + $0x14] ss:$8 sps:$4 sm:$0xff]  }
 0x406   : > { %v2890_v40 = vadd.f32 %v2597_v7, %v12862_v9  ;;  %v10269_v31 = vpop.f32.mrb[126].mxu1 }
 0x407   : > { %v3077_v29 = vpack.c.bf16 %v3047_v59, %v3046_v3  ;;  %v2601_v8 = vpop.f32.mrb[127].mxu1  ;;  %v12863_v3 = vld [vmem:[#allocation41_spill] sm:$0xff] }
 0x408   : > { %v2922_v32 = vmul.f32 0.5, %v2890_v40  ;;  %v2891_v59 = vadd.f32 %v2601_v8, %v12863_v3 }
 0x409   : > { %7347 = vmatmul.mubr.bf16.vlgmr.msra.gmra.mrb[112].mxu0 %v3077_v29  ;;  %v8672_v29 = vld [vmem:[%s12354_s4 + $0x24] ss:$8 sps:$4 sm:$0xff]  }
 0x40a   : > { %3430 = vmatpush1.bf16.msra.mxu0 %v8669_v39  ;;  %7910 = vtanh.f32 %v2922_v32  ;;  %v2923_v47 = vmul.f32 0.5, %v2891_v59 }
 0x40b   : > { %3431 = vmatprep.subr.bf16.mxu0 %v8670_v42  ;;  %v8673_v42 = vld [vmem:[%s12354_s4 + $0x20] ss:$8 sps:$4 sm:$0xff]  }
 0x40c   : > { %v7907_v48 = vpop.eup %7906  ;;  %7912 = vtanh.f32 %v2923_v47  ;;  %v10281_v7 = vpop.f32.mrb[128].mxu1 }
 0x40d   : > { %v2984_v39 = vadd.f32 1.0, %v7907_v48  ;;  %v2607_v40 = vpop.f32.mrb[129].mxu1 }
 0x40e   : > { %3432 = vmatpush1.bf16.msra.mxu0 %v8671_v18  ;;  %v7909_v8 = vpop.eup %7908  ;;  %v12864_v18 = vld [vmem:[#allocation42_spill] sm:$0xff]  ;;  %v10287_v59 = vpop.f32.mrb[130].mxu1 }
 0x40f   : > { %3433 = vmatprep.subr.bf16.mxu0 %v8672_v29  ;;  %v2892_v32 = vadd.f32 %v2607_v40, %v12864_v18  ;;  %v8674_v29 = vld [vmem:[%s12354_s4 + $0x34] ss:$8 sps:$4 sm:$0xff]   ;;  %v3016_v47 = vmul.f32 0.5, %v2984_v39  ;;  %v2985_v3 = vadd.f32 1.0, %v7909_v8  ;;  %v2611_v9 = vpop.f32.mrb[131].mxu1 }
 0x410   : > { %v2893_v63 = vadd.f32 %v2611_v9, %v12865_v62  ;;  %v8676_v18 = vld [vmem:[%s12354_s4 + $0x44] ss:$8 sps:$4 sm:$0xff]  }
 0x411   : > { %v2924_v48 = vmul.f32 0.5, %v2892_v32  ;;  %v3017_v1 = vmul.f32 0.5, %v2985_v3  ;;  %v3048_v39 = vmul.f32 %v3016_v47, %v9921_v43 }
 0x412   : > { %3434 = vmatpush1.bf16.msra.mxu0 %v8673_v42  ;;  %v8675_v42 = vld [vmem:[%s12354_s4 + $0x30] ss:$8 sps:$4 sm:$0xff]   ;;  %v2925_v40 = vmul.f32 0.5, %v2893_v63  ;;  %v8677_v63 = vld [vmem:[%s12354_s4 + $0x40] ss:$8 sps:$4 sm:$0xff]  }
 0x413   : > { %3435 = vmatprep.subr.bf16.mxu0 %v8674_v29  ;;  %7914 = vtanh.f32 %v2924_v48  ;;  %v3049_v8 = vmul.f32 %v3017_v1, %v9930_v21  ;;  %v8678_v1 = vld [vmem:[%s12354_s4 + $0x54] ss:$8 sps:$4 sm:$0xff]  }
 0x414   : > { %v7911_v32 = vpop.eup %7910  ;;  %7916 = vtanh.f32 %v2925_v40  ;;  %v10301_v9 = vpop.f32.mrb[132].mxu1 }
 0x415   : > { %v2986_v3 = vadd.f32 1.0, %v7911_v32  ;;  %v2617_v29 = vpop.f32.mrb[133].mxu1  ;;  %v3078_v62 = vpack.c.bf16 %v3049_v8, %v3048_v39  ;;  %v12868_v8 = vld [vmem:[#allocation47_spill] sm:$0xff] }
 0x416   : > { %3436 = vmatpush1.bf16.msra.mxu0 %v8675_v42  ;;  %v7913_v48 = vpop.eup %7912  ;;  %v12866_v42 = vld [vmem:[#allocation45_spill] sm:$0xff] }
 0x417   : > { %3437 = vmatprep.subr.bf16.mxu0 %v8676_v18  ;;  %v2894_v10 = vadd.f32 %v2617_v29, %v12866_v42  ;;  %v10307_v18 = vpop.f32.mrb[134].mxu1  ;;  %v3018_v47 = vmul.f32 0.5, %v2986_v3  ;;  %v2987_v40 = vadd.f32 1.0, %v7913_v48  ;;  %7350 = vmatprep.mubr.bf16.mxu0 %v3078_v62  ;;  %v8680_v42 = vld [vmem:[%s12354_s4 + $0x64] ss:$8 sps:$4 sm:$0xff]  }
 0x418   : > { %12867 = vst [vmem:[#allocation132_spill] sm:$0xff] %v10307_v18  ;;  %v2621_v32 = vpop.f32.mrb[135].mxu1 }
 0x419   : > { %v2926_v39 = vmul.f32 0.5, %v2894_v10  ;;  %v2895_v21 = vadd.f32 %v2621_v32, %v12868_v8  ;;  %v3019_v43 = vmul.f32 0.5, %v2987_v40  ;;  %v3050_v3 = vmul.f32 %v3018_v47, %v9915_v34 }
 0x41a   : > { %3438 = vmatpush1.bf16.msra.mxu0 %v8677_v63  ;;  %v8679_v63 = vld [vmem:[%s12354_s4 + $0x50] ss:$8 sps:$4 sm:$0xff]  }
 0x41b   : > { %3439 = vmatprep.subr.bf16.mxu0 %v8678_v1  ;;  %7918 = vtanh.f32 %v2926_v39  ;;  %v2927_v29 = vmul.f32 0.5, %v2895_v21  ;;  %v3051_v62 = vmul.f32 %v3019_v43, %v9924_v14  ;;  %v8681_v21 = vld [vmem:[%s12354_s4 + $0x60] ss:$8 sps:$4 sm:$0xff]   ;;  %v8682_v43 = vld [vmem:[%s12354_s4 + $0x74] ss:$8 sps:$4 sm:$0xff]  }
 0x41d   : > { %v7915_v10 = vpop.eup %7914  ;;  %7920 = vtanh.f32 %v2927_v29  ;;  %v10321_v48 = vpop.f32.mrb[136].mxu1  ;;  %v3079_v32 = vpack.c.bf16 %v3051_v62, %v3050_v3  ;;  %v12872_v62 = vld [vmem:[#allocation49_spill] sm:$0xff] }
 0x41e   : > { %3440 = vmatpush1.bf16.msra.mxu0 %v8679_v63  ;;  %12869 = vst [vmem:[#allocation133_spill] sm:$0xff] %v10321_v48  ;;  %v2988_v1 = vadd.f32 1.0, %v7915_v10  ;;  %v2627_v40 = vpop.f32.mrb[137].mxu1  ;;  %v7917_v39 = vpop.eup %7916  ;;  %v12870_v63 = vld [vmem:[#allocation48_spill] sm:$0xff] }
 0x41f   : > { %3441 = vmatprep.subr.bf16.mxu0 %v8680_v42  ;;  %v2896_v8 = vadd.f32 %v2627_v40, %v12870_v63  ;;  %v10327_v42 = vpop.f32.mrb[138].mxu1  ;;  %v2989_v29 = vadd.f32 1.0, %v7917_v39  ;;  %7351 = vmatmul.mubr.bf16.gmra.mrb[116].mxu0 %v3079_v32  ;;  %v10339_v63 = vld [vmem:[%s12357_s7] sm:$0xff]  }
 0x420   : > { %12871 = vst [vmem:[#allocation134_spill] sm:$0xff] %v10327_v42  ;;  %v3020_v47 = vmul.f32 0.5, %v2988_v1  ;;  %v2631_v10 = vpop.f32.mrb[139].mxu1  ;;  %12873 = vst [vmem:[#allocation135_spill] sm:$0xff] %v10339_v63 }
 0x421   : > { %v2928_v3 = vmul.f32 0.5, %v2896_v8  ;;  %v2897_v14 = vadd.f32 %v2631_v10, %v12872_v62  ;;  %v3021_v34 = vmul.f32 0.5, %v2989_v29 }
 0x422   : > { %3442 = vmatpush1.bf16.msra.mxu0 %v8681_v21  ;;  %v8683_v21 = vld [vmem:[%s12354_s4 + $0x70] ss:$8 sps:$4 sm:$0xff]   ;;  %v3052_v1 = vmul.f32 %v3020_v47, %v10002_v25 }
 0x423   : > { %3443 = vmatprep.subr.bf16.mxu0 %v8682_v43  ;;  %7922 = vtanh.f32 %v2928_v3  ;;  %v2929_v40 = vmul.f32 0.5, %v2897_v14  ;;  %v3053_v8 = vmul.f32 %v3021_v34, %v10008_v49  ;;  %v12874_v14 = vld [vmem:[#allocation51_spill] sm:$0xff]  ;;  %v12876_v47 = vld [vmem:[#allocation52_spill] sm:$0xff] }
 0x425   : > { %v7919_v32 = vpop.eup %7918  ;;  %7924 = vtanh.f32 %v2929_v40  ;;  %v3080_v10 = vpack.c.bf16 %v3053_v8, %v3052_v1 }
 0x426   : > { %3444 = vmatpush1.bf16.msra.mxu0 %v8683_v21  ;;  %v2990_v43 = vadd.f32 1.0, %v7919_v32 }
 0x427   : > { %7426 = vmatprep.subr.bf16.mxu0 %v10339_v63  ;;  %v10344_v39 = vpop.f32.mrb[140].mxu1  ;;  %v7921_v3 = vpop.eup %7920  ;;  %7354 = vmatprep.mubr.bf16.mxu0 %v3080_v10 }
 0x428   : > { %v2637_v29 = vpop.f32.mrb[141].mxu1  ;;  %v3022_v42 = vmul.f32 0.5, %v2990_v43  ;;  %v2991_v48 = vadd.f32 1.0, %v7921_v3 }
 0x429   : > { %v2898_v21 = vadd.f32 %v2637_v29, %v12874_v14  ;;  %v10347_v62 = vpop.f32.mrb[142].mxu1 }
 0x42a   : > { %12875 = vst [vmem:[#allocation136_spill] sm:$0xff] %v10347_v62  ;;  %v2641_v18 = vpop.f32.mrb[143].mxu1  ;;  %v3023_v34 = vmul.f32 0.5, %v2991_v48  ;;  %v3054_v49 = vmul.f32 %v3022_v42, %v9997_v24  ;;  %v12877_v62 = vld [vmem:[#allocation55_spill] sm:$0xff]  ;;  %v12878_v42 = vld [vmem:[#allocation56_spill] sm:$0xff]  ;;  %v12879_v24 = vld [vmem:[#allocation57_spill] sm:$0xff] }
 0x42b   : > { %v2930_v63 = vmul.f32 0.5, %v2898_v21  ;;  %v2899_v25 = vadd.f32 %v2641_v18, %v12876_v47 }
 0x42c   : > { %v3055_v32 = vmul.f32 %v3023_v34, %v10004_v41 }
 0x42d   : > { %7926 = vtanh.f32 %v2930_v63  ;;  %v2931_v40 = vmul.f32 0.5, %v2899_v25  ;;  %v7923_v1 = vpop.eup %7922 }
 0x42e   : > { %v2992_v29 = vadd.f32 1.0, %v7923_v1  ;;  %v3081_v43 = vpack.c.bf16 %v3055_v32, %v3054_v49 }
 0x42f   : > { %7928 = vtanh.f32 %v2931_v40  ;;  %v10352_v8 = vpop.f32.mrb[144].mxu1  ;;  %v7925_v3 = vpop.eup %7924 }
 0x430   : > { %v2647_v14 = vpop.f32.mrb[145].mxu1  ;;  %v3024_v18 = vmul.f32 0.5, %v2992_v29  ;;  %v2993_v48 = vadd.f32 1.0, %v7925_v3  ;;  %7355 = vmatmul.mubr.bf16.gmra.mrb[120].mxu0 %v3081_v43 }
 0x431   : > { %v2900_v10 = vadd.f32 %v2647_v14, %v12877_v62  ;;  %v10355_v21 = vpop.f32.mrb[146].mxu1 }
 0x432   : > { %v2651_v63 = vpop.f32.mrb[147].mxu1  ;;  %v3025_v34 = vmul.f32 0.5, %v2993_v48  ;;  %v3056_v41 = vmul.f32 %v3024_v18, %v10062_v35  ;;  %v12880_v18 = vld [vmem:[#allocation58_spill] sm:$0xff]  ;;  %v12881_v35 = vld [vmem:[#allocation59_spill] sm:$0xff] }
 0x433   : > { %v2932_v25 = vmul.f32 0.5, %v2900_v10  ;;  %v2901_v47 = vadd.f32 %v2651_v63, %v12878_v42 }
 0x434   : > { %v3057_v1 = vmul.f32 %v3025_v34, %v10073_v30 }
 0x435   : > { %7930 = vtanh.f32 %v2932_v25  ;;  %v2933_v40 = vmul.f32 0.5, %v2901_v47 }
 0x436   : > { %v3082_v29 = vpack.c.bf16 %v3057_v1, %v3056_v41 }
 0x437   : > { %v7927_v49 = vpop.eup %7926  ;;  %7932 = vtanh.f32 %v2933_v40  ;;  %v10360_v32 = vpop.f32.mrb[148].mxu1 }
 0x438   : > { %v2994_v14 = vadd.f32 1.0, %v7927_v49  ;;  %v2657_v62 = vpop.f32.mrb[149].mxu1  ;;  %7358 = vmatprep.mubr.bf16.mxu0 %v3082_v29 }
 0x439   : > { %v7929_v3 = vpop.eup %7928  ;;  %v2902_v43 = vadd.f32 %v2657_v62, %v12879_v24  ;;  %v10363_v10 = vpop.f32.mrb[150].mxu1 }
 0x43a   : > { %v3026_v63 = vmul.f32 0.5, %v2994_v14  ;;  %v2995_v48 = vadd.f32 1.0, %v7929_v3  ;;  %v2661_v25 = vpop.f32.mrb[151].mxu1 }
 0x43b   : > { %v2934_v47 = vmul.f32 0.5, %v2902_v43  ;;  %v2903_v42 = vadd.f32 %v2661_v25, %v12880_v18 }
 0x43c   : > { %v3027_v34 = vmul.f32 0.5, %v2995_v48  ;;  %v3058_v30 = vmul.f32 %v3026_v63, %v10058_v28  ;;  %v12882_v63 = vld [vmem:[#allocation60_spill] sm:$0xff]  ;;  %v12883_v28 = vld [vmem:[#allocation61_spill] sm:$0xff] }
 0x43d   : > { %7934 = vtanh.f32 %v2934_v47  ;;  %v2935_v40 = vmul.f32 0.5, %v2903_v42 }
 0x43e   : > { %v3059_v49 = vmul.f32 %v3027_v34, %v10066_v16 }
 0x43f   : > { %v7931_v41 = vpop.eup %7930  ;;  %7936 = vtanh.f32 %v2935_v40  ;;  %v10368_v1 = vpop.f32.mrb[152].mxu1 }
 0x440   : > { %v2996_v62 = vadd.f32 1.0, %v7931_v41  ;;  %v2667_v24 = vpop.f32.mrb[153].mxu1  ;;  %v3083_v14 = vpack.c.bf16 %v3059_v49, %v3058_v30 }
 0x441   : > { %v7933_v3 = vpop.eup %7932  ;;  %v2904_v29 = vadd.f32 %v2667_v24, %v12881_v35  ;;  %v10371_v43 = vpop.f32.mrb[154].mxu1 }
 0x442   : > { %v3028_v25 = vmul.f32 0.5, %v2996_v62  ;;  %v2997_v48 = vadd.f32 1.0, %v7933_v3  ;;  %v2671_v47 = vpop.f32.mrb[155].mxu1  ;;  %7359 = vmatmul.mubr.bf16.gmra.mrb[124].mxu0 %v3083_v14 }
 0x443   : > { %v2936_v42 = vmul.f32 0.5, %v2904_v29  ;;  %v2905_v18 = vadd.f32 %v2671_v47, %v12882_v63 }
 0x444   : > { %v3029_v34 = vmul.f32 0.5, %v2997_v48  ;;  %v3060_v16 = vmul.f32 %v3028_v25, %v10120_v56  ;;  %v12884_v25 = vld [vmem:[#allocation64_spill] sm:$0xff]  ;;  %v12885_v56 = vld [vmem:[#allocation65_spill] sm:$0xff] }
 0x445   : > { %7938 = vtanh.f32 %v2936_v42  ;;  %v2937_v40 = vmul.f32 0.5, %v2905_v18 }
 0x446   : > { %v3061_v41 = vmul.f32 %v3029_v34, %v10129_v50 }
 0x447   : > { %v7935_v30 = vpop.eup %7934  ;;  %7940 = vtanh.f32 %v2937_v40  ;;  %v10376_v49 = vpop.f32.mrb[156].mxu1 }
 0x448   : > { %v2998_v24 = vadd.f32 1.0, %v7935_v30  ;;  %v2677_v35 = vpop.f32.mrb[157].mxu1  ;;  %v3084_v62 = vpack.c.bf16 %v3061_v41, %v3060_v16 }
 0x449   : > { %v7937_v3 = vpop.eup %7936  ;;  %v2906_v14 = vadd.f32 %v2677_v35, %v12883_v28  ;;  %v10379_v29 = vpop.f32.mrb[158].mxu1 }
 0x44a   : > { %v3030_v47 = vmul.f32 0.5, %v2998_v24  ;;  %v2999_v48 = vadd.f32 1.0, %v7937_v3  ;;  %v2681_v42 = vpop.f32.mrb[159].mxu1  ;;  %7362 = vmatprep.mubr.bf16.mxu0 %v3084_v62 }
 0x44b   : > { %v2938_v18 = vmul.f32 0.5, %v2906_v14  ;;  %v2907_v63 = vadd.f32 %v2681_v42, %v12884_v25 }
 0x44c   : > { %v3031_v34 = vmul.f32 0.5, %v2999_v48  ;;  %v3062_v50 = vmul.f32 %v3030_v47, %v10116_v6  ;;  %v12887_v47 = vld [vmem:[#allocation69_spill] sm:$0xff] }
 0x44d   : > { %7942 = vtanh.f32 %v2938_v18  ;;  %v2939_v40 = vmul.f32 0.5, %v2907_v63 }
 0x44e   : > { %v3063_v30 = vmul.f32 %v3031_v34, %v10125_v33 }
 0x44f   : > { %v7939_v16 = vpop.eup %7938  ;;  %7944 = vtanh.f32 %v2939_v40  ;;  %v10384_v41 = vpop.f32.mrb[160].mxu1 }
 0x450   : > { %v3000_v35 = vadd.f32 1.0, %v7939_v16  ;;  %v2687_v28 = vpop.f32.mrb[161].mxu1  ;;  %v3085_v24 = vpack.c.bf16 %v3063_v30, %v3062_v50 }
 0x451   : > { %v7941_v3 = vpop.eup %7940  ;;  %v2908_v62 = vadd.f32 %v2687_v28, %v12885_v56  ;;  %v10387_v14 = vpop.f32.mrb[162].mxu1 }
 0x452   : > { %12886 = vst [vmem:[#allocation137_spill] sm:$0xff] %v10387_v14  ;;  %v3032_v42 = vmul.f32 0.5, %v3000_v35  ;;  %v3001_v48 = vadd.f32 1.0, %v7941_v3  ;;  %v2691_v18 = vpop.f32.mrb[163].mxu1  ;;  %7363 = vmatmul.mubr.bf16.gmra.mrb[128].mxu0 %v3085_v24  ;;  %v12888_v14 = vld [vmem:[#allocation72_spill] sm:$0xff] }
 0x453   : > { %v2940_v63 = vmul.f32 0.5, %v2908_v62  ;;  %v2909_v25 = vadd.f32 %v2691_v18, %v12887_v47 }
 0x454   : > { %v3033_v34 = vmul.f32 0.5, %v3001_v48  ;;  %v3064_v33 = vmul.f32 %v3032_v42, %v10175_v27  ;;  %v12889_v42 = vld [vmem:[#allocation74_spill] sm:$0xff]  ;;  %v12890_v27 = vld [vmem:[#allocation75_spill] sm:$0xff] }
 0x455   : > { %7946 = vtanh.f32 %v2940_v63  ;;  %v2941_v40 = vmul.f32 0.5, %v2909_v25 }
 0x456   : > { %v3065_v16 = vmul.f32 %v3033_v34, %v10179_v46 }
 0x457   : > { %v7943_v50 = vpop.eup %7942  ;;  %7948 = vtanh.f32 %v2941_v40  ;;  %v10392_v30 = vpop.f32.mrb[164].mxu1 }
 0x458   : > { %v3002_v28 = vadd.f32 1.0, %v7943_v50  ;;  %v2697_v56 = vpop.f32.mrb[165].mxu1  ;;  %v3086_v35 = vpack.c.bf16 %v3065_v16, %v3064_v33 }
 0x459   : > { %v7945_v3 = vpop.eup %7944  ;;  %v2910_v24 = vadd.f32 %v2697_v56, %v12888_v14  ;;  %v10395_v62 = vpop.f32.mrb[166].mxu1 }
 0x45a   : > { %v3034_v18 = vmul.f32 0.5, %v3002_v28  ;;  %v3003_v48 = vadd.f32 1.0, %v7945_v3  ;;  %v2701_v63 = vpop.f32.mrb[167].mxu1  ;;  %7366 = vmatprep.mubr.bf16.mxu0 %v3086_v35 }
 0x45b   : > { %v2942_v25 = vmul.f32 0.5, %v2910_v24  ;;  %v2911_v47 = vadd.f32 %v2701_v63, %v12889_v42 }
 0x45c   : > { %v3035_v34 = vmul.f32 0.5, %v3003_v48  ;;  %v3066_v46 = vmul.f32 %v3034_v18, %v10171_v53  ;;  %v12892_v18 = vld [vmem:[#allocation77_spill] sm:$0xff] }
 0x45d   : > { %7950 = vtanh.f32 %v2942_v25  ;;  %v2943_v40 = vmul.f32 0.5, %v2911_v47 }
 0x45e   : > { %v3067_v50 = vmul.f32 %v3035_v34, %v10177_v58 }
 0x45f   : > { %v7947_v33 = vpop.eup %7946  ;;  %7952 = vtanh.f32 %v2943_v40  ;;  %v10400_v16 = vpop.f32.mrb[168].mxu1 }
 0x460   : > { %v3004_v56 = vadd.f32 1.0, %v7947_v33  ;;  %v2707_v14 = vpop.f32.mrb[169].mxu1  ;;  %v3087_v28 = vpack.c.bf16 %v3067_v50, %v3066_v46 }
 0x461   : > { %v7949_v3 = vpop.eup %7948  ;;  %v2912_v35 = vadd.f32 %v2707_v14, %v12890_v27  ;;  %v10403_v24 = vpop.f32.mrb[170].mxu1 }
 0x462   : > { %12891 = vst [vmem:[#allocation138_spill] sm:$0xff] %v10403_v24  ;;  %v3036_v63 = vmul.f32 0.5, %v3004_v56  ;;  %v3005_v48 = vadd.f32 1.0, %v7949_v3  ;;  %v2711_v25 = vpop.f32.mrb[171].mxu1  ;;  %7367 = vmatmul.mubr.bf16.gmra.mrb[132].mxu0 %v3087_v28  ;;  %v12893_v24 = vld [vmem:[#allocation80_spill] sm:$0xff] }
 0x463   : > { %v2944_v47 = vmul.f32 0.5, %v2912_v35  ;;  %v2913_v42 = vadd.f32 %v2711_v25, %v12892_v18 }
 0x464   : > { %v3037_v34 = vmul.f32 0.5, %v3005_v48  ;;  %v3068_v58 = vmul.f32 %v3036_v63, %v10202_v26 }
 0x465   : > { %7954 = vtanh.f32 %v2944_v47  ;;  %v2945_v40 = vmul.f32 0.5, %v2913_v42 }
 0x466   : > { %v3069_v33 = vmul.f32 %v3037_v34, %v10211_v12 }
 0x467   : > { %v7951_v46 = vpop.eup %7950  ;;  %7956 = vtanh.f32 %v2945_v40  ;;  %v10408_v50 = vpop.f32.mrb[172].mxu1 }
 0x468   : > { %v3006_v14 = vadd.f32 1.0, %v7951_v46  ;;  %v2717_v27 = vpop.f32.mrb[173].mxu1  ;;  %v3088_v56 = vpack.c.bf16 %v3069_v33, %v3068_v58 }
 0x469   : > { %v7953_v3 = vpop.eup %7952  ;;  %v2914_v28 = vadd.f32 %v2717_v27, %v12893_v24  ;;  %v10411_v35 = vpop.f32.mrb[174].mxu1 }
 0x46a   : > { %v3038_v25 = vmul.f32 0.5, %v3006_v14  ;;  %v3007_v48 = vadd.f32 1.0, %v7953_v3  ;;  %v2721_v47 = vpop.f32.mrb[175].mxu1  ;;  %7370 = vmatprep.mubr.bf16.mxu0 %v3088_v56 }
 0x46b   : > { %v2946_v42 = vmul.f32 0.5, %v2914_v28  ;;  %v2915_v63 = vadd.f32 %v2721_v47, %v9707_v38 }
 0x46c   : > { %v3039_v34 = vmul.f32 0.5, %v3007_v48  ;;  %v3070_v18 = vmul.f32 %v3038_v25, %v10197_v19 }
 0x46d   : > { %7958 = vtanh.f32 %v2946_v42  ;;  %v2947_v40 = vmul.f32 0.5, %v2915_v63 }
 0x46e   : > { %v3071_v46 = vmul.f32 %v3039_v34, %v10208_v11 }
 0x46f   : > { %v7955_v58 = vpop.eup %7954  ;;  %7960 = vtanh.f32 %v2947_v40 }
 0x470   : > { %v3008_v33 = vadd.f32 1.0, %v7955_v58  ;;  %v3089_v27 = vpack.c.bf16 %v3071_v46, %v3070_v18  ;;  %v2727_v58 = vadd.f32 %v10250_v61, %v9728_v5 }
 0x471   : > { %v7957_v24 = vpop.eup %7956 }
 0x472   : > { %v3040_v12 = vmul.f32 0.5, %v3008_v33  ;;  %v3009_v14 = vadd.f32 1.0, %v7957_v24  ;;  %7371 = vmatmul.mubr.bf16.gmra.mrb[136].mxu0 %v3089_v27  ;;  %v2724_v24 = vadd.f32 %v10241_v45, %v9722_v55 }
 0x474   : > { %v3041_v3 = vmul.f32 0.5, %v3009_v14  ;;  %v3072_v56 = vmul.f32 %v3040_v12, %v10226_v52  ;;  %v2726_v12 = vadd.f32 %v10247_v54, %v9725_v60  ;;  %v2756_v27 = vmul.f32 0.5, %v2724_v24  ;;  %v12896_v24 = vld [vmem:[#allocation90_spill] sm:$0xff] }
 0x475   : > { %v2759_v14 = vmul.f32 0.5, %v2727_v58 }
 0x476   : > { %v3073_v28 = vmul.f32 %v3041_v3, %v10230_v17  ;;  %v2758_v33 = vmul.f32 0.5, %v2726_v12 }
 0x477   : > { %v7959_v48 = vpop.eup %7958 }
 0x478   : > { %v3010_v47 = vadd.f32 1.0, %v7959_v48  ;;  %v3090_v42 = vpack.c.bf16 %v3073_v28, %v3072_v56  ;;  %7962 = vtanh.f32 %v2758_v33  ;;  %v12897_v33 = vld [vmem:[#allocation91_spill] sm:$0xff] }
 0x479   : > { %v7961_v63 = vpop.eup %7960  ;;  %7964 = vtanh.f32 %v2756_v27  ;;  %v2728_v27 = vadd.f32 %v10255_v37, %v12897_v33 }
 0x47a   : > { %v3042_v25 = vmul.f32 0.5, %v3010_v47  ;;  %v3011_v38 = vadd.f32 1.0, %v7961_v63  ;;  %7374 = vmatprep.mubr.bf16.mxu0 %v3090_v42  ;;  %7966 = vtanh.f32 %v2759_v14  ;;  %v12894_v63 = vld [vmem:[#allocation88_spill] sm:$0xff] }
 0x47c   : > { %v3043_v34 = vmul.f32 0.5, %v3011_v38  ;;  %v3074_v40 = vmul.f32 %v3042_v25, %v10221_v44  ;;  %v2725_v38 = vadd.f32 %v10244_v57, %v9735_v2 }
 0x47e   : > { %v3075_v18 = vmul.f32 %v3043_v34, %v10228_v20  ;;  %v2757_v3 = vmul.f32 0.5, %v2725_v38 }
 0x480   : > { %v3091_v46 = vpack.c.bf16 %v3075_v18, %v3074_v40  ;;  %7968 = vtanh.f32 %v2757_v3  ;;  %v12895_v40 = vld [vmem:[#allocation89_spill] sm:$0xff]  ;;  %v12898_v3 = vld [vmem:[#allocation92_spill] sm:$0xff] }
 0x482   : > { %7375 = vmatmul.mubr.bf16.gmra.mrb[140].mxu0 %v3091_v46  ;;  %v7963_v56 = vpop.eup %7962 }
 0x483   : > { %3461 = vmatprep.mubr.bf16.mxu0 %v12739_v23  ;;  %v7965_v28 = vpop.eup %7964  ;;  %v2822_v61 = vadd.f32 1.0, %v7963_v56  ;;  %v2729_v56 = vadd.f32 %v10258_v15, %v12898_v3 }
 0x484   : > { %v7967_v48 = vpop.eup %7966  ;;  %v2820_v34 = vadd.f32 1.0, %v7965_v28  ;;  %v12899_v28 = vld [vmem:[#allocation93_spill] sm:$0xff] }
 0x485   : > { %v2823_v12 = vadd.f32 1.0, %v7967_v48  ;;  %v2854_v14 = vmul.f32 0.5, %v2822_v61 }
 0x48a   : > { %v7969_v42 = vpop.eup %7968 }
 0x48b   : > { %v2821_v38 = vadd.f32 1.0, %v7969_v42  ;;  %v3287_v42 = vsub.f32 1.0, %v2854_v14 }
 0x4dc   : > { %v7348_v54 = vpop.f32.mrb[112].mxu0 }
 0x4dd   : > { %v3135_v45 = vadd.f32 %v7348_v54, %v9742_v22  ;;  %v3126_v47 = vpop.f32.mrb[113].mxu0  ;;  %v2852_v54 = vmul.f32 0.5, %v2820_v34  ;;  %v3319_v34 = vmul.f32 %v3287_v42, %v9796_v0  ;;  %v12901_v0 = vld [vmem:[#allocation95_spill] sm:$0xff]  ;;  %v12905_v42 = vld [vmem:[#allocation132_spill] sm:$0xff] }
 0x4de   : > { %v3127_v25 = vadd.f32 %v3126_v47, %v12894_v63  ;;  %v7349_v57 = vpop.f32.mrb[114].mxu0  ;;  %v2855_v47 = vmul.f32 0.5, %v2823_v12 }
 0x4df   : > { %7970 = vtanh.f32 %v3135_v45  ;;  %v3138_v18 = vadd.f32 %v7349_v57, %v12895_v40  ;;  %v3129_v46 = vpop.f32.mrb[115].mxu0  ;;  %v2730_v45 = vadd.f32 %v10263_v13, %v12899_v28  ;;  %v12900_v57 = vld [vmem:[#allocation94_spill] sm:$0xff]  ;;  %v3285_v40 = vsub.f32 1.0, %v2852_v54 }
 0x4e0   : > { %7972 = vtanh.f32 %v3127_v25  ;;  %v3130_v58 = vadd.f32 %v3129_v46, %v12896_v24  ;;  %v2731_v48 = vadd.f32 %v10269_v31, %v12900_v57  ;;  %v2853_v25 = vmul.f32 0.5, %v2821_v38 }
 0x4e1   : > { %7974 = vtanh.f32 %v3138_v18  ;;  %v2760_v46 = vmul.f32 0.5, %v2728_v27  ;;  %v2761_v24 = vmul.f32 0.5, %v2729_v56  ;;  %v2762_v37 = vmul.f32 0.5, %v2730_v45 }
 0x4e2   : > { %7976 = vtanh.f32 %v3130_v58  ;;  %v3288_v18 = vsub.f32 1.0, %v2855_v47  ;;  %v2763_v61 = vmul.f32 0.5, %v2731_v48  ;;  %v3286_v63 = vsub.f32 1.0, %v2853_v25 }
 0x4e3   : > { %7978 = vtanh.f32 %v2760_v46  ;;  %v3317_v58 = vmul.f32 %v3285_v40, %v9801_v51  ;;  %v12902_v51 = vld [vmem:[#allocation96_spill] sm:$0xff] }
 0x4e4   : > { %7980 = vtanh.f32 %v2761_v24  ;;  %v3320_v27 = vmul.f32 %v3288_v18, %v9803_v36  ;;  %v3318_v48 = vmul.f32 %v3286_v63, %v9807_v4  ;;  %v2732_v24 = vadd.f32 %v10281_v7, %v12901_v0  ;;  %v12903_v36 = vld [vmem:[#allocation97_spill] sm:$0xff] }
 0x4e5   : > { %7982 = vtanh.f32 %v2762_v37  ;;  %v2733_v40 = vadd.f32 %v10287_v59, %v12902_v51  ;;  %v12906_v59 = vld [vmem:[#allocation135_spill] sm:$0xff]  ;;  %v12920_v0 = vld [vmem:[#allocation53_spill] sm:$0xff] }
 0x4e6   : > { %7984 = vtanh.f32 %v2763_v61  ;;  %v2764_v63 = vmul.f32 0.5, %v2732_v24  ;;  %v12908_v24 = vld [vmem:[#allocation101_spill] sm:$0xff] }
 0x4e7   : > { %v2765_v18 = vmul.f32 0.5, %v2733_v40 }
 0x4e8   : > { %7986 = vtanh.f32 %v2764_v63 }
 0x4e9   : > { %v7971_v33 = vpop.eup %7970  ;;  %7988 = vtanh.f32 %v2765_v18  ;;  %v12910_v18 = vld [vmem:[#allocation102_spill] sm:$0xff] }
 0x4ea   : > { %v7973_v15 = vpop.eup %7972  ;;  %v3351_v13 = vmul.f32 %v7971_v33, %v2854_v14 }
 0x4eb   : > { %v7975_v12 = vpop.eup %7974  ;;  %v3349_v31 = vmul.f32 %v7973_v15, %v2852_v54  ;;  %v2734_v54 = vadd.f32 %v10301_v9, %v12903_v36  ;;  %v8685_v9 = vld [vmem:[%s12357_s7 + $0x8] sm:$0xff]  }
 0x4ec   : > { %v7977_v38 = vpop.eup %7976  ;;  %v3352_v56 = vmul.f32 %v7975_v12, %v2855_v47  ;;  %v10444_v45 = vadd.f32 %v3351_v13, %v3319_v34  ;;  %v12904_v47 = vld [vmem:[#allocation98_spill] sm:$0xff] }
 0x4ed   : > { %v10447_v46 = vadd.f32 %v3349_v31, %v3317_v58  ;;  %v3350_v57 = vmul.f32 %v7977_v38, %v2853_v25  ;;  %v2735_v37 = vadd.f32 %v12905_v42, %v12904_v47  ;;  %v7979_v25 = vpop.eup %7978  ;;  %v2766_v61 = vmul.f32 0.5, %v2734_v54  ;;  %v12907_v38 = vld [vmem:[#allocation99_spill] sm:$0xff] }
 0x4ee   : > { %v10451_v33 = vadd.f32 %v3352_v56, %v3320_v27  ;;  %v7981_v7 = vpop.eup %7980  ;;  %v2824_v13 = vadd.f32 1.0, %v7979_v25  ;;  %v12918_v47 = vld [vmem:[#allocation111_spill] sm:$0xff] }
 0x4ef   : > { %v10455_v14 = vadd.f32 %v3350_v57, %v3318_v48  ;;  %v7983_v57 = vpop.eup %7982  ;;  %v2767_v15 = vmul.f32 0.5, %v2735_v37  ;;  %v2825_v58 = vadd.f32 1.0, %v7981_v7  ;;  %7990 = vtanh.f32 %v2766_v61  ;;  %v8686_v37 = vld [vmem:[%s12357_s7 + $0x10] sm:$0xff]  }
 0x4f0   : > { %v7985_v34 = vpop.eup %7984  ;;  %v2826_v31 = vadd.f32 1.0, %v7983_v57  ;;  %v3414_v42 = vpack.c.bf16 %v10451_v33, %v10444_v45  ;;  %v2856_v61 = vmul.f32 0.5, %v2824_v13 }
 0x4f1   : > { %v3413_v4 = vpack.c.bf16 %v10455_v14, %v10447_v46  ;;  %v2827_v48 = vadd.f32 1.0, %v7985_v34  ;;  %7992 = vtanh.f32 %v2767_v15  ;;  %v12911_v34 = vld [vmem:[#allocation103_spill] sm:$0xff] }
 0x4f2   : > { %v7352_v12 = vpop.f32.mrb[116].mxu0  ;;  %v2858_v57 = vmul.f32 0.5, %v2826_v31  ;;  %v7987_v13 = vpop.eup %7986 }
 0x4f3   : > { %3462 = vmatmul.mubr.bf16.vlgmr.msra.gmra.mrb[144].mxu0 %v3413_v4  ;;  %v3151_v27 = vadd.f32 %v7352_v12, %v12907_v38  ;;  %v3142_v56 = vpop.f32.mrb[117].mxu0  ;;  %v12909_v4 = vld [vmem:[#allocation100_spill] sm:$0xff]  ;;  %v2859_v15 = vmul.f32 0.5, %v2827_v48  ;;  %v12912_v12 = vld [vmem:[#allocation133_spill] sm:$0xff]  ;;  %v7989_v31 = vpop.eup %7988  ;;  %v2828_v2 = vadd.f32 1.0, %v7987_v13  ;;  %v12924_v13 = vld [vmem:[#allocation19_spill] sm:$0xff] }
 0x4f4   : > { %3471 = vmatprep.mubr.bf16.mxu0 %v12739_v23  ;;  %7427 = vmatpush3.bf16.msra.mxu0 %v12906_v59  ;;  %v3143_v40 = vadd.f32 %v3142_v56, %v12908_v24  ;;  %v7353_v54 = vpop.f32.mrb[118].mxu0  ;;  %v2857_v59 = vmul.f32 0.5, %v2825_v58  ;;  %v12913_v56 = vld [vmem:[#allocation104_spill] sm:$0xff]  ;;  %v3289_v58 = vsub.f32 1.0, %v2856_v61  ;;  %v3291_v48 = vsub.f32 1.0, %v2858_v57 }
 0x4f5   : > { %7428 = vmatprep.subr.bf16.mxu0 %v8685_v9  ;;  %7994 = vtanh.f32 %v3151_v27  ;;  %v3154_v63 = vadd.f32 %v7353_v54, %v12909_v4  ;;  %v3145_v25 = vpop.f32.mrb[119].mxu0  ;;  %v2736_v27 = vadd.f32 %v12912_v12, %v12911_v34  ;;  %v8688_v12 = vld [vmem:[%s12357_s7 + $0x20] sm:$0xff]   ;;  %v2829_v5 = vadd.f32 1.0, %v7989_v31 }
 0x4f6   : > { %7996 = vtanh.f32 %v3143_v40  ;;  %v3146_v7 = vadd.f32 %v3145_v25, %v12910_v18  ;;  %v12914_v40 = vld [vmem:[#allocation134_spill] sm:$0xff]  ;;  %v3292_v25 = vsub.f32 1.0, %v2859_v15  ;;  %v12917_v18 = vld [vmem:[#allocation136_spill] sm:$0xff]  ;;  %v3321_v36 = vmul.f32 %v3289_v58, %v12918_v47 }
 0x4f7   : > { %7998 = vtanh.f32 %v3154_v63  ;;  %v2737_v54 = vadd.f32 %v12914_v40, %v12913_v56  ;;  %v12915_v63 = vld [vmem:[#allocation105_spill] sm:$0xff]  ;;  %v2768_v40 = vmul.f32 0.5, %v2736_v27  ;;  %v3323_v28 = vmul.f32 %v3291_v48, %v12920_v0  ;;  %v8689_v27 = vld [vmem:[%s12357_s7 + $0x28] sm:$0xff]  }
 0x4f8   : > { %7429 = vmatpush3.bf16.msra.mxu0 %v8685_v9  ;;  %8000 = vtanh.f32 %v3146_v7  ;;  %v8687_v9 = vld [vmem:[%s12357_s7 + $0x18] sm:$0xff]   ;;  %v12916_v7 = vld [vmem:[#allocation106_spill] sm:$0xff] }
 0x4f9   : > { %7430 = vmatprep.subr.bf16.mxu0 %v8686_v37  ;;  %v2739_v4 = vadd.f32 %v12917_v18, %v12916_v7  ;;  %v7991_v34 = vpop.eup %7990  ;;  %v2769_v24 = vmul.f32 0.5, %v2737_v54  ;;  %v12921_v18 = vld [vmem:[#allocation112_spill] sm:$0xff]  ;;  %8002 = vtanh.f32 %v2768_v40 }
 0x4fa   : > { %v3324_v7 = vmul.f32 %v3292_v25, %v12921_v18  ;;  %v8691_v18 = vld [vmem:[%s12357_s7 + $0x38] sm:$0xff]  }
 0x4fb   : > { %3472 = vmatmul.mubr.bf16.gmra.mrb[148].mxu0 %v3414_v42  ;;  %v3290_v42 = vsub.f32 1.0, %v2857_v59  ;;  %v7993_v56 = vpop.eup %7992  ;;  %v2771_v3 = vmul.f32 0.5, %v2739_v4  ;;  %8004 = vtanh.f32 %v2769_v24  ;;  %v12923_v4 = vld [vmem:[#allocation18_spill] sm:$0xff] }
 0x4fc   : > { %3481 = vmatprep.mubr.bf16.mxu0 %v12739_v23  ;;  %7431 = vmatpush3.bf16.msra.mxu0 %v8686_v37  ;;  %v2738_v37 = vadd.f32 %v10344_v39, %v12915_v63  ;;  %v12919_v39 = vld [vmem:[#allocation113_spill] sm:$0xff] }
 0x4fd   : > { %7432 = vmatprep.subr.bf16.mxu0 %v8687_v9 }
 0x4fe   : > { %v2770_v63 = vmul.f32 0.5, %v2738_v37 }
 0x4ff   : > { %v7995_v38 = vpop.eup %7994 }
 0x500   : > { %7433 = vmatpush3.bf16.msra.mxu0 %v8687_v9  ;;  %v3322_v9 = vmul.f32 %v3290_v42, %v12919_v39  ;;  %v7997_v51 = vpop.eup %7996  ;;  %v3355_v22 = vmul.f32 %v7995_v38, %v2858_v57  ;;  %v2830_v42 = vadd.f32 1.0, %v7991_v34  ;;  %8006 = vtanh.f32 %v2770_v63 }
 0x501   : > { %7434 = vmatprep.subr.bf16.mxu0 %v8688_v12  ;;  %v7999_v54 = vpop.eup %7998  ;;  %v3353_v47 = vmul.f32 %v7997_v51, %v2856_v61  ;;  %v2831_v39 = vadd.f32 1.0, %v7993_v56  ;;  %8008 = vtanh.f32 %v2771_v3  ;;  %v2860_v3 = vmul.f32 0.5, %v2828_v2 }
 0x502   : > { %v8001_v58 = vpop.eup %8000  ;;  %v10499_v0 = vadd.f32 %v3355_v22, %v3323_v28  ;;  %v8690_v22 = vld [vmem:[%s12357_s7 + $0x30] sm:$0xff]   ;;  %v12926_v28 = vld [vmem:[#allocation107_spill] sm:$0xff]  ;;  %v2861_v56 = vmul.f32 0.5, %v2829_v5 }
 0x503   : > { %v7356_v37 = vpop.f32.mrb[120].mxu0  ;;  %v3354_v48 = vmul.f32 %v8001_v58, %v2857_v59  ;;  %v10502_v25 = vadd.f32 %v3353_v47, %v3321_v36  ;;  %v12928_v36 = vld [vmem:[#allocation108_spill] sm:$0xff]  ;;  %v2863_v40 = vmul.f32 0.5, %v2831_v39  ;;  %v8003_v2 = vpop.eup %8002  ;;  %v3293_v47 = vsub.f32 1.0, %v2860_v3 }
 0x504   : > { %7435 = vmatpush3.bf16.msra.mxu0 %v8688_v12  ;;  %v3356_v12 = vmul.f32 %v7999_v54, %v2859_v15  ;;  %12922 = vst [vmem:[#allocation132_spill] sm:$0xff] %v10499_v0  ;;  %v3167_v38 = vadd.f32 %v7356_v37, %v12923_v4  ;;  %v3158_v57 = vpop.f32.mrb[121].mxu0  ;;  %v12930_v54 = vld [vmem:[#allocation109_spill] sm:$0xff]  ;;  %v3294_v58 = vsub.f32 1.0, %v2861_v56 }
 0x505   : > { %7436 = vmatprep.subr.bf16.mxu0 %v8689_v27  ;;  %v3159_v31 = vadd.f32 %v3158_v57, %v12924_v13  ;;  %v7357_v51 = vpop.f32.mrb[122].mxu0  ;;  %v10511_v59 = vadd.f32 %v3354_v48, %v3322_v9  ;;  %v12929_v9 = vld [vmem:[#allocation32_spill] sm:$0xff]  ;;  %v2741_v5 = vadd.f32 %v10355_v21, %v12930_v54  ;;  %v3296_v57 = vsub.f32 1.0, %v2863_v40  ;;  %v12932_v48 = vld [vmem:[#allocation110_spill] sm:$0xff] }
 0x506   : > { %v10505_v61 = vadd.f32 %v3356_v12, %v3324_v7  ;;  %8010 = vtanh.f32 %v3167_v38  ;;  %v3170_v24 = vadd.f32 %v7357_v51, %v12926_v28  ;;  %v3161_v15 = vpop.f32.mrb[123].mxu0  ;;  %v2862_v7 = vmul.f32 0.5, %v2830_v42  ;;  %v12931_v42 = vld [vmem:[#allocation35_spill] sm:$0xff]  ;;  %v8005_v12 = vpop.eup %8004 }
 0x507   : > { %12927 = vst [vmem:[#allocation133_spill] sm:$0xff] %v10511_v59  ;;  %8012 = vtanh.f32 %v3159_v31  ;;  %v3162_v34 = vadd.f32 %v3161_v15, %v12928_v36  ;;  %v3415_v63 = vpack.c.bf16 %v10511_v59, %v10502_v25  ;;  %v2742_v37 = vadd.f32 %v10360_v32, %v12931_v42  ;;  %v12935_v42 = vld [vmem:[#allocation118_spill] sm:$0xff]  ;;  %v12936_v36 = vld [vmem:[#allocation120_spill] sm:$0xff] }
 0x508   : > { %7437 = vmatpush3.bf16.msra.mxu0 %v8689_v27  ;;  %12925 = vst [vmem:[#allocation135_spill] sm:$0xff] %v10505_v61  ;;  %8014 = vtanh.f32 %v3170_v24  ;;  %v2740_v27 = vadd.f32 %v10352_v8, %v12929_v9  ;;  %v3295_v38 = vsub.f32 1.0, %v2862_v7  ;;  %v2743_v39 = vadd.f32 %v10363_v10, %v12932_v48  ;;  %v12933_v24 = vld [vmem:[#allocation119_spill] sm:$0xff] }
 0x509   : > { %7438 = vmatprep.subr.bf16.mxu0 %v8690_v22  ;;  %8016 = vtanh.f32 %v3162_v34  ;;  %3482 = vmatmul.mubr.bf16.gmra.mrb[152].mxu0 %v3415_v63  ;;  %v3325_v15 = vmul.f32 %v3293_v47, %v12933_v24  ;;  %v12934_v34 = vld [vmem:[#allocation121_spill] sm:$0xff]  ;;  %v2774_v54 = vmul.f32 0.5, %v2742_v37  ;;  %v3416_v32 = vpack.c.bf16 %v10505_v61, %v10499_v0 }
 0x50a   : > { %3491 = vmatprep.mubr.bf16.mxu0 %v12739_v23  ;;  %v8007_v8 = vpop.eup %8006  ;;  %v2772_v31 = vmul.f32 0.5, %v2740_v27  ;;  %v3326_v63 = vmul.f32 %v3294_v58, %v12934_v34  ;;  %v3327_v9 = vmul.f32 %v3295_v38, %v12935_v42  ;;  %v3328_v28 = vmul.f32 %v3296_v57, %v12936_v36  ;;  %v12938_v42 = vld [vmem:[#allocation20_spill] sm:$0xff] }
 0x50b   : > { %v8009_v51 = vpop.eup %8008  ;;  %v2775_v13 = vmul.f32 0.5, %v2743_v39  ;;  %v2832_v27 = vadd.f32 1.0, %v8003_v2  ;;  %v2833_v4 = vadd.f32 1.0, %v8005_v12  ;;  %v2834_v24 = vadd.f32 1.0, %v8007_v8  ;;  %v12940_v12 = vld [vmem:[#allocation21_spill] sm:$0xff] }
 0x50c   : > { %7439 = vmatpush3.bf16.msra.mxu0 %v8690_v22  ;;  %v2773_v22 = vmul.f32 0.5, %v2741_v5  ;;  %8018 = vtanh.f32 %v2772_v31  ;;  %v2835_v2 = vadd.f32 1.0, %v8009_v51  ;;  %v12942_v31 = vld [vmem:[#allocation114_spill] sm:$0xff] }
 0x50d   : > { %7440 = vmatprep.subr.bf16.mxu0 %v8691_v18  ;;  %v2866_v51 = vmul.f32 0.5, %v2834_v24 }
 0x50e   : > { %8020 = vtanh.f32 %v2773_v22 }
 0x50f   : > { %8022 = vtanh.f32 %v2774_v54  ;;  %v12944_v54 = vld [vmem:[#allocation115_spill] sm:$0xff] }
 0x510   : > { %7441 = vmatpush3.bf16.msra.mxu0 %v8691_v18  ;;  %v8011_v21 = vpop.eup %8010  ;;  %8024 = vtanh.f32 %v2775_v13 }
 0x511   : > { %v8013_v18 = vpop.eup %8012  ;;  %v3359_v10 = vmul.f32 %v8011_v21, %v2862_v7  ;;  %3492 = vmatmul.mubr.bf16.gmra.mrb[156].mxu0 %v3416_v32  ;;  %v2864_v21 = vmul.f32 0.5, %v2832_v27 }
 0x512   : > { %v8015_v48 = vpop.eup %8014  ;;  %v3357_v5 = vmul.f32 %v8013_v18, %v2860_v3  ;;  %3501 = vmatprep.mubr.bf16.mxu0 %v12739_v23  ;;  %v12946_v18 = vld [vmem:[#allocation116_spill] sm:$0xff] }
 0x513   : > { %v8017_v47 = vpop.eup %8016  ;;  %v3360_v37 = vmul.f32 %v8015_v48, %v2863_v40  ;;  %v10535_v34 = vadd.f32 %v3359_v10, %v3327_v9 }
 0x514   : > { %v3358_v7 = vmul.f32 %v8017_v47, %v2861_v56  ;;  %v10538_v57 = vadd.f32 %v3357_v5, %v3325_v15  ;;  %v2865_v56 = vmul.f32 0.5, %v2833_v4  ;;  %v2867_v15 = vmul.f32 0.5, %v2835_v2  ;;  %v12947_v4 = vld [vmem:[#allocation40_spill] sm:$0xff] }
 0x515   : > { %v7360_v58 = vpop.f32.mrb[124].mxu0  ;;  %12937 = vst [vmem:[#allocation134_spill] sm:$0xff] %v10535_v34  ;;  %v10541_v8 = vadd.f32 %v3360_v37, %v3328_v28  ;;  %v12945_v28 = vld [vmem:[#allocation37_spill] sm:$0xff]  ;;  %v3297_v5 = vsub.f32 1.0, %v2864_v21  ;;  %v2746_v47 = vadd.f32 %v10376_v49, %v12947_v4  ;;  %v3299_v37 = vsub.f32 1.0, %v2866_v51  ;;  %v12951_v4 = vld [vmem:[#allocation62_spill] sm:$0xff] }
 0x516   : > { %v3183_v36 = vadd.f32 %v7360_v58, %v12938_v42  ;;  %v3174_v38 = vpop.f32.mrb[125].mxu0  ;;  %12939 = vst [vmem:[#allocation136_spill] sm:$0xff] %v10538_v57  ;;  %v10544_v9 = vadd.f32 %v3358_v7, %v3326_v63  ;;  %v2744_v32 = vadd.f32 %v10368_v1, %v12945_v28  ;;  %v2745_v63 = vadd.f32 %v10371_v43, %v12946_v18  ;;  %v8019_v10 = vpop.eup %8018  ;;  %v12949_v43 = vld [vmem:[#allocation63_spill] sm:$0xff] }
 0x517   : > { %v3175_v3 = vadd.f32 %v3174_v38, %v12940_v12  ;;  %v7361_v39 = vpop.f32.mrb[126].mxu0  ;;  %12941 = vst [vmem:[#allocation111_spill] sm:$0xff] %v10541_v8  ;;  %v3298_v27 = vsub.f32 1.0, %v2865_v56  ;;  %v3300_v24 = vsub.f32 1.0, %v2867_v15  ;;  %v3418_v18 = vpack.c.bf16 %v10541_v8, %v10535_v34 }
 0x518   : > { %8026 = vtanh.f32 %v3183_v36  ;;  %v3186_v22 = vadd.f32 %v7361_v39, %v12942_v31  ;;  %v3177_v40 = vpop.f32.mrb[127].mxu0  ;;  %12943 = vst [vmem:[#allocation113_spill] sm:$0xff] %v10544_v9  ;;  %v3417_v13 = vpack.c.bf16 %v10544_v9, %v10538_v57  ;;  %v8021_v58 = vpop.eup %8020  ;;  %v12948_v36 = vld [vmem:[#allocation117_spill] sm:$0xff]  ;;  %v2776_v1 = vmul.f32 0.5, %v2744_v32 }
 0x519   : > { %8028 = vtanh.f32 %v3175_v3  ;;  %v3178_v48 = vadd.f32 %v3177_v40, %v12944_v54  ;;  %v2747_v38 = vadd.f32 %v10379_v29, %v12948_v36  ;;  %v8023_v7 = vpop.eup %8022  ;;  %v2777_v3 = vmul.f32 0.5, %v2745_v63  ;;  %v12950_v40 = vld [vmem:[#allocation73_spill] sm:$0xff]  ;;  %v12952_v54 = vld [vmem:[#allocation68_spill] sm:$0xff] }
 0x51a   : > { %8030 = vtanh.f32 %v3186_v22  ;;  %3502 = vmatmul.mubr.bf16.gmra.mrb[160].mxu0 %v3417_v13  ;;  %v8025_v2 = vpop.eup %8024  ;;  %v3329_v22 = vmul.f32 %v3297_v5, %v12949_v43  ;;  %v2778_v13 = vmul.f32 0.5, %v2746_v47  ;;  %v3331_v28 = vmul.f32 %v3299_v37, %v12951_v4  ;;  %v12954_v4 = vld [vmem:[#allocation22_spill] sm:$0xff] }
 0x51b   : > { %8032 = vtanh.f32 %v3178_v48  ;;  %3511 = vmatprep.mubr.bf16.mxu0 %v12739_v23  ;;  %v3330_v48 = vmul.f32 %v3298_v27, %v12950_v40  ;;  %v3332_v31 = vmul.f32 %v3300_v24, %v12952_v54  ;;  %v2779_v12 = vmul.f32 0.5, %v2747_v38 }
 0x51c   : > { %v2836_v32 = vadd.f32 1.0, %v8019_v10  ;;  %v2837_v42 = vadd.f32 1.0, %v8021_v58  ;;  %8034 = vtanh.f32 %v2776_v1  ;;  %v2838_v43 = vadd.f32 1.0, %v8023_v7  ;;  %v12958_v7 = vld [vmem:[#allocation122_spill] sm:$0xff] }
 0x51d   : > { %8036 = vtanh.f32 %v2777_v3  ;;  %v2839_v10 = vadd.f32 1.0, %v8025_v2 }
 0x51e   : > { %8038 = vtanh.f32 %v2778_v13  ;;  %v2870_v2 = vmul.f32 0.5, %v2838_v43 }
 0x51f   : > { %8040 = vtanh.f32 %v2779_v12 }
 0x522   : > { %v8027_v39 = vpop.eup %8026  ;;  %3512 = vmatmul.mubr.bf16.gmra.mrb[164].mxu0 %v3418_v18  ;;  %v12956_v18 = vld [vmem:[#allocation23_spill] sm:$0xff] }
 0x523   : > { %v8029_v49 = vpop.eup %8028  ;;  %v3363_v29 = vmul.f32 %v8027_v39, %v2866_v51  ;;  %3521 = vmatprep.mubr.bf16.mxu0 %v12739_v23  ;;  %v2868_v39 = vmul.f32 0.5, %v2836_v32 }
 0x524   : > { %v8031_v36 = vpop.eup %8030  ;;  %v3361_v63 = vmul.f32 %v8029_v49, %v2864_v21 }
 0x525   : > { %v8033_v5 = vpop.eup %8032  ;;  %v7364_v27 = vpop.f32.mrb[128].mxu0  ;;  %v3364_v47 = vmul.f32 %v8031_v36, %v2867_v15  ;;  %v10565_v40 = vadd.f32 %v3363_v29, %v3331_v28  ;;  %v12960_v36 = vld [vmem:[#allocation123_spill] sm:$0xff]  ;;  %v3301_v49 = vsub.f32 1.0, %v2868_v39 }
 0x526   : > { %v3199_v54 = vadd.f32 %v7364_v27, %v12954_v4  ;;  %v3190_v37 = vpop.f32.mrb[129].mxu0  ;;  %v3362_v51 = vmul.f32 %v8033_v5, %v2865_v56  ;;  %v10568_v24 = vadd.f32 %v3361_v63, %v3329_v22  ;;  %v2869_v56 = vmul.f32 0.5, %v2837_v42  ;;  %v12962_v42 = vld [vmem:[#allocation46_spill] sm:$0xff] }
 0x527   : > { %12953 = vst [vmem:[#allocation53_spill] sm:$0xff] %v10565_v40  ;;  %v3191_v21 = vadd.f32 %v3190_v37, %v12956_v18  ;;  %v7365_v58 = vpop.f32.mrb[130].mxu0  ;;  %v10571_v38 = vadd.f32 %v3364_v47, %v3332_v31  ;;  %v2871_v22 = vmul.f32 0.5, %v2839_v10  ;;  %v12961_v31 = vld [vmem:[#allocation43_spill] sm:$0xff]  ;;  %v3303_v5 = vsub.f32 1.0, %v2870_v2  ;;  %v12966_v18 = vld [vmem:[#allocation125_spill] sm:$0xff] }
 0x528   : > { %12955 = vst [vmem:[#allocation112_spill] sm:$0xff] %v10568_v24  ;;  %8042 = vtanh.f32 %v3199_v54  ;;  %v3202_v1 = vadd.f32 %v7365_v58, %v12958_v7  ;;  %v3193_v15 = vpop.f32.mrb[131].mxu0  ;;  %v10574_v28 = vadd.f32 %v3362_v51, %v3330_v48  ;;  %v2748_v13 = vadd.f32 %v10384_v41, %v12961_v31  ;;  %v8035_v48 = vpop.eup %8034  ;;  %v12963_v51 = vld [vmem:[#allocation66_spill] sm:$0xff] }
 0x529   : > { %12957 = vst [vmem:[#allocation119_spill] sm:$0xff] %v10571_v38  ;;  %8044 = vtanh.f32 %v3191_v21  ;;  %v3194_v3 = vadd.f32 %v3193_v15, %v12960_v36  ;;  %v3302_v29 = vsub.f32 1.0, %v2869_v56  ;;  %v8037_v63 = vpop.eup %8036  ;;  %v3304_v32 = vsub.f32 1.0, %v2871_v22  ;;  %v12964_v21 = vld [vmem:[#allocation70_spill] sm:$0xff] }
 0x52a   : > { %12959 = vst [vmem:[#allocation121_spill] sm:$0xff] %v10574_v28  ;;  %8046 = vtanh.f32 %v3202_v1  ;;  %v3419_v12 = vpack.c.bf16 %v10574_v28, %v10568_v24  ;;  %v2750_v27 = vadd.f32 %v10392_v30, %v12962_v42  ;;  %v8039_v47 = vpop.eup %8038  ;;  %v2780_v43 = vmul.f32 0.5, %v2748_v13 }
 0x52b   : > { %8048 = vtanh.f32 %v3194_v3  ;;  %v8041_v54 = vpop.eup %8040  ;;  %v3333_v10 = vmul.f32 %v3301_v49, %v12963_v51  ;;  %v3334_v58 = vmul.f32 %v3302_v29, %v12964_v21  ;;  %v3420_v41 = vpack.c.bf16 %v10571_v38, %v10565_v40  ;;  %v12965_v3 = vld [vmem:[#allocation67_spill] sm:$0xff]  ;;  %v12967_v29 = vld [vmem:[#allocation124_spill] sm:$0xff]  ;;  %v12968_v21 = vld [vmem:[#allocation137_spill] sm:$0xff] }
 0x52c   : > { %3522 = vmatmul.mubr.bf16.gmra.mrb[168].mxu0 %v3419_v12  ;;  %v3335_v15 = vmul.f32 %v3303_v5, %v10116_v6  ;;  %v3336_v12 = vmul.f32 %v3304_v32, %v12965_v3  ;;  %v2782_v31 = vmul.f32 0.5, %v2750_v27  ;;  %v2840_v30 = vadd.f32 1.0, %v8035_v48  ;;  %v12969_v32 = vld [vmem:[#allocation24_spill] sm:$0xff] }
 0x52d   : > { %3531 = vmatprep.mubr.bf16.mxu0 %v12739_v23  ;;  %v2841_v42 = vadd.f32 1.0, %v8037_v63  ;;  %v2751_v13 = vadd.f32 %v10395_v62, %v12966_v18  ;;  %8050 = vtanh.f32 %v2780_v43  ;;  %v2749_v4 = vadd.f32 %v12968_v21, %v12967_v29  ;;  %v12973_v21 = vld [vmem:[#allocation126_spill] sm:$0xff] }
 0x52e   : > { %v2843_v62 = vadd.f32 1.0, %v8041_v54  ;;  %8052 = vtanh.f32 %v2782_v31  ;;  %v2872_v54 = vmul.f32 0.5, %v2840_v30  ;;  %v12983_v29 = vld [vmem:[#allocation138_spill] sm:$0xff] }
 0x52f   : > { %v2783_v3 = vmul.f32 0.5, %v2751_v13 }
 0x532   : > { %v8043_v37 = vpop.eup %8042 }
 0x533   : > { %v8045_v1 = vpop.eup %8044  ;;  %v3367_v36 = vmul.f32 %v8043_v37, %v2870_v2  ;;  %v2842_v2 = vadd.f32 1.0, %v8039_v47  ;;  %v2781_v47 = vmul.f32 0.5, %v2749_v4 }
 0x534   : > { %v8047_v7 = vpop.eup %8046  ;;  %3532 = vmatmul.mubr.bf16.gmra.mrb[172].mxu0 %v3420_v41  ;;  %v3365_v49 = vmul.f32 %v8045_v1, %v2868_v39  ;;  %v12971_v39 = vld [vmem:[#allocation25_spill] sm:$0xff] }
 0x535   : > { %v8049_v51 = vpop.eup %8048  ;;  %v7368_v55 = vpop.f32.mrb[132].mxu0  ;;  %3541 = vmatprep.mubr.bf16.mxu0 %v12739_v23  ;;  %v3368_v6 = vmul.f32 %v8047_v7, %v2871_v22  ;;  %v10595_v5 = vadd.f32 %v3367_v36, %v3335_v15  ;;  %v2873_v15 = vmul.f32 0.5, %v2841_v42 }
 0x536   : > { %v3215_v48 = vadd.f32 %v7368_v55, %v12969_v32  ;;  %v3206_v63 = vpop.f32.mrb[133].mxu0  ;;  %v3366_v27 = vmul.f32 %v8049_v51, %v2869_v56  ;;  %v10598_v37 = vadd.f32 %v3365_v49, %v3333_v10  ;;  %v12975_v55 = vld [vmem:[#allocation127_spill] sm:$0xff]  ;;  %v2874_v10 = vmul.f32 0.5, %v2842_v2 }
 0x537   : > { %v3207_v43 = vadd.f32 %v3206_v63, %v12971_v39  ;;  %v7369_v41 = vpop.f32.mrb[134].mxu0  ;;  %v10601_v1 = vadd.f32 %v3368_v6, %v3336_v12  ;;  %v2875_v12 = vmul.f32 0.5, %v2843_v62  ;;  %v8051_v13 = vpop.eup %8050  ;;  %v3305_v49 = vsub.f32 1.0, %v2872_v54  ;;  %v12977_v6 = vld [vmem:[#allocation54_spill] sm:$0xff]  ;;  %v12982_v32 = vld [vmem:[#allocation71_spill] sm:$0xff] }
 0x538   : > { %12970 = vst [vmem:[#allocation118_spill] sm:$0xff] %v10598_v37  ;;  %8054 = vtanh.f32 %v3215_v48  ;;  %v3218_v7 = vadd.f32 %v7369_v41, %v12973_v21  ;;  %v3209_v36 = vpop.f32.mrb[135].mxu0  ;;  %v10604_v22 = vadd.f32 %v3366_v27, %v3334_v58  ;;  %v12976_v58 = vld [vmem:[#allocation50_spill] sm:$0xff]  ;;  %v3307_v51 = vsub.f32 1.0, %v2874_v10  ;;  %v8053_v2 = vpop.eup %8052  ;;  %v12978_v41 = vld [vmem:[#allocation83_spill] sm:$0xff] }
 0x539   : > { %12972 = vst [vmem:[#allocation120_spill] sm:$0xff] %v10601_v1  ;;  %8056 = vtanh.f32 %v3207_v43  ;;  %v3210_v56 = vadd.f32 %v3209_v36, %v12975_v55  ;;  %v2752_v4 = vadd.f32 %v10400_v16, %v12976_v58  ;;  %v2754_v48 = vadd.f32 %v10408_v50, %v12977_v6  ;;  %v12980_v58 = vld [vmem:[#allocation79_spill] sm:$0xff]  ;;  %v12981_v6 = vld [vmem:[#allocation76_spill] sm:$0xff] }
 0x53a   : > { %12974 = vst [vmem:[#allocation63_spill] sm:$0xff] %v10604_v22  ;;  %8058 = vtanh.f32 %v3218_v7  ;;  %v3421_v31 = vpack.c.bf16 %v10604_v22, %v10598_v37  ;;  %v3306_v63 = vsub.f32 1.0, %v2873_v15  ;;  %v3308_v30 = vsub.f32 1.0, %v2875_v12 }
 0x53b   : > { %8060 = vtanh.f32 %v3210_v56  ;;  %v2784_v42 = vmul.f32 0.5, %v2752_v4  ;;  %v3422_v62 = vpack.c.bf16 %v10601_v1, %v10595_v5  ;;  %v3339_v7 = vmul.f32 %v3307_v51, %v10171_v53  ;;  %v12979_v56 = vld [vmem:[#allocation128_spill] sm:$0xff] }
 0x53c   : > { %8062 = vtanh.f32 %v2783_v3  ;;  %3542 = vmatmul.mubr.bf16.gmra.mrb[176].mxu0 %v3421_v31  ;;  %v3337_v3 = vmul.f32 %v3305_v49, %v12978_v41  ;;  %v2786_v16 = vmul.f32 0.5, %v2754_v48  ;;  %v3338_v31 = vmul.f32 %v3306_v63, %v12979_v56  ;;  %v12984_v48 = vld [vmem:[#allocation81_spill] sm:$0xff] }
 0x53d   : > { %8064 = vtanh.f32 %v2781_v47  ;;  %3551 = vmatprep.mubr.bf16.mxu0 %v12739_v23  ;;  %v3340_v50 = vmul.f32 %v3308_v30, %v12980_v58  ;;  %v2755_v55 = vadd.f32 %v10411_v35, %v12981_v6  ;;  %v2844_v39 = vadd.f32 1.0, %v8051_v13  ;;  %v12986_v13 = vld [vmem:[#allocation78_spill] sm:$0xff] }
 0x53e   : > { %v2753_v18 = vadd.f32 %v12983_v29, %v12982_v32  ;;  %8066 = vtanh.f32 %v2784_v42 }
 0x53f   : > { %8068 = vtanh.f32 %v2786_v16  ;;  %v2787_v41 = vmul.f32 0.5, %v2755_v55 }
 0x540   : > { %v2785_v56 = vmul.f32 0.5, %v2753_v18 }
 0x542   : > { %v8055_v27 = vpop.eup %8054 }
 0x543   : > { %v8057_v43 = vpop.eup %8056  ;;  %v3371_v36 = vmul.f32 %v8055_v27, %v2874_v10  ;;  %v2846_v27 = vadd.f32 1.0, %v8053_v2 }
 0x544   : > { %v8059_v47 = vpop.eup %8058  ;;  %3552 = vmatmul.mubr.bf16.gmra.mrb[180].mxu0 %v3422_v62  ;;  %v3369_v4 = vmul.f32 %v8057_v43, %v2872_v54 }
 0x545   : > { %v8061_v21 = vpop.eup %8060  ;;  %v7372_v49 = vpop.f32.mrb[136].mxu0  ;;  %3561 = vmatprep.mubr.bf16.mxu0 %v12739_v23  ;;  %v3372_v53 = vmul.f32 %v8059_v47, %v2875_v12  ;;  %v10625_v10 = vadd.f32 %v3371_v36, %v3339_v7  ;;  %v12988_v12 = vld [vmem:[#allocation26_spill] sm:$0xff]  ;;  %v2878_v16 = vmul.f32 0.5, %v2846_v27 }
 0x546   : > { %v8063_v51 = vpop.eup %8062  ;;  %v3231_v58 = vadd.f32 %v7372_v49, %v12984_v48  ;;  %v3222_v63 = vpop.f32.mrb[137].mxu0  ;;  %v3370_v30 = vmul.f32 %v8061_v21, %v2873_v15  ;;  %v10628_v35 = vadd.f32 %v3369_v4, %v3337_v3  ;;  %v12990_v21 = vld [vmem:[#allocation27_spill] sm:$0xff] }
 0x547   : > { %v8065_v54 = vpop.eup %8064  ;;  %v3223_v62 = vadd.f32 %v3222_v63, %v12986_v13  ;;  %v7373_v29 = vpop.f32.mrb[138].mxu0  ;;  %v10631_v43 = vadd.f32 %v3372_v53, %v3340_v50  ;;  %v2847_v47 = vadd.f32 1.0, %v8063_v51  ;;  %v2876_v50 = vmul.f32 0.5, %v2844_v39 }
 0x548   : > { %12985 = vst [vmem:[#allocation73_spill] sm:$0xff] %v10628_v35  ;;  %8070 = vtanh.f32 %v3231_v58  ;;  %v3234_v7 = vadd.f32 %v7373_v29, %v12988_v12  ;;  %v3225_v36 = vpop.f32.mrb[139].mxu0  ;;  %v10634_v42 = vadd.f32 %v3370_v30, %v3338_v31  ;;  %v2845_v3 = vadd.f32 1.0, %v8065_v54  ;;  %v8067_v18 = vpop.eup %8066  ;;  %v12992_v12 = vld [vmem:[#allocation28_spill] sm:$0xff] }
 0x549   : > { %12987 = vst [vmem:[#allocation62_spill] sm:$0xff] %v10631_v43  ;;  %8072 = vtanh.f32 %v3223_v62  ;;  %v3226_v15 = vadd.f32 %v3225_v36, %v12990_v21  ;;  %v2879_v55 = vmul.f32 0.5, %v2847_v47  ;;  %v3311_v4 = vsub.f32 1.0, %v2878_v16  ;;  %v8069_v53 = vpop.eup %8068 }
 0x54a   : > { %12989 = vst [vmem:[#allocation68_spill] sm:$0xff] %v10634_v42  ;;  %8074 = vtanh.f32 %v3234_v7  ;;  %v3423_v2 = vpack.c.bf16 %v10634_v42, %v10628_v35  ;;  %v2877_v31 = vmul.f32 0.5, %v2845_v3  ;;  %v3309_v49 = vsub.f32 1.0, %v2876_v50 }
 0x54b   : > { %8076 = vtanh.f32 %v3226_v15  ;;  %v3312_v51 = vsub.f32 1.0, %v2879_v55  ;;  %v3424_v30 = vpack.c.bf16 %v10631_v43, %v10625_v10  ;;  %v3343_v39 = vmul.f32 %v3311_v4, %v10197_v19 }
 0x54c   : > { %8078 = vtanh.f32 %v2787_v41  ;;  %3562 = vmatmul.mubr.bf16.gmra.mrb[184].mxu0 %v3423_v2  ;;  %v3310_v63 = vsub.f32 1.0, %v2877_v31  ;;  %v3341_v29 = vmul.f32 %v3309_v49, %v10202_v26  ;;  %v12991_v2 = vld [vmem:[#allocation131_spill] sm:$0xff]  ;;  %v12994_v49 = vld [vmem:[#allocation29_spill] sm:$0xff] }
 0x54d   : > { %8080 = vtanh.f32 %v2785_v56  ;;  %3571 = vmatprep.mubr.bf16.mxu0 %v12739_v23  ;;  %v3344_v36 = vmul.f32 %v3312_v51, %v10208_v11 }
 0x54e   : > { %v3342_v21 = vmul.f32 %v3310_v63, %v12991_v2 }
 0x552   : > { %v8071_v58 = vpop.eup %8070 }
 0x553   : > { %v8073_v54 = vpop.eup %8072  ;;  %v3375_v27 = vmul.f32 %v8071_v58, %v2878_v16 }
 0x554   : > { %v8075_v62 = vpop.eup %8074  ;;  %3572 = vmatmul.mubr.bf16.gmra.mrb[188].mxu0 %v3424_v30  ;;  %v3373_v41 = vmul.f32 %v8073_v54, %v2876_v50  ;;  %v2850_v50 = vadd.f32 1.0, %v8069_v53  ;;  %v2848_v54 = vadd.f32 1.0, %v8067_v18 }
 0x555   : > { %v8077_v7 = vpop.eup %8076  ;;  %v7376_v47 = vpop.f32.mrb[140].mxu0  ;;  %3581 = vmatprep.mubr.bf16.mxu0 %v12739_v23  ;;  %v3376_v56 = vmul.f32 %v8075_v62, %v2879_v55  ;;  %v10646_v15 = vadd.f32 %v3375_v27, %v3343_v39  ;;  %v12995_v55 = vld [vmem:[#allocation129_spill] sm:$0xff] }
 0x556   : > { %v8079_v3 = vpop.eup %8078  ;;  %v3247_v19 = vadd.f32 %v7376_v47, %v12992_v12  ;;  %v3238_v16 = vpop.f32.mrb[141].mxu0  ;;  %v3374_v4 = vmul.f32 %v8077_v7, %v2877_v31  ;;  %v10650_v58 = vadd.f32 %v3373_v41, %v3341_v29  ;;  %v12997_v47 = vld [vmem:[#allocation130_spill] sm:$0xff]  ;;  %v2882_v41 = vmul.f32 0.5, %v2850_v50 }
 0x557   : > { %v8081_v26 = vpop.eup %8080  ;;  %v3239_v30 = vadd.f32 %v3238_v16, %v12994_v49  ;;  %v7377_v11 = vpop.f32.mrb[142].mxu0  ;;  %v10653_v51 = vadd.f32 %v3376_v56, %v3344_v36  ;;  %v2851_v63 = vadd.f32 1.0, %v8079_v3  ;;  %v2880_v7 = vmul.f32 0.5, %v2848_v54 }
 0x558   : > { %12993 = vst [vmem:[#allocation66_spill] sm:$0xff] %v10650_v58  ;;  %8082 = vtanh.f32 %v3247_v19  ;;  %v3250_v39 = vadd.f32 %v7377_v11, %v12995_v55  ;;  %v3241_v27 = vpop.f32.mrb[143].mxu0  ;;  %v10656_v62 = vadd.f32 %v3374_v4, %v3342_v21  ;;  %v2849_v29 = vadd.f32 1.0, %v8081_v26 }
 0x559   : > { %8084 = vtanh.f32 %v3239_v30  ;;  %v3242_v31 = vadd.f32 %v3241_v27, %v12997_v47  ;;  %v2883_v18 = vmul.f32 0.5, %v2851_v63  ;;  %v3315_v56 = vsub.f32 1.0, %v2882_v41 }
 0x55a   : > { %12996 = vst [vmem:[#allocation70_spill] sm:$0xff] %v10656_v62  ;;  %8086 = vtanh.f32 %v3250_v39  ;;  %v3425_v53 = vpack.c.bf16 %v10656_v62, %v10650_v58  ;;  %v2881_v36 = vmul.f32 0.5, %v2849_v29  ;;  %v3313_v21 = vsub.f32 1.0, %v2880_v7 }
 0x55b   : > { %8088 = vtanh.f32 %v3242_v31  ;;  %v3316_v2 = vsub.f32 1.0, %v2883_v18  ;;  %v3426_v16 = vpack.c.bf16 %v10653_v51, %v10646_v15  ;;  %v3347_v26 = vmul.f32 %v3315_v56, %v10221_v44 }
 0x55c   : > { %3582 = vmatmul.mubr.bf16.gmra.mrb[192].mxu0 %v3425_v53  ;;  %v3314_v19 = vsub.f32 1.0, %v2881_v36  ;;  %v3345_v11 = vmul.f32 %v3313_v21, %v10226_v52 }
 0x55d   : > { %3591 = vmatprep.mubr.bf16.mxu0 %v12739_v23  ;;  %v3348_v27 = vmul.f32 %v3316_v2, %v10228_v20 }
 0x55e   : > { %v3346_v29 = vmul.f32 %v3314_v19, %v10230_v17 }
 0x562   : > { %v8083_v3 = vpop.eup %8082 }
 0x563   : > { %v8085_v4 = vpop.eup %8084  ;;  %v3379_v30 = vmul.f32 %v8083_v3, %v2882_v41  ;;  %v12999_v3 = vld [vmem:[#allocation31_spill] sm:$0xff] }
 0x564   : > { %v8087_v50 = vpop.eup %8086  ;;  %3592 = vmatmul.mubr.bf16.gmra.mrb[196].mxu0 %v3426_v16  ;;  %v3377_v54 = vmul.f32 %v8085_v4, %v2880_v7 }
 0x565   : > { %v8089_v39 = vpop.eup %8088  ;;  %3601 = vmatprep.mubr.bf16.mxu0 %v12739_v23  ;;  %v3380_v63 = vmul.f32 %v8087_v50, %v2883_v18  ;;  %v10668_v31 = vadd.f32 %v3379_v30, %v3347_v26  ;;  %v12998_v18 = vld [vmem:[#allocation30_spill] sm:$0xff]  ;;  %v13000_v30 = vld [vmem:[#allocation33_spill] sm:$0xff] }
 0x566   : > { %v3378_v53 = vmul.f32 %v8089_v39, %v2881_v36  ;;  %v10671_v47 = vadd.f32 %v3377_v54, %v3345_v11 }
 0x567   : > { %v10673_v44 = vadd.f32 %v3380_v63, %v3348_v27  ;;  %v13001_v27 = vld [vmem:[#allocation34_spill] sm:$0xff] }
 0x568   : > { %v10675_v41 = vadd.f32 %v3378_v53, %v3346_v29 }
 0x569   : > { %v3428_v20 = vpack.c.bf16 %v10673_v44, %v10668_v31 }
 0x56a   : > { %v3427_v52 = vpack.c.bf16 %v10675_v41, %v10671_v47 }
 0x56c   : > { %3602 = vmatmul.mubr.bf16.gmra.mrb[200].mxu0 %v3427_v52 }
 0x56d   : > { %3611 = vmatprep.mubr.bf16.mxu0 %v12739_v23 }
 0x574   : > { %3612 = vmatmul.mubr.bf16.gmra.mrb[204].mxu0 %v3428_v20 }
 0x5c6   : > { %v10682_v7 = vpop.f32.mrb[144].mxu0 }
 0x5c7   : > { %v3465_v17 = vpop.f32.mrb[145].mxu0 }
 0x5c8   : > { %v3782_v36 = vadd.f32 %v3465_v17, %v12998_v18  ;;  %v10685_v56 = vpop.f32.mrb[146].mxu0 }
 0x5c9   : > { %v3469_v21 = vpop.f32.mrb[147].mxu0 }
 0x5ca   : > { %v3814_v2 = vmul.f32 0.5, %v3782_v36  ;;  %v3783_v19 = vadd.f32 %v3469_v21, %v12999_v3 }
 0x5cc   : > { %8090 = vtanh.f32 %v3814_v2  ;;  %v3815_v16 = vmul.f32 0.5, %v3783_v19 }
 0x5ce   : > { %8092 = vtanh.f32 %v3815_v16  ;;  %v10688_v4 = vpop.f32.mrb[148].mxu0 }
 0x5cf   : > { %v3475_v26 = vpop.f32.mrb[149].mxu0 }
 0x5d0   : > { %v3784_v50 = vadd.f32 %v3475_v26, %v13000_v30  ;;  %v10691_v11 = vpop.f32.mrb[150].mxu0 }
 0x5d1   : > { %v3479_v54 = vpop.f32.mrb[151].mxu0 }
 0x5d2   : > { %v3816_v39 = vmul.f32 0.5, %v3784_v50  ;;  %v3785_v63 = vadd.f32 %v3479_v54, %v13001_v27 }
 0x5d4   : > { %8094 = vtanh.f32 %v3816_v39  ;;  %v3817_v29 = vmul.f32 0.5, %v3785_v63 }
 0x5d6   : > { %v8091_v53 = vpop.eup %8090  ;;  %8096 = vtanh.f32 %v3817_v29  ;;  %v13002_v29 = vld [vmem:[#allocation36_spill] sm:$0xff] }
 0x5d7   : > { %v3878_v52 = vadd.f32 1.0, %v8091_v53 }
 0x5d8   : > { %v8093_v20 = vpop.eup %8092 }
 0x5d9   : > { %v3910_v17 = vmul.f32 0.5, %v3878_v52  ;;  %v3879_v36 = vadd.f32 1.0, %v8093_v20 }
 0x5db   : > { %v3911_v21 = vmul.f32 0.5, %v3879_v36  ;;  %v3942_v2 = vmul.f32 %v3910_v17, %v10447_v46 }
 0x5dc   : > { %v10696_v54 = vpop.f32.mrb[152].mxu0 }
 0x5dd   : > { %v3943_v19 = vmul.f32 %v3911_v21, %v10455_v14  ;;  %v3485_v39 = vpop.f32.mrb[153].mxu0 }
 0x5de   : > { %v8095_v16 = vpop.eup %8094  ;;  %v3786_v53 = vadd.f32 %v3485_v39, %v13002_v29  ;;  %v10699_v52 = vpop.f32.mrb[154].mxu0  ;;  %v13004_v39 = vld [vmem:[#allocation39_spill] sm:$0xff] }
 0x5df   : > { %v3880_v26 = vadd.f32 1.0, %v8095_v16  ;;  %v3974_v30 = vpack.c.bf16 %v3943_v19, %v3942_v2  ;;  %v3489_v20 = vpop.f32.mrb[155].mxu0  ;;  %v13003_v16 = vld [vmem:[#allocation38_spill] sm:$0xff] }
 0x5e0   : > { %v8097_v3 = vpop.eup %8096  ;;  %v3818_v21 = vmul.f32 0.5, %v3786_v53  ;;  %v3787_v2 = vadd.f32 %v3489_v20, %v13003_v16  ;;  %v13007_v16 = vld [vmem:[#allocation44_spill] sm:$0xff] }
 0x5e1   : > { %v3912_v50 = vmul.f32 0.5, %v3880_v26  ;;  %v3881_v18 = vadd.f32 1.0, %v8097_v3  ;;  %7394 = vmatprep.mubr.bf16.mxu1 %v3974_v30  ;;  %v8692_v30 = vld [vmem:[%s12354_s4] ss:$8 sps:$4 sm:$0xff]  }
 0x5e2   : > { %8098 = vtanh.f32 %v3818_v21  ;;  %v3819_v3 = vmul.f32 0.5, %v3787_v2  ;;  %v8694_v21 = vld [vmem:[%s12354_s4 + $0x10] ss:$8 sps:$4 sm:$0xff]  }
 0x5e3   : > { %v3913_v63 = vmul.f32 0.5, %v3881_v18  ;;  %v3944_v17 = vmul.f32 %v3912_v50, %v10444_v45 }
 0x5e4   : > { %8100 = vtanh.f32 %v3819_v3  ;;  %v10704_v26 = vpop.f32.mrb[156].mxu0 }
 0x5e5   : > { %v3945_v36 = vmul.f32 %v3913_v63, %v10451_v33  ;;  %v3495_v18 = vpop.f32.mrb[157].mxu0  ;;  %v8693_v63 = vld [vmem:[%s12354_s4 + $0x14] ss:$8 sps:$4 sm:$0xff]  }
 0x5e6   : > { %v3788_v50 = vadd.f32 %v3495_v18, %v13004_v39  ;;  %v10710_v29 = vpop.f32.mrb[158].mxu0 }
 0x5e7   : > { %v3975_v19 = vpack.c.bf16 %v3945_v36, %v3944_v17  ;;  %v3499_v53 = vpop.f32.mrb[159].mxu0  ;;  %v13005_v17 = vld [vmem:[#allocation41_spill] sm:$0xff] }
 0x5e8   : > { %v3820_v20 = vmul.f32 0.5, %v3788_v50  ;;  %v3789_v36 = vadd.f32 %v3499_v53, %v13005_v17 }
 0x5e9   : > { %7395 = vmatmul.mubr.bf16.vlgmr.msra.gmra.mrb[176].mxu1 %v3975_v19  ;;  %v8695_v19 = vld [vmem:[%s12354_s4 + $0x24] ss:$8 sps:$4 sm:$0xff]  }
 0x5ea   : > { %4328 = vmatpush1.bf16.msra.mxu1 %v8692_v30  ;;  %8102 = vtanh.f32 %v3820_v20  ;;  %v3821_v2 = vmul.f32 0.5, %v3789_v36 }
 0x5eb   : > { %4329 = vmatprep.subr.bf16.mxu1 %v8693_v63  ;;  %v8696_v63 = vld [vmem:[%s12354_s4 + $0x20] ss:$8 sps:$4 sm:$0xff]  }
 0x5ec   : > { %v8099_v3 = vpop.eup %8098  ;;  %8104 = vtanh.f32 %v3821_v2 }
 0x5ed   : > { %v10722_v18 = vpop.f32.mrb[160].mxu0  ;;  %v3882_v30 = vadd.f32 1.0, %v8099_v3 }
 0x5ee   : > { %4330 = vmatpush1.bf16.msra.mxu1 %v8694_v21  ;;  %v3505_v50 = vpop.f32.mrb[161].mxu0  ;;  %v8101_v53 = vpop.eup %8100  ;;  %v13006_v21 = vld [vmem:[#allocation42_spill] sm:$0xff] }
 0x5ef   : > { %4331 = vmatprep.subr.bf16.mxu1 %v8695_v19  ;;  %v3790_v20 = vadd.f32 %v3505_v50, %v13006_v21  ;;  %v10728_v36 = vpop.f32.mrb[162].mxu0  ;;  %v8697_v19 = vld [vmem:[%s12354_s4 + $0x34] ss:$8 sps:$4 sm:$0xff]   ;;  %v3914_v2 = vmul.f32 0.5, %v3882_v30  ;;  %v3883_v17 = vadd.f32 1.0, %v8101_v53 }
 0x5f0   : > { %v3509_v39 = vpop.f32.mrb[163].mxu0  ;;  %v8699_v21 = vld [vmem:[%s12354_s4 + $0x44] ss:$8 sps:$4 sm:$0xff]  }
 0x5f1   : > { %v3822_v3 = vmul.f32 0.5, %v3790_v20  ;;  %v3791_v27 = vadd.f32 %v3509_v39, %v13007_v16  ;;  %v3915_v55 = vmul.f32 0.5, %v3883_v17  ;;  %v3946_v30 = vmul.f32 %v3914_v2, %v10502_v25 }
 0x5f2   : > { %4332 = vmatpush1.bf16.msra.mxu1 %v8696_v63  ;;  %v8698_v63 = vld [vmem:[%s12354_s4 + $0x30] ss:$8 sps:$4 sm:$0xff]  }
 0x5f3   : > { %4333 = vmatprep.subr.bf16.mxu1 %v8697_v19  ;;  %8106 = vtanh.f32 %v3822_v3  ;;  %v3823_v50 = vmul.f32 0.5, %v3791_v27  ;;  %v3947_v53 = vmul.f32 %v3915_v55, %v10511_v59  ;;  %v8700_v27 = vld [vmem:[%s12354_s4 + $0x40] ss:$8 sps:$4 sm:$0xff]   ;;  %v8701_v55 = vld [vmem:[%s12354_s4 + $0x54] ss:$8 sps:$4 sm:$0xff]  }
 0x5f4   : > { %v8103_v20 = vpop.eup %8102  ;;  %v13014_v59 = vld [vmem:[#allocation55_spill] sm:$0xff] }
 0x5f5   : > { %8108 = vtanh.f32 %v3823_v50  ;;  %v10742_v39 = vpop.f32.mrb[164].mxu0  ;;  %v3884_v17 = vadd.f32 1.0, %v8103_v20  ;;  %v3976_v16 = vpack.c.bf16 %v3947_v53, %v3946_v30  ;;  %v13009_v53 = vld [vmem:[#allocation47_spill] sm:$0xff] }
 0x5f6   : > { %4334 = vmatpush1.bf16.msra.mxu1 %v8698_v63  ;;  %v3515_v19 = vpop.f32.mrb[165].mxu0  ;;  %v8105_v3 = vpop.eup %8104  ;;  %v13008_v63 = vld [vmem:[#allocation45_spill] sm:$0xff] }
 0x5f7   : > { %4335 = vmatprep.subr.bf16.mxu1 %v8699_v21  ;;  %v3792_v49 = vadd.f32 %v3515_v19, %v13008_v63  ;;  %v10748_v21 = vpop.f32.mrb[166].mxu0  ;;  %v3916_v2 = vmul.f32 0.5, %v3884_v17  ;;  %v3885_v50 = vadd.f32 1.0, %v8105_v3  ;;  %7398 = vmatprep.mubr.bf16.mxu1 %v3976_v16  ;;  %v8703_v63 = vld [vmem:[%s12354_s4 + $0x64] ss:$8 sps:$4 sm:$0xff]  }
 0x5f8   : > { %v3519_v20 = vpop.f32.mrb[167].mxu0 }
 0x5f9   : > { %v3824_v30 = vmul.f32 0.5, %v3792_v49  ;;  %v3793_v12 = vadd.f32 %v3519_v20, %v13009_v53  ;;  %v3917_v13 = vmul.f32 0.5, %v3885_v50  ;;  %v3948_v17 = vmul.f32 %v3916_v2, %v10499_v0 }
 0x5fa   : > { %4336 = vmatpush1.bf16.msra.mxu1 %v8700_v27  ;;  %v8702_v27 = vld [vmem:[%s12354_s4 + $0x50] ss:$8 sps:$4 sm:$0xff]  }
 0x5fb   : > { %4337 = vmatprep.subr.bf16.mxu1 %v8701_v55  ;;  %8110 = vtanh.f32 %v3824_v30  ;;  %v3825_v19 = vmul.f32 0.5, %v3793_v12  ;;  %v3949_v16 = vmul.f32 %v3917_v13, %v10505_v61  ;;  %v8704_v12 = vld [vmem:[%s12354_s4 + $0x60] ss:$8 sps:$4 sm:$0xff]   ;;  %v8705_v13 = vld [vmem:[%s12354_s4 + $0x74] ss:$8 sps:$4 sm:$0xff]  }
 0x5fd   : > { %v8107_v49 = vpop.eup %8106  ;;  %8112 = vtanh.f32 %v3825_v19  ;;  %v3977_v20 = vpack.c.bf16 %v3949_v16, %v3948_v17  ;;  %v13011_v16 = vld [vmem:[#allocation49_spill] sm:$0xff] }
 0x5fe   : > { %4338 = vmatpush1.bf16.msra.mxu1 %v8702_v27  ;;  %v3886_v55 = vadd.f32 1.0, %v8107_v49  ;;  %v13010_v27 = vld [vmem:[#allocation48_spill] sm:$0xff] }
 0x5ff   : > { %4339 = vmatprep.subr.bf16.mxu1 %v8703_v63  ;;  %v10762_v3 = vpop.f32.mrb[168].mxu0  ;;  %v8109_v30 = vpop.eup %8108  ;;  %7399 = vmatmul.mubr.bf16.gmra.mrb[180].mxu1 %v3977_v20 }
 0x600   : > { %v3525_v50 = vpop.f32.mrb[169].mxu0  ;;  %v3918_v2 = vmul.f32 0.5, %v3886_v55  ;;  %v3887_v19 = vadd.f32 1.0, %v8109_v30 }
 0x601   : > { %v3794_v53 = vadd.f32 %v3525_v50, %v13010_v27  ;;  %v10768_v63 = vpop.f32.mrb[170].mxu0 }
 0x602   : > { %4340 = vmatpush1.bf16.msra.mxu1 %v8704_v12  ;;  %v3529_v49 = vpop.f32.mrb[171].mxu0  ;;  %v3919_v32 = vmul.f32 0.5, %v3887_v19  ;;  %v8706_v12 = vld [vmem:[%s12354_s4 + $0x70] ss:$8 sps:$4 sm:$0xff]   ;;  %v3950_v27 = vmul.f32 %v3918_v2, %v10538_v57  ;;  %v13012_v19 = vld [vmem:[#allocation51_spill] sm:$0xff] }
 0x603   : > { %4341 = vmatprep.subr.bf16.mxu1 %v8705_v13  ;;  %v3826_v17 = vmul.f32 0.5, %v3794_v53  ;;  %v3795_v48 = vadd.f32 %v3529_v49, %v13011_v16  ;;  %v13013_v2 = vld [vmem:[#allocation52_spill] sm:$0xff] }
 0x604   : > { %v3951_v6 = vmul.f32 %v3919_v32, %v10544_v9 }
 0x605   : > { %8114 = vtanh.f32 %v3826_v17  ;;  %v3827_v50 = vmul.f32 0.5, %v3795_v48  ;;  %v8111_v13 = vpop.eup %8110 }
 0x606   : > { %4342 = vmatpush1.bf16.msra.mxu1 %v8706_v12  ;;  %v3888_v20 = vadd.f32 1.0, %v8111_v13  ;;  %v3978_v30 = vpack.c.bf16 %v3951_v6, %v3950_v27 }
 0x607   : > { %8116 = vtanh.f32 %v3827_v50  ;;  %v10779_v55 = vpop.f32.mrb[172].mxu0  ;;  %v8113_v49 = vpop.eup %8112 }
 0x608   : > { %v3535_v53 = vpop.f32.mrb[173].mxu0  ;;  %v3920_v0 = vmul.f32 0.5, %v3888_v20  ;;  %v3889_v12 = vadd.f32 1.0, %v8113_v49  ;;  %7402 = vmatprep.mubr.bf16.mxu1 %v3978_v30 }
 0x609   : > { %v3796_v16 = vadd.f32 %v3535_v53, %v13012_v19  ;;  %v10782_v61 = vpop.f32.mrb[174].mxu0 }
 0x60a   : > { %v3539_v17 = vpop.f32.mrb[175].mxu0  ;;  %v3921_v32 = vmul.f32 0.5, %v3889_v12  ;;  %v3952_v9 = vmul.f32 %v3920_v0, %v10535_v34  ;;  %v13015_v0 = vld [vmem:[#allocation56_spill] sm:$0xff]  ;;  %v13016_v34 = vld [vmem:[#allocation57_spill] sm:$0xff] }
 0x60b   : > { %v3828_v48 = vmul.f32 0.5, %v3796_v16  ;;  %v3797_v57 = vadd.f32 %v3539_v17, %v13013_v2 }
 0x60c   : > { %v3953_v13 = vmul.f32 %v3921_v32, %v10541_v8 }
 0x60d   : > { %8118 = vtanh.f32 %v3828_v48  ;;  %v3829_v50 = vmul.f32 0.5, %v3797_v57 }
 0x60e   : > { %v3979_v20 = vpack.c.bf16 %v3953_v13, %v3952_v9 }
 0x60f   : > { %v8115_v6 = vpop.eup %8114  ;;  %8120 = vtanh.f32 %v3829_v50  ;;  %v10787_v27 = vpop.f32.mrb[176].mxu0 }
 0x610   : > { %v3890_v53 = vadd.f32 1.0, %v8115_v6  ;;  %v3545_v19 = vpop.f32.mrb[177].mxu0  ;;  %7403 = vmatmul.mubr.bf16.gmra.mrb[184].mxu1 %v3979_v20 }
 0x611   : > { %v8117_v49 = vpop.eup %8116  ;;  %v3798_v30 = vadd.f32 %v3545_v19, %v13014_v59  ;;  %v10790_v16 = vpop.f32.mrb[178].mxu0 }
 0x612   : > { %v3922_v17 = vmul.f32 0.5, %v3890_v53  ;;  %v3891_v12 = vadd.f32 1.0, %v8117_v49  ;;  %v3549_v48 = vpop.f32.mrb[179].mxu0 }
 0x613   : > { %v3830_v57 = vmul.f32 0.5, %v3798_v30  ;;  %v3799_v2 = vadd.f32 %v3549_v48, %v13015_v0 }
 0x614   : > { %v3923_v32 = vmul.f32 0.5, %v3891_v12  ;;  %v3954_v8 = vmul.f32 %v3922_v17, %v10568_v24  ;;  %v13017_v17 = vld [vmem:[#allocation58_spill] sm:$0xff]  ;;  %v13018_v24 = vld [vmem:[#allocation59_spill] sm:$0xff] }
 0x615   : > { %8122 = vtanh.f32 %v3830_v57  ;;  %v3831_v50 = vmul.f32 0.5, %v3799_v2 }
 0x616   : > { %v3955_v6 = vmul.f32 %v3923_v32, %v10574_v28 }
 0x617   : > { %v8119_v9 = vpop.eup %8118  ;;  %8124 = vtanh.f32 %v3831_v50  ;;  %v10795_v13 = vpop.f32.mrb[180].mxu0 }
 0x618   : > { %v3892_v19 = vadd.f32 1.0, %v8119_v9  ;;  %v3555_v59 = vpop.f32.mrb[181].mxu0  ;;  %v3980_v53 = vpack.c.bf16 %v3955_v6, %v3954_v8 }
 0x619   : > { %v8121_v49 = vpop.eup %8120  ;;  %v3800_v20 = vadd.f32 %v3555_v59, %v13016_v34  ;;  %v10798_v30 = vpop.f32.mrb[182].mxu0 }
 0x61a   : > { %v3924_v48 = vmul.f32 0.5, %v3892_v19  ;;  %v3893_v12 = vadd.f32 1.0, %v8121_v49  ;;  %v3559_v57 = vpop.f32.mrb[183].mxu0  ;;  %7406 = vmatprep.mubr.bf16.mxu1 %v3980_v53 }
 0x61b   : > { %v3832_v2 = vmul.f32 0.5, %v3800_v20  ;;  %v3801_v0 = vadd.f32 %v3559_v57, %v13017_v17 }
 0x61c   : > { %v3925_v32 = vmul.f32 0.5, %v3893_v12  ;;  %v3956_v28 = vmul.f32 %v3924_v48, %v10565_v40  ;;  %v13019_v48 = vld [vmem:[#allocation60_spill] sm:$0xff]  ;;  %v13020_v40 = vld [vmem:[#allocation61_spill] sm:$0xff] }
 0x61d   : > { %8126 = vtanh.f32 %v3832_v2  ;;  %v3833_v50 = vmul.f32 0.5, %v3801_v0 }
 0x61e   : > { %v3957_v9 = vmul.f32 %v3925_v32, %v10571_v38 }
 0x61f   : > { %v8123_v8 = vpop.eup %8122  ;;  %8128 = vtanh.f32 %v3833_v50  ;;  %v10803_v6 = vpop.f32.mrb[184].mxu0 }
 0x620   : > { %v3894_v59 = vadd.f32 1.0, %v8123_v8  ;;  %v3565_v34 = vpop.f32.mrb[185].mxu0  ;;  %v3981_v19 = vpack.c.bf16 %v3957_v9, %v3956_v28 }
 0x621   : > { %v8125_v49 = vpop.eup %8124  ;;  %v3802_v53 = vadd.f32 %v3565_v34, %v13018_v24  ;;  %v10806_v20 = vpop.f32.mrb[186].mxu0 }
 0x622   : > { %v3926_v57 = vmul.f32 0.5, %v3894_v59  ;;  %v3895_v12 = vadd.f32 1.0, %v8125_v49  ;;  %v3569_v2 = vpop.f32.mrb[187].mxu0  ;;  %7407 = vmatmul.mubr.bf16.gmra.mrb[188].mxu1 %v3981_v19 }
 0x623   : > { %v3834_v0 = vmul.f32 0.5, %v3802_v53  ;;  %v3803_v17 = vadd.f32 %v3569_v2, %v13019_v48 }
 0x624   : > { %v3927_v32 = vmul.f32 0.5, %v3895_v12  ;;  %v3958_v38 = vmul.f32 %v3926_v57, %v10598_v37  ;;  %v13021_v57 = vld [vmem:[#allocation64_spill] sm:$0xff]  ;;  %v13022_v37 = vld [vmem:[#allocation65_spill] sm:$0xff] }
 0x625   : > { %8130 = vtanh.f32 %v3834_v0  ;;  %v3835_v50 = vmul.f32 0.5, %v3803_v17 }
 0x626   : > { %v3959_v8 = vmul.f32 %v3927_v32, %v10604_v22 }
 0x627   : > { %v8127_v28 = vpop.eup %8126  ;;  %8132 = vtanh.f32 %v3835_v50  ;;  %v10811_v9 = vpop.f32.mrb[188].mxu0 }
 0x628   : > { %v3896_v34 = vadd.f32 1.0, %v8127_v28  ;;  %v3575_v24 = vpop.f32.mrb[189].mxu0  ;;  %v3982_v59 = vpack.c.bf16 %v3959_v8, %v3958_v38 }
 0x629   : > { %v8129_v49 = vpop.eup %8128  ;;  %v3804_v19 = vadd.f32 %v3575_v24, %v13020_v40  ;;  %v10814_v53 = vpop.f32.mrb[190].mxu0 }
 0x62a   : > { %v3928_v2 = vmul.f32 0.5, %v3896_v34  ;;  %v3897_v12 = vadd.f32 1.0, %v8129_v49  ;;  %v3579_v0 = vpop.f32.mrb[191].mxu0  ;;  %7410 = vmatprep.mubr.bf16.mxu1 %v3982_v59 }
 0x62b   : > { %v3836_v17 = vmul.f32 0.5, %v3804_v19  ;;  %v3805_v48 = vadd.f32 %v3579_v0, %v13021_v57 }
 0x62c   : > { %v3929_v32 = vmul.f32 0.5, %v3897_v12  ;;  %v3960_v22 = vmul.f32 %v3928_v2, %v10595_v5  ;;  %v13024_v2 = vld [vmem:[#allocation69_spill] sm:$0xff] }
 0x62d   : > { %8134 = vtanh.f32 %v3836_v17  ;;  %v3837_v50 = vmul.f32 0.5, %v3805_v48 }
 0x62e   : > { %v3961_v28 = vmul.f32 %v3929_v32, %v10601_v1 }
 0x62f   : > { %v8131_v38 = vpop.eup %8130  ;;  %8136 = vtanh.f32 %v3837_v50  ;;  %v10819_v8 = vpop.f32.mrb[192].mxu0 }
 0x630   : > { %v3898_v24 = vadd.f32 1.0, %v8131_v38  ;;  %v3585_v40 = vpop.f32.mrb[193].mxu0  ;;  %v3983_v34 = vpack.c.bf16 %v3961_v28, %v3960_v22 }
 0x631   : > { %v8133_v49 = vpop.eup %8132  ;;  %v3806_v59 = vadd.f32 %v3585_v40, %v13022_v37  ;;  %v10822_v19 = vpop.f32.mrb[194].mxu0 }
 0x632   : > { %13023 = vst [vmem:[#allocation67_spill] sm:$0xff] %v10822_v19  ;;  %v3930_v0 = vmul.f32 0.5, %v3898_v24  ;;  %v3899_v12 = vadd.f32 1.0, %v8133_v49  ;;  %v3589_v17 = vpop.f32.mrb[195].mxu0  ;;  %7411 = vmatmul.mubr.bf16.gmra.mrb[192].mxu1 %v3983_v34  ;;  %v13025_v19 = vld [vmem:[#allocation72_spill] sm:$0xff] }
 0x633   : > { %v3838_v48 = vmul.f32 0.5, %v3806_v59  ;;  %v3807_v57 = vadd.f32 %v3589_v17, %v13024_v2 }
 0x634   : > { %v3931_v32 = vmul.f32 0.5, %v3899_v12  ;;  %v3962_v1 = vmul.f32 %v3930_v0, %v10628_v35  ;;  %v13026_v0 = vld [vmem:[#allocation74_spill] sm:$0xff]  ;;  %v13027_v35 = vld [vmem:[#allocation75_spill] sm:$0xff] }
 0x635   : > { %8138 = vtanh.f32 %v3838_v48  ;;  %v3839_v50 = vmul.f32 0.5, %v3807_v57 }
 0x636   : > { %v3963_v38 = vmul.f32 %v3931_v32, %v10634_v42 }
 0x637   : > { %v8135_v22 = vpop.eup %8134  ;;  %8140 = vtanh.f32 %v3839_v50  ;;  %v10827_v28 = vpop.f32.mrb[196].mxu0 }
 0x638   : > { %v3900_v40 = vadd.f32 1.0, %v8135_v22  ;;  %v3595_v37 = vpop.f32.mrb[197].mxu0  ;;  %v3984_v24 = vpack.c.bf16 %v3963_v38, %v3962_v1 }
 0x639   : > { %v8137_v49 = vpop.eup %8136  ;;  %v3808_v34 = vadd.f32 %v3595_v37, %v13025_v19  ;;  %v10830_v59 = vpop.f32.mrb[198].mxu0 }
 0x63a   : > { %v3932_v17 = vmul.f32 0.5, %v3900_v40  ;;  %v3901_v12 = vadd.f32 1.0, %v8137_v49  ;;  %v3599_v48 = vpop.f32.mrb[199].mxu0  ;;  %7414 = vmatprep.mubr.bf16.mxu1 %v3984_v24 }
 0x63b   : > { %v3840_v57 = vmul.f32 0.5, %v3808_v34  ;;  %v3809_v2 = vadd.f32 %v3599_v48, %v13026_v0 }
 0x63c   : > { %v3933_v32 = vmul.f32 0.5, %v3901_v12  ;;  %v3964_v42 = vmul.f32 %v3932_v17, %v10625_v10  ;;  %v13029_v17 = vld [vmem:[#allocation77_spill] sm:$0xff] }
 0x63d   : > { %8142 = vtanh.f32 %v3840_v57  ;;  %v3841_v50 = vmul.f32 0.5, %v3809_v2 }
 0x63e   : > { %v3965_v22 = vmul.f32 %v3933_v32, %v10631_v43 }
 0x63f   : > { %v8139_v1 = vpop.eup %8138  ;;  %8144 = vtanh.f32 %v3841_v50  ;;  %v10835_v38 = vpop.f32.mrb[200].mxu0 }
 0x640   : > { %v3902_v37 = vadd.f32 1.0, %v8139_v1  ;;  %v3605_v19 = vpop.f32.mrb[201].mxu0  ;;  %v3985_v40 = vpack.c.bf16 %v3965_v22, %v3964_v42 }
 0x641   : > { %v8141_v49 = vpop.eup %8140  ;;  %v3810_v24 = vadd.f32 %v3605_v19, %v13027_v35  ;;  %v10838_v34 = vpop.f32.mrb[202].mxu0 }
 0x642   : > { %13028 = vst [vmem:[#allocation137_spill] sm:$0xff] %v10838_v34  ;;  %v3934_v48 = vmul.f32 0.5, %v3902_v37  ;;  %v3903_v12 = vadd.f32 1.0, %v8141_v49  ;;  %v3609_v57 = vpop.f32.mrb[203].mxu0  ;;  %7415 = vmatmul.mubr.bf16.gmra.mrb[196].mxu1 %v3985_v40  ;;  %v13030_v34 = vld [vmem:[#allocation80_spill] sm:$0xff] }
 0x643   : > { %v3842_v2 = vmul.f32 0.5, %v3810_v24  ;;  %v3811_v0 = vadd.f32 %v3609_v57, %v13029_v17 }
 0x644   : > { %v3935_v32 = vmul.f32 0.5, %v3903_v12  ;;  %v3966_v43 = vmul.f32 %v3934_v48, %v10650_v58  ;;  %v13031_v48 = vld [vmem:[#allocation82_spill] sm:$0xff] }
 0x645   : > { %8146 = vtanh.f32 %v3842_v2  ;;  %v3843_v50 = vmul.f32 0.5, %v3811_v0 }
 0x646   : > { %v3967_v1 = vmul.f32 %v3935_v32, %v10656_v62 }
 0x647   : > { %v8143_v42 = vpop.eup %8142  ;;  %8148 = vtanh.f32 %v3843_v50  ;;  %v10843_v22 = vpop.f32.mrb[204].mxu0 }
 0x648   : > { %v3904_v19 = vadd.f32 1.0, %v8143_v42  ;;  %v3615_v35 = vpop.f32.mrb[205].mxu0  ;;  %v3986_v37 = vpack.c.bf16 %v3967_v1, %v3966_v43 }
 0x649   : > { %v8145_v49 = vpop.eup %8144  ;;  %v3812_v40 = vadd.f32 %v3615_v35, %v13030_v34  ;;  %v10846_v24 = vpop.f32.mrb[206].mxu0 }
 0x64a   : > { %v3936_v57 = vmul.f32 0.5, %v3904_v19  ;;  %v3905_v12 = vadd.f32 1.0, %v8145_v49  ;;  %v3619_v2 = vpop.f32.mrb[207].mxu0  ;;  %7418 = vmatprep.mubr.bf16.mxu1 %v3986_v37 }
 0x64b   : > { %v3844_v0 = vmul.f32 0.5, %v3812_v40  ;;  %v3813_v17 = vadd.f32 %v3619_v2, %v13031_v48 }
 0x64c   : > { %v3937_v32 = vmul.f32 0.5, %v3905_v12  ;;  %v3968_v62 = vmul.f32 %v3936_v57, %v10646_v15 }
 0x64d   : > { %8150 = vtanh.f32 %v3844_v0  ;;  %v3845_v50 = vmul.f32 0.5, %v3813_v17 }
 0x64e   : > { %v3969_v42 = vmul.f32 %v3937_v32, %v10653_v51 }
 0x64f   : > { %v8147_v43 = vpop.eup %8146  ;;  %8152 = vtanh.f32 %v3845_v50 }
 0x650   : > { %v3906_v1 = vadd.f32 1.0, %v8147_v43  ;;  %v3987_v35 = vpack.c.bf16 %v3969_v42, %v3968_v62 }
 0x651   : > { %v8149_v34 = vpop.eup %8148 }
 0x652   : > { %v3938_v58 = vmul.f32 0.5, %v3906_v1  ;;  %v3907_v19 = vadd.f32 1.0, %v8149_v34  ;;  %7419 = vmatmul.mubr.bf16.gmra.mrb[200].mxu1 %v3987_v35  ;;  %v13032_v34 = vld [vmem:[#allocation84_spill] sm:$0xff]  ;;  %v13033_v1 = vld [vmem:[#allocation85_spill] sm:$0xff] }
 0x653   : > { %v3622_v43 = vadd.f32 %v10682_v7, %v13032_v34  ;;  %v3625_v35 = vadd.f32 %v10691_v11, %v13033_v1 }
 0x654   : > { %v3939_v49 = vmul.f32 0.5, %v3907_v19  ;;  %v3970_v37 = vmul.f32 %v3938_v58, %v10671_v47  ;;  %v3624_v58 = vadd.f32 %v10688_v4, %v9725_v60  ;;  %v13034_v19 = vld [vmem:[#allocation86_spill] sm:$0xff] }
 0x656   : > { %v3971_v40 = vmul.f32 %v3939_v49, %v10675_v41  ;;  %v3656_v49 = vmul.f32 0.5, %v3624_v58 }
 0x657   : > { %v8151_v12 = vpop.eup %8150 }
 0x658   : > { %v3908_v2 = vadd.f32 1.0, %v8151_v12  ;;  %v3988_v17 = vpack.c.bf16 %v3971_v40, %v3970_v37  ;;  %v3654_v37 = vmul.f32 0.5, %v3622_v43  ;;  %v3657_v40 = vmul.f32 0.5, %v3625_v35  ;;  %v13037_v43 = vld [vmem:[#allocation89_spill] sm:$0xff] }
 0x659   : > { %v8153_v0 = vpop.eup %8152  ;;  %8154 = vtanh.f32 %v3656_v49 }
 0x65a   : > { %v3940_v57 = vmul.f32 0.5, %v3908_v2  ;;  %v3909_v48 = vadd.f32 1.0, %v8153_v0  ;;  %7422 = vmatprep.mubr.bf16.mxu1 %v3988_v17  ;;  %8156 = vtanh.f32 %v3654_v37  ;;  %v13038_v37 = vld [vmem:[#allocation90_spill] sm:$0xff] }
 0x65b   : > { %8158 = vtanh.f32 %v3657_v40 }
 0x65c   : > { %v3941_v32 = vmul.f32 0.5, %v3909_v48  ;;  %v3972_v50 = vmul.f32 %v3940_v57, %v10668_v31  ;;  %v3623_v48 = vadd.f32 %v10685_v56, %v13034_v19  ;;  %v13035_v57 = vld [vmem:[#allocation87_spill] sm:$0xff] }
 0x65d   : > { %v13039_v19 = vld [vmem:[#allocation91_spill] sm:$0xff] }
 0x65e   : > { %v3973_v62 = vmul.f32 %v3941_v32, %v10673_v44  ;;  %v3655_v12 = vmul.f32 0.5, %v3623_v48  ;;  %v3626_v1 = vadd.f32 %v10696_v54, %v13039_v19 }
 0x660   : > { %v3989_v42 = vpack.c.bf16 %v3973_v62, %v3972_v50  ;;  %8160 = vtanh.f32 %v3655_v12  ;;  %v13036_v62 = vld [vmem:[#allocation88_spill] sm:$0xff] }
 0x662   : > { %7423 = vmatmul.mubr.bf16.gmra.mrb[204].mxu1 %v3989_v42 }
 0x663   : > { %4359 = vmatprep.mubr.bf16.mxu1 %v12739_v23  ;;  %v8155_v2 = vpop.eup %8154 }
 0x664   : > { %v8157_v17 = vpop.eup %8156  ;;  %v3720_v11 = vadd.f32 1.0, %v8155_v2 }
 0x665   : > { %v8159_v0 = vpop.eup %8158  ;;  %v3718_v58 = vadd.f32 1.0, %v8157_v17  ;;  %v13041_v17 = vld [vmem:[#allocation93_spill] sm:$0xff] }
 0x666   : > { %v3721_v49 = vadd.f32 1.0, %v8159_v0 }
 0x66a   : > { %v8161_v50 = vpop.eup %8160 }
 0x66b   : > { %v3719_v12 = vadd.f32 1.0, %v8161_v50 }
 0x6bc   : > { %v7396_v4 = vpop.f32.mrb[176].mxu1 }
 0x6bd   : > { %v4033_v7 = vadd.f32 %v7396_v4, %v13035_v57  ;;  %v4024_v32 = vpop.f32.mrb[177].mxu1  ;;  %v3752_v4 = vmul.f32 0.5, %v3720_v11  ;;  %v13040_v57 = vld [vmem:[#allocation92_spill] sm:$0xff] }
 0x6be   : > { %v4025_v42 = vadd.f32 %v4024_v32, %v13036_v62  ;;  %v7397_v56 = vpop.f32.mrb[178].mxu1  ;;  %v3627_v2 = vadd.f32 %v10699_v52, %v13040_v57  ;;  %v3750_v32 = vmul.f32 0.5, %v3718_v58 }
 0x6bf   : > { %8162 = vtanh.f32 %v4033_v7  ;;  %v4036_v35 = vadd.f32 %v7397_v56, %v13037_v43  ;;  %v4027_v48 = vpop.f32.mrb[179].mxu1  ;;  %v3628_v7 = vadd.f32 %v10704_v26, %v13041_v17  ;;  %v3753_v56 = vmul.f32 0.5, %v3721_v49  ;;  %v13042_v43 = vld [vmem:[#allocation94_spill] sm:$0xff] }
 0x6c0   : > { %8164 = vtanh.f32 %v4025_v42  ;;  %v4028_v40 = vadd.f32 %v4027_v48, %v13038_v37  ;;  %v3629_v0 = vadd.f32 %v10710_v29, %v13042_v43  ;;  %v3751_v42 = vmul.f32 0.5, %v3719_v12 }
 0x6c1   : > { %8166 = vtanh.f32 %v4036_v35  ;;  %v3658_v48 = vmul.f32 0.5, %v3626_v1  ;;  %v4185_v50 = vsub.f32 1.0, %v3752_v4  ;;  %v3659_v37 = vmul.f32 0.5, %v3627_v2 }
 0x6c2   : > { %8168 = vtanh.f32 %v4028_v40  ;;  %v4183_v62 = vsub.f32 1.0, %v3750_v32  ;;  %v3660_v54 = vmul.f32 0.5, %v3628_v7  ;;  %v4186_v35 = vsub.f32 1.0, %v3753_v56 }
 0x6c3   : > { %v3661_v11 = vmul.f32 0.5, %v3629_v0  ;;  %v4184_v34 = vsub.f32 1.0, %v3751_v42  ;;  %8170 = vtanh.f32 %v3658_v48  ;;  %v4217_v58 = vmul.f32 %v4185_v50, %v10444_v45  ;;  %v13043_v45 = vld [vmem:[#allocation95_spill] sm:$0xff] }
 0x6c4   : > { %8172 = vtanh.f32 %v3659_v37  ;;  %v4215_v40 = vmul.f32 %v4183_v62, %v10447_v46  ;;  %v4218_v12 = vmul.f32 %v4186_v35, %v10451_v33  ;;  %v13044_v46 = vld [vmem:[#allocation96_spill] sm:$0xff]  ;;  %v13045_v33 = vld [vmem:[#allocation97_spill] sm:$0xff] }
 0x6c5   : > { %8174 = vtanh.f32 %v3660_v54  ;;  %v4216_v0 = vmul.f32 %v4184_v34, %v10455_v14  ;;  %v3631_v62 = vadd.f32 %v10728_v36, %v13044_v46 }
 0x6c6   : > { %8176 = vtanh.f32 %v3661_v11 }
 0x6c7   : > { %v3663_v54 = vmul.f32 0.5, %v3631_v62 }
 0x6c9   : > { %v8163_v19 = vpop.eup %8162 }
 0x6ca   : > { %v8165_v52 = vpop.eup %8164  ;;  %v4249_v26 = vmul.f32 %v8163_v19, %v3752_v4  ;;  %v3630_v19 = vadd.f32 %v10722_v18, %v13043_v45 }
 0x6cb   : > { %v8167_v49 = vpop.eup %8166  ;;  %v4247_v29 = vmul.f32 %v8165_v52, %v3750_v32  ;;  %v3632_v32 = vadd.f32 %v10742_v39, %v13045_v33 }
 0x6cc   : > { %v8169_v1 = vpop.eup %8168  ;;  %v4250_v2 = vmul.f32 %v8167_v49, %v3753_v56  ;;  %v10879_v7 = vadd.f32 %v4249_v26, %v4217_v58  ;;  %v13046_v56 = vld [vmem:[#allocation98_spill] sm:$0xff]  ;;  %v3662_v34 = vmul.f32 0.5, %v3630_v19  ;;  %v13047_v26 = vld [vmem:[#allocation99_spill] sm:$0xff]  ;;  %v13049_v19 = vld [vmem:[#allocation100_spill] sm:$0xff] }
 0x6cd   : > { %v10882_v48 = vadd.f32 %v4247_v29, %v4215_v40  ;;  %v4248_v43 = vmul.f32 %v8169_v1, %v3751_v42  ;;  %v3633_v50 = vadd.f32 %v10748_v21, %v13046_v56  ;;  %v8171_v42 = vpop.eup %8170  ;;  %v3664_v35 = vmul.f32 0.5, %v3632_v32  ;;  %v13048_v1 = vld [vmem:[#allocation101_spill] sm:$0xff] }
 0x6ce   : > { %v10886_v37 = vadd.f32 %v4250_v2, %v4218_v12  ;;  %v8173_v18 = vpop.eup %8172  ;;  %8178 = vtanh.f32 %v3662_v34  ;;  %v3722_v52 = vadd.f32 1.0, %v8171_v42 }
 0x6cf   : > { %v10890_v4 = vadd.f32 %v4248_v43, %v4216_v0  ;;  %v8175_v36 = vpop.eup %8174  ;;  %v3665_v43 = vmul.f32 0.5, %v3633_v50  ;;  %8180 = vtanh.f32 %v3663_v54  ;;  %v3723_v58 = vadd.f32 1.0, %v8173_v18  ;;  %v13050_v50 = vld [vmem:[#allocation102_spill] sm:$0xff] }
 0x6d0   : > { %v8177_v11 = vpop.eup %8176  ;;  %v3724_v21 = vadd.f32 1.0, %v8175_v36  ;;  %8182 = vtanh.f32 %v3664_v35  ;;  %v4312_v0 = vpack.c.bf16 %v10886_v37, %v10879_v7  ;;  %v3754_v34 = vmul.f32 0.5, %v3722_v52  ;;  %v13051_v35 = vld [vmem:[#allocation103_spill] sm:$0xff] }
 0x6d1   : > { %v4311_v14 = vpack.c.bf16 %v10890_v4, %v10882_v48  ;;  %v3725_v29 = vadd.f32 1.0, %v8177_v11  ;;  %8184 = vtanh.f32 %v3665_v43  ;;  %v3755_v42 = vmul.f32 0.5, %v3723_v58  ;;  %v13052_v43 = vld [vmem:[#allocation104_spill] sm:$0xff] }
 0x6d2   : > { %v7400_v39 = vpop.f32.mrb[180].mxu1  ;;  %v3756_v54 = vmul.f32 0.5, %v3724_v21  ;;  %v3634_v36 = vadd.f32 %v10762_v3, %v13051_v35  ;;  %v3635_v11 = vadd.f32 %v10768_v63, %v13052_v43  ;;  %v13055_v63 = vld [vmem:[#allocation133_spill] sm:$0xff] }
 0x6d3   : > { %4360 = vmatmul.mubr.bf16.vlgmr.msra.gmra.mrb[208].mxu1 %v4311_v14  ;;  %v4049_v49 = vadd.f32 %v7400_v39, %v13047_v26  ;;  %v4040_v40 = vpop.f32.mrb[181].mxu1  ;;  %v3757_v18 = vmul.f32 0.5, %v3725_v29  ;;  %v13056_v26 = vld [vmem:[#allocation132_spill] sm:$0xff] }
 0x6d4   : > { %4369 = vmatprep.mubr.bf16.mxu1 %v12739_v23  ;;  %v4041_v12 = vadd.f32 %v4040_v40, %v13048_v1  ;;  %v7401_v2 = vpop.f32.mrb[182].mxu1  ;;  %v4188_v40 = vsub.f32 1.0, %v3755_v42  ;;  %v4189_v58 = vsub.f32 1.0, %v3756_v54 }
 0x6d5   : > { %8186 = vtanh.f32 %v4049_v49  ;;  %v4052_v62 = vadd.f32 %v7401_v2, %v13049_v19  ;;  %v4043_v32 = vpop.f32.mrb[183].mxu1  ;;  %v4187_v49 = vsub.f32 1.0, %v3754_v34 }
 0x6d6   : > { %8188 = vtanh.f32 %v4041_v12  ;;  %v4044_v14 = vadd.f32 %v4043_v32, %v13050_v50  ;;  %v13053_v12 = vld [vmem:[#allocation105_spill] sm:$0xff]  ;;  %v3666_v32 = vmul.f32 0.5, %v3634_v36  ;;  %v3667_v50 = vmul.f32 0.5, %v3635_v11 }
 0x6d7   : > { %8190 = vtanh.f32 %v4052_v62  ;;  %v3636_v2 = vadd.f32 %v10779_v55, %v13053_v12  ;;  %v13054_v62 = vld [vmem:[#allocation106_spill] sm:$0xff]  ;;  %v4219_v35 = vmul.f32 %v4187_v49, %v10502_v25  ;;  %v4220_v43 = vmul.f32 %v4188_v40, %v13055_v63  ;;  %v13057_v55 = vld [vmem:[#allocation135_spill] sm:$0xff] }
 0x6d8   : > { %8192 = vtanh.f32 %v4044_v14  ;;  %v8179_v39 = vpop.eup %8178  ;;  %v3637_v21 = vadd.f32 %v10782_v61, %v13054_v62  ;;  %v4221_v56 = vmul.f32 %v4189_v58, %v13056_v26  ;;  %v13059_v40 = vld [vmem:[#allocation18_spill] sm:$0xff] }
 0x6d9   : > { %v8181_v52 = vpop.eup %8180  ;;  %v3668_v19 = vmul.f32 0.5, %v3636_v2  ;;  %v3726_v17 = vadd.f32 1.0, %v8179_v39  ;;  %8194 = vtanh.f32 %v3666_v32  ;;  %v13060_v39 = vld [vmem:[#allocation19_spill] sm:$0xff] }
 0x6da   : > { %v8183_v29 = vpop.eup %8182  ;;  %v3669_v33 = vmul.f32 0.5, %v3637_v21  ;;  %v3727_v61 = vadd.f32 1.0, %v8181_v52  ;;  %8196 = vtanh.f32 %v3667_v50  ;;  %v13062_v50 = vld [vmem:[#allocation107_spill] sm:$0xff] }
 0x6db   : > { %4370 = vmatmul.mubr.bf16.gmra.mrb[212].mxu1 %v4312_v0  ;;  %v4190_v0 = vsub.f32 1.0, %v3757_v18  ;;  %v8185_v14 = vpop.eup %8184  ;;  %v3728_v11 = vadd.f32 1.0, %v8183_v29  ;;  %8198 = vtanh.f32 %v3668_v19  ;;  %v3758_v19 = vmul.f32 0.5, %v3726_v17  ;;  %v13065_v29 = vld [vmem:[#allocation109_spill] sm:$0xff] }
 0x6dc   : > { %4379 = vmatprep.mubr.bf16.mxu1 %v12739_v23  ;;  %8200 = vtanh.f32 %v3669_v33 }
 0x6dd   : > { %v4222_v12 = vmul.f32 %v4190_v0, %v13057_v55 }
 0x6df   : > { %v8187_v3 = vpop.eup %8186 }
 0x6e0   : > { %v8189_v1 = vpop.eup %8188  ;;  %v4253_v46 = vmul.f32 %v8187_v3, %v3756_v54  ;;  %v3729_v54 = vadd.f32 1.0, %v8185_v14  ;;  %v4191_v14 = vsub.f32 1.0, %v3758_v19  ;;  %v13066_v3 = vld [vmem:[#allocation35_spill] sm:$0xff] }
 0x6e1   : > { %v8191_v45 = vpop.eup %8190  ;;  %v4251_v36 = vmul.f32 %v8189_v1, %v3754_v34  ;;  %v3640_v63 = vadd.f32 %v10795_v13, %v13066_v3 }
 0x6e2   : > { %v8193_v62 = vpop.eup %8192  ;;  %v4254_v25 = vmul.f32 %v8191_v45, %v3757_v18  ;;  %v10918_v49 = vadd.f32 %v4253_v46, %v4221_v56  ;;  %v13063_v56 = vld [vmem:[#allocation108_spill] sm:$0xff]  ;;  %v3760_v18 = vmul.f32 0.5, %v3728_v11  ;;  %v13067_v11 = vld [vmem:[#allocation110_spill] sm:$0xff] }
 0x6e3   : > { %v7404_v57 = vpop.f32.mrb[184].mxu1  ;;  %v4252_v58 = vmul.f32 %v8193_v62, %v3755_v42  ;;  %v10921_v0 = vadd.f32 %v4251_v36, %v4219_v35  ;;  %v3759_v42 = vmul.f32 0.5, %v3727_v61  ;;  %v3761_v35 = vmul.f32 0.5, %v3729_v54  ;;  %v8195_v32 = vpop.eup %8194 }
 0x6e4   : > { %13058 = vst [vmem:[#allocation83_spill] sm:$0xff] %v10918_v49  ;;  %v4065_v2 = vadd.f32 %v7404_v57, %v13059_v40  ;;  %v4056_v26 = vpop.f32.mrb[185].mxu1  ;;  %v10924_v1 = vadd.f32 %v4254_v25, %v4222_v12  ;;  %v13064_v12 = vld [vmem:[#allocation32_spill] sm:$0xff]  ;;  %v8197_v55 = vpop.eup %8196  ;;  %v4193_v61 = vsub.f32 1.0, %v3760_v18  ;;  %v3641_v25 = vadd.f32 %v10798_v30, %v13067_v11 }
 0x6e5   : > { %v4057_v52 = vadd.f32 %v4056_v26, %v13060_v39  ;;  %v7405_v21 = vpop.f32.mrb[186].mxu1  ;;  %v10927_v46 = vadd.f32 %v4252_v58, %v4220_v43  ;;  %v3638_v62 = vadd.f32 %v10787_v27, %v13064_v12  ;;  %v3639_v43 = vadd.f32 %v10790_v16, %v13065_v29  ;;  %v13068_v16 = vld [vmem:[#allocation136_spill] sm:$0xff]  ;;  %v13071_v29 = vld [vmem:[#allocation111_spill] sm:$0xff] }
 0x6e6   : > { %13061 = vst [vmem:[#allocation128_spill] sm:$0xff] %v10924_v1  ;;  %8202 = vtanh.f32 %v4065_v2  ;;  %v4068_v34 = vadd.f32 %v7405_v21, %v13062_v50  ;;  %v4059_v45 = vpop.f32.mrb[187].mxu1  ;;  %v4192_v17 = vsub.f32 1.0, %v3759_v42  ;;  %v4194_v36 = vsub.f32 1.0, %v3761_v35  ;;  %v8199_v2 = vpop.eup %8198  ;;  %v13069_v21 = vld [vmem:[#allocation113_spill] sm:$0xff]  ;;  %v13147_v40 = vld [vmem:[#allocation48_spill] sm:$0xff] }
 0x6e7   : > { %8204 = vtanh.f32 %v4057_v52  ;;  %v4060_v57 = vadd.f32 %v4059_v45, %v13063_v56  ;;  %v4313_v33 = vpack.c.bf16 %v10927_v46, %v10921_v0  ;;  %v3670_v27 = vmul.f32 0.5, %v3638_v62  ;;  %v8201_v26 = vpop.eup %8200 }
 0x6e8   : > { %8206 = vtanh.f32 %v4068_v34  ;;  %v3671_v58 = vmul.f32 0.5, %v3639_v43  ;;  %v4223_v52 = vmul.f32 %v4191_v14, %v13068_v16  ;;  %v4224_v34 = vmul.f32 %v4192_v17, %v13069_v21 }
 0x6e9   : > { %8208 = vtanh.f32 %v4060_v57  ;;  %4380 = vmatmul.mubr.bf16.gmra.mrb[216].mxu1 %v4313_v33  ;;  %v3672_v45 = vmul.f32 0.5, %v3640_v63  ;;  %v4314_v57 = vpack.c.bf16 %v10924_v1, %v10918_v49  ;;  %v13070_v33 = vld [vmem:[#allocation134_spill] sm:$0xff]  ;;  %v4226_v12 = vmul.f32 %v4194_v36, %v13071_v29 }
 0x6ea   : > { %4389 = vmatprep.mubr.bf16.mxu1 %v12739_v23  ;;  %v4225_v3 = vmul.f32 %v4193_v61, %v13070_v33  ;;  %v3673_v56 = vmul.f32 0.5, %v3641_v25  ;;  %v3730_v62 = vadd.f32 1.0, %v8195_v32  ;;  %v3731_v50 = vadd.f32 1.0, %v8197_v55  ;;  %v13073_v61 = vld [vmem:[#allocation20_spill] sm:$0xff]  ;;  %v13075_v55 = vld [vmem:[#allocation21_spill] sm:$0xff] }
 0x6eb   : > { %8210 = vtanh.f32 %v3670_v27  ;;  %v3732_v16 = vadd.f32 1.0, %v8199_v2  ;;  %v3733_v32 = vadd.f32 1.0, %v8201_v26  ;;  %v13081_v33 = vld [vmem:[#allocation116_spill] sm:$0xff] }
 0x6ec   : > { %8212 = vtanh.f32 %v3671_v58  ;;  %v13077_v58 = vld [vmem:[#allocation114_spill] sm:$0xff] }
 0x6ed   : > { %8214 = vtanh.f32 %v3672_v45  ;;  %v3764_v26 = vmul.f32 0.5, %v3732_v16 }
 0x6ee   : > { %8216 = vtanh.f32 %v3673_v56 }
 0x6f0   : > { %v8203_v54 = vpop.eup %8202 }
 0x6f1   : > { %v8205_v13 = vpop.eup %8204  ;;  %v4257_v30 = vmul.f32 %v8203_v54, %v3760_v18  ;;  %4390 = vmatmul.mubr.bf16.gmra.mrb[220].mxu1 %v4314_v57  ;;  %v3762_v57 = vmul.f32 0.5, %v3730_v62 }
 0x6f2   : > { %v8207_v11 = vpop.eup %8206  ;;  %v4255_v43 = vmul.f32 %v8205_v13, %v3758_v19  ;;  %4399 = vmatprep.mubr.bf16.mxu1 %v12739_v23 }
 0x6f3   : > { %v8209_v14 = vpop.eup %8208  ;;  %v4258_v63 = vmul.f32 %v8207_v11, %v3761_v35  ;;  %v10948_v21 = vadd.f32 %v4257_v30, %v4225_v3  ;;  %v13079_v11 = vld [vmem:[#allocation115_spill] sm:$0xff] }
 0x6f4   : > { %v4256_v18 = vmul.f32 %v8209_v14, %v3759_v42  ;;  %v10951_v25 = vadd.f32 %v4255_v43, %v4223_v52  ;;  %v3763_v42 = vmul.f32 0.5, %v3731_v50  ;;  %v3765_v52 = vmul.f32 0.5, %v3733_v32  ;;  %v13082_v50 = vld [vmem:[#allocation40_spill] sm:$0xff] }
 0x6f5   : > { %v7408_v17 = vpop.f32.mrb[188].mxu1  ;;  %13072 = vst [vmem:[#allocation79_spill] sm:$0xff] %v10948_v21  ;;  %v10954_v2 = vadd.f32 %v4258_v63, %v4226_v12  ;;  %v13080_v12 = vld [vmem:[#allocation37_spill] sm:$0xff]  ;;  %v8211_v30 = vpop.eup %8210  ;;  %v4195_v43 = vsub.f32 1.0, %v3762_v57  ;;  %v3644_v14 = vadd.f32 %v10811_v9, %v13082_v50  ;;  %v4197_v63 = vsub.f32 1.0, %v3764_v26 }
 0x6f6   : > { %v4081_v29 = vadd.f32 %v7408_v17, %v13073_v61  ;;  %v4072_v36 = vpop.f32.mrb[189].mxu1  ;;  %13074 = vst [vmem:[#allocation138_spill] sm:$0xff] %v10951_v25  ;;  %v10957_v3 = vadd.f32 %v4256_v18, %v4224_v34  ;;  %v3642_v13 = vadd.f32 %v10803_v6, %v13080_v12  ;;  %v3643_v34 = vadd.f32 %v10806_v20, %v13081_v33  ;;  %v8213_v17 = vpop.eup %8212  ;;  %v13084_v20 = vld [vmem:[#allocation112_spill] sm:$0xff]  ;;  %v13086_v50 = vld [vmem:[#allocation53_spill] sm:$0xff] }
 0x6f7   : > { %v4073_v19 = vadd.f32 %v4072_v36, %v13075_v55  ;;  %v7409_v27 = vpop.f32.mrb[190].mxu1  ;;  %13076 = vst [vmem:[#allocation131_spill] sm:$0xff] %v10954_v2  ;;  %v4196_v62 = vsub.f32 1.0, %v3763_v42  ;;  %v4198_v16 = vsub.f32 1.0, %v3765_v52  ;;  %v8215_v18 = vpop.eup %8214  ;;  %v4316_v33 = vpack.c.bf16 %v10954_v2, %v10948_v21 }
 0x6f8   : > { %8218 = vtanh.f32 %v4081_v29  ;;  %v4084_v54 = vadd.f32 %v7409_v27, %v13077_v58  ;;  %v4075_v35 = vpop.f32.mrb[191].mxu1  ;;  %13078 = vst [vmem:[#allocation133_spill] sm:$0xff] %v10957_v3  ;;  %v4315_v56 = vpack.c.bf16 %v10957_v3, %v10951_v25  ;;  %v13083_v29 = vld [vmem:[#allocation117_spill] sm:$0xff]  ;;  %v3674_v6 = vmul.f32 0.5, %v3642_v13  ;;  %v8217_v32 = vpop.eup %8216 }
 0x6f9   : > { %8220 = vtanh.f32 %v4073_v19  ;;  %v4076_v45 = vadd.f32 %v4075_v35, %v13079_v11  ;;  %v3645_v36 = vadd.f32 %v10814_v53, %v13083_v29  ;;  %v3675_v19 = vmul.f32 0.5, %v3643_v34  ;;  %v13085_v35 = vld [vmem:[#allocation121_spill] sm:$0xff]  ;;  %v13087_v11 = vld [vmem:[#allocation119_spill] sm:$0xff] }
 0x6fa   : > { %8222 = vtanh.f32 %v4084_v54  ;;  %4400 = vmatmul.mubr.bf16.gmra.mrb[224].mxu1 %v4315_v56  ;;  %v4227_v54 = vmul.f32 %v4195_v43, %v13084_v20  ;;  %v3676_v56 = vmul.f32 0.5, %v3644_v14  ;;  %v4229_v12 = vmul.f32 %v4197_v63, %v13086_v50  ;;  %v13089_v50 = vld [vmem:[#allocation22_spill] sm:$0xff] }
 0x6fb   : > { %8224 = vtanh.f32 %v4076_v45  ;;  %4409 = vmatprep.mubr.bf16.mxu1 %v12739_v23  ;;  %v4228_v45 = vmul.f32 %v4196_v62, %v13085_v35  ;;  %v4230_v58 = vmul.f32 %v4198_v16, %v13087_v11  ;;  %v3677_v55 = vmul.f32 0.5, %v3645_v36 }
 0x6fc   : > { %v3734_v13 = vadd.f32 1.0, %v8211_v30  ;;  %v3735_v61 = vadd.f32 1.0, %v8213_v17  ;;  %8226 = vtanh.f32 %v3674_v6  ;;  %v3736_v20 = vadd.f32 1.0, %v8215_v18  ;;  %v13093_v18 = vld [vmem:[#allocation122_spill] sm:$0xff] }
 0x6fd   : > { %8228 = vtanh.f32 %v3675_v19  ;;  %v3737_v30 = vadd.f32 1.0, %v8217_v32 }
 0x6fe   : > { %8230 = vtanh.f32 %v3676_v56  ;;  %v3768_v32 = vmul.f32 0.5, %v3736_v20 }
 0x6ff   : > { %8232 = vtanh.f32 %v3677_v55 }
 0x702   : > { %v8219_v27 = vpop.eup %8218  ;;  %4410 = vmatmul.mubr.bf16.gmra.mrb[228].mxu1 %v4316_v33  ;;  %v13091_v33 = vld [vmem:[#allocation23_spill] sm:$0xff] }
 0x703   : > { %v8221_v9 = vpop.eup %8220  ;;  %v4261_v53 = vmul.f32 %v8219_v27, %v3764_v26  ;;  %4419 = vmatprep.mubr.bf16.mxu1 %v12739_v23  ;;  %v3766_v27 = vmul.f32 0.5, %v3734_v13 }
 0x704   : > { %v8223_v29 = vpop.eup %8222  ;;  %v4259_v34 = vmul.f32 %v8221_v9, %v3762_v57 }
 0x705   : > { %v8225_v43 = vpop.eup %8224  ;;  %v7412_v62 = vpop.f32.mrb[192].mxu1  ;;  %v4262_v14 = vmul.f32 %v8223_v29, %v3765_v52  ;;  %v10978_v35 = vadd.f32 %v4261_v53, %v4229_v12  ;;  %v13095_v29 = vld [vmem:[#allocation123_spill] sm:$0xff]  ;;  %v4199_v9 = vsub.f32 1.0, %v3766_v27 }
 0x706   : > { %v4097_v11 = vadd.f32 %v7412_v62, %v13089_v50  ;;  %v4088_v63 = vpop.f32.mrb[193].mxu1  ;;  %v4260_v26 = vmul.f32 %v8225_v43, %v3763_v42  ;;  %v10981_v16 = vadd.f32 %v4259_v34, %v4227_v54  ;;  %v3767_v42 = vmul.f32 0.5, %v3735_v61  ;;  %v13097_v61 = vld [vmem:[#allocation46_spill] sm:$0xff] }
 0x707   : > { %13088 = vst [vmem:[#allocation132_spill] sm:$0xff] %v10978_v35  ;;  %v4089_v57 = vadd.f32 %v4088_v63, %v13091_v33  ;;  %v7413_v17 = vpop.f32.mrb[194].mxu1  ;;  %v10984_v36 = vadd.f32 %v4262_v14, %v4230_v58  ;;  %v3769_v54 = vmul.f32 0.5, %v3737_v30  ;;  %v13096_v58 = vld [vmem:[#allocation43_spill] sm:$0xff]  ;;  %v4201_v43 = vsub.f32 1.0, %v3768_v32  ;;  %v13101_v33 = vld [vmem:[#allocation125_spill] sm:$0xff] }
 0x708   : > { %13090 = vst [vmem:[#allocation135_spill] sm:$0xff] %v10981_v16  ;;  %8234 = vtanh.f32 %v4097_v11  ;;  %v4100_v6 = vadd.f32 %v7413_v17, %v13093_v18  ;;  %v4091_v52 = vpop.f32.mrb[195].mxu1  ;;  %v10987_v12 = vadd.f32 %v4260_v26, %v4228_v45  ;;  %v3646_v56 = vadd.f32 %v10819_v8, %v13096_v58  ;;  %v8227_v45 = vpop.eup %8226  ;;  %v13098_v26 = vld [vmem:[#allocation118_spill] sm:$0xff] }
 0x709   : > { %13092 = vst [vmem:[#allocation136_spill] sm:$0xff] %v10984_v36  ;;  %8236 = vtanh.f32 %v4089_v57  ;;  %v4092_v19 = vadd.f32 %v4091_v52, %v13095_v29  ;;  %v4200_v53 = vsub.f32 1.0, %v3767_v42  ;;  %v8229_v34 = vpop.eup %8228  ;;  %v4202_v13 = vsub.f32 1.0, %v3769_v54  ;;  %v13099_v57 = vld [vmem:[#allocation63_spill] sm:$0xff] }
 0x70a   : > { %13094 = vst [vmem:[#allocation113_spill] sm:$0xff] %v10987_v12  ;;  %8238 = vtanh.f32 %v4100_v6  ;;  %v4317_v55 = vpack.c.bf16 %v10987_v12, %v10981_v16  ;;  %v3648_v62 = vadd.f32 %v10827_v28, %v13097_v61  ;;  %v8231_v14 = vpop.eup %8230  ;;  %v3678_v20 = vmul.f32 0.5, %v3646_v56 }
 0x70b   : > { %8240 = vtanh.f32 %v4092_v19  ;;  %v8233_v11 = vpop.eup %8232  ;;  %v4231_v30 = vmul.f32 %v4199_v9, %v13098_v26  ;;  %v4232_v17 = vmul.f32 %v4200_v53, %v13099_v57  ;;  %v4318_v8 = vpack.c.bf16 %v10984_v36, %v10978_v35  ;;  %v13100_v19 = vld [vmem:[#allocation120_spill] sm:$0xff]  ;;  %v13103_v57 = vld [vmem:[#allocation67_spill] sm:$0xff] }
 0x70c   : > { %4420 = vmatmul.mubr.bf16.gmra.mrb[232].mxu1 %v4317_v55  ;;  %v4233_v52 = vmul.f32 %v4201_v43, %v10595_v5  ;;  %v4234_v55 = vmul.f32 %v4202_v13, %v13100_v19  ;;  %v3680_v58 = vmul.f32 0.5, %v3648_v62  ;;  %v3738_v28 = vadd.f32 1.0, %v8227_v45  ;;  %v13102_v53 = vld [vmem:[#allocation124_spill] sm:$0xff] }
 0x70d   : > { %4429 = vmatprep.mubr.bf16.mxu1 %v12739_v23  ;;  %v3739_v61 = vadd.f32 1.0, %v8229_v34  ;;  %v3649_v56 = vadd.f32 %v10830_v59, %v13101_v33  ;;  %8242 = vtanh.f32 %v3678_v20  ;;  %v3647_v50 = vadd.f32 %v13103_v57, %v13102_v53  ;;  %v13104_v13 = vld [vmem:[#allocation24_spill] sm:$0xff]  ;;  %v13108_v57 = vld [vmem:[#allocation126_spill] sm:$0xff]  ;;  %v13118_v53 = vld [vmem:[#allocation137_spill] sm:$0xff] }
 0x70e   : > { %v3741_v59 = vadd.f32 1.0, %v8233_v11  ;;  %8244 = vtanh.f32 %v3680_v58  ;;  %v3770_v11 = vmul.f32 0.5, %v3738_v28 }
 0x70f   : > { %v3681_v19 = vmul.f32 0.5, %v3649_v56 }
 0x712   : > { %v8235_v63 = vpop.eup %8234 }
 0x713   : > { %v8237_v6 = vpop.eup %8236  ;;  %v4265_v29 = vmul.f32 %v8235_v63, %v3768_v32  ;;  %v3740_v32 = vadd.f32 1.0, %v8231_v14  ;;  %v3679_v14 = vmul.f32 0.5, %v3647_v50 }
 0x714   : > { %v8239_v18 = vpop.eup %8238  ;;  %4430 = vmatmul.mubr.bf16.gmra.mrb[236].mxu1 %v4318_v8  ;;  %v4263_v9 = vmul.f32 %v8237_v6, %v3766_v27  ;;  %v13106_v27 = vld [vmem:[#allocation25_spill] sm:$0xff] }
 0x715   : > { %v8241_v26 = vpop.eup %8240  ;;  %v7416_v39 = vpop.f32.mrb[196].mxu1  ;;  %4439 = vmatprep.mubr.bf16.mxu1 %v12739_v23  ;;  %v4266_v5 = vmul.f32 %v8239_v18, %v3769_v54  ;;  %v11008_v43 = vadd.f32 %v4265_v29, %v4233_v52  ;;  %v3771_v52 = vmul.f32 0.5, %v3739_v61 }
 0x716   : > { %v4113_v45 = vadd.f32 %v7416_v39, %v13104_v13  ;;  %v4104_v34 = vpop.f32.mrb[197].mxu1  ;;  %v4264_v62 = vmul.f32 %v8241_v26, %v3767_v42  ;;  %v11011_v63 = vadd.f32 %v4263_v9, %v4231_v30  ;;  %v13110_v39 = vld [vmem:[#allocation127_spill] sm:$0xff]  ;;  %v3772_v30 = vmul.f32 0.5, %v3740_v32 }
 0x717   : > { %v4105_v20 = vadd.f32 %v4104_v34, %v13106_v27  ;;  %v7417_v8 = vpop.f32.mrb[198].mxu1  ;;  %v11014_v6 = vadd.f32 %v4266_v5, %v4234_v55  ;;  %v3773_v55 = vmul.f32 0.5, %v3741_v59  ;;  %v8243_v56 = vpop.eup %8242  ;;  %v4203_v9 = vsub.f32 1.0, %v3770_v11  ;;  %v13112_v5 = vld [vmem:[#allocation54_spill] sm:$0xff]  ;;  %v13117_v13 = vld [vmem:[#allocation71_spill] sm:$0xff] }
 0x718   : > { %13105 = vst [vmem:[#allocation134_spill] sm:$0xff] %v11011_v63  ;;  %8246 = vtanh.f32 %v4113_v45  ;;  %v4116_v18 = vadd.f32 %v7417_v8, %v13108_v57  ;;  %v4107_v29 = vpop.f32.mrb[199].mxu1  ;;  %v11017_v54 = vadd.f32 %v4264_v62, %v4232_v17  ;;  %v13111_v17 = vld [vmem:[#allocation50_spill] sm:$0xff]  ;;  %v4205_v26 = vsub.f32 1.0, %v3772_v30  ;;  %v8245_v32 = vpop.eup %8244  ;;  %v13113_v8 = vld [vmem:[#allocation73_spill] sm:$0xff] }
 0x719   : > { %13107 = vst [vmem:[#allocation111_spill] sm:$0xff] %v11014_v6  ;;  %8248 = vtanh.f32 %v4105_v20  ;;  %v4108_v42 = vadd.f32 %v4107_v29, %v13110_v39  ;;  %v3650_v50 = vadd.f32 %v10835_v38, %v13111_v17  ;;  %v3652_v45 = vadd.f32 %v10843_v22, %v13112_v5  ;;  %v13115_v17 = vld [vmem:[#allocation62_spill] sm:$0xff]  ;;  %v13116_v5 = vld [vmem:[#allocation76_spill] sm:$0xff] }
 0x71a   : > { %13109 = vst [vmem:[#allocation112_spill] sm:$0xff] %v11017_v54  ;;  %8250 = vtanh.f32 %v4116_v18  ;;  %v4319_v58 = vpack.c.bf16 %v11017_v54, %v11011_v63  ;;  %v4204_v34 = vsub.f32 1.0, %v3771_v52  ;;  %v4206_v28 = vsub.f32 1.0, %v3773_v55 }
 0x71b   : > { %8252 = vtanh.f32 %v4108_v42  ;;  %v3682_v61 = vmul.f32 0.5, %v3650_v50  ;;  %v4320_v59 = vpack.c.bf16 %v11014_v6, %v11008_v43  ;;  %v4237_v18 = vmul.f32 %v4205_v26, %v10625_v10  ;;  %v13114_v42 = vld [vmem:[#allocation68_spill] sm:$0xff] }
 0x71c   : > { %8254 = vtanh.f32 %v3681_v19  ;;  %4440 = vmatmul.mubr.bf16.gmra.mrb[240].mxu1 %v4319_v58  ;;  %v4235_v19 = vmul.f32 %v4203_v9, %v13113_v8  ;;  %v3684_v38 = vmul.f32 0.5, %v3652_v45  ;;  %v4236_v58 = vmul.f32 %v4204_v34, %v13114_v42  ;;  %v13120_v45 = vld [vmem:[#allocation81_spill] sm:$0xff] }
 0x71d   : > { %8256 = vtanh.f32 %v3679_v14  ;;  %4449 = vmatprep.mubr.bf16.mxu1 %v12739_v23  ;;  %v4238_v22 = vmul.f32 %v4206_v28, %v13115_v17  ;;  %v3653_v39 = vadd.f32 %v10846_v24, %v13116_v5  ;;  %v3742_v27 = vadd.f32 1.0, %v8243_v56  ;;  %v13122_v56 = vld [vmem:[#allocation78_spill] sm:$0xff]  ;;  %v13145_v5 = vld [vmem:[#allocation45_spill] sm:$0xff] }
 0x71e   : > { %v3651_v33 = vadd.f32 %v13118_v53, %v13117_v13  ;;  %8258 = vtanh.f32 %v3682_v61 }
 0x71f   : > { %8260 = vtanh.f32 %v3684_v38  ;;  %v3685_v8 = vmul.f32 0.5, %v3653_v39 }
 0x720   : > { %v3683_v42 = vmul.f32 0.5, %v3651_v33 }
 0x722   : > { %v8247_v62 = vpop.eup %8246 }
 0x723   : > { %v8249_v20 = vpop.eup %8248  ;;  %v4269_v29 = vmul.f32 %v8247_v62, %v3772_v30  ;;  %v3744_v62 = vadd.f32 1.0, %v8245_v32 }
 0x724   : > { %v8251_v14 = vpop.eup %8250  ;;  %4450 = vmatmul.mubr.bf16.gmra.mrb[244].mxu1 %v4320_v59  ;;  %v4267_v50 = vmul.f32 %v8249_v20, %v3770_v11 }
 0x725   : > { %v8253_v57 = vpop.eup %8252  ;;  %v7420_v9 = vpop.f32.mrb[200].mxu1  ;;  %4459 = vmatprep.mubr.bf16.mxu1 %v12739_v23  ;;  %v4270_v10 = vmul.f32 %v8251_v14, %v3773_v55  ;;  %v11038_v30 = vadd.f32 %v4269_v29, %v4237_v18  ;;  %v13124_v55 = vld [vmem:[#allocation26_spill] sm:$0xff]  ;;  %v3776_v38 = vmul.f32 0.5, %v3744_v62 }
 0x726   : > { %v8255_v26 = vpop.eup %8254  ;;  %v4129_v17 = vadd.f32 %v7420_v9, %v13120_v45  ;;  %v4120_v34 = vpop.f32.mrb[201].mxu1  ;;  %v4268_v28 = vmul.f32 %v8253_v57, %v3771_v52  ;;  %v11041_v24 = vadd.f32 %v4267_v50, %v4235_v19  ;;  %v13126_v57 = vld [vmem:[#allocation27_spill] sm:$0xff] }
 0x727   : > { %13119 = vst [vmem:[#allocation121_spill] sm:$0xff] %v11038_v30  ;;  %v8257_v11 = vpop.eup %8256  ;;  %v4121_v59 = vadd.f32 %v4120_v34, %v13122_v56  ;;  %v7421_v53 = vpop.f32.mrb[202].mxu1  ;;  %v11044_v20 = vadd.f32 %v4270_v10, %v4238_v22  ;;  %v3745_v14 = vadd.f32 1.0, %v8255_v26  ;;  %v3774_v22 = vmul.f32 0.5, %v3742_v27 }
 0x728   : > { %13121 = vst [vmem:[#allocation53_spill] sm:$0xff] %v11041_v24  ;;  %8262 = vtanh.f32 %v4129_v17  ;;  %v4132_v18 = vadd.f32 %v7421_v53, %v13124_v55  ;;  %v4123_v29 = vpop.f32.mrb[203].mxu1  ;;  %v11047_v61 = vadd.f32 %v4268_v28, %v4236_v58  ;;  %v3743_v19 = vadd.f32 1.0, %v8257_v11  ;;  %v8259_v33 = vpop.eup %8258  ;;  %v13127_v53 = vld [vmem:[#allocation66_spill] sm:$0xff] }
 0x729   : > { %13123 = vst [vmem:[#allocation119_spill] sm:$0xff] %v11044_v20  ;;  %8264 = vtanh.f32 %v4121_v59  ;;  %v4124_v52 = vadd.f32 %v4123_v29, %v13126_v57  ;;  %v3777_v39 = vmul.f32 0.5, %v3745_v14  ;;  %v4209_v50 = vsub.f32 1.0, %v3776_v38  ;;  %v8261_v10 = vpop.eup %8260  ;;  %v13128_v57 = vld [vmem:[#allocation70_spill] sm:$0xff] }
 0x72a   : > { %13125 = vst [vmem:[#allocation118_spill] sm:$0xff] %v11047_v61  ;;  %8266 = vtanh.f32 %v4132_v18  ;;  %v4321_v32 = vpack.c.bf16 %v11047_v61, %v11041_v24  ;;  %v3775_v58 = vmul.f32 0.5, %v3743_v19  ;;  %v4207_v9 = vsub.f32 1.0, %v3774_v22 }
 0x72b   : > { %8268 = vtanh.f32 %v4124_v52  ;;  %v4210_v26 = vsub.f32 1.0, %v3777_v39  ;;  %v4322_v28 = vpack.c.bf16 %v11044_v20, %v11038_v30  ;;  %v4241_v27 = vmul.f32 %v4209_v50, %v10646_v15 }
 0x72c   : > { %8270 = vtanh.f32 %v3685_v8  ;;  %4460 = vmatmul.mubr.bf16.gmra.mrb[248].mxu1 %v4321_v32  ;;  %v4208_v34 = vsub.f32 1.0, %v3775_v58  ;;  %v4239_v8 = vmul.f32 %v4207_v9, %v13127_v53 }
 0x72d   : > { %8272 = vtanh.f32 %v3683_v42  ;;  %4469 = vmatprep.mubr.bf16.mxu1 %v12739_v23  ;;  %v4242_v14 = vmul.f32 %v4210_v26, %v10653_v51  ;;  %v13131_v51 = vld [vmem:[#allocation29_spill] sm:$0xff] }
 0x72e   : > { %v4240_v55 = vmul.f32 %v4208_v34, %v13128_v57 }
 0x732   : > { %v8263_v17 = vpop.eup %8262 }
 0x733   : > { %v8265_v11 = vpop.eup %8264  ;;  %v4273_v62 = vmul.f32 %v8263_v17, %v3776_v38  ;;  %v13130_v38 = vld [vmem:[#allocation28_spill] sm:$0xff]  ;;  %v3748_v17 = vadd.f32 1.0, %v8261_v10 }
 0x734   : > { %v8267_v59 = vpop.eup %8266  ;;  %v4271_v18 = vmul.f32 %v8265_v11, %v3774_v22  ;;  %4470 = vmatmul.mubr.bf16.gmra.mrb[252].mxu1 %v4322_v28 }
 0x735   : > { %v8269_v29 = vpop.eup %8268  ;;  %v11058_v42 = vadd.f32 %v4273_v62, %v4241_v27  ;;  %v4274_v52 = vmul.f32 %v8267_v59, %v3777_v39  ;;  %v7424_v19 = vpop.f32.mrb[204].mxu1  ;;  %4479 = vmatprep.mubr.bf16.mxu1 %v12739_v23  ;;  %v3746_v39 = vadd.f32 1.0, %v8259_v33  ;;  %v13133_v62 = vld [vmem:[#allocation129_spill] sm:$0xff] }
 0x736   : > { %v8271_v32 = vpop.eup %8270  ;;  %v11062_v56 = vadd.f32 %v4271_v18, %v4239_v8  ;;  %v4272_v15 = vmul.f32 %v8269_v29, %v3775_v58  ;;  %v4145_v50 = vadd.f32 %v7424_v19, %v13130_v38  ;;  %v4136_v9 = vpop.f32.mrb[205].mxu1  ;;  %v13134_v58 = vld [vmem:[#allocation130_spill] sm:$0xff]  ;;  %v3780_v18 = vmul.f32 0.5, %v3748_v17 }
 0x737   : > { %v8273_v22 = vpop.eup %8272  ;;  %v11065_v28 = vadd.f32 %v4274_v52, %v4242_v14  ;;  %v4137_v26 = vadd.f32 %v4136_v9, %v13131_v51  ;;  %v7425_v11 = vpop.f32.mrb[206].mxu1  ;;  %v3749_v34 = vadd.f32 1.0, %v8271_v32  ;;  %v3778_v29 = vmul.f32 0.5, %v3746_v39 }
 0x738   : > { %13129 = vst [vmem:[#allocation63_spill] sm:$0xff] %v11062_v56  ;;  %v11068_v27 = vadd.f32 %v4272_v15, %v4240_v55  ;;  %8274 = vtanh.f32 %v4145_v50  ;;  %v4148_v59 = vadd.f32 %v7425_v11, %v13133_v62  ;;  %v4139_v57 = vpop.f32.mrb[207].mxu1  ;;  %v3747_v8 = vadd.f32 1.0, %v8273_v22 }
 0x739   : > { %8276 = vtanh.f32 %v4137_v26  ;;  %v4140_v53 = vadd.f32 %v4139_v57, %v13134_v58  ;;  %v3781_v33 = vmul.f32 0.5, %v3749_v34  ;;  %v4213_v14 = vsub.f32 1.0, %v3780_v18 }
 0x73a   : > { %13132 = vst [vmem:[#allocation120_spill] sm:$0xff] %v11068_v27  ;;  %v4323_v10 = vpack.c.bf16 %v11068_v27, %v11062_v56  ;;  %8278 = vtanh.f32 %v4148_v59  ;;  %v3779_v55 = vmul.f32 0.5, %v3747_v8  ;;  %v4211_v52 = vsub.f32 1.0, %v3778_v29 }
 0x73b   : > { %8280 = vtanh.f32 %v4140_v53  ;;  %v4214_v19 = vsub.f32 1.0, %v3781_v33  ;;  %v4324_v50 = vpack.c.bf16 %v11065_v28, %v11058_v42  ;;  %v4245_v22 = vmul.f32 %v4213_v14, %v10668_v31 }
 0x73c   : > { %4480 = vmatmul.mubr.bf16.gmra.mrb[0].mxu1 %v4323_v10  ;;  %v4212_v15 = vsub.f32 1.0, %v3779_v55  ;;  %v4243_v11 = vmul.f32 %v4211_v52, %v10671_v47 }
 0x73d   : > { %4489 = vmatprep.mubr.bf16.mxu1 %v12739_v23  ;;  %v4246_v57 = vmul.f32 %v4214_v19, %v10673_v44  ;;  %v13136_v19 = vld [vmem:[#allocation31_spill] sm:$0xff] }
 0x73e   : > { %v4244_v8 = vmul.f32 %v4212_v15, %v10675_v41 }
 0x742   : > { %v8275_v32 = vpop.eup %8274 }
 0x743   : > { %v8277_v9 = vpop.eup %8276  ;;  %v4277_v26 = vmul.f32 %v8275_v32, %v3780_v18 }
 0x744   : > { %v8279_v17 = vpop.eup %8278  ;;  %v4275_v39 = vmul.f32 %v8277_v9, %v3778_v29  ;;  %4490 = vmatmul.mubr.bf16.gmra.mrb[4].mxu1 %v4324_v50  ;;  %v13137_v9 = vld [vmem:[#allocation33_spill] sm:$0xff] }
 0x745   : > { %v8281_v59 = vpop.eup %8280  ;;  %v11080_v34 = vadd.f32 %v4277_v26, %v4245_v22  ;;  %v4278_v53 = vmul.f32 %v8279_v17, %v3781_v33  ;;  %4499 = vmatprep.mubr.bf16.mxu1 %v12739_v23  ;;  %v13135_v33 = vld [vmem:[#allocation30_spill] sm:$0xff] }
 0x746   : > { %v11084_v10 = vadd.f32 %v4275_v39, %v4243_v11  ;;  %v4276_v58 = vmul.f32 %v8281_v59, %v3779_v55  ;;  %v13138_v39 = vld [vmem:[#allocation34_spill] sm:$0xff] }
 0x747   : > { %v11086_v31 = vadd.f32 %v4278_v53, %v4246_v57 }
 0x748   : > { %v11088_v18 = vadd.f32 %v4276_v58, %v4244_v8 }
 0x749   : > { %v4326_v44 = vpack.c.bf16 %v11086_v31, %v11080_v34 }
 0x74a   : > { %v4325_v47 = vpack.c.bf16 %v11088_v18, %v11084_v10 }
 0x74c   : > { %4500 = vmatmul.mubr.bf16.gmra.mrb[8].mxu1 %v4325_v47 }
 0x74d   : > { %4509 = vmatprep.mubr.bf16.mxu1 %v12739_v23 }
 0x754   : > { %4510 = vmatmul.mubr.bf16.gmra.mrb[12].mxu1 %v4326_v44 }
 0x7a6   : > { %v11095_v29 = vpop.f32.mrb[208].mxu1 }
 0x7a7   : > { %v4363_v41 = vpop.f32.mrb[209].mxu1 }
 0x7a8   : > { %v4680_v14 = vadd.f32 %v4363_v41, %v13135_v33  ;;  %v11098_v55 = vpop.f32.mrb[210].mxu1 }
 0x7a9   : > { %v4367_v52 = vpop.f32.mrb[211].mxu1 }
 0x7aa   : > { %v4712_v58 = vmul.f32 0.5, %v4680_v14  ;;  %v4681_v32 = vadd.f32 %v4367_v52, %v13136_v19  ;;  %v7692_v19 = vld [vmem:[%s12359_s9] sm:$0xff]  }
 0x7ab   : > { %7474 = vmatprep.subr.bf16.mxu0 %v7692_v19 }
 0x7ac   : > { %8282 = vtanh.f32 %v4712_v58  ;;  %v4713_v15 = vmul.f32 0.5, %v4681_v32 }
 0x7ae   : > { %8284 = vtanh.f32 %v4713_v15  ;;  %v11101_v50 = vpop.f32.mrb[212].mxu1 }
 0x7af   : > { %v4373_v23 = vpop.f32.mrb[213].mxu1 }
 0x7b0   : > { %v4682_v22 = vadd.f32 %v4373_v23, %v13137_v9  ;;  %v11104_v26 = vpop.f32.mrb[214].mxu1 }
 0x7b1   : > { %v4377_v17 = vpop.f32.mrb[215].mxu1 }
 0x7b2   : > { %v4714_v11 = vmul.f32 0.5, %v4682_v22  ;;  %v4683_v59 = vadd.f32 %v4377_v17, %v13138_v39 }
 0x7b4   : > { %8286 = vtanh.f32 %v4714_v11  ;;  %v4715_v57 = vmul.f32 0.5, %v4683_v59  ;;  %v13139_v59 = vld [vmem:[#allocation36_spill] sm:$0xff] }
 0x7b6   : > { %v8283_v53 = vpop.eup %8282  ;;  %8288 = vtanh.f32 %v4715_v57 }
 0x7b7   : > { %v4776_v8 = vadd.f32 1.0, %v8283_v53 }
 0x7b8   : > { %v8285_v47 = vpop.eup %8284 }
 0x7b9   : > { %v4808_v44 = vmul.f32 0.5, %v4776_v8  ;;  %v4777_v41 = vadd.f32 1.0, %v8285_v47 }
 0x7bb   : > { %v4809_v33 = vmul.f32 0.5, %v4777_v41  ;;  %v4840_v14 = vmul.f32 %v4808_v44, %v10882_v48 }
 0x7bc   : > { %v11112_v17 = vpop.f32.mrb[216].mxu1 }
 0x7bd   : > { %v4841_v52 = vmul.f32 %v4809_v33, %v10890_v4  ;;  %v4383_v11 = vpop.f32.mrb[217].mxu1  ;;  %v13140_v33 = vld [vmem:[#allocation38_spill] sm:$0xff] }
 0x7be   : > { %v8287_v58 = vpop.eup %8286  ;;  %v4684_v57 = vadd.f32 %v4383_v11, %v13139_v59  ;;  %v11115_v53 = vpop.f32.mrb[218].mxu1 }
 0x7bf   : > { %v4778_v32 = vadd.f32 1.0, %v8287_v58  ;;  %v4872_v15 = vpack.c.bf16 %v4841_v52, %v4840_v14  ;;  %v4387_v8 = vpop.f32.mrb[219].mxu1 }
 0x7c0   : > { %v8289_v23 = vpop.eup %8288  ;;  %v4716_v41 = vmul.f32 0.5, %v4684_v57  ;;  %v4685_v14 = vadd.f32 %v4387_v8, %v13140_v33  ;;  %v13142_v8 = vld [vmem:[#allocation41_spill] sm:$0xff] }
 0x7c1   : > { %v4810_v9 = vmul.f32 0.5, %v4778_v32  ;;  %v4779_v22 = vadd.f32 1.0, %v8289_v23  ;;  %7442 = vmatprep.mubr.bf16.mxu0 %v4872_v15  ;;  %v7693_v32 = vld [vmem:[%s12359_s9 + $0x8] sm:$0xff]  }
 0x7c2   : > { %8290 = vtanh.f32 %v4716_v41  ;;  %v4717_v58 = vmul.f32 0.5, %v4685_v14 }
 0x7c3   : > { %v4811_v39 = vmul.f32 0.5, %v4779_v22  ;;  %v4842_v47 = vmul.f32 %v4810_v9, %v10879_v7  ;;  %v13141_v22 = vld [vmem:[#allocation39_spill] sm:$0xff] }
 0x7c4   : > { %8292 = vtanh.f32 %v4717_v58  ;;  %v11123_v15 = vpop.f32.mrb[220].mxu1 }
 0x7c5   : > { %v4843_v44 = vmul.f32 %v4811_v39, %v10886_v37  ;;  %v4393_v23 = vpop.f32.mrb[221].mxu1  ;;  %v7694_v39 = vld [vmem:[%s12359_s9 + $0x10] sm:$0xff]  }
 0x7c6   : > { %v4686_v9 = vadd.f32 %v4393_v23, %v13141_v22  ;;  %v11126_v11 = vpop.f32.mrb[222].mxu1  ;;  %v13143_v23 = vld [vmem:[#allocation42_spill] sm:$0xff] }
 0x7c7   : > { %v4873_v52 = vpack.c.bf16 %v4843_v44, %v4842_v47  ;;  %v4397_v59 = vpop.f32.mrb[223].mxu1 }
 0x7c8   : > { %v4718_v57 = vmul.f32 0.5, %v4686_v9  ;;  %v4687_v47 = vadd.f32 %v4397_v59, %v13142_v8 }
 0x7c9   : > { %7443 = vmatmul.mubr.bf16.vlgmr.msra.gmra.mrb[208].mxu0 %v4873_v52 }
 0x7ca   : > { %7475 = vmatpush3.bf16.msra.mxu0 %v7692_v19  ;;  %8294 = vtanh.f32 %v4718_v57  ;;  %v4719_v44 = vmul.f32 0.5, %v4687_v47  ;;  %v7695_v19 = vld [vmem:[%s12359_s9 + $0x18] sm:$0xff]   ;;  %v13144_v47 = vld [vmem:[#allocation44_spill] sm:$0xff] }
 0x7cb   : > { %7476 = vmatprep.subr.bf16.mxu0 %v7693_v32 }
 0x7cc   : > { %v8291_v41 = vpop.eup %8290  ;;  %8296 = vtanh.f32 %v4719_v44 }
 0x7cd   : > { %v11135_v33 = vpop.f32.mrb[224].mxu1  ;;  %v4780_v14 = vadd.f32 1.0, %v8291_v41 }
 0x7ce   : > { %7477 = vmatpush3.bf16.msra.mxu0 %v7693_v32  ;;  %v4403_v52 = vpop.f32.mrb[225].mxu1  ;;  %v8293_v58 = vpop.eup %8292 }
 0x7cf   : > { %7478 = vmatprep.subr.bf16.mxu0 %v7694_v39  ;;  %v4688_v22 = vadd.f32 %v4403_v52, %v13143_v23  ;;  %v11138_v9 = vpop.f32.mrb[226].mxu1  ;;  %v4812_v32 = vmul.f32 0.5, %v4780_v14  ;;  %v4781_v59 = vadd.f32 1.0, %v8293_v58 }
 0x7d0   : > { %v4407_v57 = vpop.f32.mrb[227].mxu1 }
 0x7d1   : > { %v4720_v8 = vmul.f32 0.5, %v4688_v22  ;;  %v4689_v62 = vadd.f32 %v4407_v57, %v13144_v47  ;;  %v4813_v51 = vmul.f32 0.5, %v4781_v59  ;;  %v4844_v41 = vmul.f32 %v4812_v32, %v10921_v0  ;;  %v13146_v32 = vld [vmem:[#allocation47_spill] sm:$0xff] }
 0x7d2   : > { %7479 = vmatpush3.bf16.msra.mxu0 %v7694_v39 }
 0x7d3   : > { %7480 = vmatprep.subr.bf16.mxu0 %v7695_v19  ;;  %8298 = vtanh.f32 %v4720_v8  ;;  %v4721_v44 = vmul.f32 0.5, %v4689_v62  ;;  %v4845_v39 = vmul.f32 %v4813_v51, %v10927_v46 }
 0x7d4   : > { %v8295_v38 = vpop.eup %8294 }
 0x7d5   : > { %8300 = vtanh.f32 %v4721_v44  ;;  %v11143_v52 = vpop.f32.mrb[228].mxu1  ;;  %v4782_v23 = vadd.f32 1.0, %v8295_v38  ;;  %v4874_v14 = vpack.c.bf16 %v4845_v39, %v4844_v41 }
 0x7d6   : > { %7481 = vmatpush3.bf16.msra.mxu0 %v7695_v19  ;;  %v4413_v45 = vpop.f32.mrb[229].mxu1  ;;  %v8297_v58 = vpop.eup %8296 }
 0x7d7   : > { %v4690_v22 = vadd.f32 %v4413_v45, %v13145_v5  ;;  %v11146_v13 = vpop.f32.mrb[230].mxu1  ;;  %v4814_v59 = vmul.f32 0.5, %v4782_v23  ;;  %v4783_v19 = vadd.f32 1.0, %v8297_v58  ;;  %7446 = vmatprep.mubr.bf16.mxu0 %v4874_v14 }
 0x7d8   : > { %v4417_v57 = vpop.f32.mrb[231].mxu1 }
 0x7d9   : > { %v4722_v62 = vmul.f32 0.5, %v4690_v22  ;;  %v4691_v8 = vadd.f32 %v4417_v57, %v13146_v32  ;;  %v4815_v51 = vmul.f32 0.5, %v4783_v19  ;;  %v4846_v44 = vmul.f32 %v4814_v59, %v10918_v49  ;;  %v13148_v59 = vld [vmem:[#allocation49_spill] sm:$0xff]  ;;  %v13149_v49 = vld [vmem:[#allocation51_spill] sm:$0xff] }
 0x7db   : > { %8302 = vtanh.f32 %v4722_v62  ;;  %v4723_v47 = vmul.f32 0.5, %v4691_v8  ;;  %v4847_v38 = vmul.f32 %v4815_v51, %v10924_v1 }
 0x7dd   : > { %v8299_v41 = vpop.eup %8298  ;;  %8304 = vtanh.f32 %v4723_v47  ;;  %v4875_v23 = vpack.c.bf16 %v4847_v38, %v4846_v44 }
 0x7de   : > { %v4784_v5 = vadd.f32 1.0, %v8299_v41 }
 0x7df   : > { %v11151_v39 = vpop.f32.mrb[232].mxu1  ;;  %v8301_v58 = vpop.eup %8300  ;;  %7447 = vmatmul.mubr.bf16.gmra.mrb[212].mxu0 %v4875_v23 }
 0x7e0   : > { %v4423_v45 = vpop.f32.mrb[233].mxu1  ;;  %v4816_v57 = vmul.f32 0.5, %v4784_v5  ;;  %v4785_v19 = vadd.f32 1.0, %v8301_v58 }
 0x7e1   : > { %v4692_v14 = vadd.f32 %v4423_v45, %v13147_v40  ;;  %v11154_v22 = vpop.f32.mrb[234].mxu1 }
 0x7e2   : > { %v4427_v62 = vpop.f32.mrb[235].mxu1  ;;  %v4817_v51 = vmul.f32 0.5, %v4785_v19  ;;  %v4848_v1 = vmul.f32 %v4816_v57, %v10951_v25  ;;  %v13150_v57 = vld [vmem:[#allocation52_spill] sm:$0xff]  ;;  %v13151_v25 = vld [vmem:[#allocation55_spill] sm:$0xff] }
 0x7e3   : > { %v4724_v32 = vmul.f32 0.5, %v4692_v14  ;;  %v4693_v8 = vadd.f32 %v4427_v62, %v13148_v59 }
 0x7e4   : > { %v4849_v41 = vmul.f32 %v4817_v51, %v10957_v3 }
 0x7e5   : > { %8306 = vtanh.f32 %v4724_v32  ;;  %v4725_v47 = vmul.f32 0.5, %v4693_v8  ;;  %v8303_v44 = vpop.eup %8302 }
 0x7e6   : > { %v4786_v40 = vadd.f32 1.0, %v8303_v44  ;;  %v4876_v5 = vpack.c.bf16 %v4849_v41, %v4848_v1 }
 0x7e7   : > { %8308 = vtanh.f32 %v4725_v47  ;;  %v11159_v38 = vpop.f32.mrb[236].mxu1  ;;  %v8305_v58 = vpop.eup %8304 }
 0x7e8   : > { %v4433_v45 = vpop.f32.mrb[237].mxu1  ;;  %v4818_v62 = vmul.f32 0.5, %v4786_v40  ;;  %v4787_v19 = vadd.f32 1.0, %v8305_v58  ;;  %7450 = vmatprep.mubr.bf16.mxu0 %v4876_v5 }
 0x7e9   : > { %v4694_v23 = vadd.f32 %v4433_v45, %v13149_v49  ;;  %v11162_v14 = vpop.f32.mrb[238].mxu1 }
 0x7ea   : > { %v4437_v32 = vpop.f32.mrb[239].mxu1  ;;  %v4819_v51 = vmul.f32 0.5, %v4787_v19  ;;  %v4850_v3 = vmul.f32 %v4818_v62, %v10948_v21  ;;  %v13152_v62 = vld [vmem:[#allocation56_spill] sm:$0xff]  ;;  %v13153_v21 = vld [vmem:[#allocation57_spill] sm:$0xff] }
 0x7eb   : > { %v4726_v59 = vmul.f32 0.5, %v4694_v23  ;;  %v4695_v8 = vadd.f32 %v4437_v32, %v13150_v57 }
 0x7ec   : > { %v4851_v44 = vmul.f32 %v4819_v51, %v10954_v2 }
 0x7ed   : > { %8310 = vtanh.f32 %v4726_v59  ;;  %v4727_v47 = vmul.f32 0.5, %v4695_v8 }
 0x7ee   : > { %v4877_v40 = vpack.c.bf16 %v4851_v44, %v4850_v3 }
 0x7ef   : > { %v8307_v1 = vpop.eup %8306  ;;  %8312 = vtanh.f32 %v4727_v47  ;;  %v11167_v41 = vpop.f32.mrb[240].mxu1 }
 0x7f0   : > { %v4788_v49 = vadd.f32 1.0, %v8307_v1  ;;  %v4443_v45 = vpop.f32.mrb[241].mxu1  ;;  %7451 = vmatmul.mubr.bf16.gmra.mrb[216].mxu0 %v4877_v40 }
 0x7f1   : > { %v8309_v58 = vpop.eup %8308  ;;  %v4696_v5 = vadd.f32 %v4443_v45, %v13151_v25  ;;  %v11170_v23 = vpop.f32.mrb[242].mxu1 }
 0x7f2   : > { %v4820_v32 = vmul.f32 0.5, %v4788_v49  ;;  %v4789_v19 = vadd.f32 1.0, %v8309_v58  ;;  %v4447_v59 = vpop.f32.mrb[243].mxu1 }
 0x7f3   : > { %v4728_v57 = vmul.f32 0.5, %v4696_v5  ;;  %v4697_v8 = vadd.f32 %v4447_v59, %v13152_v62 }
 0x7f4   : > { %v4821_v51 = vmul.f32 0.5, %v4789_v19  ;;  %v4852_v2 = vmul.f32 %v4820_v32, %v10981_v16  ;;  %v13154_v32 = vld [vmem:[#allocation58_spill] sm:$0xff]  ;;  %v13155_v16 = vld [vmem:[#allocation59_spill] sm:$0xff] }
 0x7f5   : > { %8314 = vtanh.f32 %v4728_v57  ;;  %v4729_v47 = vmul.f32 0.5, %v4697_v8 }
 0x7f6   : > { %v4853_v1 = vmul.f32 %v4821_v51, %v10987_v12 }
 0x7f7   : > { %v8311_v3 = vpop.eup %8310  ;;  %8316 = vtanh.f32 %v4729_v47  ;;  %v11175_v44 = vpop.f32.mrb[244].mxu1 }
 0x7f8   : > { %v4790_v25 = vadd.f32 1.0, %v8311_v3  ;;  %v4453_v45 = vpop.f32.mrb[245].mxu1  ;;  %v4878_v49 = vpack.c.bf16 %v4853_v1, %v4852_v2 }
 0x7f9   : > { %v8313_v58 = vpop.eup %8312  ;;  %v4698_v40 = vadd.f32 %v4453_v45, %v13153_v21  ;;  %v11178_v5 = vpop.f32.mrb[246].mxu1 }
 0x7fa   : > { %v4822_v59 = vmul.f32 0.5, %v4790_v25  ;;  %v4791_v19 = vadd.f32 1.0, %v8313_v58  ;;  %v4457_v57 = vpop.f32.mrb[247].mxu1  ;;  %7454 = vmatprep.mubr.bf16.mxu0 %v4878_v49 }
 0x7fb   : > { %v4730_v62 = vmul.f32 0.5, %v4698_v40  ;;  %v4699_v8 = vadd.f32 %v4457_v57, %v13154_v32 }
 0x7fc   : > { %v4823_v51 = vmul.f32 0.5, %v4791_v19  ;;  %v4854_v12 = vmul.f32 %v4822_v59, %v10978_v35  ;;  %v11191_v59 = vld [vmem:[%s12358_s8] sm:$0xff]  }
 0x7fd   : > { %8318 = vtanh.f32 %v4730_v62  ;;  %v4731_v47 = vmul.f32 0.5, %v4699_v8  ;;  %v13156_v8 = vld [vmem:[#allocation60_spill] sm:$0xff]  ;;  %7514 = vmatprep.subr.bf16.mxu0 %v11191_v59 }
 0x7fe   : > { %v4855_v3 = vmul.f32 %v4823_v51, %v10984_v36 }
 0x7ff   : > { %v8315_v2 = vpop.eup %8314  ;;  %8320 = vtanh.f32 %v4731_v47  ;;  %v11183_v1 = vpop.f32.mrb[248].mxu1 }
 0x800   : > { %v4792_v21 = vadd.f32 1.0, %v8315_v2  ;;  %v4463_v45 = vpop.f32.mrb[249].mxu1  ;;  %v4879_v25 = vpack.c.bf16 %v4855_v3, %v4854_v12 }
 0x801   : > { %v8317_v58 = vpop.eup %8316  ;;  %v4700_v49 = vadd.f32 %v4463_v45, %v13155_v16  ;;  %v11186_v40 = vpop.f32.mrb[250].mxu1 }
 0x802   : > { %v4824_v57 = vmul.f32 0.5, %v4792_v21  ;;  %v4793_v19 = vadd.f32 1.0, %v8317_v58  ;;  %v4467_v62 = vpop.f32.mrb[251].mxu1  ;;  %7455 = vmatmul.mubr.bf16.gmra.mrb[220].mxu0 %v4879_v25 }
 0x803   : > { %v4732_v32 = vmul.f32 0.5, %v4700_v49  ;;  %v4701_v51 = vadd.f32 %v4467_v62, %v13156_v8  ;;  %v13157_v49 = vld [vmem:[#allocation61_spill] sm:$0xff] }
 0x804   : > { %v4825_v47 = vmul.f32 0.5, %v4793_v19  ;;  %v4856_v16 = vmul.f32 %v4824_v57, %v11011_v63  ;;  %v13159_v57 = vld [vmem:[#allocation64_spill] sm:$0xff] }
 0x805   : > { %8322 = vtanh.f32 %v4732_v32  ;;  %v4733_v12 = vmul.f32 0.5, %v4701_v51 }
 0x806   : > { %v4857_v3 = vmul.f32 %v4825_v47, %v11017_v54 }
 0x807   : > { %v8319_v2 = vpop.eup %8318  ;;  %8324 = vtanh.f32 %v4733_v12  ;;  %v11197_v21 = vpop.f32.mrb[252].mxu1 }
 0x808   : > { %v4794_v45 = vadd.f32 1.0, %v8319_v2  ;;  %v4473_v25 = vpop.f32.mrb[253].mxu1  ;;  %v4880_v58 = vpack.c.bf16 %v4857_v3, %v4856_v16 }
 0x809   : > { %v8321_v36 = vpop.eup %8320  ;;  %v4702_v35 = vadd.f32 %v4473_v25, %v13157_v49  ;;  %v11200_v62 = vpop.f32.mrb[254].mxu1 }
 0x80a   : > { %13158 = vst [vmem:[#allocation67_spill] sm:$0xff] %v11200_v62  ;;  %v4826_v19 = vmul.f32 0.5, %v4794_v45  ;;  %v4795_v8 = vadd.f32 1.0, %v8321_v36  ;;  %v4477_v32 = vpop.f32.mrb[255].mxu1  ;;  %7458 = vmatprep.mubr.bf16.mxu0 %v4880_v58  ;;  %v13160_v62 = vld [vmem:[#allocation65_spill] sm:$0xff] }
 0x80b   : > { %v4734_v51 = vmul.f32 0.5, %v4702_v35  ;;  %v4703_v63 = vadd.f32 %v4477_v32, %v13159_v57 }
 0x80c   : > { %v4827_v47 = vmul.f32 0.5, %v4795_v8  ;;  %v4858_v54 = vmul.f32 %v4826_v19, %v11008_v43  ;;  %v13162_v19 = vld [vmem:[#allocation69_spill] sm:$0xff] }
 0x80d   : > { %8326 = vtanh.f32 %v4734_v51  ;;  %v4735_v12 = vmul.f32 0.5, %v4703_v63 }
 0x80e   : > { %v4859_v2 = vmul.f32 %v4827_v47, %v11014_v6 }
 0x80f   : > { %v8323_v16 = vpop.eup %8322  ;;  %8328 = vtanh.f32 %v4735_v12  ;;  %v11205_v3 = vpop.f32.mrb[0].mxu1 }
 0x810   : > { %v4796_v25 = vadd.f32 1.0, %v8323_v16  ;;  %v4483_v49 = vpop.f32.mrb[1].mxu1  ;;  %v4881_v45 = vpack.c.bf16 %v4859_v2, %v4858_v54 }
 0x811   : > { %v8325_v36 = vpop.eup %8324  ;;  %v4704_v58 = vadd.f32 %v4483_v49, %v13160_v62  ;;  %v11208_v35 = vpop.f32.mrb[2].mxu1 }
 0x812   : > { %13161 = vst [vmem:[#allocation73_spill] sm:$0xff] %v11208_v35  ;;  %v4828_v32 = vmul.f32 0.5, %v4796_v25  ;;  %v4797_v8 = vadd.f32 1.0, %v8325_v36  ;;  %v4487_v51 = vpop.f32.mrb[3].mxu1  ;;  %7459 = vmatmul.mubr.bf16.gmra.mrb[224].mxu0 %v4881_v45  ;;  %v13163_v35 = vld [vmem:[#allocation72_spill] sm:$0xff] }
 0x813   : > { %v4736_v63 = vmul.f32 0.5, %v4704_v58  ;;  %v4705_v57 = vadd.f32 %v4487_v51, %v13162_v19 }
 0x814   : > { %v4829_v47 = vmul.f32 0.5, %v4797_v8  ;;  %v4860_v6 = vmul.f32 %v4828_v32, %v11041_v24  ;;  %v13164_v32 = vld [vmem:[#allocation74_spill] sm:$0xff]  ;;  %v13165_v24 = vld [vmem:[#allocation75_spill] sm:$0xff] }
 0x815   : > { %8330 = vtanh.f32 %v4736_v63  ;;  %v4737_v12 = vmul.f32 0.5, %v4705_v57 }
 0x816   : > { %v4861_v16 = vmul.f32 %v4829_v47, %v11047_v61 }
 0x817   : > { %v8327_v54 = vpop.eup %8326  ;;  %8332 = vtanh.f32 %v4737_v12  ;;  %v11213_v2 = vpop.f32.mrb[4].mxu1 }
 0x818   : > { %v4798_v62 = vadd.f32 1.0, %v8327_v54  ;;  %v4493_v49 = vpop.f32.mrb[5].mxu1  ;;  %v4882_v25 = vpack.c.bf16 %v4861_v16, %v4860_v6 }
 0x819   : > { %v8329_v36 = vpop.eup %8328  ;;  %v4706_v45 = vadd.f32 %v4493_v49, %v13163_v35  ;;  %v11216_v58 = vpop.f32.mrb[6].mxu1 }
 0x81a   : > { %v4830_v51 = vmul.f32 0.5, %v4798_v62  ;;  %v4799_v8 = vadd.f32 1.0, %v8329_v36  ;;  %v4497_v63 = vpop.f32.mrb[7].mxu1  ;;  %7462 = vmatprep.mubr.bf16.mxu0 %v4882_v25 }
 0x81b   : > { %v4738_v19 = vmul.f32 0.5, %v4706_v45  ;;  %v4707_v57 = vadd.f32 %v4497_v63, %v13164_v32 }
 0x81c   : > { %v4831_v47 = vmul.f32 0.5, %v4799_v8  ;;  %v4862_v61 = vmul.f32 %v4830_v51, %v11038_v30  ;;  %v13166_v51 = vld [vmem:[#allocation77_spill] sm:$0xff]  ;;  %v13167_v30 = vld [vmem:[#allocation80_spill] sm:$0xff] }
 0x81d   : > { %8334 = vtanh.f32 %v4738_v19  ;;  %v4739_v12 = vmul.f32 0.5, %v4707_v57 }
 0x81e   : > { %v4863_v54 = vmul.f32 %v4831_v47, %v11044_v20 }
 0x81f   : > { %v8331_v6 = vpop.eup %8330  ;;  %8336 = vtanh.f32 %v4739_v12  ;;  %v11221_v16 = vpop.f32.mrb[8].mxu1 }
 0x820   : > { %v4800_v35 = vadd.f32 1.0, %v8331_v6  ;;  %v4503_v49 = vpop.f32.mrb[9].mxu1  ;;  %v4883_v62 = vpack.c.bf16 %v4863_v54, %v4862_v61 }
 0x821   : > { %v8333_v36 = vpop.eup %8332  ;;  %v4708_v25 = vadd.f32 %v4503_v49, %v13165_v24  ;;  %v11224_v45 = vpop.f32.mrb[10].mxu1 }
 0x822   : > { %v4832_v63 = vmul.f32 0.5, %v4800_v35  ;;  %v4801_v8 = vadd.f32 1.0, %v8333_v36  ;;  %v4507_v19 = vpop.f32.mrb[11].mxu1  ;;  %7463 = vmatmul.mubr.bf16.gmra.mrb[228].mxu0 %v4883_v62 }
 0x823   : > { %v4740_v32 = vmul.f32 0.5, %v4708_v25  ;;  %v4709_v57 = vadd.f32 %v4507_v19, %v13166_v51 }
 0x824   : > { %v4833_v47 = vmul.f32 0.5, %v4801_v8  ;;  %v4864_v20 = vmul.f32 %v4832_v63, %v11062_v56  ;;  %v13168_v63 = vld [vmem:[#allocation82_spill] sm:$0xff] }
 0x825   : > { %8338 = vtanh.f32 %v4740_v32  ;;  %v4741_v12 = vmul.f32 0.5, %v4709_v57 }
 0x826   : > { %v4865_v6 = vmul.f32 %v4833_v47, %v11068_v27 }
 0x827   : > { %v8335_v61 = vpop.eup %8334  ;;  %8340 = vtanh.f32 %v4741_v12  ;;  %v11229_v54 = vpop.f32.mrb[12].mxu1 }
 0x828   : > { %v4802_v24 = vadd.f32 1.0, %v8335_v61  ;;  %v4513_v49 = vpop.f32.mrb[13].mxu1  ;;  %v4884_v35 = vpack.c.bf16 %v4865_v6, %v4864_v20 }
 0x829   : > { %v8337_v36 = vpop.eup %8336  ;;  %v4710_v62 = vadd.f32 %v4513_v49, %v13167_v30  ;;  %v11232_v25 = vpop.f32.mrb[14].mxu1 }
 0x82a   : > { %v4834_v19 = vmul.f32 0.5, %v4802_v24  ;;  %v4803_v8 = vadd.f32 1.0, %v8337_v36  ;;  %v4517_v32 = vpop.f32.mrb[15].mxu1  ;;  %7466 = vmatprep.mubr.bf16.mxu0 %v4884_v35 }
 0x82b   : > { %v4742_v51 = vmul.f32 0.5, %v4710_v62  ;;  %v4711_v57 = vadd.f32 %v4517_v32, %v13168_v63 }
 0x82c   : > { %v4835_v47 = vmul.f32 0.5, %v4803_v8  ;;  %v4866_v27 = vmul.f32 %v4834_v19, %v11058_v42 }
 0x82d   : > { %8342 = vtanh.f32 %v4742_v51  ;;  %v4743_v12 = vmul.f32 0.5, %v4711_v57 }
 0x82e   : > { %v4867_v61 = vmul.f32 %v4835_v47, %v11065_v28 }
 0x82f   : > { %v8339_v20 = vpop.eup %8338  ;;  %8344 = vtanh.f32 %v4743_v12 }
 0x830   : > { %v4804_v6 = vadd.f32 1.0, %v8339_v20  ;;  %v4885_v30 = vpack.c.bf16 %v4867_v61, %v4866_v27  ;;  %v13169_v20 = vld [vmem:[#allocation3_spill] sm:$0xff] }
 0x831   : > { %v8341_v49 = vpop.eup %8340 }
 0x832   : > { %v4836_v56 = vmul.f32 0.5, %v4804_v6  ;;  %v4805_v24 = vadd.f32 1.0, %v8341_v49  ;;  %7467 = vmatmul.mubr.bf16.gmra.mrb[232].mxu0 %v4885_v30  ;;  %v13170_v6 = vld [vmem:[#allocation2_spill] sm:$0xff]  ;;  %v13171_v30 = vld [vmem:[#allocation7_spill] sm:$0xff]  ;;  %v7698_v49 = vld [vmem:[%s12358_s8 + $0x10] sm:$0xff]  }
 0x834   : > { %v4837_v36 = vmul.f32 0.5, %v4805_v24  ;;  %v4868_v35 = vmul.f32 %v4836_v56, %v11084_v10  ;;  %v7697_v56 = vld [vmem:[%s12358_s8 + $0x8] sm:$0xff]   ;;  %v7699_v24 = vld [vmem:[%s12358_s8 + $0x18] sm:$0xff]  }
 0x836   : > { %v4869_v62 = vmul.f32 %v4837_v36, %v11088_v18  ;;  %v13172_v36 = vld [vmem:[#allocation6_spill] sm:$0xff] }
 0x837   : > { %v8343_v8 = vpop.eup %8342 }
 0x838   : > { %v4806_v32 = vadd.f32 1.0, %v8343_v8  ;;  %v4886_v51 = vpack.c.bf16 %v4869_v62, %v4868_v35  ;;  %v13173_v35 = vld [vmem:[#allocation11_spill] sm:$0xff]  ;;  %v13174_v8 = vld [vmem:[#allocation10_spill] sm:$0xff] }
 0x839   : > { %v8345_v63 = vpop.eup %8344  ;;  %v7701_v62 = vld [vmem:[%s12358_s8 + $0x28] sm:$0xff]  }
 0x83a   : > { %v4838_v19 = vmul.f32 0.5, %v4806_v32  ;;  %v4807_v57 = vadd.f32 1.0, %v8345_v63  ;;  %7470 = vmatprep.mubr.bf16.mxu0 %v4886_v51  ;;  %v13175_v32 = vld [vmem:[#allocation15_spill] sm:$0xff]  ;;  %v7702_v51 = vld [vmem:[%s12358_s8 + $0x30] sm:$0xff]   ;;  %v7703_v63 = vld [vmem:[%s12358_s8 + $0x38] sm:$0xff]  }
 0x83c   : > { %v4839_v47 = vmul.f32 0.5, %v4807_v57  ;;  %v4870_v12 = vmul.f32 %v4838_v19, %v11080_v34  ;;  %v13176_v19 = vld [vmem:[#allocation14_spill] sm:$0xff]  ;;  %v13177_v57 = vld [vmem:[#allocation5_spill] sm:$0xff] }
 0x83e   : > { %v4871_v27 = vmul.f32 %v4839_v47, %v11086_v31  ;;  %v13178_v47 = vld [vmem:[#allocation4_spill] sm:$0xff] }
 0x840   : > { %v4887_v61 = vpack.c.bf16 %v4871_v27, %v4870_v12  ;;  %v13179_v12 = vld [vmem:[#allocation9_spill] sm:$0xff]  ;;  %v13180_v27 = vld [vmem:[#allocation8_spill] sm:$0xff] }
 0x842   : > { %7471 = vmatmul.mubr.bf16.gmra.mrb[236].mxu0 %v4887_v61  ;;  %v13181_v61 = vld [vmem:[#allocation13_spill] sm:$0xff] }
 0x843   : > { %7482 = vmatprep.mubr.msk.bf16.mxu0 %vm942_vm2, %v13169_v20  ;;  %v13182_v20 = vld [vmem:[#allocation12_spill] sm:$0xff] }
 0x84a   : > { %7483 = vmatmul.mubr.msk.bf16.vlgmr.msra.gmra.mrb[240].mxu0 %vm942_vm2, %v13170_v6  ;;  %v13184_v6 = vld [vmem:[#allocation16_spill] sm:$0xff] }
 0x84b   : > { %7486 = vmatprep.mubr.msk.bf16.mxu0 %vm942_vm2, %v13171_v30  ;;  %7515 = vmatpush3.bf16.msra.mxu0 %v11191_v59  ;;  %v7700_v59 = vld [vmem:[%s12358_s8 + $0x20] sm:$0xff]   ;;  %v4522_v30 = vadd.f32 %v11101_v50, %v9725_v60 }
 0x84c   : > { %7516 = vmatprep.subr.bf16.mxu0 %v7697_v56 }
 0x84f   : > { %7517 = vmatpush3.bf16.msra.mxu0 %v7697_v56  ;;  %v13183_v56 = vld [vmem:[#allocation17_spill] sm:$0xff] }
 0x850   : > { %7518 = vmatprep.subr.bf16.mxu0 %v7698_v49 }
 0x852   : > { %7487 = vmatmul.mubr.msk.bf16.gmra.mrb[244].mxu0 %vm942_vm2, %v13172_v36  ;;  %v13186_v36 = vld [vmem:[#allocation85_spill] sm:$0xff] }
 0x853   : > { %7490 = vmatprep.mubr.msk.bf16.mxu0 %vm942_vm2, %v13173_v35  ;;  %7519 = vmatpush3.bf16.msra.mxu0 %v7698_v49  ;;  %v13185_v49 = vld [vmem:[#allocation84_spill] sm:$0xff]  ;;  %v4523_v35 = vadd.f32 %v11104_v26, %v13186_v36  ;;  %v13191_v36 = vld [vmem:[#allocation90_spill] sm:$0xff] }
 0x854   : > { %7520 = vmatprep.subr.bf16.mxu0 %v7699_v24 }
 0x857   : > { %7521 = vmatpush3.bf16.msra.mxu0 %v7699_v24  ;;  %v4520_v24 = vadd.f32 %v11095_v29, %v13185_v49 }
 0x858   : > { %7522 = vmatprep.subr.bf16.mxu0 %v7700_v59 }
 0x85a   : > { %7491 = vmatmul.mubr.msk.bf16.gmra.mrb[248].mxu0 %vm942_vm2, %v13174_v8  ;;  %v4554_v8 = vmul.f32 0.5, %v4522_v30 }
 0x85b   : > { %7494 = vmatprep.mubr.msk.bf16.mxu0 %vm942_vm2, %v13175_v32  ;;  %7523 = vmatpush3.bf16.msra.mxu0 %v7700_v59  ;;  %v13187_v59 = vld [vmem:[#allocation86_spill] sm:$0xff]  ;;  %v4552_v32 = vmul.f32 0.5, %v4520_v24 }
 0x85c   : > { %7524 = vmatprep.subr.bf16.mxu0 %v7701_v62  ;;  %8346 = vtanh.f32 %v4554_v8  ;;  %v13192_v8 = vld [vmem:[#allocation91_spill] sm:$0xff] }
 0x85d   : > { %8348 = vtanh.f32 %v4552_v32  ;;  %v4524_v32 = vadd.f32 %v11112_v17, %v13192_v8 }
 0x85f   : > { %7525 = vmatpush3.bf16.msra.mxu0 %v7701_v62  ;;  %v4521_v62 = vadd.f32 %v11098_v55, %v13187_v59 }
 0x860   : > { %7526 = vmatprep.subr.bf16.mxu0 %v7702_v51 }
 0x862   : > { %7495 = vmatmul.mubr.msk.bf16.gmra.mrb[252].mxu0 %vm942_vm2, %v13176_v19 }
 0x863   : > { %7498 = vmatprep.mubr.msk.bf16.mxu0 %vm942_vm2, %v13177_v57  ;;  %7527 = vmatpush3.bf16.msra.mxu0 %v7702_v51  ;;  %v4555_v51 = vmul.f32 0.5, %v4523_v35 }
 0x864   : > { %7528 = vmatprep.subr.bf16.mxu0 %v7703_v63 }
 0x865   : > { %8350 = vtanh.f32 %v4555_v51 }
 0x866   : > { %v8347_v19 = vpop.eup %8346 }
 0x867   : > { %7529 = vmatpush3.bf16.msra.mxu0 %v7703_v63  ;;  %v4553_v63 = vmul.f32 0.5, %v4521_v62  ;;  %v8349_v57 = vpop.eup %8348  ;;  %v4618_v26 = vadd.f32 1.0, %v8347_v19 }
 0x869   : > { %8352 = vtanh.f32 %v4553_v63  ;;  %v4650_v62 = vmul.f32 0.5, %v4618_v26  ;;  %v13193_v63 = vld [vmem:[#allocation92_spill] sm:$0xff] }
 0x86a   : > { %7499 = vmatmul.mubr.msk.bf16.gmra.mrb[0].mxu0 %vm942_vm2, %v13178_v47  ;;  %v13188_v47 = vld [vmem:[#allocation87_spill] sm:$0xff]  ;;  %v4525_v19 = vadd.f32 %v11115_v53, %v13193_v63 }
 0x86b   : > { %7502 = vmatprep.mubr.msk.bf16.mxu0 %vm942_vm2, %v13179_v12 }
 0x86c   : > { %v4557_v26 = vmul.f32 0.5, %v4525_v19 }
 0x86f   : > { %v8351_v50 = vpop.eup %8350 }
 0x870   : > { %v4619_v24 = vadd.f32 1.0, %v8351_v50  ;;  %v13195_v50 = vld [vmem:[#allocation94_spill] sm:$0xff] }
 0x872   : > { %7503 = vmatmul.mubr.msk.bf16.gmra.mrb[4].mxu0 %vm942_vm2, %v13180_v27 }
 0x873   : > { %7506 = vmatprep.mubr.msk.bf16.mxu0 %vm942_vm2, %v13181_v61  ;;  %v8353_v27 = vpop.eup %8352  ;;  %v13189_v61 = vld [vmem:[#allocation88_spill] sm:$0xff] }
 0x874   : > { %v4617_v59 = vadd.f32 1.0, %v8353_v27  ;;  %v4556_v27 = vmul.f32 0.5, %v4524_v32 }
 0x87a   : > { %7507 = vmatmul.mubr.msk.bf16.gmra.mrb[8].mxu0 %vm942_vm2, %v13182_v20 }
 0x87b   : > { %7510 = vmatprep.mubr.msk.bf16.mxu0 %vm942_vm2, %v13183_v56  ;;  %v4616_v56 = vadd.f32 1.0, %v8349_v57  ;;  %v4651_v57 = vmul.f32 0.5, %v4619_v24 }
 0x87d   : > { %v4648_v51 = vmul.f32 0.5, %v4616_v56 }
 0x882   : > { %7511 = vmatmul.mubr.msk.bf16.gmra.mrb[12].mxu0 %vm942_vm2, %v13184_v6  ;;  %v13190_v6 = vld [vmem:[#allocation89_spill] sm:$0xff] }
 0x89c   : > { %v7444_v60 = vpop.f32.mrb[208].mxu0 }
 0x89d   : > { %v4931_v29 = vadd.f32 %v7444_v60, %v13188_v47  ;;  %v4922_v12 = vpop.f32.mrb[209].mxu0  ;;  %v13194_v60 = vld [vmem:[#allocation93_spill] sm:$0xff] }
 0x89e   : > { %v4923_v20 = vadd.f32 %v4922_v12, %v13189_v61  ;;  %v7445_v55 = vpop.f32.mrb[210].mxu0  ;;  %v4526_v47 = vadd.f32 %v11123_v15, %v13194_v60  ;;  %v4527_v12 = vadd.f32 %v11126_v11, %v13195_v50  ;;  %v5083_v61 = vsub.f32 1.0, %v4650_v62  ;;  %v13197_v50 = vld [vmem:[#allocation96_spill] sm:$0xff] }
 0x89f   : > { %8354 = vtanh.f32 %v4931_v29  ;;  %v4934_v30 = vadd.f32 %v7445_v55, %v13190_v6  ;;  %v4925_v49 = vpop.f32.mrb[211].mxu0  ;;  %v4649_v29 = vmul.f32 0.5, %v4617_v59  ;;  %v5084_v55 = vsub.f32 1.0, %v4651_v57 }
 0x8a0   : > { %8356 = vtanh.f32 %v4923_v20  ;;  %v4926_v35 = vadd.f32 %v4925_v49, %v13191_v36  ;;  %v5081_v20 = vsub.f32 1.0, %v4648_v51  ;;  %v4558_v6 = vmul.f32 0.5, %v4526_v47  ;;  %v13196_v47 = vld [vmem:[#allocation95_spill] sm:$0xff] }
 0x8a1   : > { %8358 = vtanh.f32 %v4934_v30  ;;  %v5082_v30 = vsub.f32 1.0, %v4649_v29  ;;  %v4559_v56 = vmul.f32 0.5, %v4527_v12  ;;  %v5115_v53 = vmul.f32 %v5083_v61, %v10879_v7 }
 0x8a2   : > { %8360 = vtanh.f32 %v4926_v35  ;;  %v5113_v15 = vmul.f32 %v5081_v20, %v10882_v48  ;;  %v5116_v59 = vmul.f32 %v5084_v55, %v10886_v37  ;;  %v4528_v7 = vadd.f32 %v11135_v33, %v13196_v47  ;;  %v7704_v37 = vld [vmem:[%s12361_s11] sm:$0xff]  }
 0x8a3   : > { %8362 = vtanh.f32 %v4556_v27  ;;  %v5114_v63 = vmul.f32 %v5082_v30, %v10890_v4  ;;  %v4529_v12 = vadd.f32 %v11138_v9, %v13197_v50  ;;  %v13199_v27 = vld [vmem:[#allocation98_spill] sm:$0xff]  ;;  %7562 = vmatprep.subr.bf16.mxu1 %v7704_v37 }
 0x8a4   : > { %8364 = vtanh.f32 %v4557_v26  ;;  %v4531_v4 = vadd.f32 %v11146_v13, %v13199_v27  ;;  %v4560_v20 = vmul.f32 0.5, %v4528_v7  ;;  %7563 = vmatpush3.bf16.msra.mxu1 %v7704_v37  ;;  %v13205_v37 = vld [vmem:[#allocation104_spill] sm:$0xff]  ;;  %v13206_v27 = vld [vmem:[#allocation105_spill] sm:$0xff] }
 0x8a5   : > { %8366 = vtanh.f32 %v4558_v6  ;;  %v4561_v33 = vmul.f32 0.5, %v4529_v12  ;;  %v13204_v12 = vld [vmem:[#allocation103_spill] sm:$0xff] }
 0x8a6   : > { %8368 = vtanh.f32 %v4559_v56  ;;  %v4563_v6 = vmul.f32 0.5, %v4531_v4  ;;  %v4534_v4 = vadd.f32 %v11159_v38, %v13206_v27  ;;  %v13208_v38 = vld [vmem:[#allocation83_spill] sm:$0xff] }
 0x8a7   : > { %8370 = vtanh.f32 %v4560_v20 }
 0x8a8   : > { %8372 = vtanh.f32 %v4561_v33 }
 0x8a9   : > { %v8355_v17 = vpop.eup %8354 }
 0x8aa   : > { %v8357_v49 = vpop.eup %8356  ;;  %v5147_v24 = vmul.f32 %v8355_v17, %v4650_v62 }
 0x8ab   : > { %v8359_v36 = vpop.eup %8358  ;;  %v5145_v35 = vmul.f32 %v8357_v49, %v4648_v51  ;;  %v13198_v51 = vld [vmem:[#allocation97_spill] sm:$0xff]  ;;  %v13200_v49 = vld [vmem:[#allocation99_spill] sm:$0xff] }
 0x8ac   : > { %v8361_v11 = vpop.eup %8360  ;;  %v5148_v8 = vmul.f32 %v8359_v36, %v4651_v57  ;;  %v5179_v32 = vadd.f32 %v5147_v24, %v5115_v53  ;;  %v4530_v57 = vadd.f32 %v11143_v52, %v13198_v51  ;;  %v4533_v51 = vadd.f32 %v11154_v22, %v13205_v37 }
 0x8ad   : > { %v5146_v19 = vmul.f32 %v8361_v11, %v4649_v29  ;;  %v5177_v60 = vadd.f32 %v5145_v35, %v5113_v15  ;;  %v8363_v26 = vpop.eup %8362  ;;  %v13201_v15 = vld [vmem:[#allocation101_spill] sm:$0xff] }
 0x8ae   : > { %v5180_v62 = vadd.f32 %v5148_v8, %v5116_v59  ;;  %v4562_v9 = vmul.f32 0.5, %v4530_v57  ;;  %v8365_v55 = vpop.eup %8364  ;;  %v4620_v56 = vadd.f32 1.0, %v8363_v26  ;;  %v13202_v8 = vld [vmem:[#allocation100_spill] sm:$0xff]  ;;  %v13207_v26 = vld [vmem:[#allocation106_spill] sm:$0xff] }
 0x8af   : > { %v5178_v48 = vadd.f32 %v5146_v19, %v5114_v63  ;;  %v8367_v17 = vpop.eup %8366  ;;  %v4621_v24 = vadd.f32 1.0, %v8365_v55  ;;  %v13203_v19 = vld [vmem:[#allocation102_spill] sm:$0xff] }
 0x8b0   : > { %v5210_v61 = vpack.c.bf16 %v5180_v62, %v5179_v32  ;;  %v8369_v30 = vpop.eup %8368  ;;  %8374 = vtanh.f32 %v4562_v9  ;;  %v4622_v36 = vadd.f32 1.0, %v8367_v17  ;;  %v4652_v47 = vmul.f32 0.5, %v4620_v56 }
 0x8b1   : > { %v5209_v29 = vpack.c.bf16 %v5178_v48, %v5177_v60  ;;  %8376 = vtanh.f32 %v4563_v6  ;;  %v4623_v59 = vadd.f32 1.0, %v8369_v30  ;;  %v4653_v7 = vmul.f32 0.5, %v4621_v24  ;;  %v8371_v57 = vpop.eup %8370 }
 0x8b2   : > { %v7448_v52 = vpop.f32.mrb[212].mxu0  ;;  %v4654_v62 = vmul.f32 0.5, %v4622_v36  ;;  %v4532_v48 = vadd.f32 %v11151_v39, %v13204_v12  ;;  %v4535_v9 = vadd.f32 %v11162_v14, %v13207_v26  ;;  %v4566_v56 = vmul.f32 0.5, %v4534_v4  ;;  %v13212_v4 = vld [vmem:[#allocation107_spill] sm:$0xff] }
 0x8b3   : > { %7530 = vmatprep.mubr.bf16.mxu0 %v5209_v29  ;;  %v4947_v13 = vadd.f32 %v7448_v52, %v13200_v49  ;;  %v4938_v53 = vpop.f32.mrb[213].mxu0  ;;  %v4655_v50 = vmul.f32 0.5, %v4623_v59  ;;  %v8373_v29 = vpop.eup %8372  ;;  %v5086_v20 = vsub.f32 1.0, %v4653_v7  ;;  %v4565_v52 = vmul.f32 0.5, %v4533_v51 }
 0x8b4   : > { %7531 = vmatmul.mubr.bf16.vlgmr.msra.gmra.mrb[240].mxu0 %v5210_v61  ;;  %v4939_v35 = vadd.f32 %v4938_v53, %v13201_v15  ;;  %v7449_v11 = vpop.f32.mrb[214].mxu0  ;;  %v5085_v61 = vsub.f32 1.0, %v4652_v47  ;;  %v5087_v33 = vsub.f32 1.0, %v4654_v62  ;;  %v4564_v17 = vmul.f32 0.5, %v4532_v48 }
 0x8b5   : > { %8378 = vtanh.f32 %v4947_v13  ;;  %v4950_v32 = vadd.f32 %v7449_v11, %v13202_v8  ;;  %v4941_v63 = vpop.f32.mrb[215].mxu0  ;;  %v5088_v6 = vsub.f32 1.0, %v4655_v50  ;;  %v4567_v13 = vmul.f32 0.5, %v4535_v9  ;;  %v13209_v11 = vld [vmem:[#allocation128_spill] sm:$0xff] }
 0x8b6   : > { %8380 = vtanh.f32 %v4939_v35  ;;  %v4942_v60 = vadd.f32 %v4941_v63, %v13203_v19  ;;  %v5117_v22 = vmul.f32 %v5085_v61, %v10921_v0  ;;  %v5118_v53 = vmul.f32 %v5086_v20, %v10927_v46  ;;  %v13210_v0 = vld [vmem:[#allocation18_spill] sm:$0xff] }
 0x8b7   : > { %8382 = vtanh.f32 %v4950_v32  ;;  %v5119_v24 = vmul.f32 %v5087_v33, %v13208_v38  ;;  %v4624_v35 = vadd.f32 1.0, %v8371_v57  ;;  %v5120_v59 = vmul.f32 %v5088_v6, %v13209_v11 }
 0x8b8   : > { %8384 = vtanh.f32 %v4942_v60  ;;  %v4625_v32 = vadd.f32 1.0, %v8373_v29 }
 0x8b9   : > { %8386 = vtanh.f32 %v4564_v17  ;;  %v4656_v6 = vmul.f32 0.5, %v4624_v35  ;;  %v13217_v35 = vld [vmem:[#allocation110_spill] sm:$0xff] }
 0x8ba   : > { %v8375_v55 = vpop.eup %8374  ;;  %8388 = vtanh.f32 %v4565_v52  ;;  %v4657_v17 = vmul.f32 0.5, %v4625_v32 }
 0x8bb   : > { %v8377_v30 = vpop.eup %8376  ;;  %8390 = vtanh.f32 %v4566_v56  ;;  %v4626_v51 = vadd.f32 1.0, %v8375_v55 }
 0x8bc   : > { %8392 = vtanh.f32 %v4567_v13  ;;  %v4627_v27 = vadd.f32 1.0, %v8377_v30  ;;  %v13215_v30 = vld [vmem:[#allocation109_spill] sm:$0xff]  ;;  %v5089_v13 = vsub.f32 1.0, %v4656_v6 }
 0x8bd   : > { %v4658_v55 = vmul.f32 0.5, %v4626_v51 }
 0x8be   : > { %v4659_v52 = vmul.f32 0.5, %v4627_v27 }
 0x8bf   : > { %v8379_v39 = vpop.eup %8378 }
 0x8c0   : > { %v8381_v49 = vpop.eup %8380  ;;  %v5151_v36 = vmul.f32 %v8379_v39, %v4654_v62  ;;  %v13211_v62 = vld [vmem:[#allocation19_spill] sm:$0xff]  ;;  %v13214_v39 = vld [vmem:[#allocation32_spill] sm:$0xff] }
 0x8c1   : > { %v8383_v15 = vpop.eup %8382  ;;  %v5149_v14 = vmul.f32 %v8381_v49, %v4652_v47  ;;  %v4536_v56 = vadd.f32 %v11167_v41, %v13214_v39 }
 0x8c2   : > { %v8385_v8 = vpop.eup %8384  ;;  %v5152_v19 = vmul.f32 %v8383_v15, %v4655_v50  ;;  %v5183_v60 = vadd.f32 %v5151_v36, %v5119_v24  ;;  %v13213_v50 = vld [vmem:[#allocation108_spill] sm:$0xff]  ;;  %v5090_v36 = vsub.f32 1.0, %v4657_v17  ;;  %v5091_v15 = vsub.f32 1.0, %v4658_v55 }
 0x8c3   : > { %v7452_v63 = vpop.f32.mrb[216].mxu0  ;;  %v5150_v46 = vmul.f32 %v8385_v8, %v4653_v7  ;;  %v5181_v37 = vadd.f32 %v5149_v14, %v5117_v22  ;;  %v4537_v22 = vadd.f32 %v11170_v23, %v13215_v30  ;;  %v8387_v49 = vpop.eup %8386  ;;  %v4539_v14 = vadd.f32 %v11178_v5, %v13217_v35  ;;  %v13218_v23 = vld [vmem:[#allocation138_spill] sm:$0xff] }
 0x8c4   : > { %v4963_v12 = vadd.f32 %v7452_v63, %v13210_v0  ;;  %v4954_v48 = vpop.f32.mrb[217].mxu0  ;;  %v5184_v47 = vadd.f32 %v5152_v19, %v5120_v59  ;;  %v8389_v24 = vpop.eup %8388  ;;  %v5092_v59 = vsub.f32 1.0, %v4659_v52  ;;  %v4568_v8 = vmul.f32 0.5, %v4536_v56 }
 0x8c5   : > { %v4955_v57 = vadd.f32 %v4954_v48, %v13211_v62  ;;  %v7453_v61 = vpop.f32.mrb[218].mxu0  ;;  %v5182_v33 = vadd.f32 %v5150_v46, %v5118_v53  ;;  %v13216_v53 = vld [vmem:[#allocation35_spill] sm:$0xff]  ;;  %v8391_v11 = vpop.eup %8390  ;;  %v4569_v32 = vmul.f32 0.5, %v4537_v22  ;;  %v13219_v48 = vld [vmem:[#allocation133_spill] sm:$0xff] }
 0x8c6   : > { %8394 = vtanh.f32 %v4963_v12  ;;  %v4966_v29 = vadd.f32 %v7453_v61, %v13212_v4  ;;  %v4957_v20 = vpop.f32.mrb[219].mxu0  ;;  %v5212_v9 = vpack.c.bf16 %v5184_v47, %v5183_v60  ;;  %v4538_v38 = vadd.f32 %v11175_v44, %v13216_v53  ;;  %v8393_v41 = vpop.eup %8392  ;;  %v13220_v44 = vld [vmem:[#allocation79_spill] sm:$0xff] }
 0x8c7   : > { %8396 = vtanh.f32 %v4955_v57  ;;  %v4958_v26 = vadd.f32 %v4957_v20, %v13213_v50  ;;  %v5211_v7 = vpack.c.bf16 %v5182_v33, %v5181_v37  ;;  %v5121_v60 = vmul.f32 %v5089_v13, %v13218_v23  ;;  %v13221_v61 = vld [vmem:[#allocation131_spill] sm:$0xff]  ;;  %v13222_v50 = vld [vmem:[#allocation20_spill] sm:$0xff]  ;;  %v13224_v13 = vld [vmem:[#allocation114_spill] sm:$0xff] }
 0x8c8   : > { %8398 = vtanh.f32 %v4966_v29  ;;  %v4570_v19 = vmul.f32 0.5, %v4538_v38  ;;  %v4571_v12 = vmul.f32 0.5, %v4539_v14  ;;  %v5122_v46 = vmul.f32 %v5090_v36, %v13219_v48 }
 0x8c9   : > { %8400 = vtanh.f32 %v4958_v26  ;;  %7534 = vmatprep.mubr.bf16.mxu0 %v5211_v7  ;;  %v5123_v37 = vmul.f32 %v5091_v15, %v13220_v44  ;;  %v4628_v57 = vadd.f32 1.0, %v8387_v49  ;;  %v5124_v47 = vmul.f32 %v5092_v59, %v13221_v61  ;;  %v13229_v44 = vld [vmem:[#allocation117_spill] sm:$0xff] }
 0x8ca   : > { %7535 = vmatmul.mubr.bf16.gmra.mrb[244].mxu0 %v5212_v9  ;;  %8402 = vtanh.f32 %v4568_v8  ;;  %v4629_v4 = vadd.f32 1.0, %v8389_v24  ;;  %v4630_v56 = vadd.f32 1.0, %v8391_v11  ;;  %v4631_v49 = vadd.f32 1.0, %v8393_v41  ;;  %v13226_v8 = vld [vmem:[#allocation37_spill] sm:$0xff]  ;;  %v13227_v41 = vld [vmem:[#allocation116_spill] sm:$0xff] }
 0x8cb   : > { %8404 = vtanh.f32 %v4569_v32  ;;  %v4660_v35 = vmul.f32 0.5, %v4628_v57  ;;  %v4540_v32 = vadd.f32 %v11183_v1, %v13226_v8 }
 0x8cc   : > { %8406 = vtanh.f32 %v4570_v19  ;;  %v4661_v14 = vmul.f32 0.5, %v4629_v4  ;;  %v4662_v11 = vmul.f32 0.5, %v4630_v56  ;;  %v4663_v59 = vmul.f32 0.5, %v4631_v49 }
 0x8cd   : > { %8408 = vtanh.f32 %v4571_v12  ;;  %v5093_v23 = vsub.f32 1.0, %v4660_v35 }
 0x8ce   : > { %v5096_v57 = vsub.f32 1.0, %v4663_v59 }
 0x8d0   : > { %v8395_v63 = vpop.eup %8394 }
 0x8d1   : > { %v8397_v0 = vpop.eup %8396  ;;  %v5155_v51 = vmul.f32 %v8395_v63, %v4658_v55  ;;  %v13223_v55 = vld [vmem:[#allocation21_spill] sm:$0xff]  ;;  %v4541_v63 = vadd.f32 %v11186_v40, %v13227_v41  ;;  %v13231_v40 = vld [vmem:[#allocation135_spill] sm:$0xff] }
 0x8d2   : > { %v8399_v62 = vpop.eup %8398  ;;  %v5153_v5 = vmul.f32 %v8397_v0, %v4656_v6  ;;  %v13228_v0 = vld [vmem:[#allocation40_spill] sm:$0xff]  ;;  %v5125_v4 = vmul.f32 %v5093_v23, %v13231_v40  ;;  %v13240_v40 = vld [vmem:[#allocation46_spill] sm:$0xff] }
 0x8d3   : > { %v8401_v27 = vpop.eup %8400  ;;  %v5156_v20 = vmul.f32 %v8399_v62, %v4659_v52  ;;  %v5187_v33 = vadd.f32 %v5155_v51, %v5123_v37  ;;  %v13225_v52 = vld [vmem:[#allocation115_spill] sm:$0xff]  ;;  %v4542_v12 = vadd.f32 %v11197_v21, %v13228_v0  ;;  %v4573_v61 = vmul.f32 0.5, %v4541_v63  ;;  %v13233_v21 = vld [vmem:[#allocation132_spill] sm:$0xff]  ;;  %v13237_v63 = vld [vmem:[#allocation122_spill] sm:$0xff] }
 0x8d4   : > { %v5154_v7 = vmul.f32 %v8401_v27, %v4657_v17  ;;  %v5185_v39 = vadd.f32 %v5153_v5, %v5121_v60  ;;  %v8403_v19 = vpop.eup %8402  ;;  %v5094_v60 = vsub.f32 1.0, %v4661_v14  ;;  %v13230_v37 = vld [vmem:[#allocation67_spill] sm:$0xff]  ;;  %v4572_v5 = vmul.f32 0.5, %v4540_v32 }
 0x8d5   : > { %v7456_v29 = vpop.f32.mrb[220].mxu0  ;;  %v5188_v6 = vadd.f32 %v5156_v20, %v5124_v47  ;;  %v8405_v48 = vpop.eup %8404  ;;  %v4543_v51 = vadd.f32 %v13230_v37, %v13229_v44  ;;  %v4574_v27 = vmul.f32 0.5, %v4542_v12 }
 0x8d6   : > { %v4979_v26 = vadd.f32 %v7456_v29, %v13222_v50  ;;  %v4970_v9 = vpop.f32.mrb[221].mxu0  ;;  %v5186_v24 = vadd.f32 %v5154_v7, %v5122_v46  ;;  %v5095_v46 = vsub.f32 1.0, %v4662_v11  ;;  %v8407_v62 = vpop.eup %8406  ;;  %v13232_v29 = vld [vmem:[#allocation113_spill] sm:$0xff]  ;;  %v4632_v50 = vadd.f32 1.0, %v8403_v19 }
 0x8d7   : > { %v4971_v30 = vadd.f32 %v4970_v9, %v13223_v55  ;;  %v7457_v22 = vpop.f32.mrb[222].mxu0  ;;  %v5214_v15 = vpack.c.bf16 %v5188_v6, %v5187_v33  ;;  %v8409_v1 = vpop.eup %8408  ;;  %v5126_v20 = vmul.f32 %v5094_v60, %v13232_v29  ;;  %v4633_v56 = vadd.f32 1.0, %v8405_v48 }
 0x8d8   : > { %8410 = vtanh.f32 %v4979_v26  ;;  %v4982_v53 = vadd.f32 %v7457_v22, %v13224_v13  ;;  %v4973_v38 = vpop.f32.mrb[223].mxu0  ;;  %v5213_v17 = vpack.c.bf16 %v5186_v24, %v5185_v39  ;;  %v4575_v26 = vmul.f32 0.5, %v4543_v51  ;;  %v13235_v24 = vld [vmem:[#allocation22_spill] sm:$0xff]  ;;  %v13239_v51 = vld [vmem:[#allocation43_spill] sm:$0xff] }
 0x8d9   : > { %8412 = vtanh.f32 %v4971_v30  ;;  %v4974_v36 = vadd.f32 %v4973_v38, %v13225_v52  ;;  %v5127_v9 = vmul.f32 %v5095_v46, %v13233_v21  ;;  %v13234_v30 = vld [vmem:[#allocation136_spill] sm:$0xff]  ;;  %v4634_v49 = vadd.f32 1.0, %v8407_v62 }
 0x8da   : > { %8414 = vtanh.f32 %v4982_v53  ;;  %7538 = vmatprep.mubr.bf16.mxu0 %v5213_v17  ;;  %v5128_v22 = vmul.f32 %v5096_v57, %v13234_v30  ;;  %v4635_v8 = vadd.f32 1.0, %v8409_v1  ;;  %v4664_v48 = vmul.f32 0.5, %v4632_v50 }
 0x8db   : > { %8416 = vtanh.f32 %v4974_v36  ;;  %7539 = vmatmul.mubr.bf16.gmra.mrb[248].mxu0 %v5214_v15  ;;  %v4665_v46 = vmul.f32 0.5, %v4633_v56  ;;  %v4666_v44 = vmul.f32 0.5, %v4634_v49  ;;  %v4544_v62 = vadd.f32 %v11205_v3, %v13239_v51  ;;  %v13243_v56 = vld [vmem:[#allocation111_spill] sm:$0xff] }
 0x8dc   : > { %8418 = vtanh.f32 %v4572_v5  ;;  %v4667_v37 = vmul.f32 0.5, %v4635_v8  ;;  %v5097_v5 = vsub.f32 1.0, %v4664_v48 }
 0x8dd   : > { %8420 = vtanh.f32 %v4573_v61  ;;  %v5098_v1 = vsub.f32 1.0, %v4665_v46 }
 0x8de   : > { %8422 = vtanh.f32 %v4574_v27  ;;  %v5100_v27 = vsub.f32 1.0, %v4667_v37 }
 0x8df   : > { %8424 = vtanh.f32 %v4575_v26  ;;  %v13241_v26 = vld [vmem:[#allocation134_spill] sm:$0xff] }
 0x8e0   : > { %v5129_v21 = vmul.f32 %v5097_v5, %v13241_v26 }
 0x8e2   : > { %v8411_v47 = vpop.eup %8410 }
 0x8e3   : > { %v8413_v33 = vpop.eup %8412  ;;  %v5159_v7 = vmul.f32 %v8411_v47, %v4662_v11  ;;  %v13236_v11 = vld [vmem:[#allocation23_spill] sm:$0xff]  ;;  %v5099_v47 = vsub.f32 1.0, %v4666_v44 }
 0x8e4   : > { %v8415_v39 = vpop.eup %8414  ;;  %v5157_v55 = vmul.f32 %v8413_v33, %v4660_v35  ;;  %v4576_v33 = vmul.f32 0.5, %v4544_v62 }
 0x8e5   : > { %v8417_v6 = vpop.eup %8416  ;;  %v7460_v13 = vpop.f32.mrb[224].mxu0  ;;  %v5160_v53 = vmul.f32 %v8415_v39, %v4663_v59  ;;  %v5191_v38 = vadd.f32 %v5159_v7, %v5127_v9  ;;  %v13238_v59 = vld [vmem:[#allocation123_spill] sm:$0xff]  ;;  %v13242_v9 = vld [vmem:[#allocation112_spill] sm:$0xff]  ;;  %v5131_v3 = vmul.f32 %v5099_v47, %v11008_v43 }
 0x8e6   : > { %v4995_v52 = vadd.f32 %v7460_v13, %v13235_v24  ;;  %v4986_v36 = vpop.f32.mrb[225].mxu0  ;;  %v5158_v15 = vmul.f32 %v8417_v6, %v4661_v14  ;;  %v5189_v17 = vadd.f32 %v5157_v55, %v5125_v4  ;;  %v8419_v57 = vpop.eup %8418  ;;  %v4546_v4 = vadd.f32 %v11213_v2, %v13240_v40  ;;  %v13251_v40 = vld [vmem:[#allocation50_spill] sm:$0xff] }
 0x8e7   : > { %v4987_v32 = vadd.f32 %v4986_v36, %v13236_v11  ;;  %v7461_v41 = vpop.f32.mrb[226].mxu0  ;;  %v5192_v35 = vadd.f32 %v5160_v53, %v5128_v22  ;;  %v8421_v61 = vpop.eup %8420  ;;  %v5130_v7 = vmul.f32 %v5098_v1, %v13242_v9  ;;  %v5132_v55 = vmul.f32 %v5100_v27, %v13243_v56  ;;  %v13244_v53 = vld [vmem:[#allocation125_spill] sm:$0xff]  ;;  %v13253_v56 = vld [vmem:[#allocation71_spill] sm:$0xff] }
 0x8e8   : > { %8426 = vtanh.f32 %v4995_v52  ;;  %v4998_v19 = vadd.f32 %v7461_v41, %v13237_v63  ;;  %v4989_v23 = vpop.f32.mrb[227].mxu0  ;;  %v5190_v60 = vadd.f32 %v5158_v15, %v5126_v20  ;;  %v8423_v29 = vpop.eup %8422  ;;  %v4578_v30 = vmul.f32 0.5, %v4546_v4  ;;  %v13245_v52 = vld [vmem:[#allocation124_spill] sm:$0xff]  ;;  %v13246_v36 = vld [vmem:[#allocation73_spill] sm:$0xff] }
 0x8e9   : > { %8428 = vtanh.f32 %v4987_v32  ;;  %v4990_v0 = vadd.f32 %v4989_v23, %v13238_v59  ;;  %v5216_v12 = vpack.c.bf16 %v5192_v35, %v5191_v38  ;;  %v8425_v20 = vpop.eup %8424  ;;  %v4636_v49 = vadd.f32 1.0, %v8419_v57  ;;  %v13247_v32 = vld [vmem:[#allocation24_spill] sm:$0xff]  ;;  %v13248_v59 = vld [vmem:[#allocation25_spill] sm:$0xff]  ;;  %v13250_v57 = vld [vmem:[#allocation127_spill] sm:$0xff] }
 0x8ea   : > { %8430 = vtanh.f32 %v4998_v19  ;;  %v5215_v14 = vpack.c.bf16 %v5190_v60, %v5189_v17  ;;  %v4637_v13 = vadd.f32 1.0, %v8421_v61  ;;  %v4547_v2 = vadd.f32 %v11216_v58, %v13244_v53 }
 0x8eb   : > { %8432 = vtanh.f32 %v4990_v0  ;;  %v4545_v15 = vadd.f32 %v13246_v36, %v13245_v52  ;;  %v4638_v43 = vadd.f32 1.0, %v8423_v29  ;;  %v4639_v23 = vadd.f32 1.0, %v8425_v20  ;;  %v13257_v52 = vld [vmem:[#allocation76_spill] sm:$0xff]  ;;  %v13258_v36 = vld [vmem:[#allocation118_spill] sm:$0xff] }
 0x8ec   : > { %7542 = vmatprep.mubr.bf16.mxu0 %v5215_v14  ;;  %8434 = vtanh.f32 %v4576_v33  ;;  %v4668_v1 = vmul.f32 0.5, %v4636_v49  ;;  %v4669_v47 = vmul.f32 0.5, %v4637_v13  ;;  %v4548_v4 = vadd.f32 %v11221_v16, %v13251_v40  ;;  %v13255_v13 = vld [vmem:[#allocation53_spill] sm:$0xff] }
 0x8ed   : > { %7543 = vmatmul.mubr.bf16.gmra.mrb[252].mxu0 %v5216_v12  ;;  %8436 = vtanh.f32 %v4578_v30  ;;  %v4579_v12 = vmul.f32 0.5, %v4547_v2  ;;  %v4670_v61 = vmul.f32 0.5, %v4638_v43  ;;  %v4671_v27 = vmul.f32 0.5, %v4639_v23 }
 0x8ee   : > { %v5101_v20 = vsub.f32 1.0, %v4668_v1 }
 0x8ef   : > { %v5103_v33 = vsub.f32 1.0, %v4670_v61  ;;  %v5104_v9 = vsub.f32 1.0, %v4671_v27 }
 0x8f0   : > { %v5133_v53 = vmul.f32 %v5101_v20, %v13255_v13 }
 0x8f2   : > { %v8427_v50 = vpop.eup %8426 }
 0x8f3   : > { %v8429_v39 = vpop.eup %8428  ;;  %v5163_v22 = vmul.f32 %v8427_v50, %v4666_v44  ;;  %v13252_v50 = vld [vmem:[#allocation54_spill] sm:$0xff] }
 0x8f4   : > { %v8431_v6 = vpop.eup %8430  ;;  %v5161_v38 = vmul.f32 %v8429_v39, %v4664_v48  ;;  %v13249_v48 = vld [vmem:[#allocation126_spill] sm:$0xff]  ;;  %v4550_v26 = vadd.f32 %v11229_v54, %v13252_v50  ;;  %v4580_v39 = vmul.f32 0.5, %v4548_v4  ;;  %v4551_v54 = vadd.f32 %v11232_v25, %v13257_v52  ;;  %v13264_v52 = vld [vmem:[#allocation28_spill] sm:$0xff] }
 0x8f5   : > { %v8433_v24 = vpop.eup %8432  ;;  %v5195_v17 = vadd.f32 %v5163_v22, %v5131_v3  ;;  %v5164_v8 = vmul.f32 %v8431_v6, %v4667_v37  ;;  %v7464_v11 = vpop.f32.mrb[228].mxu0  ;;  %v4577_v37 = vmul.f32 0.5, %v4545_v15  ;;  %v13254_v22 = vld [vmem:[#allocation121_spill] sm:$0xff] }
 0x8f6   : > { %v5011_v41 = vadd.f32 %v7464_v11, %v13247_v32  ;;  %v5002_v35 = vpop.f32.mrb[229].mxu0  ;;  %v5162_v63 = vmul.f32 %v8433_v24, %v4665_v46  ;;  %v5193_v19 = vadd.f32 %v5161_v38, %v5129_v21  ;;  %v8435_v29 = vpop.eup %8434  ;;  %v5102_v21 = vsub.f32 1.0, %v4669_v47  ;;  %v13256_v38 = vld [vmem:[#allocation119_spill] sm:$0xff] }
 0x8f7   : > { %v5196_v60 = vadd.f32 %v5164_v8, %v5132_v55  ;;  %v5003_v58 = vadd.f32 %v5002_v35, %v13248_v59  ;;  %v7465_v0 = vpop.f32.mrb[230].mxu0  ;;  %v4549_v55 = vadd.f32 %v11224_v45, %v13253_v56  ;;  %v5135_v6 = vmul.f32 %v5103_v33, %v13254_v22  ;;  %v13263_v22 = vld [vmem:[#allocation63_spill] sm:$0xff] }
 0x8f8   : > { %8438 = vtanh.f32 %v5011_v41  ;;  %v5014_v14 = vadd.f32 %v7465_v0, %v13249_v48  ;;  %v5005_v44 = vpop.f32.mrb[231].mxu0  ;;  %v5194_v51 = vadd.f32 %v5162_v63, %v5130_v7  ;;  %v8437_v7 = vpop.eup %8436  ;;  %v4582_v49 = vmul.f32 0.5, %v4550_v26  ;;  %v13259_v63 = vld [vmem:[#allocation81_spill] sm:$0xff] }
 0x8f9   : > { %v5218_v62 = vpack.c.bf16 %v5196_v60, %v5195_v17  ;;  %8440 = vtanh.f32 %v5003_v58  ;;  %v5006_v5 = vadd.f32 %v5005_v44, %v13250_v57  ;;  %v5136_v24 = vmul.f32 %v5104_v9, %v13256_v38 }
 0x8fa   : > { %8442 = vtanh.f32 %v5014_v14  ;;  %v5217_v46 = vpack.c.bf16 %v5194_v51, %v5193_v19  ;;  %v5134_v15 = vmul.f32 %v5102_v21, %v13258_v36  ;;  %v4640_v11 = vadd.f32 1.0, %v8435_v29  ;;  %v13261_v51 = vld [vmem:[#allocation26_spill] sm:$0xff] }
 0x8fb   : > { %8444 = vtanh.f32 %v5006_v5  ;;  %v4581_v35 = vmul.f32 0.5, %v4549_v55  ;;  %v4642_v0 = vadd.f32 1.0, %v8437_v7  ;;  %v4583_v44 = vmul.f32 0.5, %v4551_v54 }
 0x8fc   : > { %8446 = vtanh.f32 %v4579_v12  ;;  %7546 = vmatprep.mubr.bf16.mxu0 %v5217_v46  ;;  %v13260_v12 = vld [vmem:[#allocation78_spill] sm:$0xff]  ;;  %v4672_v4 = vmul.f32 0.5, %v4640_v11 }
 0x8fd   : > { %8448 = vtanh.f32 %v4577_v37  ;;  %7547 = vmatmul.mubr.bf16.gmra.mrb[0].mxu0 %v5218_v62  ;;  %v4674_v40 = vmul.f32 0.5, %v4642_v0  ;;  %v13268_v0 = vld [vmem:[#allocation130_spill] sm:$0xff] }
 0x8fe   : > { %8450 = vtanh.f32 %v4580_v39  ;;  %v5105_v26 = vsub.f32 1.0, %v4672_v4 }
 0x8ff   : > { %8452 = vtanh.f32 %v4582_v49  ;;  %v5107_v50 = vsub.f32 1.0, %v4674_v40 }
 0x901   : > { %v5139_v56 = vmul.f32 %v5107_v50, %v11058_v42 }
 0x902   : > { %v8439_v3 = vpop.eup %8438 }
 0x903   : > { %v8441_v30 = vpop.eup %8440  ;;  %v5167_v16 = vmul.f32 %v8439_v3, %v4670_v61 }
 0x904   : > { %v8443_v2 = vpop.eup %8442  ;;  %v5165_v17 = vmul.f32 %v8441_v30, %v4668_v1  ;;  %v13262_v1 = vld [vmem:[#allocation27_spill] sm:$0xff] }
 0x905   : > { %v8445_v8 = vpop.eup %8444  ;;  %v5199_v45 = vadd.f32 %v5167_v16, %v5135_v6  ;;  %v5168_v43 = vmul.f32 %v8443_v2, %v4671_v27  ;;  %v7468_v32 = vpop.f32.mrb[232].mxu0  ;;  %v5137_v6 = vmul.f32 %v5105_v26, %v13263_v22 }
 0x906   : > { %v8447_v41 = vpop.eup %8446  ;;  %v5027_v19 = vadd.f32 %v7468_v32, %v13259_v63  ;;  %v5018_v23 = vpop.f32.mrb[233].mxu0  ;;  %v5166_v60 = vmul.f32 %v8445_v8, %v4669_v47  ;;  %v5197_v59 = vadd.f32 %v5165_v17, %v5133_v53  ;;  %v13266_v32 = vld [vmem:[#allocation29_spill] sm:$0xff] }
 0x907   : > { %v8449_v58 = vpop.eup %8448  ;;  %v5200_v25 = vadd.f32 %v5168_v43, %v5136_v24  ;;  %v5019_v48 = vadd.f32 %v5018_v23, %v13260_v12  ;;  %v7469_v14 = vpop.f32.mrb[234].mxu0  ;;  %v4643_v5 = vadd.f32 1.0, %v8447_v41 }
 0x908   : > { %8454 = vtanh.f32 %v5027_v19  ;;  %v5030_v37 = vadd.f32 %v7469_v14, %v13261_v51  ;;  %v5021_v62 = vpop.f32.mrb[235].mxu0  ;;  %v5198_v57 = vadd.f32 %v5166_v60, %v5134_v15  ;;  %v4641_v47 = vadd.f32 1.0, %v8449_v58  ;;  %v8451_v33 = vpop.eup %8450  ;;  %v13265_v15 = vld [vmem:[#allocation120_spill] sm:$0xff] }
 0x909   : > { %v5220_v46 = vpack.c.bf16 %v5200_v25, %v5199_v45  ;;  %8456 = vtanh.f32 %v5019_v48  ;;  %v5022_v61 = vadd.f32 %v5021_v62, %v13262_v1  ;;  %v4675_v29 = vmul.f32 0.5, %v4643_v5  ;;  %v8453_v21 = vpop.eup %8452 }
 0x90a   : > { %8458 = vtanh.f32 %v5030_v37  ;;  %v5219_v27 = vpack.c.bf16 %v5198_v57, %v5197_v59  ;;  %v4673_v20 = vmul.f32 0.5, %v4641_v47  ;;  %v4646_v45 = vadd.f32 1.0, %v8453_v21 }
 0x90b   : > { %8460 = vtanh.f32 %v5022_v61  ;;  %v5108_v9 = vsub.f32 1.0, %v4675_v29  ;;  %v4644_v63 = vadd.f32 1.0, %v8451_v33 }
 0x90c   : > { %8462 = vtanh.f32 %v4583_v44  ;;  %7550 = vmatprep.mubr.bf16.mxu0 %v5219_v27  ;;  %v5106_v39 = vsub.f32 1.0, %v4673_v20  ;;  %v4678_v14 = vmul.f32 0.5, %v4646_v45 }
 0x90d   : > { %8464 = vtanh.f32 %v4581_v35  ;;  %7551 = vmatmul.mubr.bf16.gmra.mrb[4].mxu0 %v5220_v46  ;;  %v5140_v13 = vmul.f32 %v5108_v9, %v11065_v28  ;;  %v13267_v28 = vld [vmem:[#allocation129_spill] sm:$0xff]  ;;  %v4676_v44 = vmul.f32 0.5, %v4644_v63 }
 0x90e   : > { %v5138_v17 = vmul.f32 %v5106_v39, %v13265_v15  ;;  %v5111_v62 = vsub.f32 1.0, %v4678_v14 }
 0x90f   : > { %v5109_v57 = vsub.f32 1.0, %v4676_v44 }
 0x910   : > { %v5143_v47 = vmul.f32 %v5111_v62, %v11080_v34  ;;  %v7705_v34 = vld [vmem:[%s12361_s11 + $0x8] sm:$0xff]  }
 0x911   : > { %7564 = vmatprep.subr.bf16.mxu1 %v7705_v34 }
 0x912   : > { %v8455_v7 = vpop.eup %8454  ;;  %7565 = vmatpush3.bf16.msra.mxu1 %v7705_v34 }
 0x913   : > { %v8457_v3 = vpop.eup %8456  ;;  %v5171_v55 = vmul.f32 %v8455_v7, %v4674_v40 }
 0x914   : > { %v8459_v30 = vpop.eup %8458  ;;  %v5169_v49 = vmul.f32 %v8457_v3, %v4672_v4  ;;  %v5141_v4 = vmul.f32 %v5109_v57, %v11084_v10  ;;  %v11432_v10 = vld [vmem:[%s12360_s10] ss:$0 sm:$0xff] }
 0x915   : > { %v8461_v16 = vpop.eup %8460  ;;  %v5203_v53 = vadd.f32 %v5171_v55, %v5139_v56  ;;  %v5172_v2 = vmul.f32 %v8459_v30, %v4675_v29  ;;  %v7472_v38 = vpop.f32.mrb[236].mxu0 }
 0x916   : > { %v8463_v24 = vpop.eup %8462  ;;  %v5043_v54 = vadd.f32 %v7472_v38, %v13264_v52  ;;  %v5034_v36 = vpop.f32.mrb[237].mxu0  ;;  %v5170_v8 = vmul.f32 %v8461_v16, %v4673_v20  ;;  %v5201_v11 = vadd.f32 %v5169_v49, %v5137_v6 }
 0x917   : > { %v8465_v42 = vpop.eup %8464  ;;  %v5204_v43 = vadd.f32 %v5172_v2, %v5140_v13  ;;  %v5035_v41 = vadd.f32 %v5034_v36, %v13266_v32  ;;  %v7473_v35 = vpop.f32.mrb[238].mxu0  ;;  %v4647_v59 = vadd.f32 1.0, %v8463_v24 }
 0x918   : > { %8466 = vtanh.f32 %v5043_v54  ;;  %v5046_v19 = vadd.f32 %v7473_v35, %v13267_v28  ;;  %v5037_v23 = vpop.f32.mrb[239].mxu0  ;;  %v5202_v60 = vadd.f32 %v5170_v8, %v5138_v17  ;;  %v4645_v12 = vadd.f32 1.0, %v8465_v42 }
 0x919   : > { %v5222_v58 = vpack.c.bf16 %v5204_v43, %v5203_v53  ;;  %8468 = vtanh.f32 %v5035_v41  ;;  %v5038_v25 = vadd.f32 %v5037_v23, %v13268_v0  ;;  %v4679_v51 = vmul.f32 0.5, %v4647_v59 }
 0x91a   : > { %8470 = vtanh.f32 %v5046_v19  ;;  %v5221_v48 = vpack.c.bf16 %v5202_v60, %v5201_v11  ;;  %v4677_v37 = vmul.f32 0.5, %v4645_v12 }
 0x91b   : > { %8472 = vtanh.f32 %v5038_v25  ;;  %v5112_v5 = vsub.f32 1.0, %v4679_v51 }
 0x91c   : > { %7554 = vmatprep.mubr.bf16.mxu0 %v5221_v48  ;;  %v5110_v1 = vsub.f32 1.0, %v4677_v37 }
 0x91d   : > { %7555 = vmatmul.mubr.bf16.gmra.mrb[8].mxu0 %v5222_v58  ;;  %v5144_v33 = vmul.f32 %v5112_v5, %v11086_v31 }
 0x91e   : > { %v5142_v21 = vmul.f32 %v5110_v1, %v11088_v18 }
 0x922   : > { %v8467_v46 = vpop.eup %8466 }
 0x923   : > { %v8469_v61 = vpop.eup %8468  ;;  %v5175_v27 = vmul.f32 %v8467_v46, %v4678_v14 }
 0x924   : > { %v8471_v40 = vpop.eup %8470  ;;  %v5173_v29 = vmul.f32 %v8469_v61, %v4676_v44 }
 0x925   : > { %v8473_v20 = vpop.eup %8472  ;;  %v5207_v50 = vadd.f32 %v5175_v27, %v5143_v47  ;;  %v5176_v26 = vmul.f32 %v8471_v40, %v4679_v51 }
 0x926   : > { %v5174_v9 = vmul.f32 %v8473_v20, %v4677_v37  ;;  %v5205_v7 = vadd.f32 %v5173_v29, %v5141_v4 }
 0x927   : > { %v5208_v39 = vadd.f32 %v5176_v26, %v5144_v33 }
 0x928   : > { %v5206_v3 = vadd.f32 %v5174_v9, %v5142_v21 }
 0x929   : > { %v5224_v56 = vpack.c.bf16 %v5208_v39, %v5207_v50 }
 0x92a   : > { %v5223_v55 = vpack.c.bf16 %v5206_v3, %v5205_v7 }
 0x92c   : > { %7558 = vmatprep.mubr.bf16.mxu0 %v5223_v55 }
 0x92d   : > { %7559 = vmatmul.mubr.bf16.gmra.mrb[12].mxu0 %v5224_v56 }
 0x987   : > { %v7532_v31 = vpop.f32.mrb[240].mxu0 }
 0x988   : > { %v11435_v18 = vadd.f32 %v7532_v31, %v11432_v10  ;;  %v5492_v30 = vpop.f32.mrb[241].mxu0 }
 0x989   : > { %v11438_v22 = vadd.f32 %v11432_v10, %v5492_v30  ;;  %v7533_v6 = vpop.f32.mrb[242].mxu0 }
 0x98a   : > { %v11441_v49 = vmul.f32 0.70710677, %v11435_v18  ;;  %v11444_v16 = vadd.f32 %v7533_v6, %v11432_v10  ;;  %v5495_v13 = vpop.f32.mrb[243].mxu0 }
 0x98b   : > { %v11447_v53 = vmul.f32 0.70710677, %v11438_v22  ;;  %v11454_v24 = vadd.f32 %v11432_v10, %v5495_v13 }
 0x98c   : > { %v5788_v2 = vand.u32 2147483647, %v11441_v49  ;;  %v11451_v38 = vmul.f32 0.70710677, %v11444_v16  ;;  %vm5724_vm3 = vcmp.ge.f32.partialorder %v11441_v49, 0.0 }
 0x98d   : > { %v5786_v52 = vand.u32 2147483647, %v11447_v53  ;;  %v11459_v8 = vmul.f32 0.70710677, %v11454_v24  ;;  %vm5722_vm4 = vcmp.ge.f32.partialorder %v11447_v53, 0.0 }
 0x98e   : > { %v5820_v54 = vmul.f32 0.3275911, %v5788_v2  ;;  %v5789_v15 = vand.u32 2147483647, %v11451_v38  ;;  %v6236_v35 = vsub.f32 0.0, %v5788_v2  ;;  %vm5725_vm5 = vcmp.ge.f32.partialorder %v11451_v38, 0.0 }
 0x98f   : > { %v5818_v36 = vmul.f32 0.3275911, %v5786_v52  ;;  %v5787_v45 = vand.u32 2147483647, %v11459_v8  ;;  %v6234_v63 = vsub.f32 0.0, %v5786_v52  ;;  %vm5723_vm6 = vcmp.ge.f32.partialorder %v11459_v8, 0.0 }
 0x990   : > { %v5852_v17 = vadd.f32 1.0, %v5820_v54  ;;  %v5821_v42 = vmul.f32 0.3275911, %v5789_v15  ;;  %v6268_v19 = vmul.f32 %v6236_v35, %v5788_v2  ;;  %v6237_v23 = vsub.f32 0.0, %v5789_v15 }
 0x991   : > { %v5850_v11 = vadd.f32 1.0, %v5818_v36  ;;  %v5819_v32 = vmul.f32 0.3275911, %v5787_v45  ;;  %v6266_v58 = vmul.f32 %v6234_v63, %v5786_v52  ;;  %v6235_v25 = vsub.f32 0.0, %v5787_v45 }
 0x992   : > { %8474 = vrcp.f32 %v5852_v17  ;;  %v5853_v43 = vadd.f32 1.0, %v5821_v42  ;;  %v6302_v14 = vmul.f32 1.442695, %v6268_v19  ;;  %v6269_v51 = vmul.f32 %v6237_v23, %v5789_v15 }
 0x993   : > { %8476 = vrcp.f32 %v5850_v11  ;;  %v5851_v41 = vadd.f32 1.0, %v5819_v32  ;;  %v6298_v62 = vmul.f32 1.442695, %v6266_v58  ;;  %v6267_v1 = vmul.f32 %v6235_v25, %v5787_v45 }
 0x994   : > { %8478 = vrcp.f32 %v5853_v43  ;;  %v6304_v20 = vmul.f32 1.442695, %v6269_v51  ;;  %v8717_v51 = vmov -1.0  }
 0x995   : > { %8480 = vrcp.f32 %v5851_v41  ;;  %v6300_v39 = vmul.f32 1.442695, %v6267_v1  ;;  %v5756_v53 = vsel %vm5724_vm3, 1.0, %v8717_v51 }
 0x996   : > { %8482 = vpow2.f32 %v6302_v14 }
 0x997   : > { %8484 = vpow2.f32 %v6298_v62 }
 0x998   : > { %8486 = vpow2.f32 %v6304_v20 }
 0x999   : > { %8488 = vpow2.f32 %v6300_v39 }
 0x99c   : > { %v8475_v28 = vpop.eup %8474 }
 0x99d   : > { %v8477_v60 = vpop.eup %8476  ;;  %v5948_v59 = vmul.f32 1.0614054, %v8475_v28  ;;  %v7536_v61 = vpop.f32.mrb[244].mxu0 }
 0x99e   : > { %v5946_v0 = vmul.f32 1.0614054, %v8477_v60  ;;  %v11462_v48 = vpop.eup %8478  ;;  %v11469_v4 = vadd.f32 %v7536_v61, %v11432_v10  ;;  %v5508_v33 = vpop.f32.mrb[245].mxu0 }
 0x99f   : > { %v5980_v12 = vadd.f32 -1.4531521, %v5948_v59  ;;  %v5949_v57 = vmul.f32 1.0614054, %v11462_v48  ;;  %v11465_v5 = vpop.eup %8480  ;;  %v7537_v9 = vpop.f32.mrb[246].mxu0  ;;  %v11476_v56 = vadd.f32 %v11432_v10, %v5508_v33 }
 0x9a0   : > { %v5978_v44 = vadd.f32 -1.4531521, %v5946_v0  ;;  %v5947_v40 = vmul.f32 1.0614054, %v11465_v5  ;;  %v11473_v3 = vmul.f32 0.70710677, %v11469_v4  ;;  %v11489_v43 = vadd.f32 %v7537_v9, %v11432_v10  ;;  %v8483_v23 = vpop.eup %8482 }
 0x9a1   : > { %v6012_v37 = vmul.f32 %v8475_v28, %v5980_v12  ;;  %v5981_v27 = vadd.f32 -1.4531521, %v5949_v57  ;;  %v5511_v55 = vpop.f32.mrb[247].mxu0  ;;  %v11485_v17 = vmul.f32 0.70710677, %v11476_v56  ;;  %v8485_v0 = vpop.eup %8484  ;;  %v5754_v57 = vsel %vm5722_vm4, 1.0, %v8717_v51 }
 0x9a2   : > { %v6010_v46 = vmul.f32 %v8477_v60, %v5978_v44  ;;  %v5979_v21 = vadd.f32 -1.4531521, %v5947_v40  ;;  %v11480_v13 = vand.u32 2147483647, %v11473_v3  ;;  %v11499_v44 = vmul.f32 0.70710677, %v11489_v43  ;;  %v8487_v61 = vpop.eup %8486 }
 0x9a3   : > { %v6044_v47 = vadd.f32 1.4214138, %v6012_v37  ;;  %v6013_v26 = vmul.f32 %v11462_v48, %v5981_v27  ;;  %v11495_v58 = vand.u32 2147483647, %v11485_v17  ;;  %v5661_v9 = vmul.f32 0.5, %v11444_v16 }
 0x9a4   : > { %v6042_v29 = vadd.f32 1.4214138, %v6010_v46  ;;  %v6011_v30 = vmul.f32 %v11465_v5, %v5979_v21  ;;  %v5824_v15 = vmul.f32 0.3275911, %v11480_v13  ;;  %v11514_v33 = vand.u32 2147483647, %v11499_v44 }
 0x9a5   : > { %v6076_v50 = vmul.f32 %v8475_v28, %v6044_v47  ;;  %v6045_v31 = vadd.f32 1.4214138, %v6013_v26  ;;  %v5822_v37 = vmul.f32 0.3275911, %v11495_v58  ;;  %v8489_v26 = vpop.eup %8488  ;;  %vm5728_vm8 = vcmp.ge.f32.partialorder %v11473_v3, 0.0 }
 0x9a6   : > { %v6074_v7 = vmul.f32 %v8477_v60, %v6042_v29  ;;  %v6043_v54 = vadd.f32 1.4214138, %v6011_v30  ;;  %v5856_v41 = vadd.f32 1.0, %v5824_v15  ;;  %v5757_v30 = vsel %vm5725_vm5, 1.0, %v8717_v51 }
 0x9a7   : > { %v6108_v34 = vadd.f32 -0.28449672, %v6076_v50  ;;  %v6077_v52 = vmul.f32 %v11462_v48, %v6045_v31  ;;  %v5854_v27 = vadd.f32 1.0, %v5822_v37  ;;  %v5755_v15 = vsel %vm5723_vm6, 1.0, %v8717_v51 }
 0x9a8   : > { %v6106_v6 = vadd.f32 -0.28449672, %v6074_v7  ;;  %v6075_v45 = vmul.f32 %v11465_v5, %v6043_v54  ;;  %8490 = vrcp.f32 %v5856_v41  ;;  %vm5726_vm9 = vcmp.ge.f32.partialorder %v11485_v17, 0.0 }
 0x9a9   : > { %v6140_v2 = vmul.f32 %v8475_v28, %v6108_v34  ;;  %v6109_v42 = vadd.f32 -0.28449672, %v6077_v52  ;;  %8492 = vrcp.f32 %v5854_v27  ;;  %v5825_v34 = vmul.f32 0.3275911, %v11514_v33 }
 0x9aa   : > { %v6138_v36 = vmul.f32 %v8477_v60, %v6106_v6  ;;  %v6107_v19 = vadd.f32 -0.28449672, %v6075_v45  ;;  %v11568_v27 = vmul.f32 0.5, %v11476_v56  ;;  %vm5729_vm10 = vcmp.ge.f32.partialorder %v11499_v44, 0.0 }
 0x9ab   : > { %v6172_v11 = vadd.f32 0.2548296, %v6140_v2  ;;  %v6141_v63 = vmul.f32 %v11462_v48, %v6109_v42  ;;  %v5659_v2 = vmul.f32 0.5, %v11454_v24  ;;  %v5857_v52 = vadd.f32 1.0, %v5825_v34 }
 0x9ac   : > { %v6170_v32 = vadd.f32 0.2548296, %v6138_v36  ;;  %v6139_v14 = vmul.f32 %v11465_v5, %v6107_v19  ;;  %v11539_v24 = vmul.f32 0.5, %v11469_v4 }
 0x9ad   : > { %v6204_v35 = vmul.f32 %v8475_v28, %v6172_v11  ;;  %v6173_v12 = vadd.f32 0.2548296, %v6141_v63  ;;  %v5660_v28 = vmul.f32 0.5, %v11435_v18  ;;  %v11510_v18 = vadd.f32 %v11432_v10, %v5511_v55 }
 0x9ae   : > { %v6202_v59 = vmul.f32 %v8477_v60, %v6170_v32  ;;  %v6171_v1 = vadd.f32 0.2548296, %v6139_v14  ;;  %v7540_v40 = vpop.f32.mrb[248].mxu0  ;;  %v6238_v11 = vsub.f32 0.0, %v11495_v58  ;;  %8494 = vrcp.f32 %v5857_v52 }
 0x9af   : > { %v6364_v25 = vmul.f32 %v8483_v23, %v6204_v35  ;;  %v6205_v46 = vmul.f32 %v11462_v48, %v6173_v12  ;;  %v5524_v50 = vpop.f32.mrb[249].mxu0  ;;  %v5658_v48 = vmul.f32 0.5, %v11438_v22  ;;  %v6240_v22 = vsub.f32 0.0, %v11480_v13 }
 0x9b0   : > { %v6362_v60 = vmul.f32 %v8485_v0, %v6202_v59  ;;  %v6203_v20 = vmul.f32 %v11465_v5, %v6171_v1  ;;  %v7541_v7 = vpop.f32.mrb[250].mxu0  ;;  %v11527_v6 = vmul.f32 0.70710677, %v11510_v18  ;;  %v11544_v0 = vadd.f32 %v7540_v40, %v11432_v10 }
 0x9b1   : > { %v6396_v62 = vsub.f32 1.0, %v6364_v25  ;;  %v6365_v29 = vmul.f32 %v8487_v61, %v6205_v46  ;;  %v11520_v31 = vpop.f32.mrb[251].mxu0  ;;  %v6272_v35 = vmul.f32 %v6240_v22, %v11480_v13  ;;  %v6270_v25 = vmul.f32 %v6238_v11, %v11495_v58 }
 0x9b2   : > { %v6394_v47 = vsub.f32 1.0, %v6362_v60  ;;  %v6363_v55 = vmul.f32 %v8489_v26, %v6203_v20  ;;  %v11530_v54 = vpop.eup %8490  ;;  %v11535_v38 = vand.u32 2147483647, %v11527_v6  ;;  %v11549_v14 = vadd.f32 %v11432_v10, %v5524_v50 }
 0x9b3   : > { %v6428_v49 = vmul.f32 %v6396_v62, %v5756_v53  ;;  %v6397_v39 = vsub.f32 1.0, %v6365_v29  ;;  %v5952_v32 = vmul.f32 1.0614054, %v11530_v54  ;;  %v11552_v60 = vpop.eup %8492  ;;  %v6310_v37 = vmul.f32 1.442695, %v6272_v35 }
 0x9b4   : > { %v6426_v21 = vmul.f32 %v6394_v47, %v5754_v57  ;;  %v6395_v8 = vsub.f32 1.0, %v6363_v55  ;;  %v5823_v63 = vmul.f32 0.3275911, %v11535_v38  ;;  %v6241_v62 = vsub.f32 0.0, %v11514_v33 }
 0x9b5   : > { %v6460_v5 = vadd.f32 1.0, %v6428_v49  ;;  %v6429_v16 = vmul.f32 %v6397_v39, %v5757_v30  ;;  %v5984_v59 = vadd.f32 -1.4531521, %v5952_v32  ;;  %v11556_v57 = vmul.f32 0.70710677, %v11544_v0 }
 0x9b6   : > { %v6458_v36 = vadd.f32 1.0, %v6426_v21  ;;  %v6427_v45 = vmul.f32 %v6395_v8, %v5755_v15  ;;  %v5855_v12 = vadd.f32 1.0, %v5823_v63  ;;  %v5950_v1 = vmul.f32 1.0614054, %v11552_v60 }
 0x9b7   : > { %v6461_v42 = vadd.f32 1.0, %v6429_v16  ;;  %v6492_v41 = vmul.f32 %v6460_v5, %v5660_v28  ;;  %v6016_v13 = vmul.f32 %v11530_v54, %v5984_v59  ;;  %v11560_v61 = vmul.f32 0.70710677, %v11549_v14 }
 0x9b8   : > { %v6459_v23 = vadd.f32 1.0, %v6427_v45  ;;  %v6490_v4 = vmul.f32 %v6458_v36, %v5658_v48  ;;  %8496 = vrcp.f32 %v5855_v12  ;;  %v11565_v47 = vsel %vm5728_vm8, 1.0, %v8717_v51  ;;  %v11582_v21 = vpop.eup %8494 }
 0x9b9   : > { %v6493_v19 = vmul.f32 %v6461_v42, %v5661_v9  ;;  %v6048_v58 = vadd.f32 1.4214138, %v6016_v13  ;;  %v5796_v40 = vand.u32 2147483647, %v11556_v57  ;;  %v11572_v49 = vadd.f32 %v7541_v7, %v11432_v10 }
 0x9ba   : > { %v6491_v53 = vmul.f32 %v6459_v23, %v5659_v2  ;;  %v5982_v20 = vadd.f32 -1.4531521, %v5950_v1  ;;  %v6306_v50 = vmul.f32 1.442695, %v6270_v25  ;;  %v11576_v26 = vmul.f32 0.5, %v11489_v43 }
 0x9bb   : > { %v6523_v28 = vpack.c.bf16 %v6493_v19, %v6492_v41  ;;  %v6080_v29 = vmul.f32 %v11530_v54, %v6048_v58  ;;  %8498 = vpow2.f32 %v6310_v37  ;;  %v6273_v3 = vmul.f32 %v6241_v62, %v11514_v33 }
 0x9bc   : > { %v6522_v46 = vpack.c.bf16 %v6491_v53, %v6490_v4  ;;  %v5828_v48 = vmul.f32 0.3275911, %v5796_v40  ;;  %v5794_v56 = vand.u32 2147483647, %v11560_v61  ;;  %v6014_v7 = vmul.f32 %v11552_v60, %v5982_v20 }
 0x9bd   : > { %v6112_v9 = vadd.f32 -0.28449672, %v6080_v29  ;;  %v6239_v39 = vsub.f32 0.0, %v11535_v38  ;;  %v11587_v43 = vmul.f32 0.70710677, %v11572_v49  ;;  %8500 = vpow2.f32 %v6306_v50 }
 0x9be   : > { %7566 = vmatprep.mubr.msk.bf16.mxu1 %vm6557_vm7, %v6522_v46  ;;  %v5953_v34 = vmul.f32 1.0614054, %v11582_v21  ;;  %v5860_v5 = vadd.f32 1.0, %v5828_v48  ;;  %v5826_v33 = vmul.f32 0.3275911, %v5794_v56  ;;  %v6244_v35 = vsub.f32 0.0, %v5796_v40 }
 0x9bf   : > { %7567 = vmatmul.mubr.msk.bf16.vlgmr.msra.gmra.mrb[16].mxu1 %vm6557_vm7, %v6523_v28  ;;  %v6144_v22 = vmul.f32 %v11530_v54, %v6112_v9  ;;  %v6046_v16 = vadd.f32 1.4214138, %v6014_v7  ;;  %v6312_v42 = vmul.f32 1.442695, %v6273_v3  ;;  %v6271_v45 = vmul.f32 %v6239_v39, %v11535_v38 }
 0x9c0   : > { %v7544_v55 = vpop.f32.mrb[252].mxu0  ;;  %v5985_v8 = vadd.f32 -1.4531521, %v5953_v34  ;;  %8502 = vrcp.f32 %v5860_v5  ;;  %v5858_v52 = vadd.f32 1.0, %v5826_v33  ;;  %v6242_v63 = vsub.f32 0.0, %v5794_v56 }
 0x9c1   : > { %v11590_v30 = vpop.f32.mrb[253].mxu0  ;;  %v6176_v15 = vadd.f32 0.2548296, %v6144_v22  ;;  %v6078_v11 = vmul.f32 %v11552_v60, %v6046_v16  ;;  %v5797_v19 = vand.u32 2147483647, %v11587_v43  ;;  %v11610_v12 = vsel %vm5726_vm9, 1.0, %v8717_v51 }
 0x9c2   : > { %v11594_v2 = vpop.f32.mrb[254].mxu0  ;;  %v11601_v32 = vpop.eup %8496  ;;  %v6017_v41 = vmul.f32 %v11582_v21, %v5985_v8  ;;  %8504 = vrcp.f32 %v5858_v52  ;;  %v11614_v28 = vadd.f32 %v11432_v10, %v11520_v31  ;;  %v11620_v62 = vsel %vm5729_vm10, 1.0, %v8717_v51 }
 0x9c3   : > { %v11597_v36 = vpop.f32.mrb[255].mxu0  ;;  %v6208_v23 = vmul.f32 %v11530_v54, %v6176_v15  ;;  %v6110_v59 = vadd.f32 -0.28449672, %v6078_v11  ;;  %v5951_v25 = vmul.f32 1.0614054, %v11601_v32  ;;  %8506 = vpow2.f32 %v6312_v42 }
 0x9c4   : > { %v6049_v38 = vadd.f32 1.4214138, %v6017_v41  ;;  %v5829_v4 = vmul.f32 0.3275911, %v5797_v19  ;;  %v6308_v54 = vmul.f32 1.442695, %v6271_v45  ;;  %v6276_v46 = vmul.f32 %v6244_v35, %v5796_v40 }
 0x9c5   : > { %v6142_v53 = vmul.f32 %v11552_v60, %v6110_v59  ;;  %v5983_v13 = vadd.f32 -1.4531521, %v5951_v25  ;;  %v8499_v37 = vpop.eup %8498  ;;  %v6274_v20 = vmul.f32 %v6242_v63, %v5794_v56  ;;  %vm5727_vm11 = vcmp.ge.f32.partialorder %v11527_v6, 0.0 }
 0x9c6   : > { %v6081_v17 = vmul.f32 %v11582_v21, %v6049_v38  ;;  %v5861_v58 = vadd.f32 1.0, %v5829_v4  ;;  %v6368_v1 = vmul.f32 %v8499_v37, %v6208_v23  ;;  %v11626_v3 = vmul.f32 0.70710677, %v11614_v28 }
 0x9c7   : > { %v6174_v29 = vadd.f32 0.2548296, %v6142_v53  ;;  %v6015_v31 = vmul.f32 %v11601_v32, %v5983_v13  ;;  %v8501_v48 = vpop.eup %8500  ;;  %v6245_v7 = vsub.f32 0.0, %v5797_v19  ;;  %v6318_v34 = vmul.f32 1.442695, %v6276_v46 }
 0x9c8   : > { %v6113_v50 = vadd.f32 -0.28449672, %v6081_v17  ;;  %8508 = vrcp.f32 %v5861_v58  ;;  %v5795_v56 = vand.u32 2147483647, %v11626_v3  ;;  %v11634_v5 = vadd.f32 %v7544_v55, %v11432_v10 }
 0x9c9   : > { %v6206_v44 = vmul.f32 %v11552_v60, %v6174_v29  ;;  %v6047_v9 = vadd.f32 1.4214138, %v6015_v31  ;;  %8510 = vpow2.f32 %v6308_v54  ;;  %v6400_v33 = vsub.f32 1.0, %v6368_v1 }
 0x9ca   : > { %v11629_v40 = vpop.eup %8502  ;;  %v6145_v39 = vmul.f32 %v11582_v21, %v6113_v50  ;;  %v6314_v8 = vmul.f32 1.442695, %v6274_v20  ;;  %v11639_v15 = vmul.f32 0.5, %v11510_v18  ;;  %v5827_v11 = vmul.f32 0.3275911, %v5795_v56 }
 0x9cb   : > { %v6079_v22 = vmul.f32 %v11601_v32, %v6047_v9  ;;  %v5956_v16 = vmul.f32 1.0614054, %v11629_v40  ;;  %v6366_v60 = vmul.f32 %v8501_v48, %v6206_v44  ;;  %v5759_v55 = vsel %vm5727_vm11, 1.0, %v8717_v51 }
 0x9cc   : > { %v6177_v52 = vadd.f32 0.2548296, %v6145_v39  ;;  %v11643_v45 = vpop.eup %8504  ;;  %v6277_v63 = vmul.f32 %v6245_v7, %v5797_v19  ;;  %v5859_v18 = vadd.f32 1.0, %v5827_v11  ;;  %v11653_v38 = vmul.f32 0.70710677, %v11634_v5 }
 0x9cd   : > { %v6111_v41 = vadd.f32 -0.28449672, %v6079_v22  ;;  %v5988_v35 = vadd.f32 -1.4531521, %v5956_v16  ;;  %v5954_v25 = vmul.f32 1.0614054, %v11643_v45  ;;  %v8507_v53 = vpop.eup %8506  ;;  %v6432_v13 = vmul.f32 %v6400_v33, %v11565_v47 }
 0x9ce   : > { %v6209_v59 = vmul.f32 %v11582_v21, %v6177_v52  ;;  %8512 = vpow2.f32 %v6318_v34  ;;  %v6398_v37 = vsub.f32 1.0, %v6366_v60  ;;  %v6243_v1 = vsub.f32 0.0, %v5795_v56 }
 0x9cf   : > { %v6143_v6 = vmul.f32 %v11601_v32, %v6111_v41  ;;  %v6020_v54 = vmul.f32 %v11629_v40, %v5988_v35  ;;  %v5986_v17 = vadd.f32 -1.4531521, %v5954_v25  ;;  %8514 = vrcp.f32 %v5859_v18 }
 0x9d0   : > { %v11641_v42 = vpop.f32.mrb[0].mxu0  ;;  %v6369_v21 = vmul.f32 %v8507_v53, %v6209_v59  ;;  %8516 = vpow2.f32 %v6314_v8  ;;  %v6320_v20 = vmul.f32 1.442695, %v6277_v63  ;;  %v11666_v50 = vand.u32 2147483647, %v11653_v38 }
 0x9d1   : > { %v11648_v23 = vpop.f32.mrb[1].mxu0  ;;  %v6175_v46 = vadd.f32 0.2548296, %v6143_v6  ;;  %v6052_v58 = vadd.f32 1.4214138, %v6020_v54  ;;  %v6018_v47 = vmul.f32 %v11643_v45, %v5986_v17  ;;  %v6464_v44 = vadd.f32 1.0, %v6432_v13 }
 0x9d2   : > { %v11655_v4 = vpop.f32.mrb[2].mxu0  ;;  %v11662_v29 = vpop.eup %8508  ;;  %v6401_v31 = vsub.f32 1.0, %v6369_v21  ;;  %v6430_v34 = vmul.f32 %v6398_v37, %v11610_v12  ;;  %v5832_v16 = vmul.f32 0.3275911, %v11666_v50  ;;  %v6275_v11 = vmul.f32 %v6243_v1, %v5795_v56 }
 0x9d3   : > { %v11660_v19 = vpop.f32.mrb[3].mxu0  ;;  %v8511_v48 = vpop.eup %8510  ;;  %v6207_v9 = vmul.f32 %v11601_v32, %v6175_v46  ;;  %v6084_v7 = vmul.f32 %v11629_v40, %v6052_v58  ;;  %v5957_v39 = vmul.f32 1.0614054, %v11662_v29  ;;  %v6050_v22 = vadd.f32 1.4214138, %v6018_v47 }
 0x9d4   : > { %v6433_v33 = vmul.f32 %v6401_v31, %v11620_v62  ;;  %v5864_v63 = vadd.f32 1.0, %v5832_v16  ;;  %v11677_v32 = vadd.f32 %v11432_v10, %v11590_v30  ;;  %v6496_v59 = vmul.f32 %v6464_v44, %v11539_v24 }
 0x9d5   : > { %v6367_v8 = vmul.f32 %v8511_v48, %v6207_v9  ;;  %v6116_v60 = vadd.f32 -0.28449672, %v6084_v7  ;;  %v5989_v52 = vadd.f32 -1.4531521, %v5957_v39  ;;  %v6082_v35 = vmul.f32 %v11643_v45, %v6050_v22 }
 0x9d6   : > { %v6465_v41 = vadd.f32 1.0, %v6433_v33  ;;  %v6462_v18 = vadd.f32 1.0, %v6430_v34  ;;  %8518 = vrcp.f32 %v5864_v63  ;;  %v6316_v17 = vmul.f32 1.442695, %v6275_v11 }
 0x9d7   : > { %v6399_v12 = vsub.f32 1.0, %v6367_v8  ;;  %v6148_v62 = vmul.f32 %v11629_v40, %v6116_v60  ;;  %v6021_v25 = vmul.f32 %v11662_v29, %v5989_v52  ;;  %v6114_v13 = vadd.f32 -0.28449672, %v6082_v35 }
 0x9d8   : > { %v6497_v53 = vmul.f32 %v6465_v41, %v11576_v26  ;;  %v8513_v56 = vpop.eup %8512  ;;  %8520 = vpow2.f32 %v6320_v20  ;;  %v11687_v46 = vmul.f32 0.70710677, %v11677_v32  ;;  %v6494_v47 = vmul.f32 %v6462_v18, %v11568_v27 }
 0x9d9   : > { %v6431_v6 = vmul.f32 %v6399_v12, %v5759_v55  ;;  %v6180_v54 = vadd.f32 0.2548296, %v6148_v62  ;;  %v6053_v37 = vadd.f32 1.4214138, %v6021_v25  ;;  %v11683_v21 = vpop.eup %8514  ;;  %v6146_v24 = vmul.f32 %v11643_v45, %v6114_v13 }
 0x9da   : > { %v6525_v30 = vpack.c.bf16 %v6497_v53, %v6496_v59  ;;  %v8517_v58 = vpop.eup %8516  ;;  %v5955_v55 = vmul.f32 1.0614054, %v11683_v21  ;;  %v11694_v48 = vand.u32 2147483647, %v11687_v46  ;;  %v11698_v44 = vadd.f32 %v11594_v2, %v11432_v10 }
 0x9db   : > { %v6463_v1 = vadd.f32 1.0, %v6431_v6  ;;  %v6212_v26 = vmul.f32 %v11629_v40, %v6180_v54  ;;  %v6085_v31 = vmul.f32 %v11662_v29, %v6053_v37  ;;  %v6178_v20 = vadd.f32 0.2548296, %v6146_v24 }
 0x9dc   : > { %v5987_v34 = vadd.f32 -1.4531521, %v5955_v55  ;;  %v5830_v22 = vmul.f32 0.3275911, %v11694_v48  ;;  %vm5732_vm12 = vcmp.ge.f32.partialorder %v11556_v57, 0.0  ;;  %8522 = vpow2.f32 %v6316_v17 }
 0x9dd   : > { %v6495_v7 = vmul.f32 %v6463_v1, %v11639_v15  ;;  %v6372_v39 = vmul.f32 %v8513_v56, %v6212_v26  ;;  %v6117_v40 = vadd.f32 -0.28449672, %v6085_v31  ;;  %v5668_v15 = vmul.f32 0.5, %v11544_v0 }
 0x9de   : > { %v6019_v2 = vmul.f32 %v11683_v21, %v5987_v34  ;;  %v6210_v11 = vmul.f32 %v11643_v45, %v6178_v20  ;;  %v5862_v41 = vadd.f32 1.0, %v5830_v22  ;;  %v11716_v59 = vmul.f32 0.70710677, %v11698_v44 }
 0x9df   : > { %v6524_v16 = vpack.c.bf16 %v6495_v7, %v6494_v47  ;;  %v6149_v8 = vmul.f32 %v11662_v29, %v6117_v40  ;;  %v6404_v52 = vsub.f32 1.0, %v6372_v39  ;;  %v5764_v12 = vsel %vm5732_vm12, 1.0, %v8717_v51 }
 0x9e0   : > { %v11700_v9 = vpop.f32.mrb[4].mxu0  ;;  %v6051_v63 = vadd.f32 1.4214138, %v6019_v2  ;;  %v11719_v57 = vpop.eup %8518  ;;  %vm5730_vm13 = vcmp.ge.f32.partialorder %v11560_v61, 0.0  ;;  %v6248_v0 = vsub.f32 0.0, %v11666_v50  ;;  %8524 = vrcp.f32 %v5862_v41 }
 0x9e1   : > { %v11703_v33 = vpop.f32.mrb[5].mxu0  ;;  %v6181_v35 = vadd.f32 0.2548296, %v6149_v8  ;;  %7570 = vmatprep.mubr.msk.bf16.mxu1 %vm6557_vm7, %v6524_v16  ;;  %vm5733_vm14 = vcmp.ge.f32.partialorder %v11587_v43, 0.0  ;;  %v5960_v18 = vmul.f32 1.0614054, %v11719_v57  ;;  %v6436_v53 = vmul.f32 %v6404_v52, %v5764_v12 }
 0x9e2   : > { %v11706_v27 = vpop.f32.mrb[6].mxu0  ;;  %7571 = vmatmul.mubr.msk.bf16.gmra.mrb[20].mxu1 %vm6557_vm7, %v6525_v30  ;;  %v8521_v45 = vpop.eup %8520  ;;  %v6083_v25 = vmul.f32 %v11683_v21, %v6051_v63  ;;  %v6370_v13 = vmul.f32 %v8517_v58, %v6210_v11  ;;  %v5801_v56 = vand.u32 2147483647, %v11716_v59  ;;  %v11732_v61 = vadd.f32 %v11432_v10, %v11597_v36 }
 0x9e3   : > { %v11711_v60 = vpop.f32.mrb[7].mxu0  ;;  %v6213_v62 = vmul.f32 %v11662_v29, %v6181_v35  ;;  %v5762_v6 = vsel %vm5730_vm13, 1.0, %v8717_v51  ;;  %v5992_v30 = vadd.f32 -1.4531521, %v5960_v18  ;;  %v5669_v24 = vmul.f32 0.5, %v11572_v49 }
 0x9e4   : > { %v6115_v37 = vadd.f32 -0.28449672, %v6083_v25  ;;  %vm5731_vm15 = vcmp.ge.f32.partialorder %v11626_v3, 0.0  ;;  %v6280_v29 = vmul.f32 %v6248_v0, %v11666_v50  ;;  %v5833_v17 = vmul.f32 0.3275911, %v5801_v56 }
 0x9e5   : > { %v6373_v54 = vmul.f32 %v8521_v45, %v6213_v62  ;;  %v5765_v58 = vsel %vm5733_vm14, 1.0, %v8717_v51  ;;  %v6024_v26 = vmul.f32 %v11719_v57, %v5992_v30  ;;  %v6468_v31 = vadd.f32 1.0, %v6436_v53 }
 0x9e6   : > { %v6147_v36 = vmul.f32 %v11683_v21, %v6115_v37  ;;  %v6402_v55 = vsub.f32 1.0, %v6370_v13  ;;  %v5865_v47 = vadd.f32 1.0, %v5833_v17  ;;  %v11744_v20 = vmul.f32 0.70710677, %v11732_v61  ;;  %v8523_v34 = vpop.eup %8522 }
 0x9e7   : > { %v6405_v1 = vsub.f32 1.0, %v6373_v54  ;;  %v5763_v3 = vsel %vm5731_vm15, 1.0, %v8717_v51  ;;  %v6056_v7 = vadd.f32 1.4214138, %v6024_v26  ;;  %v6326_v39 = vmul.f32 1.442695, %v6280_v29 }
 0x9e8   : > { %v6179_v50 = vadd.f32 0.2548296, %v6147_v36  ;;  %8526 = vrcp.f32 %v5865_v47  ;;  %v11748_v43 = vand.u32 2147483647, %v11744_v20  ;;  %v11752_v40 = vadd.f32 %v11641_v42, %v11432_v10 }
 0x9e9   : > { %v6437_v49 = vmul.f32 %v6405_v1, %v5765_v58  ;;  %v6088_v8 = vmul.f32 %v11719_v57, %v6056_v7  ;;  %v6246_v2 = vsub.f32 0.0, %v11694_v48  ;;  %v11759_v11 = vmul.f32 %v6468_v31, %v5668_v15 }
 0x9ea   : > { %v6211_v16 = vmul.f32 %v11683_v21, %v6179_v50  ;;  %v11757_v52 = vpop.eup %8524  ;;  %v6434_v41 = vmul.f32 %v6402_v55, %v5762_v6  ;;  %v6249_v35 = vsub.f32 0.0, %v5801_v56  ;;  %v5831_v63 = vmul.f32 0.3275911, %v11748_v43 }
 0x9eb   : > { %v6469_v22 = vadd.f32 1.0, %v6437_v49  ;;  %v6120_v45 = vadd.f32 -0.28449672, %v6088_v8  ;;  %v5958_v21 = vmul.f32 1.0614054, %v11757_v52  ;;  %8528 = vpow2.f32 %v6326_v39 }
 0x9ec   : > { %v6371_v0 = vmul.f32 %v8523_v34, %v6211_v16  ;;  %v5863_v25 = vadd.f32 1.0, %v5831_v63  ;;  %v11770_v18 = vmul.f32 0.70710677, %v11752_v40  ;;  %v11774_v15 = vadd.f32 %v11432_v10, %v11648_v23 }
 0x9ed   : > { %v11764_v42 = vmul.f32 %v6469_v22, %v5669_v24  ;;  %v6152_v54 = vmul.f32 %v11719_v57, %v6120_v45  ;;  %v5990_v37 = vadd.f32 -1.4531521, %v5958_v21  ;;  %v6466_v24 = vadd.f32 1.0, %v6434_v41 }
 0x9ee   : > { %v6403_v6 = vsub.f32 1.0, %v6371_v0  ;;  %v6278_v29 = vmul.f32 %v6246_v2, %v11694_v48  ;;  %8530 = vrcp.f32 %v5863_v25  ;;  %v11785_v17 = vand.u32 2147483647, %v11770_v18 }
 0x9ef   : > { %v6527_v13 = vpack.c.bf16 %v11764_v42, %v11759_v11  ;;  %v5666_v23 = vmul.f32 0.5, %v11549_v14  ;;  %v6022_v1 = vmul.f32 %v11757_v52, %v5990_v37  ;;  %v6281_v36 = vmul.f32 %v6249_v35, %v5801_v56 }
 0x9f0   : > { %v11762_v12 = vpop.f32.mrb[8].mxu0  ;;  %v6435_v58 = vmul.f32 %v6403_v6, %v5763_v3  ;;  %v5667_v26 = vmul.f32 0.5, %v11614_v28  ;;  %v11791_v31 = vmul.f32 0.5, %v11634_v5  ;;  %v6184_v55 = vadd.f32 0.2548296, %v6152_v54 }
 0x9f1   : > { %v11767_v62 = vpop.f32.mrb[9].mxu0  ;;  %v5836_v47 = vmul.f32 0.3275911, %v11785_v17  ;;  %vm5736_vm0 = vcmp.ge.f32.partialorder %v11653_v38, 0.0  ;;  %v6054_v48 = vadd.f32 1.4214138, %v6022_v1  ;;  %v6498_v3 = vmul.f32 %v6466_v24, %v5666_v23 }
 0x9f2   : > { %v11776_v53 = vpop.f32.mrb[10].mxu0  ;;  %v6467_v49 = vadd.f32 1.0, %v6435_v58  ;;  %v11796_v50 = vmul.f32 0.70710677, %v11774_v15  ;;  %v11798_v14 = vpop.eup %8526  ;;  %vm5734_vm2 = vcmp.ge.f32.partialorder %v11687_v46, 0.0  ;;  %v6247_v22 = vsub.f32 0.0, %v11748_v43 }
 0x9f3   : > { %v11781_v30 = vpop.f32.mrb[11].mxu0  ;;  %v6322_v56 = vmul.f32 1.442695, %v6278_v29  ;;  %v5868_v28 = vadd.f32 1.0, %v5836_v47  ;;  %v6086_v5 = vmul.f32 %v11757_v52, %v6054_v48  ;;  %v5961_v39 = vmul.f32 1.0614054, %v11798_v14 }
 0x9f4   : > { %v6499_v7 = vmul.f32 %v6467_v49, %v5667_v26  ;;  %v6328_v34 = vmul.f32 1.442695, %v6281_v36  ;;  %v11805_v16 = vand.u32 2147483647, %v11796_v50  ;;  %v11809_v8 = vadd.f32 %v11655_v4, %v11432_v10 }
 0x9f5   : > { %8532 = vrcp.f32 %v5868_v28  ;;  %v6216_v11 = vmul.f32 %v11719_v57, %v6184_v55  ;;  %v6118_v41 = vadd.f32 -0.28449672, %v6086_v5  ;;  %v5993_v35 = vadd.f32 -1.4531521, %v5961_v39  ;;  %v8529_v63 = vpop.eup %8528 }
 0x9f6   : > { %v6526_v2 = vpack.c.bf16 %v6499_v7, %v6498_v3  ;;  %v5768_v42 = vsel %vm5736_vm0, 1.0, %v8717_v51  ;;  %v11816_v0 = vmul.f32 0.5, %v11677_v32  ;;  %v11821_v45 = vsel %vm5734_vm2, 1.0, %v8717_v51 }
 0x9f7   : > { %v5834_v4 = vmul.f32 0.3275911, %v11805_v16  ;;  %v6150_v21 = vmul.f32 %v11757_v52, %v6118_v41  ;;  %v11826_v57 = vmul.f32 0.5, %v11698_v44  ;;  %vm5737_vm3 = vcmp.ge.f32.partialorder %v11716_v59, 0.0 }
 0x9f8   : > { %v6025_v38 = vmul.f32 %v11798_v14, %v5993_v35  ;;  %7574 = vmatprep.mubr.msk.bf16.mxu1 %vm6557_vm7, %v6526_v2  ;;  %v11831_v32 = vpop.eup %8530  ;;  %8534 = vpow2.f32 %v6322_v56  ;;  %v11834_v46 = vmul.f32 0.70710677, %v11809_v8  ;;  %v11838_v6 = vadd.f32 %v11432_v10, %v11660_v19 }
 0x9f9   : > { %v5866_v25 = vadd.f32 1.0, %v5834_v4  ;;  %7575 = vmatmul.mubr.msk.bf16.gmra.mrb[24].mxu1 %vm6557_vm7, %v6527_v13  ;;  %v6376_v44 = vmul.f32 %v8529_v63, %v6216_v11  ;;  %8536 = vpow2.f32 %v6328_v34  ;;  %v6279_v59 = vmul.f32 %v6247_v22, %v11748_v43 }
 0x9fa   : > { %v6057_v54 = vadd.f32 1.4214138, %v6025_v38  ;;  %v11843_v37 = vsel %vm5737_vm3, 1.0, %v8717_v51  ;;  %v11846_v24 = vmul.f32 0.5, %v11732_v61  ;;  %v5959_v29 = vmul.f32 1.0614054, %v11831_v32 }
 0x9fb   : > { %8538 = vrcp.f32 %v5866_v25  ;;  %v6182_v19 = vadd.f32 0.2548296, %v6150_v21  ;;  %vm5735_vm4 = vcmp.ge.f32.partialorder %v11744_v20, 0.0  ;;  %v6252_v13 = vsub.f32 0.0, %v11785_v17 }
 0x9fc   : > { %v6089_v58 = vmul.f32 %v11798_v14, %v6057_v54  ;;  %v5991_v43 = vadd.f32 -1.4531521, %v5959_v29  ;;  %v11857_v36 = vand.u32 2147483647, %v11834_v46  ;;  %v11860_v61 = vmul.f32 0.70710677, %v11838_v6 }
 0x9fd   : > { %v6408_v26 = vsub.f32 1.0, %v6376_v44  ;;  %v6324_v47 = vmul.f32 1.442695, %v6279_v59  ;;  %v11867_v20 = vsel %vm5735_vm4, 1.0, %v8717_v51  ;;  %v11873_v28 = vadd.f32 %v11700_v9, %v11432_v10 }
 0x9fe   : > { %v6121_v55 = vadd.f32 -0.28449672, %v6089_v58  ;;  %v6023_v3 = vmul.f32 %v11831_v32, %v5991_v43  ;;  %v5837_v56 = vmul.f32 0.3275911, %v11857_v36  ;;  %v6214_v5 = vmul.f32 %v11757_v52, %v6182_v19 }
 0x9ff   : > { %v11864_v48 = vpop.eup %8532  ;;  %v6284_v22 = vmul.f32 %v6252_v13, %v11785_v17  ;;  %v6250_v11 = vsub.f32 0.0, %v11805_v16  ;;  %v11883_v35 = vand.u32 2147483647, %v11860_v61  ;;  %v6440_v63 = vmul.f32 %v6408_v26, %v5768_v42 }
 0xa00   : > { %v11849_v23 = vpop.f32.mrb[12].mxu0  ;;  %v6153_v39 = vmul.f32 %v11798_v14, %v6121_v55  ;;  %v5964_v34 = vmul.f32 1.0614054, %v11864_v48  ;;  %v6055_v2 = vadd.f32 1.4214138, %v6023_v3  ;;  %v5869_v41 = vadd.f32 1.0, %v5837_v56 }
 0xa01   : > { %v11854_v1 = vpop.f32.mrb[13].mxu0  ;;  %8540 = vpow2.f32 %v6324_v47  ;;  %v5835_v21 = vmul.f32 0.3275911, %v11883_v35  ;;  %v11888_v38 = vmul.f32 0.70710677, %v11873_v28  ;;  %v11892_v54 = vmul.f32 0.5, %v11752_v40 }
 0xa02   : > { %v11862_v49 = vpop.f32.mrb[14].mxu0  ;;  %v6185_v10 = vadd.f32 0.2548296, %v6153_v39  ;;  %v5996_v9 = vadd.f32 -1.4531521, %v5964_v34  ;;  %v8535_v4 = vpop.eup %8534  ;;  %v6087_v52 = vmul.f32 %v11831_v32, %v6055_v2  ;;  %8542 = vrcp.f32 %v5869_v41 }
 0xa03   : > { %v11875_v7 = vpop.f32.mrb[15].mxu0  ;;  %v8537_v17 = vpop.eup %8536  ;;  %v6374_v25 = vmul.f32 %v8535_v4, %v6214_v5  ;;  %v6334_v19 = vmul.f32 1.442695, %v6284_v22  ;;  %v6282_v58 = vmul.f32 %v6250_v11, %v11805_v16  ;;  %v5867_v13 = vadd.f32 1.0, %v5835_v21  ;;  %v11909_v2 = vld [vmem:[%s12360_s10] ss:$0 sm:$0xff] }
 0xa04   : > { %v6217_v44 = vmul.f32 %v11798_v14, %v6185_v10  ;;  %v6028_v42 = vmul.f32 %v11864_v48, %v5996_v9  ;;  %v6119_v29 = vadd.f32 -0.28449672, %v6087_v52  ;;  %v6472_v43 = vadd.f32 1.0, %v6440_v63 }
 0xa05   : > { %v11895_v59 = vpop.eup %8538  ;;  %v6253_v14 = vsub.f32 0.0, %v11857_v36  ;;  %8544 = vrcp.f32 %v5867_v13  ;;  %v11902_v40 = vand.u32 2147483647, %v11888_v38  ;;  %v6406_v56 = vsub.f32 1.0, %v6374_v25 }
 0xa06   : > { %v6377_v26 = vmul.f32 %v8537_v17, %v6217_v44  ;;  %v6060_v55 = vadd.f32 1.4214138, %v6028_v42  ;;  %v5962_v47 = vmul.f32 1.0614054, %v11895_v59  ;;  %v6151_v3 = vmul.f32 %v11831_v32, %v6119_v29 }
 0xa07   : > { %8546 = vpow2.f32 %v6334_v19  ;;  %v5840_v22 = vmul.f32 0.3275911, %v11902_v40  ;;  %v11913_v11 = vadd.f32 %v11909_v2, %v11703_v33  ;;  %v6330_v9 = vmul.f32 1.442695, %v6282_v58 }
 0xa08   : > { %v6409_v5 = vsub.f32 1.0, %v6377_v26  ;;  %v6092_v39 = vmul.f32 %v11864_v48, %v6060_v55  ;;  %v5994_v34 = vadd.f32 -1.4531521, %v5962_v47  ;;  %v6183_v16 = vadd.f32 0.2548296, %v6151_v3 }
 0xa09   : > { %v11918_v4 = vmul.f32 %v6472_v43, %v11791_v31  ;;  %vm5740_vm5 = vcmp.ge.f32.partialorder %v11770_v18, 0.0  ;;  %v6285_v21 = vmul.f32 %v6253_v14, %v11857_v36  ;;  %v5872_v17 = vadd.f32 1.0, %v5840_v22 }
 0xa0a   : > { %v6441_v41 = vmul.f32 %v6409_v5, %v11843_v37  ;;  %v6124_v63 = vadd.f32 -0.28449672, %v6092_v39  ;;  %v6026_v10 = vmul.f32 %v11895_v59, %v5994_v34  ;;  %v6215_v52 = vmul.f32 %v11831_v32, %v6183_v16 }
 0xa0b   : > { %v8541_v25 = vpop.eup %8540  ;;  %v6438_v33 = vmul.f32 %v6406_v56, %v11821_v45  ;;  %v6251_v31 = vsub.f32 0.0, %v11883_v35  ;;  %8548 = vrcp.f32 %v5872_v17  ;;  %v11929_v32 = vmul.f32 0.70710677, %v11913_v11 }
 0xa0c   : > { %v6473_v44 = vadd.f32 1.0, %v6441_v41  ;;  %v6156_v37 = vmul.f32 %v11864_v48, %v6124_v63  ;;  %v6058_v42 = vadd.f32 1.4214138, %v6026_v10  ;;  %v11925_v29 = vpop.eup %8542  ;;  %v6375_v19 = vmul.f32 %v8541_v25, %v6215_v52 }
 0xa0d   : > { %v5965_v45 = vmul.f32 1.0614054, %v11925_v29  ;;  %8550 = vpow2.f32 %v6330_v9  ;;  %v6336_v26 = vmul.f32 1.442695, %v6285_v21  ;;  %v11935_v55 = vand.u32 2147483647, %v11929_v32 }
 0xa0e   : > { %v6505_v58 = vmul.f32 %v6473_v44, %v11826_v57  ;;  %v6188_v36 = vadd.f32 0.2548296, %v6156_v37  ;;  %v6090_v13 = vmul.f32 %v11895_v59, %v6058_v42  ;;  %v6407_v43 = vsub.f32 1.0, %v6375_v19 }
 0xa0f   : > { %v6470_v47 = vadd.f32 1.0, %v6438_v33  ;;  %v5997_v56 = vadd.f32 -1.4531521, %v5965_v45  ;;  %v11938_v5 = vpop.eup %8544  ;;  %v6283_v39 = vmul.f32 %v6251_v31, %v11883_v35  ;;  %v5838_v34 = vmul.f32 0.3275911, %v11935_v55 }
 0xa10   : > { %v6529_v3 = vpack.c.bf16 %v6505_v58, %v11918_v4  ;;  %v6122_v14 = vadd.f32 -0.28449672, %v6090_v13  ;;  %v6439_v57 = vmul.f32 %v6407_v43, %v11867_v20  ;;  %v11945_v16 = vadd.f32 %v11909_v2, %v11706_v27 }
 0xa11   : > { %v6220_v22 = vmul.f32 %v11864_v48, %v6188_v36  ;;  %v6029_v63 = vmul.f32 %v11925_v29, %v5997_v56  ;;  %v5963_v10 = vmul.f32 1.0614054, %v11938_v5  ;;  %v8547_v9 = vpop.eup %8546  ;;  %vm5738_vm6 = vcmp.ge.f32.partialorder %v11796_v50, 0.0 }
 0xa12   : > { %v6154_v41 = vmul.f32 %v11895_v59, %v6122_v14  ;;  %v6471_v4 = vadd.f32 1.0, %v6439_v57  ;;  %8552 = vpow2.f32 %v6336_v26  ;;  %v5870_v20 = vadd.f32 1.0, %v5838_v34 }
 0xa13   : > { %v6502_v35 = vmul.f32 %v6470_v47, %v11816_v0  ;;  %v6061_v21 = vadd.f32 1.4214138, %v6029_v63  ;;  %v6256_v27 = vsub.f32 0.0, %v11902_v40  ;;  %v5995_v17 = vadd.f32 -1.4531521, %v5963_v10 }
 0xa14   : > { %v6186_v52 = vadd.f32 0.2548296, %v6154_v41  ;;  %v6503_v48 = vmul.f32 %v6471_v4, %v11846_v24  ;;  %8554 = vrcp.f32 %v5870_v20  ;;  %v11956_v25 = vmul.f32 0.70710677, %v11945_v16 }
 0xa15   : > { %v5772_v33 = vsel %vm5740_vm5, 1.0, %v8717_v51  ;;  %v6380_v44 = vmul.f32 %v8547_v9, %v6220_v22  ;;  %v6093_v37 = vmul.f32 %v11925_v29, %v6061_v21  ;;  %v6332_v42 = vmul.f32 1.442695, %v6283_v39  ;;  %v11962_v0 = vpop.eup %8548 }
 0xa16   : > { %v6528_v19 = vpack.c.bf16 %v6503_v48, %v6502_v35  ;;  %v11965_v31 = vmul.f32 0.5, %v11774_v15  ;;  %v6027_v24 = vmul.f32 %v11938_v5, %v5995_v17  ;;  %v11970_v58 = vadd.f32 %v11909_v2, %v11711_v60 }
 0xa17   : > { %v5770_v18 = vsel %vm5738_vm6, 1.0, %v8717_v51  ;;  %v6218_v36 = vmul.f32 %v11895_v59, %v6186_v52  ;;  %v6125_v13 = vadd.f32 -0.28449672, %v6093_v37  ;;  %v5968_v45 = vmul.f32 1.0614054, %v11962_v0  ;;  %v8551_v43 = vpop.eup %8550 }
 0xa18   : > { %vm5741_vm8 = vcmp.ge.f32.partialorder %v11834_v46, 0.0  ;;  %v6059_v15 = vadd.f32 1.4214138, %v6027_v24  ;;  %v6288_v26 = vmul.f32 %v6256_v27, %v11902_v40  ;;  %v5809_v47 = vand.u32 2147483647, %v11956_v25  ;;  %7578 = vmatprep.mubr.msk.bf16.mxu1 %vm6557_vm7, %v6528_v19 }
 0xa19   : > { %v6412_v60 = vsub.f32 1.0, %v6380_v44  ;;  %v6157_v14 = vmul.f32 %v11925_v29, %v6125_v13  ;;  %8556 = vpow2.f32 %v6332_v42  ;;  %v6000_v50 = vadd.f32 -1.4531521, %v5968_v45  ;;  %7579 = vmatmul.mubr.msk.bf16.gmra.mrb[28].mxu1 %vm6557_vm7, %v6529_v3 }
 0xa1a   : > { %v5677_v59 = vmul.f32 0.5, %v11809_v8  ;;  %v6091_v56 = vmul.f32 %v11938_v5, %v6059_v15  ;;  %v5841_v57 = vmul.f32 0.3275911, %v5809_v47  ;;  %v11986_v46 = vmul.f32 0.70710677, %v11970_v58 }
 0xa1b   : > { %v6378_v40 = vmul.f32 %v8551_v43, %v6218_v36  ;;  %v5773_v39 = vsel %vm5741_vm8, 1.0, %v8717_v51  ;;  %v6189_v34 = vadd.f32 0.2548296, %v6157_v14  ;;  %v6032_v22 = vmul.f32 %v11962_v0, %v6000_v50 }
 0xa1c   : > { %v8553_v41 = vpop.eup %8552  ;;  %v6123_v63 = vadd.f32 -0.28449672, %v6091_v56  ;;  %v6342_v10 = vmul.f32 1.442695, %v6288_v26  ;;  %v6254_v9 = vsub.f32 0.0, %v11935_v55  ;;  %v5873_v3 = vadd.f32 1.0, %v5841_v57 }
 0xa1d   : > { %v6444_v4 = vmul.f32 %v6412_v60, %v5772_v33  ;;  %v6221_v8 = vmul.f32 %v11925_v29, %v6189_v34  ;;  %vm5739_vm9 = vcmp.ge.f32.partialorder %v11860_v61, 0.0  ;;  %v6064_v20 = vadd.f32 1.4214138, %v6032_v22 }
 0xa1e   : > { %v11993_v35 = vpop.eup %8554  ;;  %v6155_v52 = vmul.f32 %v11938_v5, %v6123_v63  ;;  %8558 = vrcp.f32 %v5873_v3  ;;  %v5807_v21 = vand.u32 2147483647, %v11986_v46  ;;  %v11999_v27 = vadd.f32 %v11909_v2, %v11762_v12 }
 0xa1f   : > { %v6410_v48 = vsub.f32 1.0, %v6378_v40  ;;  %v6381_v17 = vmul.f32 %v8553_v41, %v6221_v8  ;;  %v6096_v33 = vmul.f32 %v11962_v0, %v6064_v20  ;;  %v5966_v29 = vmul.f32 1.0614054, %v11993_v35 }
 0xa20   : > { %v6187_v44 = vadd.f32 0.2548296, %v6155_v52  ;;  %8560 = vpow2.f32 %v6342_v10  ;;  %v6286_v37 = vmul.f32 %v6254_v9, %v11935_v55  ;;  %v5839_v42 = vmul.f32 0.3275911, %v5807_v21 }
 0xa21   : > { %v6476_v19 = vadd.f32 1.0, %v6444_v4  ;;  %v6413_v24 = vsub.f32 1.0, %v6381_v17  ;;  %v6128_v36 = vadd.f32 -0.28449672, %v6096_v33  ;;  %v5998_v13 = vadd.f32 -1.4531521, %v5966_v29 }
 0xa22   : > { %v6219_v45 = vmul.f32 %v11938_v5, %v6187_v44  ;;  %v6257_v43 = vsub.f32 0.0, %v5809_v47  ;;  %v5871_v12 = vadd.f32 1.0, %v5839_v42  ;;  %v12006_v15 = vmul.f32 0.70710677, %v11999_v27 }
 0xa23   : > { %v8557_v26 = vpop.eup %8556  ;;  %v6442_v60 = vmul.f32 %v6410_v48, %v5770_v18  ;;  %v6445_v14 = vmul.f32 %v6413_v24, %v5773_v39  ;;  %v6160_v50 = vmul.f32 %v11962_v0, %v6128_v36  ;;  %v6030_v56 = vmul.f32 %v11993_v35, %v5998_v13 }
 0xa24   : > { %v5675_v55 = vmul.f32 0.5, %v11838_v6  ;;  %v6379_v57 = vmul.f32 %v8557_v26, %v6219_v45  ;;  %8562 = vrcp.f32 %v5871_v12  ;;  %v12013_v40 = vadd.f32 %v11909_v2, %v11767_v62 }
 0xa25   : > { %v6477_v5 = vadd.f32 1.0, %v6445_v14  ;;  %v5771_v34 = vsel %vm5739_vm9, 1.0, %v8717_v51  ;;  %v6062_v22 = vadd.f32 1.4214138, %v6030_v56  ;;  %v6338_v18 = vmul.f32 1.442695, %v6286_v37 }
 0xa26   : > { %v6508_v39 = vmul.f32 %v6476_v19, %v11892_v54  ;;  %v6411_v41 = vsub.f32 1.0, %v6379_v57  ;;  %v6289_v63 = vmul.f32 %v6257_v43, %v5809_v47  ;;  %v12020_v10 = vand.u32 2147483647, %v12006_v15 }
 0xa27   : > { %v6474_v6 = vadd.f32 1.0, %v6442_v60  ;;  %v6509_v9 = vmul.f32 %v6477_v5, %v5677_v59  ;;  %v6192_v3 = vadd.f32 0.2548296, %v6160_v50  ;;  %v6094_v62 = vmul.f32 %v11993_v35, %v6062_v22 }
 0xa28   : > { %v12023_v4 = vpop.eup %8558  ;;  %v6443_v8 = vmul.f32 %v6411_v41, %v5771_v34  ;;  %vm5744_vm10 = vcmp.ge.f32.partialorder %v11888_v38, 0.0  ;;  %v5844_v61 = vmul.f32 0.3275911, %v12020_v10  ;;  %v12028_v20 = vmul.f32 0.70710677, %v12013_v40 }
 0xa29   : > { %v6531_v54 = vpack.c.bf16 %v6509_v9, %v6508_v39  ;;  %v6126_v47 = vadd.f32 -0.28449672, %v6094_v62  ;;  %v5969_v52 = vmul.f32 1.0614054, %v12023_v4  ;;  %v6255_v48 = vsub.f32 0.0, %v5807_v21 }
 0xa2a   : > { %v8561_v17 = vpop.eup %8560  ;;  %v6475_v59 = vadd.f32 1.0, %v6443_v8  ;;  %8564 = vpow2.f32 %v6338_v18  ;;  %v6344_v33 = vmul.f32 1.442695, %v6289_v63  ;;  %v5876_v29 = vadd.f32 1.0, %v5844_v61 }
 0xa2b   : > { %v6506_v44 = vmul.f32 %v6474_v6, %v11965_v31  ;;  %v6224_v37 = vmul.f32 %v11962_v0, %v6192_v3  ;;  %v6158_v42 = vmul.f32 %v11993_v35, %v6126_v47  ;;  %v6001_v19 = vadd.f32 -1.4531521, %v5969_v52 }
 0xa2c   : > { %v6507_v24 = vmul.f32 %v6475_v59, %v5675_v55  ;;  %8566 = vrcp.f32 %v5876_v29  ;;  %v12035_v36 = vand.u32 2147483647, %v12028_v20  ;;  %v12039_v13 = vadd.f32 %v11909_v2, %v11776_v53 }
 0xa2d   : > { %v6033_v45 = vmul.f32 %v12023_v4, %v6001_v19  ;;  %v6287_v43 = vmul.f32 %v6255_v48, %v5807_v21  ;;  %v12045_v0 = vmul.f32 0.5, %v11873_v28  ;;  %v6190_v26 = vadd.f32 0.2548296, %v6158_v42 }
 0xa2e   : > { %v12042_v12 = vpop.eup %8562  ;;  %v6530_v31 = vpack.c.bf16 %v6507_v24, %v6506_v44  ;;  %v5842_v60 = vmul.f32 0.3275911, %v12035_v36  ;;  %v5776_v14 = vsel %vm5744_vm10, 1.0, %v8717_v51  ;;  %v6384_v50 = vmul.f32 %v8561_v17, %v6224_v37 }
 0xa2f   : > { %v6065_v56 = vadd.f32 1.4214138, %v6033_v45  ;;  %v5967_v53 = vmul.f32 1.0614054, %v12042_v12  ;;  %vm5742_vm11 = vcmp.ge.f32.partialorder %v11929_v32, 0.0  ;;  %8568 = vpow2.f32 %v6344_v33 }
 0xa30   : > { %v5874_v21 = vadd.f32 1.0, %v5842_v60  ;;  %v12054_v55 = vmul.f32 0.70710677, %v12039_v13  ;;  %7582 = vmatprep.mubr.msk.bf16.mxu1 %vm6557_vm7, %v6530_v31  ;;  %v6340_v5 = vmul.f32 1.442695, %v6287_v43  ;;  %v12060_v38 = vadd.f32 %v11909_v2, %v11781_v30 }
 0xa31   : > { %v6097_v28 = vmul.f32 %v12023_v4, %v6065_v56  ;;  %v5999_v57 = vadd.f32 -1.4531521, %v5967_v53  ;;  %7583 = vmatmul.mubr.msk.bf16.gmra.mrb[32].mxu1 %vm6557_vm7, %v6531_v54  ;;  %v6222_v34 = vmul.f32 %v11993_v35, %v6190_v26  ;;  %v6260_v22 = vsub.f32 0.0, %v12020_v10 }
 0xa32   : > { %8570 = vrcp.f32 %v5874_v21  ;;  %v12066_v18 = vand.u32 2147483647, %v12054_v55  ;;  %v6416_v39 = vsub.f32 1.0, %v6384_v50  ;;  %v12069_v41 = vmul.f32 0.5, %v11913_v11 }
 0xa33   : > { %v6129_v63 = vadd.f32 -0.28449672, %v6097_v28  ;;  %v6031_v6 = vmul.f32 %v12042_v12, %v5999_v57  ;;  %v5774_v30 = vsel %vm5742_vm11, 1.0, %v8717_v51  ;;  %v12076_v35 = vmul.f32 0.5, %v11945_v16 }
 0xa34   : > { %v8565_v9 = vpop.eup %8564  ;;  %vm5745_vm12 = vcmp.ge.f32.partialorder %v11956_v25, 0.0  ;;  %v5845_v3 = vmul.f32 0.3275911, %v12066_v18  ;;  %vm5743_vm13 = vcmp.ge.f32.partialorder %v11986_v46, 0.0  ;;  %v12083_v8 = vmul.f32 0.70710677, %v12060_v38 }
 0xa35   : > { %v6161_v62 = vmul.f32 %v12023_v4, %v6129_v63  ;;  %v6063_v11 = vadd.f32 1.4214138, %v6031_v6  ;;  %v6382_v54 = vmul.f32 %v8565_v9, %v6222_v34  ;;  %8572 = vpow2.f32 %v6340_v5 }
 0xa36   : > { %v12085_v61 = vpop.eup %8566  ;;  %v6292_v32 = vmul.f32 %v6260_v22, %v12020_v10  ;;  %v5877_v16 = vadd.f32 1.0, %v5845_v3  ;;  %v6448_v47 = vmul.f32 %v6416_v39, %v5776_v14  ;;  %v6258_v59 = vsub.f32 0.0, %v12035_v36 }
 0xa37   : > { %v6193_v52 = vadd.f32 0.2548296, %v6161_v62  ;;  %v6095_v48 = vmul.f32 %v12042_v12, %v6063_v11  ;;  %v5972_v17 = vmul.f32 1.0614054, %v12085_v61  ;;  %v12092_v33 = vand.u32 2147483647, %v12083_v8 }
 0xa38   : > { %8574 = vrcp.f32 %v5877_v16  ;;  %v12096_v29 = vadd.f32 %v11909_v2, %v11849_v23  ;;  %v5777_v10 = vsel %vm5745_vm12, 1.0, %v8717_v51  ;;  %v6414_v24 = vsub.f32 1.0, %v6382_v54 }
 0xa39   : > { %v6225_v44 = vmul.f32 %v12023_v4, %v6193_v52  ;;  %v6127_v37 = vadd.f32 -0.28449672, %v6095_v48  ;;  %v6004_v42 = vadd.f32 -1.4531521, %v5972_v17  ;;  %v8569_v19 = vpop.eup %8568  ;;  %v12103_v45 = vmul.f32 0.5, %v11970_v58 }
 0xa3a   : > { %v5775_v43 = vsel %vm5743_vm13, 1.0, %v8717_v51  ;;  %v5843_v23 = vmul.f32 0.3275911, %v12092_v33  ;;  %v6350_v60 = vmul.f32 1.442695, %v6292_v32  ;;  %v6480_v14 = vadd.f32 1.0, %v6448_v47 }
 0xa3b   : > { %v6385_v31 = vmul.f32 %v8569_v19, %v6225_v44  ;;  %v6159_v26 = vmul.f32 %v12042_v12, %v6127_v37  ;;  %v6036_v25 = vmul.f32 %v12085_v61, %v6004_v42  ;;  %v6290_v50 = vmul.f32 %v6258_v59, %v12035_v36 }
 0xa3c   : > { %v12111_v4 = vpop.eup %8570  ;;  %v5875_v56 = vadd.f32 1.0, %v5843_v23  ;;  %v12115_v58 = vmul.f32 0.70710677, %v12096_v29  ;;  %v6261_v28 = vsub.f32 0.0, %v12066_v18  ;;  %v6446_v57 = vmul.f32 %v6414_v24, %v5774_v30 }
 0xa3d   : > { %v6417_v53 = vsub.f32 1.0, %v6385_v31  ;;  %v6191_v46 = vadd.f32 0.2548296, %v6159_v26  ;;  %v6068_v21 = vadd.f32 1.4214138, %v6036_v25  ;;  %v12121_v34 = vadd.f32 %v11909_v2, %v11854_v1 }
 0xa3e   : > { %v5970_v5 = vmul.f32 1.0614054, %v12111_v4  ;;  %8576 = vrcp.f32 %v5875_v56  ;;  %v6512_v6 = vmul.f32 %v6480_v14, %v12045_v0  ;;  %v6346_v3 = vmul.f32 1.442695, %v6290_v50 }
 0xa3f   : > { %v6449_v22 = vmul.f32 %v6417_v53, %v5777_v10  ;;  %v6223_v36 = vmul.f32 %v12042_v12, %v6191_v46  ;;  %v6100_v39 = vmul.f32 %v12085_v61, %v6068_v21  ;;  %8578 = vpow2.f32 %v6350_v60  ;;  %v8573_v63 = vpop.eup %8572 }
 0xa40   : > { %v6002_v9 = vadd.f32 -1.4531521, %v5970_v5  ;;  %v12127_v30 = vand.u32 2147483647, %v12115_v58  ;;  %v6293_v1 = vmul.f32 %v6261_v28, %v12066_v18  ;;  %v6478_v16 = vadd.f32 1.0, %v6446_v57 }
 0xa41   : > { %v6481_v62 = vadd.f32 1.0, %v6449_v22  ;;  %v6383_v11 = vmul.f32 %v8573_v63, %v6223_v36  ;;  %v6132_v54 = vadd.f32 -0.28449672, %v6100_v39  ;;  %v12135_v52 = vmul.f32 0.70710677, %v12121_v34 }
 0xa42   : > { %v12130_v32 = vpop.eup %8574  ;;  %v6034_v12 = vmul.f32 %v12111_v4, %v6002_v9  ;;  %v5848_v47 = vmul.f32 0.3275911, %v12127_v30  ;;  %v6259_v18 = vsub.f32 0.0, %v12092_v33  ;;  %v12143_v37 = vadd.f32 %v11909_v2, %v11862_v49 }
 0xa43   : > { %v6513_v0 = vmul.f32 %v6481_v62, %v12076_v35  ;;  %v6415_v48 = vsub.f32 1.0, %v6383_v11  ;;  %v6164_v17 = vmul.f32 %v12085_v61, %v6132_v54  ;;  %v5973_v59 = vmul.f32 1.0614054, %v12130_v32 }
 0xa44   : > { %v6066_v10 = vadd.f32 1.4214138, %v6034_v12  ;;  %v5880_v44 = vadd.f32 1.0, %v5848_v47  ;;  %v6352_v35 = vmul.f32 1.442695, %v6293_v1  ;;  %v6510_v25 = vmul.f32 %v6478_v16, %v12069_v41 }
 0xa45   : > { %v6533_v42 = vpack.c.bf16 %v6513_v0, %v6512_v6  ;;  %v6447_v19 = vmul.f32 %v6415_v48, %v5775_v43  ;;  %v6196_v24 = vadd.f32 0.2548296, %v6164_v17  ;;  %v6005_v23 = vadd.f32 -1.4531521, %v5973_v59 }
 0xa46   : > { %v6098_v31 = vmul.f32 %v12111_v4, %v6066_v10  ;;  %8580 = vrcp.f32 %v5880_v44  ;;  %v12147_v26 = vand.u32 2147483647, %v12135_v52  ;;  %v6291_v56 = vmul.f32 %v6259_v18, %v12092_v33 }
 0xa47   : > { %v6479_v60 = vadd.f32 1.0, %v6447_v19  ;;  %8582 = vpow2.f32 %v6346_v3  ;;  %v6037_v14 = vmul.f32 %v12130_v32, %v6005_v23  ;;  %v6228_v49 = vmul.f32 %v12085_v61, %v6196_v24 }
 0xa48   : > { %v12151_v50 = vpop.eup %8576  ;;  %v6130_v43 = vadd.f32 -0.28449672, %v6098_v31  ;;  %v5846_v53 = vmul.f32 0.3275911, %v12147_v26  ;;  %v12159_v41 = vmul.f32 0.70710677, %v12143_v37  ;;  %8584 = vpow2.f32 %v6352_v35 }
 0xa49   : > { %v8579_v46 = vpop.eup %8578  ;;  %v6511_v21 = vmul.f32 %v6479_v60, %v12103_v45  ;;  %v6069_v28 = vadd.f32 1.4214138, %v6037_v14  ;;  %v5971_v57 = vmul.f32 1.0614054, %v12151_v50  ;;  %v6348_v63 = vmul.f32 1.442695, %v6291_v56 }
 0xa4a   : > { %v6162_v5 = vmul.f32 %v12111_v4, %v6130_v43  ;;  %v5878_v22 = vadd.f32 1.0, %v5846_v53  ;;  %v6388_v6 = vmul.f32 %v8579_v46, %v6228_v49  ;;  %v12165_v3 = vand.u32 2147483647, %v12159_v41 }
 0xa4b   : > { %v6532_v36 = vpack.c.bf16 %v6511_v21, %v6510_v25  ;;  %v6101_v61 = vmul.f32 %v12130_v32, %v6069_v28  ;;  %v6003_v39 = vadd.f32 -1.4531521, %v5971_v57  ;;  %v12170_v62 = vadd.f32 %v11909_v2, %v11875_v7 }
 0xa4c   : > { %v6194_v33 = vadd.f32 0.2548296, %v6162_v5  ;;  %8586 = vrcp.f32 %v5878_v22  ;;  %v5849_v16 = vmul.f32 0.3275911, %v12165_v3  ;;  %vm5748_vm14 = vcmp.ge.f32.partialorder %v12006_v15, 0.0 }
 0xa4d   : > { %v6133_v9 = vadd.f32 -0.28449672, %v6101_v61  ;;  %v6035_v45 = vmul.f32 %v12151_v50, %v6003_v39  ;;  %7586 = vmatprep.mubr.msk.bf16.mxu1 %vm6557_vm7, %v6532_v36  ;;  %vm5746_vm15 = vcmp.ge.f32.partialorder %v12028_v20, 0.0  ;;  %8588 = vpow2.f32 %v6348_v63 }
 0xa4e   : > { %7587 = vmatmul.mubr.msk.bf16.gmra.mrb[36].mxu1 %vm6557_vm7, %v6533_v42  ;;  %v6226_v11 = vmul.f32 %v12111_v4, %v6194_v33  ;;  %v12181_v47 = vmul.f32 0.70710677, %v12170_v62  ;;  %v6420_v2 = vsub.f32 1.0, %v6388_v6  ;;  %v5684_v17 = vmul.f32 0.5, %v11999_v27 }
 0xa4f   : > { %v6165_v54 = vmul.f32 %v12130_v32, %v6133_v9  ;;  %v6067_v1 = vadd.f32 1.4214138, %v6035_v45  ;;  %vm5749_vm0 = vcmp.ge.f32.partialorder %v12054_v55, 0.0  ;;  %v6264_v59 = vsub.f32 0.0, %v12127_v30 }
 0xa50   : > { %v12176_v12 = vpop.eup %8580  ;;  %v5881_v10 = vadd.f32 1.0, %v5849_v16  ;;  %v5780_v23 = vsel %vm5748_vm14, 1.0, %v8717_v51  ;;  %v5778_v31 = vsel %vm5746_vm15, 1.0, %v8717_v51  ;;  %v5815_v27 = vand.u32 2147483647, %v12181_v47 }
 0xa51   : > { %v8583_v7 = vpop.eup %8582  ;;  %v6197_v0 = vadd.f32 0.2548296, %v6165_v54  ;;  %v6099_v4 = vmul.f32 %v12151_v50, %v6067_v1  ;;  %v5976_v48 = vmul.f32 1.0614054, %v12176_v12  ;;  %v6452_v35 = vmul.f32 %v6420_v2, %v5780_v23 }
 0xa52   : > { %v6386_v18 = vmul.f32 %v8583_v7, %v6226_v11  ;;  %v8585_v24 = vpop.eup %8584  ;;  %8590 = vrcp.f32 %v5881_v10  ;;  %v5685_v49 = vmul.f32 0.5, %v12039_v13  ;;  %v5781_v15 = vsel %vm5749_vm0, 1.0, %v8717_v51 }
 0xa53   : > { %v6229_v44 = vmul.f32 %v12130_v32, %v6197_v0  ;;  %v6131_v42 = vadd.f32 -0.28449672, %v6099_v4  ;;  %v6008_v19 = vadd.f32 -1.4531521, %v5976_v48  ;;  %v6296_v20 = vmul.f32 %v6264_v59, %v12127_v30 }
 0xa54   : > { %v5847_v43 = vmul.f32 0.3275911, %v5815_v27  ;;  %v6418_v56 = vsub.f32 1.0, %v6386_v18  ;;  %vm5747_vm2 = vcmp.ge.f32.partialorder %v12083_v8, 0.0  ;;  %v6262_v57 = vsub.f32 0.0, %v12147_v26 }
 0xa55   : > { %v6389_v25 = vmul.f32 %v8585_v24, %v6229_v44  ;;  %v6163_v60 = vmul.f32 %v12151_v50, %v6131_v42  ;;  %v6040_v32 = vmul.f32 %v12176_v12, %v6008_v19  ;;  %v6484_v22 = vadd.f32 1.0, %v6452_v35 }
 0xa56   : > { %v12198_v14 = vpop.eup %8586  ;;  %v5879_v5 = vadd.f32 1.0, %v5847_v43  ;;  %v6358_v30 = vmul.f32 1.442695, %v6296_v20  ;;  %v6265_v33 = vsub.f32 0.0, %v12165_v3  ;;  %v6450_v63 = vmul.f32 %v6418_v56, %v5778_v31 }
 0xa57   : > { %v6421_v53 = vsub.f32 1.0, %v6389_v25  ;;  %v6195_v46 = vadd.f32 0.2548296, %v6163_v60  ;;  %v6072_v21 = vadd.f32 1.4214138, %v6040_v32  ;;  %v8589_v61 = vpop.eup %8588  ;;  %v6294_v54 = vmul.f32 %v6262_v57, %v12147_v26 }
 0xa58   : > { %v5974_v28 = vmul.f32 1.0614054, %v12198_v14  ;;  %8592 = vrcp.f32 %v5879_v5  ;;  %v6516_v1 = vmul.f32 %v6484_v22, %v5684_v17  ;;  %v5779_v0 = vsel %vm5747_vm2, 1.0, %v8717_v51 }
 0xa59   : > { %v6453_v13 = vmul.f32 %v6421_v53, %v5781_v15  ;;  %v6227_v36 = vmul.f32 %v12151_v50, %v6195_v46  ;;  %v6104_v55 = vmul.f32 %v12176_v12, %v6072_v21  ;;  %8594 = vpow2.f32 %v6358_v30 }
 0xa5a   : > { %v6006_v39 = vadd.f32 -1.4531521, %v5974_v28  ;;  %v6297_v48 = vmul.f32 %v6265_v33, %v12165_v3  ;;  %v6482_v59 = vadd.f32 1.0, %v6450_v63  ;;  %v5682_v26 = vmul.f32 0.5, %v12013_v40 }
 0xa5b   : > { %v6485_v6 = vadd.f32 1.0, %v6453_v13  ;;  %v6387_v9 = vmul.f32 %v8589_v61, %v6227_v36  ;;  %v6136_v45 = vadd.f32 -0.28449672, %v6104_v55  ;;  %v6354_v42 = vmul.f32 1.442695, %v6294_v54 }
 0xa5c   : > { %v6038_v11 = vmul.f32 %v12198_v14, %v6006_v39  ;;  %v8591_v2 = vpop.eup %8590  ;;  %v6263_v19 = vsub.f32 0.0, %v5815_v27  ;;  %v5683_v24 = vmul.f32 0.5, %v12060_v38  ;;  %v6360_v25 = vmul.f32 1.442695, %v6297_v48 }
 0xa5d   : > { %v6517_v16 = vmul.f32 %v6485_v6, %v5685_v49  ;;  %v6419_v7 = vsub.f32 1.0, %v6387_v9  ;;  %v6168_v50 = vmul.f32 %v12176_v12, %v6136_v45  ;;  %v5977_v44 = vmul.f32 1.0614054, %v8591_v2 }
 0xa5e   : > { %v6070_v4 = vadd.f32 1.4214138, %v6038_v11  ;;  %v6514_v60 = vmul.f32 %v6482_v59, %v5682_v26  ;;  %8596 = vpow2.f32 %v6354_v42  ;;  %v6295_v20 = vmul.f32 %v6263_v19, %v5815_v27 }
 0xa5f   : > { %v6535_v10 = vpack.c.bf16 %v6517_v16, %v6516_v1  ;;  %v6451_v18 = vmul.f32 %v6419_v7, %v5779_v0  ;;  %v6200_v31 = vadd.f32 0.2548296, %v6168_v50  ;;  %v6009_v8 = vadd.f32 -1.4531521, %v5977_v44 }
 0xa60   : > { %v6102_v17 = vmul.f32 %v12198_v14, %v6070_v4  ;;  %8598 = vpow2.f32 %v6360_v25  ;;  %v6356_v57 = vmul.f32 1.442695, %v6295_v20  ;;  %vm5752_vm3 = vcmp.ge.f32.partialorder %v12115_v58, 0.0 }
 0xa61   : > { %v6483_v23 = vadd.f32 1.0, %v6451_v18  ;;  %v6041_v3 = vmul.f32 %v8591_v2, %v6009_v8  ;;  %v6232_v43 = vmul.f32 %v12176_v12, %v6200_v31  ;;  %v5784_v45 = vsel %vm5752_vm3, 1.0, %v8717_v51 }
 0xa62   : > { %v6134_v35 = vadd.f32 -0.28449672, %v6102_v17  ;;  %v8593_v49 = vpop.eup %8592  ;;  %8600 = vpow2.f32 %v6356_v57  ;;  %vm5753_vm4 = vcmp.ge.f32.partialorder %v12159_v41, 0.0  ;;  %vm5750_vm5 = vcmp.ge.f32.partialorder %v12135_v52, 0.0 }
 0xa63   : > { %v6515_v32 = vmul.f32 %v6483_v23, %v5683_v24  ;;  %v6073_v56 = vadd.f32 1.4214138, %v6041_v3  ;;  %v5975_v53 = vmul.f32 1.0614054, %v8593_v49  ;;  %v8595_v28 = vpop.eup %8594  ;;  %v5785_v7 = vsel %vm5753_vm4, 1.0, %v8717_v51 }
 0xa64   : > { %v6166_v15 = vmul.f32 %v12198_v14, %v6134_v35  ;;  %v6392_v5 = vmul.f32 %v8595_v28, %v6232_v43  ;;  %v5688_v48 = vmul.f32 0.5, %v12096_v29  ;;  %v5782_v59 = vsel %vm5750_vm5, 1.0, %v8717_v51 }
 0xa65   : > { %v6534_v40 = vpack.c.bf16 %v6515_v32, %v6514_v60  ;;  %v6105_v46 = vmul.f32 %v8591_v2, %v6073_v56  ;;  %v6007_v21 = vadd.f32 -1.4531521, %v5975_v53  ;;  %vm5751_vm6 = vcmp.ge.f32.partialorder %v12181_v47, 0.0  ;;  %v12243_v47 = vld [vmem:[%s12362_s12] ss:$0 sm:$0xff] }
 0xa66   : > { %v6198_v38 = vadd.f32 0.2548296, %v6166_v15  ;;  %v6424_v12 = vsub.f32 1.0, %v6392_v5  ;;  %v5783_v42 = vsel %vm5751_vm6, 1.0, %v8717_v51  ;;  %v5686_v29 = vmul.f32 0.5, %v12121_v34 }
 0xa67   : > { %7590 = vmatprep.mubr.msk.bf16.mxu1 %vm6557_vm7, %v6534_v40  ;;  %v6137_v22 = vadd.f32 -0.28449672, %v6105_v46  ;;  %v6039_v13 = vmul.f32 %v8593_v49, %v6007_v21  ;;  %v5687_v31 = vmul.f32 0.5, %v12170_v62 }
 0xa68   : > { %7591 = vmatmul.mubr.msk.bf16.gmra.mrb[40].mxu1 %vm6557_vm7, %v6535_v10  ;;  %v6230_v27 = vmul.f32 %v12198_v14, %v6198_v38  ;;  %v8597_v39 = vpop.eup %8596  ;;  %v6456_v11 = vmul.f32 %v6424_v12, %v5784_v45  ;;  %v5689_v10 = vmul.f32 0.5, %v12143_v37 }
 0xa69   : > { %v6169_v36 = vmul.f32 %v8591_v2, %v6137_v22  ;;  %v6071_v55 = vadd.f32 1.4214138, %v6039_v13 }
 0xa6a   : > { %v6390_v33 = vmul.f32 %v8597_v39, %v6230_v27  ;;  %v8599_v9 = vpop.eup %8598  ;;  %v6488_v50 = vadd.f32 1.0, %v6456_v11 }
 0xa6b   : > { %v6201_v61 = vadd.f32 0.2548296, %v6169_v36  ;;  %v6103_v30 = vmul.f32 %v8593_v49, %v6071_v55 }
 0xa6c   : > { %v6422_v1 = vsub.f32 1.0, %v6390_v33  ;;  %v6520_v44 = vmul.f32 %v6488_v50, %v5688_v48 }
 0xa6d   : > { %v6233_v63 = vmul.f32 %v8591_v2, %v6201_v61  ;;  %v6135_v6 = vadd.f32 -0.28449672, %v6103_v30  ;;  %v8601_v2 = vpop.eup %8600 }
 0xa6e   : > { %v6454_v41 = vmul.f32 %v6422_v1, %v5782_v59 }
 0xa6f   : > { %v6393_v54 = vmul.f32 %v8599_v9, %v6233_v63  ;;  %v6167_v14 = vmul.f32 %v8593_v49, %v6135_v6 }
 0xa70   : > { %v6486_v19 = vadd.f32 1.0, %v6454_v41 }
 0xa71   : > { %v6425_v16 = vsub.f32 1.0, %v6393_v54  ;;  %v6199_v58 = vadd.f32 0.2548296, %v6167_v14 }
 0xa72   : > { %v6518_v37 = vmul.f32 %v6486_v19, %v5686_v29 }
 0xa73   : > { %v6457_v0 = vmul.f32 %v6425_v16, %v5785_v7  ;;  %v6231_v4 = vmul.f32 %v8593_v49, %v6199_v58 }
 0xa75   : > { %v6489_v18 = vadd.f32 1.0, %v6457_v0  ;;  %v6391_v52 = vmul.f32 %v8601_v2, %v6231_v4 }
 0xa77   : > { %v6521_v26 = vmul.f32 %v6489_v18, %v5689_v10  ;;  %v6423_v17 = vsub.f32 1.0, %v6391_v52 }
 0xa79   : > { %v6537_v24 = vpack.c.bf16 %v6521_v26, %v6520_v44  ;;  %v6455_v23 = vmul.f32 %v6423_v17, %v5783_v42 }
 0xa7b   : > { %v6487_v8 = vadd.f32 1.0, %v6455_v23 }
 0xa7d   : > { %v6519_v35 = vmul.f32 %v6487_v8, %v5687_v31 }
 0xa7f   : > { %v6536_v25 = vpack.c.bf16 %v6519_v35, %v6518_v37 }
 0xa81   : > { %7594 = vmatprep.mubr.msk.bf16.mxu1 %vm6557_vm7, %v6536_v25 }
 0xa82   : > { %7595 = vmatmul.mubr.msk.bf16.gmra.mrb[44].mxu1 %vm6557_vm7, %v6537_v24 }
 0xa92   : > { %v7568_v51 = vpop.f32.mrb[16].mxu1 }
 0xa93   : > { %v6649_v34 = vadd.f32 %v7568_v51, %v12243_v47  ;;  %v6640_v62 = vpop.f32.mrb[17].mxu1 }
 0xa94   : > { %v6641_v60 = vadd.f32 %v12243_v47, %v6640_v62  ;;  %v7569_v32 = vpop.f32.mrb[18].mxu1 }
 0xa95   : > { %6769 = vst.msk [vmem:[%s12249_s21 + $0x10] sm:$0xff] %vm631_vm1, %v6649_v34  ;;  %v6652_v3 = vadd.f32 %v7569_v32, %v12243_v47  ;;  %v6643_v49 = vpop.f32.mrb[19].mxu1 }
 0xa96   : > { %6767 = vst.msk [vmem:[%s12249_s21] sm:$0xff] %vm631_vm1, %v6641_v60  ;;  %v6644_v15 = vadd.f32 %v12243_v47, %v6643_v49 }
 0xa97   : > { %6770 = vst.msk [vmem:[%s12249_s21 + $0x18] sm:$0xff] %vm631_vm1, %v6652_v3 }
 0xa98   : > { %6768 = vst.msk [vmem:[%s12249_s21 + $0x8] sm:$0xff] %vm631_vm1, %v6644_v15 }
 0xab5   : > { %v7572_v20 = vpop.f32.mrb[20].mxu1 }
 0xab6   : > { %v6665_v40 = vadd.f32 %v7572_v20, %v12243_v47  ;;  %v6656_v43 = vpop.f32.mrb[21].mxu1 }
 0xab7   : > { %v6657_v56 = vadd.f32 %v12243_v47, %v6656_v43  ;;  %v7573_v53 = vpop.f32.mrb[22].mxu1 }
 0xab8   : > { %6773 = vst.msk [vmem:[%s12249_s21 + $0x30] sm:$0xff] %vm631_vm1, %v6665_v40  ;;  %v6668_v38 = vadd.f32 %v7573_v53, %v12243_v47  ;;  %v6659_v46 = vpop.f32.mrb[23].mxu1 }
 0xab9   : > { %6771 = vst.msk [vmem:[%s12249_s21 + $0x20] sm:$0xff] %vm631_vm1, %v6657_v56  ;;  %v6660_v21 = vadd.f32 %v12243_v47, %v6659_v46 }
 0xaba   : > { %6774 = vst.msk [vmem:[%s12249_s21 + $0x38] sm:$0xff] %vm631_vm1, %v6668_v38 }
 0xabb   : > { %6772 = vst.msk [vmem:[%s12249_s21 + $0x28] sm:$0xff] %vm631_vm1, %v6660_v21 }
 0xacc   : > { %v7576_v28 = vpop.f32.mrb[24].mxu1 }
 0xacd   : > { %v6681_v57 = vadd.f32 %v7576_v28, %v12243_v47  ;;  %v6672_v5 = vpop.f32.mrb[25].mxu1 }
 0xace   : > { %v6673_v22 = vadd.f32 %v12243_v47, %v6672_v5  ;;  %v7577_v13 = vpop.f32.mrb[26].mxu1 }
 0xacf   : > { %6777 = vst.msk [vmem:[%s12249_s21 + $0x50] sm:$0xff] %vm631_vm1, %v6681_v57  ;;  %v6684_v27 = vadd.f32 %v7577_v13, %v12243_v47  ;;  %v6675_v36 = vpop.f32.mrb[27].mxu1 }
 0xad0   : > { %6775 = vst.msk [vmem:[%s12249_s21 + $0x40] sm:$0xff] %vm631_vm1, %v6673_v22  ;;  %v6676_v55 = vadd.f32 %v12243_v47, %v6675_v36 }
 0xad1   : > { %6778 = vst.msk [vmem:[%s12249_s21 + $0x58] sm:$0xff] %vm631_vm1, %v6684_v27 }
 0xad2   : > { %6776 = vst.msk [vmem:[%s12249_s21 + $0x48] sm:$0xff] %vm631_vm1, %v6676_v55 }
 0xaec   : > { %v7580_v12 = vpop.f32.mrb[28].mxu1 }
 0xaed   : > { %v6697_v61 = vadd.f32 %v7580_v12, %v12243_v47  ;;  %v6688_v30 = vpop.f32.mrb[29].mxu1 }
 0xaee   : > { %v6689_v39 = vadd.f32 %v12243_v47, %v6688_v30  ;;  %v7581_v33 = vpop.f32.mrb[30].mxu1 }
 0xaef   : > { %6781 = vst.msk [vmem:[%s12249_s21 + $0x70] sm:$0xff] %vm631_vm1, %v6697_v61  ;;  %v6700_v63 = vadd.f32 %v7581_v33, %v12243_v47  ;;  %v6691_v6 = vpop.f32.mrb[31].mxu1 }
 0xaf0   : > { %6779 = vst.msk [vmem:[%s12249_s21 + $0x60] sm:$0xff] %vm631_vm1, %v6689_v39  ;;  %v6692_v9 = vadd.f32 %v12243_v47, %v6691_v6 }
 0xaf1   : > { %6782 = vst.msk [vmem:[%s12249_s21 + $0x78] sm:$0xff] %vm631_vm1, %v6700_v63 }
 0xaf2   : > { %6780 = vst.msk [vmem:[%s12249_s21 + $0x68] sm:$0xff] %vm631_vm1, %v6692_v9 }
 0xb04   : > { %v7584_v45 = vpop.f32.mrb[32].mxu1 }
 0xb05   : > { %v6713_v11 = vadd.f32 %v7584_v45, %v12243_v47  ;;  %v6704_v54 = vpop.f32.mrb[33].mxu1 }
 0xb06   : > { %v6705_v14 = vadd.f32 %v12243_v47, %v6704_v54  ;;  %v7585_v1 = vpop.f32.mrb[34].mxu1 }
 0xb07   : > { %6785 = vst.msk [vmem:[%s12249_s21 + $0x90] sm:$0xff] %vm631_vm1, %v6713_v11  ;;  %v6716_v16 = vadd.f32 %v7585_v1, %v12243_v47  ;;  %v6707_v58 = vpop.f32.mrb[35].mxu1 }
 0xb08   : > { %6783 = vst.msk [vmem:[%s12249_s21 + $0x80] sm:$0xff] %vm631_vm1, %v6705_v14  ;;  %v6708_v7 = vadd.f32 %v12243_v47, %v6707_v58 }
 0xb09   : > { %6786 = vst.msk [vmem:[%s12249_s21 + $0x98] sm:$0xff] %vm631_vm1, %v6716_v16 }
 0xb0a   : > { %6784 = vst.msk [vmem:[%s12249_s21 + $0x88] sm:$0xff] %vm631_vm1, %v6708_v7 }
 0xb21   : > { %v7588_v50 = vpop.f32.mrb[36].mxu1 }
 0xb22   : > { %v6729_v0 = vadd.f32 %v7588_v50, %v12243_v47  ;;  %v6720_v4 = vpop.f32.mrb[37].mxu1 }
 0xb23   : > { %v6721_v2 = vadd.f32 %v12243_v47, %v6720_v4  ;;  %v7589_v48 = vpop.f32.mrb[38].mxu1 }
 0xb24   : > { %6789 = vst.msk [vmem:[%s12249_s21 + $0xb0] sm:$0xff] %vm631_vm1, %v6729_v0  ;;  %v6732_v59 = vadd.f32 %v7589_v48, %v12243_v47  ;;  %v6723_v10 = vpop.f32.mrb[39].mxu1 }
 0xb25   : > { %6787 = vst.msk [vmem:[%s12249_s21 + $0xa0] sm:$0xff] %vm631_vm1, %v6721_v2  ;;  %v6724_v41 = vadd.f32 %v12243_v47, %v6723_v10 }
 0xb26   : > { %6790 = vst.msk [vmem:[%s12249_s21 + $0xb8] sm:$0xff] %vm631_vm1, %v6732_v59 }
 0xb27   : > { %6788 = vst.msk [vmem:[%s12249_s21 + $0xa8] sm:$0xff] %vm631_vm1, %v6724_v41 }
 0xb3b   : > { %v7592_v18 = vpop.f32.mrb[40].mxu1 }
 0xb3c   : > { %v6745_v52 = vadd.f32 %v7592_v18, %v12243_v47  ;;  %v6736_v44 = vpop.f32.mrb[41].mxu1 }
 0xb3d   : > { %v6737_v26 = vadd.f32 %v12243_v47, %v6736_v44  ;;  %v7593_v17 = vpop.f32.mrb[42].mxu1 }
 0xb3e   : > { %6793 = vst.msk [vmem:[%s12249_s21 + $0xd0] sm:$0xff] %vm631_vm1, %v6745_v52  ;;  %v6748_v42 = vadd.f32 %v7593_v17, %v12243_v47  ;;  %v6739_v19 = vpop.f32.mrb[43].mxu1 }
 0xb3f   : > { %6791 = vst.msk [vmem:[%s12249_s21 + $0xc0] sm:$0xff] %vm631_vm1, %v6737_v26  ;;  %v6740_v24 = vadd.f32 %v12243_v47, %v6739_v19 }
 0xb40   : > { %6794 = vst.msk [vmem:[%s12249_s21 + $0xd8] sm:$0xff] %vm631_vm1, %v6748_v42 }
 0xb41   : > { %6792 = vst.msk [vmem:[%s12249_s21 + $0xc8] sm:$0xff] %vm631_vm1, %v6740_v24 }
 0xb55   : > { %v7596_v23 = vpop.f32.mrb[44].mxu1 }
 0xb56   : > { %v6761_v29 = vadd.f32 %v7596_v23, %v12243_v47  ;;  %v6752_v31 = vpop.f32.mrb[45].mxu1 }
 0xb57   : > { %v6753_v8 = vadd.f32 %v12243_v47, %v6752_v31  ;;  %v7597_v37 = vpop.f32.mrb[46].mxu1 }
 0xb58   : > { %6797 = vst.msk [vmem:[%s12249_s21 + $0xf0] sm:$0xff] %vm631_vm1, %v6761_v29  ;;  %v6764_v35 = vadd.f32 %v7597_v37, %v12243_v47  ;;  %v6755_v25 = vpop.f32.mrb[47].mxu1 }
 0xb59   : > { %6795 = vst.msk [vmem:[%s12249_s21 + $0xe0] sm:$0xff] %vm631_vm1, %v6753_v8  ;;  %v6756_v51 = vadd.f32 %v12243_v47, %v6755_v25 }
 0xb5a   : > { %6798 = vst.msk [vmem:[%s12249_s21 + $0xf8] sm:$0xff] %vm631_vm1, %v6764_v35 }
 0xb5b   : > { %6796 = vst.msk [vmem:[%s12249_s21 + $0xe8] sm:$0xff] %vm631_vm1, %v6756_v51 }
 0xb5c PF: > { %s23_s25 = sadd.s32 1, %s8714_s25  }
 0xb5d   : > { %p20_p4 = scmp.ge.s32.totalorder %s23_s25, 4  }
 0xb5f   :  { %22 = sbr.rel (!%p20_p4) target bundleno = 1 (0x1), region = 105 }

</bundles_post_ra>
